<compile_context>
chip_gen: v7x
topology: tpu7x:2x2x1
jax: 0.10.0
libtpu: 0.0.40
codegen_flags: <defaults>
</compile_context>

<pallas_src>
import jax
import jax.numpy as jnp
from jax import lax
from jax.experimental import pallas as pl
from jax.experimental.pallas import tpu as pltpu


# ----------------------------- Pallas kernels -----------------------------

def _conv_pool_kernel(p1_ref, w1_ref, b1_ref, w2_ref, b2_ref, out_ref,
                      h1_s, pat_s, y_s, hm_s):
    n_img = p1_ref.shape[0]          # images per grid step (compile-time)

    # h1_s rows 676..679 are only ever read as the (dropped) garbage taps of
    # conv2's last virtual row: zero them once per grid step.  They are never
    # written inside the per-image loop, so there is no ordering hazard.
    h1_s[pl.ds(676, 4), :] = jnp.zeros((4, 32), jnp.bfloat16)

    @pl.loop(0, n_img)
    def _(img):
        # ---- conv1 (1->32, 3x3) + bias + ReLU (bf16 operands, f32 accum) ---
        # p1_ref[img]: (676, 9) im2col patches, row index = h*26 + w.
        h1 = jnp.dot(p1_ref[img], w1_ref[...],
                     preferred_element_type=jnp.float32)            # (676, 32)
        h1 = jnp.maximum(h1 + b1_ref[...], 0.0)
        h1_s[pl.ds(0, 676), :] = h1.astype(jnp.bfloat16)            # cast once

        # ---- conv2 (32->64, 3x3): build the full im2col patch matrix in VMEM.
        # conv2 output lives on a "virtual" 24x26 grid (row m = h*26 + w);
        # columns w = 24, 25 are wrap-around garbage and never reach out_ref
        # (dropped by the pooling compaction below).  Tap t = (i, j) of the
        # 3x3 kernel is h1 shifted by i*26 + j rows.
        for t in range(9):
            i, j = divmod(t, 3)
            pat_s[:, pl.ds(32 * t, 32)] = h1_s[pl.ds(i * 26 + j, 624), :]

        # single K=288 MXU matmul (accumulation stays in the MXU) + bias + ReLU
        y = jnp.dot(pat_s[...], w2_ref[...],
                    preferred_element_type=jnp.float32)             # (624, 64)
        y_s[...] = jnp.maximum(y + b2_ref[...], 0.0)

        # ---- fused 2x2 max-pool -------------------------------------------
        # horizontal: max over column pairs == stride-2 row gather (row=h*26+w)
        # hmax row index = h*13 + q, q in [0,13); q == 12 rows are garbage.
        hm_s[...] = jnp.maximum(y_s[pl.ds(0, 312, stride=2), :],
                                y_s[pl.ds(1, 312, stride=2), :])    # (312, 64)
        # vertical max folded directly into the 12x12 compaction: rows
        # 26*ph + q and 26*ph + 13 + q with q < 12 never touch the garbage
        # q == 12 rows, so no zero padding of hm_s is required.
        for ph in range(12):
            out_ref[img, pl.ds(12 * ph, 12), :] = jnp.maximum(
                hm_s[pl.ds(26 * ph, 12), :],
                hm_s[pl.ds(26 * ph + 13, 12), :]).astype(jnp.bfloat16)


def _fc_head_kernel(x_ref, w1_ref, b1_ref, w2_ref, b2_ref, o_ref):
    # fc1: bf16 activations x bf16 weight -> f32 accumulate, + bias + ReLU
    h = jnp.dot(x_ref[...], w1_ref[...], preferred_element_type=jnp.float32)
    h = jnp.maximum(h + b1_ref[...], 0.0)
    # fc2 (tiny, f32) + numerically stable log_softmax
    z = jnp.dot(h, w2_ref[...], preferred_element_type=jnp.float32) + b2_ref[...]
    m = jnp.max(z, axis=-1, keepdims=True)
    lse = jnp.log(jnp.sum(jnp.exp(z - m), axis=-1, keepdims=True)) + m
    o_ref[...] = z - lse


# ----------------------------- kernel wrappers -----------------------------

def _conv_pool(p1, w1, b1, w2, b2, img_block=8):
    B = p1.shape[0]
    ib = min(img_block, B)
    return pl.pallas_call(
        _conv_pool_kernel,
        grid=(pl.cdiv(B, ib),),
        in_specs=[
            pl.BlockSpec((ib, 676, 9), lambda b: (b, 0, 0)),
            pl.BlockSpec((9, 32), lambda b: (0, 0)),
            pl.BlockSpec((1, 32), lambda b: (0, 0)),
            pl.BlockSpec((288, 64), lambda b: (0, 0)),
            pl.BlockSpec((1, 64), lambda b: (0, 0)),
        ],
        out_specs=pl.BlockSpec((ib, 144, 64), lambda b: (b, 0, 0)),
        out_shape=jax.ShapeDtypeStruct((B, 144, 64), jnp.bfloat16),
        scratch_shapes=[
            pltpu.VMEM((680, 32), jnp.bfloat16),    # conv1 output, zero-padded
            pltpu.VMEM((624, 288), jnp.bfloat16),   # conv2 im2col patch matrix
            pltpu.VMEM((624, 64), jnp.float32),     # conv2 output (virtual 24x26)
            pltpu.VMEM((312, 64), jnp.float32),     # horizontally pooled rows
        ],
        compiler_params=pltpu.CompilerParams(
            dimension_semantics=("parallel",)),
    )(p1, w1, b1, w2, b2)


def _fc_head(flat, w1, b1, w2, b2, block_m=256):
    B, K = flat.shape
    N1 = w1.shape[1]
    N2 = w2.shape[1]
    tb = min(block_m, B)
    return pl.pallas_call(
        _fc_head_kernel,
        grid=(pl.cdiv(B, tb),),
        in_specs=[
            pl.BlockSpec((tb, K), lambda i: (i, 0)),
            pl.BlockSpec((K, N1), lambda i: (0, 0)),
            pl.BlockSpec((1, N1), lambda i: (0, 0)),
            pl.BlockSpec((N1, N2), lambda i: (0, 0)),
            pl.BlockSpec((1, N2), lambda i: (0, 0)),
        ],
        out_specs=pl.BlockSpec((tb, N2), lambda i: (i, 0)),
        out_shape=jax.ShapeDtypeStruct((B, N2), jnp.float32),
        compiler_params=pltpu.CompilerParams(
            dimension_semantics=("parallel",),
            vmem_limit_bytes=32 * 1024 * 1024,
        ),
    )(flat, w1, b1, w2, b2)


# ----------------------------- glue (plain JAX) -----------------------------

def _im2col_3x3_1ch(x):
    # x: (B, H, W) single channel -> (B, (H-2)*(W-2), 9), patch order t = i*3+j
    B, H, W = x.shape
    Ho, Wo = H - 2, W - 2
    cols = [x[:, i:i + Ho, j:j + Wo] for i in range(3) for j in range(3)]
    return jnp.stack(cols, axis=-1).reshape(B, Ho * Wo, 9)


def init_params(key):
    # PyTorch-shaped parameters (used directly by the pure-JAX reference).
    ks = jax.random.split(key, 8)
    return {
        "conv1_w": 0.1 * jax.random.normal(ks[0], (32, 1, 3, 3), jnp.float32),
        "conv1_b": 0.1 * jax.random.normal(ks[1], (32,), jnp.float32),
        "conv2_w": 0.05 * jax.random.normal(ks[2], (64, 32, 3, 3), jnp.float32),
        "conv2_b": 0.05 * jax.random.normal(ks[3], (64,), jnp.float32),
        "fc1_w": 0.02 * jax.random.normal(ks[4], (128, 9216), jnp.float32),
        "fc1_b": 0.02 * jax.random.normal(ks[5], (128,), jnp.float32),
        "fc2_w": 0.05 * jax.random.normal(ks[6], (10, 128), jnp.float32),
        "fc2_b": 0.05 * jax.random.normal(ks[7], (10,), jnp.float32),
    }


def pack_params(p):
    # conv weights repacked to (kh, kw, cin, cout) row order used by the kernel:
    # row index of w2 is 32*(3*i + j) + cin, matching the patch-matrix layout.
    w1 = jnp.transpose(p["conv1_w"], (2, 3, 1, 0)).reshape(9, 32)
    w2 = jnp.transpose(p["conv2_w"], (2, 3, 1, 0)).reshape(288, 64)
    # fc1 rows permuted from NCHW-flatten order (c*144 + ph*12 + pw) to the
    # kernel's pooled-feature order ((ph*12 + pw)*64 + c) -> flatten is free.
    wf1 = (p["fc1_w"].reshape(128, 64, 12, 12)
           .transpose(2, 3, 1, 0).reshape(9216, 128))
    return {
        "w1": w1.astype(jnp.bfloat16),
        "b1": p["conv1_b"].reshape(1, 32).astype(jnp.float32),
        "w2": w2.astype(jnp.bfloat16),
        "b2": p["conv2_b"].reshape(1, 64).astype(jnp.float32),
        "wf1": wf1.astype(jnp.bfloat16),
        "bf1": p["fc1_b"].reshape(1, 128).astype(jnp.float32),
        "wf2": p["fc2_w"].T.astype(jnp.float32),      # (128, 10), tiny
        "bf2": p["fc2_b"].reshape(1, 10).astype(jnp.float32),
    }


@jax.jit
def net_forward(x_nchw, params):
    B = x_nchw.shape[0]
    # conv1's im2col on the 1-channel input is a tiny gather; emitted in bf16
    # (~12 KB/image) so the lane-sparse (676, 9) DMA costs half of f32.
    p1 = _im2col_3x3_1ch(x_nchw[:, 0, :, :]).astype(jnp.bfloat16)  # (B, 676, 9)
    feats = _conv_pool(p1, params["w1"], params["b1"],
                       params["w2"], params["b2"])        # (B, 144, 64) bf16
    # dropout1 / dropout2: identity (eval mode).
    # TODO(synk): training-mode stochastic dropout is intentionally omitted.
    flat = feats.reshape(B, 144 * 64)                     # free reshape (bf16)
    return _fc_head(flat, params["wf1"], params["bf1"],
                    params["wf2"], params["bf2"])         # (B, 10) f32


@jax.jit
def reference_forward(x, p):
    # Pure-JAX f32 reference matching the PyTorch module (eval mode).
    h = lax.conv_general_dilated(x, p["conv1_w"], (1, 1), "VALID",
                                 dimension_numbers=("NCHW", "OIHW", "NCHW"))
    h = jax.nn.relu(h + p["conv1_b"][None, :, None, None])
    h = lax.conv_general_dilated(h, p["conv2_w"], (1, 1), "VALID",
                                 dimension_numbers=("NCHW", "OIHW", "NCHW"))
    h = jax.nn.relu(h + p["conv2_b"][None, :, None, None])
    h = lax.reduce_window(h, -jnp.inf, lax.max, (1, 1, 2, 2), (1, 1, 2, 2), "VALID")
    h = h.reshape(x.shape[0], -1)
    h = jax.nn.relu(h @ p["fc1_w"].T + p["fc1_b"])
    z = h @ p["fc2_w"].T + p["fc2_b"]
    return jax.nn.log_softmax(z, axis=-1)


if __name__ == "__main__":
    key = jax.random.PRNGKey(0)
    k_x, k_p = jax.random.split(key)
    # fc1 expects 9216 = 64*12*12 features -> input must be (B, 1, 28, 28)
    x = jax.random.normal(k_x, (2, 1, 28, 28), jnp.float32)
    torch_like = init_params(k_p)
    packed = pack_params(torch_like)

    out = net_forward(x, packed)
    out = jax.block_until_ready(out)

    assert out.shape == (2, 10)
    # log_softmax rows must exp-sum to 1
    assert jnp.allclose(jnp.sum(jnp.exp(out), axis=1), 1.0, atol=1e-4)
    # match the f32 reference (loose tolerance: conv/fc operands are bf16)
    ref = reference_forward(x, torch_like)
    assert jnp.allclose(out, ref, atol=0.1)
    print("KERNEL_OK")
</pallas_src>

<mosaic_0001>
module attributes {stable_mosaic.version = 11 : i64} {
  func.func @_fc_head_kernel(%arg0: i32, %arg1: memref<2x9216xbf16, #tpu.memory_space<vmem>>, %arg2: memref<9216x128xbf16, #tpu.memory_space<vmem>>, %arg3: memref<1x128xf32, #tpu.memory_space<vmem>>, %arg4: memref<128x10xf32, #tpu.memory_space<vmem>>, %arg5: memref<1x10xf32, #tpu.memory_space<vmem>>, %arg6: memref<2x10xf32, #tpu.memory_space<vmem>>) attributes {dimension_semantics = [#tpu.dimension_semantics<parallel>], iteration_bounds = array<i64: 1>, scalar_prefetch = 0 : i64, scratch_operands = 0 : i64, tpu.core_type = #tpu.core_type<tc>, window_params = [{transform_indices = @transform_0, window_bounds = array<i64: 2, 9216>}, {pipeline_mode = #tpu.pipeline_mode<synchronous>, transform_indices = @transform_1, window_bounds = array<i64: 9216, 128>}, {pipeline_mode = #tpu.pipeline_mode<synchronous>, transform_indices = @transform_2, window_bounds = array<i64: 1, 128>}, {pipeline_mode = #tpu.pipeline_mode<synchronous>, transform_indices = @transform_3, window_bounds = array<i64: 128, 10>}, {pipeline_mode = #tpu.pipeline_mode<synchronous>, transform_indices = @transform_4, window_bounds = array<i64: 1, 10>}, {transform_indices = @transform_5, window_bounds = array<i64: 2, 10>}]} {
    %c0 = arith.constant 0 : index
    %c0_0 = arith.constant 0 : index
    %0 = vector.load %arg1[%c0, %c0_0] : memref<2x9216xbf16, #tpu.memory_space<vmem>>, vector<2x9216xbf16>
    %c0_1 = arith.constant 0 : index
    %c0_2 = arith.constant 0 : index
    %1 = vector.load %arg2[%c0_1, %c0_2] : memref<9216x128xbf16, #tpu.memory_space<vmem>>, vector<9216x128xbf16>
    %cst = arith.constant dense<0.000000e+00> : vector<2x128xf32>
    %2 = tpu.matmul %0, %1, %cst {dimension_numbers = #tpu.dot_dimension_numbers<[1], [0], [0], [1], [0, 0, 1, 1], [], []>} : vector<2x9216xbf16>, vector<9216x128xbf16>, vector<2x128xf32> -> vector<2x128xf32>
    %c0_3 = arith.constant 0 : index
    %c0_4 = arith.constant 0 : index
    %3 = vector.load %arg3[%c0_3, %c0_4] : memref<1x128xf32, #tpu.memory_space<vmem>>, vector<1x128xf32>
    %4 = vector.broadcast %3 : vector<1x128xf32> to vector<2x128xf32>
    %5 = arith.addf %2, %4 : vector<2x128xf32>
    %cst_5 = arith.constant 0.000000e+00 : f32
    %6 = vector.broadcast %cst_5 : f32 to vector<2x128xf32>
    %7 = arith.maximumf %5, %6 : vector<2x128xf32>
    %c0_6 = arith.constant 0 : index
    %c0_7 = arith.constant 0 : index
    %8 = vector.load %arg4[%c0_6, %c0_7] : memref<128x10xf32, #tpu.memory_space<vmem>>, vector<128x10xf32>
    %cst_8 = arith.constant dense<0.000000e+00> : vector<2x10xf32>
    %9 = tpu.matmul %7, %8, %cst_8 {dimension_numbers = #tpu.dot_dimension_numbers<[1], [0], [0], [1], [0, 0, 1, 1], [], []>} : vector<2x128xf32>, vector<128x10xf32>, vector<2x10xf32> -> vector<2x10xf32>
    %c0_9 = arith.constant 0 : index
    %c0_10 = arith.constant 0 : index
    %10 = vector.load %arg5[%c0_9, %c0_10] : memref<1x10xf32, #tpu.memory_space<vmem>>, vector<1x10xf32>
    %11 = vector.broadcast %10 : vector<1x10xf32> to vector<2x10xf32>
    %12 = arith.addf %9, %11 : vector<2x10xf32>
    %cst_11 = arith.constant dense<0xFF800000> : vector<2xf32>
    %13 = vector.multi_reduction <maximumf>, %12, %cst_11 [1] : vector<2x10xf32> to vector<2xf32>
    %14 = vector.shape_cast %13 : vector<2xf32> to vector<2x1xf32>
    %15 = vector.broadcast %14 : vector<2x1xf32> to vector<2x10xf32>
    %16 = arith.subf %12, %15 : vector<2x10xf32>
    %17 = math.exp %16 : vector<2x10xf32>
    %cst_12 = arith.constant dense<0.000000e+00> : vector<2xf32>
    %18 = vector.multi_reduction <add>, %17, %cst_12 [1] : vector<2x10xf32> to vector<2xf32>
    %19 = vector.shape_cast %18 : vector<2xf32> to vector<2x1xf32>
    %20 = math.log %19 : vector<2x1xf32>
    %21 = arith.addf %20, %14 : vector<2x1xf32>
    %22 = vector.broadcast %21 : vector<2x1xf32> to vector<2x10xf32>
    %23 = arith.subf %12, %22 : vector<2x10xf32>
    %c0_13 = arith.constant 0 : index
    %c0_14 = arith.constant 0 : index
    %24 = vector.load %arg6[%c0_13, %c0_14] : memref<2x10xf32, #tpu.memory_space<vmem>>, vector<2x10xf32>
    tpu.vector_store %arg6[%c0_13, %c0_14], %23 {strides = array<i32>} : memref<2x10xf32, #tpu.memory_space<vmem>>, vector<2x10xf32>,
    return
  }
  func.func @transform_0(%arg0: i32) -> (i32, i32) {
    %c0_i32 = arith.constant 0 : i32
    %c0_i32_0 = arith.constant 0 : i32
    return %arg0, %c0_i32 : i32, i32
  }
  func.func @transform_1(%arg0: i32) -> (i32, i32) {
    %c0_i32 = arith.constant 0 : i32
    %c0_i32_0 = arith.constant 0 : i32
    %c0_i32_1 = arith.constant 0 : i32
    return %c0_i32, %c0_i32_0 : i32, i32
  }
  func.func @transform_2(%arg0: i32) -> (i32, i32) {
    %c0_i32 = arith.constant 0 : i32
    %c0_i32_0 = arith.constant 0 : i32
    %c0_i32_1 = arith.constant 0 : i32
    return %c0_i32, %c0_i32_0 : i32, i32
  }
  func.func @transform_3(%arg0: i32) -> (i32, i32) {
    %c0_i32 = arith.constant 0 : i32
    %c0_i32_0 = arith.constant 0 : i32
    %c0_i32_1 = arith.constant 0 : i32
    return %c0_i32, %c0_i32_0 : i32, i32
  }
  func.func @transform_4(%arg0: i32) -> (i32, i32) {
    %c0_i32 = arith.constant 0 : i32
    %c0_i32_0 = arith.constant 0 : i32
    %c0_i32_1 = arith.constant 0 : i32
    return %c0_i32, %c0_i32_0 : i32, i32
  }
  func.func @transform_5(%arg0: i32) -> (i32, i32) {
    %c0_i32 = arith.constant 0 : i32
    %c0_i32_0 = arith.constant 0 : i32
    return %arg0, %c0_i32 : i32, i32
  }
}

module attributes {stable_mosaic.version = 11 : i64} {
  func.func @_conv_pool_kernel(%arg0: i32, %arg1: memref<2x676x9xbf16, #tpu.memory_space<vmem>>, %arg2: memref<9x32xbf16, #tpu.memory_space<vmem>>, %arg3: memref<1x32xf32, #tpu.memory_space<vmem>>, %arg4: memref<288x64xbf16, #tpu.memory_space<vmem>>, %arg5: memref<1x64xf32, #tpu.memory_space<vmem>>, %arg6: memref<2x144x64xbf16, #tpu.memory_space<vmem>>, %arg7: memref<680x32xbf16, #tpu.memory_space<vmem>>, %arg8: memref<624x288xbf16, #tpu.memory_space<vmem>>, %arg9: memref<624x64xf32, #tpu.memory_space<vmem>>, %arg10: memref<312x64xf32, #tpu.memory_space<vmem>>) attributes {dimension_semantics = [#tpu.dimension_semantics<parallel>], iteration_bounds = array<i64: 1>, scalar_prefetch = 0 : i64, scratch_operands = 4 : i64, tpu.core_type = #tpu.core_type<tc>, window_params = [{transform_indices = @transform_0, window_bounds = array<i64: 2, 676, 9>}, {pipeline_mode = #tpu.pipeline_mode<synchronous>, transform_indices = @transform_1, window_bounds = array<i64: 9, 32>}, {pipeline_mode = #tpu.pipeline_mode<synchronous>, transform_indices = @transform_2, window_bounds = array<i64: 1, 32>}, {pipeline_mode = #tpu.pipeline_mode<synchronous>, transform_indices = @transform_3, window_bounds = array<i64: 288, 64>}, {pipeline_mode = #tpu.pipeline_mode<synchronous>, transform_indices = @transform_4, window_bounds = array<i64: 1, 64>}, {transform_indices = @transform_5, window_bounds = array<i64: 2, 144, 64>}]} {
    %cst = arith.constant 0.000000e+00 : bf16
    %0 = vector.broadcast %cst : bf16 to vector<4x32xbf16>
    %c676 = arith.constant 676 : index
    %c0 = arith.constant 0 : index
    %1 = vector.load %arg7[%c676, %c0] : memref<680x32xbf16, #tpu.memory_space<vmem>>, vector<4x32xbf16>
    tpu.vector_store %arg7[%c676, %c0], %0 {strides = array<i32>} : memref<680x32xbf16, #tpu.memory_space<vmem>>, vector<4x32xbf16>,
    %c0_i32 = arith.constant 0 : i32
    %c2_i32 = arith.constant 2 : i32
    %2 = arith.addi %c0_i32, %c2_i32 : i32
    %c1_i32 = arith.constant 1 : i32
    scf.for %arg11 = %c0_i32 to %2 step %c1_i32  : i32 {
      %c1_i32_1 = arith.constant 1 : i32
      %3 = arith.muli %arg11, %c1_i32_1 : i32
      %c0_i32_2 = arith.constant 0 : i32
      %4 = arith.addi %c0_i32_2, %3 : i32
      %5 = arith.index_cast %4 : i32 to index
      %c0_3 = arith.constant 0 : index
      %c0_4 = arith.constant 0 : index
      %6 = vector.load %arg1[%5, %c0_3, %c0_4] : memref<2x676x9xbf16, #tpu.memory_space<vmem>>, vector<1x676x9xbf16>
      %7 = vector.shape_cast %6 : vector<1x676x9xbf16> to vector<676x9xbf16>
      %c0_5 = arith.constant 0 : index
      %c0_6 = arith.constant 0 : index
      %8 = vector.load %arg2[%c0_5, %c0_6] : memref<9x32xbf16, #tpu.memory_space<vmem>>, vector<9x32xbf16>
      %cst_7 = arith.constant dense<0.000000e+00> : vector<676x32xf32>
      %9 = tpu.matmul %7, %8, %cst_7 {dimension_numbers = #tpu.dot_dimension_numbers<[1], [0], [0], [1], [0, 0, 1, 1], [], []>} : vector<676x9xbf16>, vector<9x32xbf16>, vector<676x32xf32> -> vector<676x32xf32>
      %c0_8 = arith.constant 0 : index
      %c0_9 = arith.constant 0 : index
      %10 = vector.load %arg3[%c0_8, %c0_9] : memref<1x32xf32, #tpu.memory_space<vmem>>, vector<1x32xf32>
      %11 = vector.broadcast %10 : vector<1x32xf32> to vector<676x32xf32>
      %12 = arith.addf %9, %11 : vector<676x32xf32>
      %cst_10 = arith.constant 0.000000e+00 : f32
      %13 = vector.broadcast %cst_10 : f32 to vector<676x32xf32>
      %14 = arith.maximumf %12, %13 : vector<676x32xf32>
      %15 = arith.truncf %14 : vector<676x32xf32> to vector<676x32xbf16>
      %c0_11 = arith.constant 0 : index
      %c0_12 = arith.constant 0 : index
      %16 = vector.load %arg7[%c0_11, %c0_12] : memref<680x32xbf16, #tpu.memory_space<vmem>>, vector<676x32xbf16>
      tpu.vector_store %arg7[%c0_11, %c0_12], %15 {strides = array<i32>} : memref<680x32xbf16, #tpu.memory_space<vmem>>, vector<676x32xbf16>,
      %c0_13 = arith.constant 0 : index
      %c0_14 = arith.constant 0 : index
      %17 = vector.load %arg7[%c0_13, %c0_14] : memref<680x32xbf16, #tpu.memory_space<vmem>>, vector<624x32xbf16>
      %c0_15 = arith.constant 0 : index
      %c0_16 = arith.constant 0 : index
      %18 = vector.load %arg8[%c0_15, %c0_16] : memref<624x288xbf16, #tpu.memory_space<vmem>>, vector<624x32xbf16>
      tpu.vector_store %arg8[%c0_15, %c0_16], %17 {strides = array<i32>} : memref<624x288xbf16, #tpu.memory_space<vmem>>, vector<624x32xbf16>,
      %c1 = arith.constant 1 : index
      %c0_17 = arith.constant 0 : index
      %19 = vector.load %arg7[%c1, %c0_17] : memref<680x32xbf16, #tpu.memory_space<vmem>>, vector<624x32xbf16>
      %c0_18 = arith.constant 0 : index
      %c32 = arith.constant 32 : index
      %20 = vector.load %arg8[%c0_18, %c32] : memref<624x288xbf16, #tpu.memory_space<vmem>>, vector<624x32xbf16>
      tpu.vector_store %arg8[%c0_18, %c32], %19 {strides = array<i32>} : memref<624x288xbf16, #tpu.memory_space<vmem>>, vector<624x32xbf16>,
      %c2 = arith.constant 2 : index
      %c0_19 = arith.constant 0 : index
      %21 = vector.load %arg7[%c2, %c0_19] : memref<680x32xbf16, #tpu.memory_space<vmem>>, vector<624x32xbf16>
      %c0_20 = arith.constant 0 : index
      %c64 = arith.constant 64 : index
      %22 = vector.load %arg8[%c0_20, %c64] : memref<624x288xbf16, #tpu.memory_space<vmem>>, vector<624x32xbf16>
      tpu.vector_store %arg8[%c0_20, %c64], %21 {strides = array<i32>} : memref<624x288xbf16, #tpu.memory_space<vmem>>, vector<624x32xbf16>,
      %c26 = arith.constant 26 : index
      %c0_21 = arith.constant 0 : index
      %23 = vector.load %arg7[%c26, %c0_21] : memref<680x32xbf16, #tpu.memory_space<vmem>>, vector<624x32xbf16>
      %c0_22 = arith.constant 0 : index
      %c96 = arith.constant 96 : index
      %24 = vector.load %arg8[%c0_22, %c96] : memref<624x288xbf16, #tpu.memory_space<vmem>>, vector<624x32xbf16>
      tpu.vector_store %arg8[%c0_22, %c96], %23 {strides = array<i32>} : memref<624x288xbf16, #tpu.memory_space<vmem>>, vector<624x32xbf16>,
      %c27 = arith.constant 27 : index
      %c0_23 = arith.constant 0 : index
      %25 = vector.load %arg7[%c27, %c0_23] : memref<680x32xbf16, #tpu.memory_space<vmem>>, vector<624x32xbf16>
      %c0_24 = arith.constant 0 : index
      %c128 = arith.constant 128 : index
      %26 = vector.load %arg8[%c0_24, %c128] : memref<624x288xbf16, #tpu.memory_space<vmem>>, vector<624x32xbf16>
      tpu.vector_store %arg8[%c0_24, %c128], %25 {strides = array<i32>} : memref<624x288xbf16, #tpu.memory_space<vmem>>, vector<624x32xbf16>,
      %c28 = arith.constant 28 : index
      %c0_25 = arith.constant 0 : index
      %27 = vector.load %arg7[%c28, %c0_25] : memref<680x32xbf16, #tpu.memory_space<vmem>>, vector<624x32xbf16>
      %c0_26 = arith.constant 0 : index
      %c160 = arith.constant 160 : index
      %28 = vector.load %arg8[%c0_26, %c160] : memref<624x288xbf16, #tpu.memory_space<vmem>>, vector<624x32xbf16>
      tpu.vector_store %arg8[%c0_26, %c160], %27 {strides = array<i32>} : memref<624x288xbf16, #tpu.memory_space<vmem>>, vector<624x32xbf16>,
      %c52 = arith.constant 52 : index
      %c0_27 = arith.constant 0 : index
      %29 = vector.load %arg7[%c52, %c0_27] : memref<680x32xbf16, #tpu.memory_space<vmem>>, vector<624x32xbf16>
      %c0_28 = arith.constant 0 : index
      %c192 = arith.constant 192 : index
      %30 = vector.load %arg8[%c0_28, %c192] : memref<624x288xbf16, #tpu.memory_space<vmem>>, vector<624x32xbf16>
      tpu.vector_store %arg8[%c0_28, %c192], %29 {strides = array<i32>} : memref<624x288xbf16, #tpu.memory_space<vmem>>, vector<624x32xbf16>,
      %c53 = arith.constant 53 : index
      %c0_29 = arith.constant 0 : index
      %31 = vector.load %arg7[%c53, %c0_29] : memref<680x32xbf16, #tpu.memory_space<vmem>>, vector<624x32xbf16>
      %c0_30 = arith.constant 0 : index
      %c224 = arith.constant 224 : index
      %32 = vector.load %arg8[%c0_30, %c224] : memref<624x288xbf16, #tpu.memory_space<vmem>>, vector<624x32xbf16>
      tpu.vector_store %arg8[%c0_30, %c224], %31 {strides = array<i32>} : memref<624x288xbf16, #tpu.memory_space<vmem>>, vector<624x32xbf16>,
      %c54 = arith.constant 54 : index
      %c0_31 = arith.constant 0 : index
      %33 = vector.load %arg7[%c54, %c0_31] : memref<680x32xbf16, #tpu.memory_space<vmem>>, vector<624x32xbf16>
      %c0_32 = arith.constant 0 : index
      %c256 = arith.constant 256 : index
      %34 = vector.load %arg8[%c0_32, %c256] : memref<624x288xbf16, #tpu.memory_space<vmem>>, vector<624x32xbf16>
      tpu.vector_store %arg8[%c0_32, %c256], %33 {strides = array<i32>} : memref<624x288xbf16, #tpu.memory_space<vmem>>, vector<624x32xbf16>,
      %c0_33 = arith.constant 0 : index
      %c0_34 = arith.constant 0 : index
      %35 = vector.load %arg8[%c0_33, %c0_34] : memref<624x288xbf16, #tpu.memory_space<vmem>>, vector<624x288xbf16>
      %c0_35 = arith.constant 0 : index
      %c0_36 = arith.constant 0 : index
      %36 = vector.load %arg4[%c0_35, %c0_36] : memref<288x64xbf16, #tpu.memory_space<vmem>>, vector<288x64xbf16>
      %cst_37 = arith.constant dense<0.000000e+00> : vector<624x64xf32>
      %37 = tpu.matmul %35, %36, %cst_37 {dimension_numbers = #tpu.dot_dimension_numbers<[1], [0], [0], [1], [0, 0, 1, 1], [], []>} : vector<624x288xbf16>, vector<288x64xbf16>, vector<624x64xf32> -> vector<624x64xf32>
      %c0_38 = arith.constant 0 : index
      %c0_39 = arith.constant 0 : index
      %38 = vector.load %arg5[%c0_38, %c0_39] : memref<1x64xf32, #tpu.memory_space<vmem>>, vector<1x64xf32>
      %39 = vector.broadcast %38 : vector<1x64xf32> to vector<624x64xf32>
      %40 = arith.addf %37, %39 : vector<624x64xf32>
      %cst_40 = arith.constant 0.000000e+00 : f32
      %41 = vector.broadcast %cst_40 : f32 to vector<624x64xf32>
      %42 = arith.maximumf %40, %41 : vector<624x64xf32>
      %c0_41 = arith.constant 0 : index
      %c0_42 = arith.constant 0 : index
      %43 = vector.load %arg9[%c0_41, %c0_42] : memref<624x64xf32, #tpu.memory_space<vmem>>, vector<624x64xf32>
      tpu.vector_store %arg9[%c0_41, %c0_42], %42 {strides = array<i32>} : memref<624x64xf32, #tpu.memory_space<vmem>>, vector<624x64xf32>,
      %c0_43 = arith.constant 0 : index
      %c0_44 = arith.constant 0 : index
      %44 = tpu.strided_load %arg9[%c0_43, %c0_44] {strides = array<i32: 2, 1>} : memref<624x64xf32, #tpu.memory_space<vmem>>, vector<312x64xf32>
      %c1_45 = arith.constant 1 : index
      %c0_46 = arith.constant 0 : index
      %45 = tpu.strided_load %arg9[%c1_45, %c0_46] {strides = array<i32: 2, 1>} : memref<624x64xf32, #tpu.memory_space<vmem>>, vector<312x64xf32>
      %46 = arith.maximumf %44, %45 : vector<312x64xf32>
      %c0_47 = arith.constant 0 : index
      %c0_48 = arith.constant 0 : index
      %47 = vector.load %arg10[%c0_47, %c0_48] : memref<312x64xf32, #tpu.memory_space<vmem>>, vector<312x64xf32>
      tpu.vector_store %arg10[%c0_47, %c0_48], %46 {strides = array<i32>} : memref<312x64xf32, #tpu.memory_space<vmem>>, vector<312x64xf32>,
      %c0_49 = arith.constant 0 : index
      %c0_50 = arith.constant 0 : index
      %48 = vector.load %arg10[%c0_49, %c0_50] : memref<312x64xf32, #tpu.memory_space<vmem>>, vector<12x64xf32>
      %c13 = arith.constant 13 : index
      %c0_51 = arith.constant 0 : index
      %49 = vector.load %arg10[%c13, %c0_51] : memref<312x64xf32, #tpu.memory_space<vmem>>, vector<12x64xf32>
      %50 = arith.maximumf %48, %49 : vector<12x64xf32>
      %51 = arith.truncf %50 : vector<12x64xf32> to vector<12x64xbf16>
      %52 = arith.index_cast %4 : i32 to index
      %c0_52 = arith.constant 0 : index
      %c0_53 = arith.constant 0 : index
      %53 = vector.load %arg6[%52, %c0_52, %c0_53] : memref<2x144x64xbf16, #tpu.memory_space<vmem>>, vector<1x12x64xbf16>
      %54 = vector.shape_cast %53 : vector<1x12x64xbf16> to vector<12x64xbf16>
      %55 = vector.shape_cast %51 : vector<12x64xbf16> to vector<1x12x64xbf16>
      tpu.vector_store %arg6[%52, %c0_52, %c0_53], %55 {strides = array<i32>} : memref<2x144x64xbf16, #tpu.memory_space<vmem>>, vector<1x12x64xbf16>,
      %c26_54 = arith.constant 26 : index
      %c0_55 = arith.constant 0 : index
      %56 = vector.load %arg10[%c26_54, %c0_55] : memref<312x64xf32, #tpu.memory_space<vmem>>, vector<12x64xf32>
      %c39 = arith.constant 39 : index
      %c0_56 = arith.constant 0 : index
      %57 = vector.load %arg10[%c39, %c0_56] : memref<312x64xf32, #tpu.memory_space<vmem>>, vector<12x64xf32>
      %58 = arith.maximumf %56, %57 : vector<12x64xf32>
      %59 = arith.truncf %58 : vector<12x64xf32> to vector<12x64xbf16>
      %60 = arith.index_cast %4 : i32 to index
      %c12 = arith.constant 12 : index
      %c0_57 = arith.constant 0 : index
      %61 = vector.load %arg6[%60, %c12, %c0_57] : memref<2x144x64xbf16, #tpu.memory_space<vmem>>, vector<1x12x64xbf16>
      %62 = vector.shape_cast %61 : vector<1x12x64xbf16> to vector<12x64xbf16>
      %63 = vector.shape_cast %59 : vector<12x64xbf16> to vector<1x12x64xbf16>
      tpu.vector_store %arg6[%60, %c12, %c0_57], %63 {strides = array<i32>} : memref<2x144x64xbf16, #tpu.memory_space<vmem>>, vector<1x12x64xbf16>,
      %c52_58 = arith.constant 52 : index
      %c0_59 = arith.constant 0 : index
      %64 = vector.load %arg10[%c52_58, %c0_59] : memref<312x64xf32, #tpu.memory_space<vmem>>, vector<12x64xf32>
      %c65 = arith.constant 65 : index
      %c0_60 = arith.constant 0 : index
      %65 = vector.load %arg10[%c65, %c0_60] : memref<312x64xf32, #tpu.memory_space<vmem>>, vector<12x64xf32>
      %66 = arith.maximumf %64, %65 : vector<12x64xf32>
      %67 = arith.truncf %66 : vector<12x64xf32> to vector<12x64xbf16>
      %68 = arith.index_cast %4 : i32 to index
      %c24 = arith.constant 24 : index
      %c0_61 = arith.constant 0 : index
      %69 = vector.load %arg6[%68, %c24, %c0_61] : memref<2x144x64xbf16, #tpu.memory_space<vmem>>, vector<1x12x64xbf16>
      %70 = vector.shape_cast %69 : vector<1x12x64xbf16> to vector<12x64xbf16>
      %71 = vector.shape_cast %67 : vector<12x64xbf16> to vector<1x12x64xbf16>
      tpu.vector_store %arg6[%68, %c24, %c0_61], %71 {strides = array<i32>} : memref<2x144x64xbf16, #tpu.memory_space<vmem>>, vector<1x12x64xbf16>,
      %c78 = arith.constant 78 : index
      %c0_62 = arith.constant 0 : index
      %72 = vector.load %arg10[%c78, %c0_62] : memref<312x64xf32, #tpu.memory_space<vmem>>, vector<12x64xf32>
      %c91 = arith.constant 91 : index
      %c0_63 = arith.constant 0 : index
      %73 = vector.load %arg10[%c91, %c0_63] : memref<312x64xf32, #tpu.memory_space<vmem>>, vector<12x64xf32>
      %74 = arith.maximumf %72, %73 : vector<12x64xf32>
      %75 = arith.truncf %74 : vector<12x64xf32> to vector<12x64xbf16>
      %76 = arith.index_cast %4 : i32 to index
      %c36 = arith.constant 36 : index
      %c0_64 = arith.constant 0 : index
      %77 = vector.load %arg6[%76, %c36, %c0_64] : memref<2x144x64xbf16, #tpu.memory_space<vmem>>, vector<1x12x64xbf16>
      %78 = vector.shape_cast %77 : vector<1x12x64xbf16> to vector<12x64xbf16>
      %79 = vector.shape_cast %75 : vector<12x64xbf16> to vector<1x12x64xbf16>
      tpu.vector_store %arg6[%76, %c36, %c0_64], %79 {strides = array<i32>} : memref<2x144x64xbf16, #tpu.memory_space<vmem>>, vector<1x12x64xbf16>,
      %c104 = arith.constant 104 : index
      %c0_65 = arith.constant 0 : index
      %80 = vector.load %arg10[%c104, %c0_65] : memref<312x64xf32, #tpu.memory_space<vmem>>, vector<12x64xf32>
      %c117 = arith.constant 117 : index
      %c0_66 = arith.constant 0 : index
      %81 = vector.load %arg10[%c117, %c0_66] : memref<312x64xf32, #tpu.memory_space<vmem>>, vector<12x64xf32>
      %82 = arith.maximumf %80, %81 : vector<12x64xf32>
      %83 = arith.truncf %82 : vector<12x64xf32> to vector<12x64xbf16>
      %84 = arith.index_cast %4 : i32 to index
      %c48 = arith.constant 48 : index
      %c0_67 = arith.constant 0 : index
      %85 = vector.load %arg6[%84, %c48, %c0_67] : memref<2x144x64xbf16, #tpu.memory_space<vmem>>, vector<1x12x64xbf16>
      %86 = vector.shape_cast %85 : vector<1x12x64xbf16> to vector<12x64xbf16>
      %87 = vector.shape_cast %83 : vector<12x64xbf16> to vector<1x12x64xbf16>
      tpu.vector_store %arg6[%84, %c48, %c0_67], %87 {strides = array<i32>} : memref<2x144x64xbf16, #tpu.memory_space<vmem>>, vector<1x12x64xbf16>,
      %c130 = arith.constant 130 : index
      %c0_68 = arith.constant 0 : index
      %88 = vector.load %arg10[%c130, %c0_68] : memref<312x64xf32, #tpu.memory_space<vmem>>, vector<12x64xf32>
      %c143 = arith.constant 143 : index
      %c0_69 = arith.constant 0 : index
      %89 = vector.load %arg10[%c143, %c0_69] : memref<312x64xf32, #tpu.memory_space<vmem>>, vector<12x64xf32>
      %90 = arith.maximumf %88, %89 : vector<12x64xf32>
      %91 = arith.truncf %90 : vector<12x64xf32> to vector<12x64xbf16>
      %92 = arith.index_cast %4 : i32 to index
      %c60 = arith.constant 60 : index
      %c0_70 = arith.constant 0 : index
      %93 = vector.load %arg6[%92, %c60, %c0_70] : memref<2x144x64xbf16, #tpu.memory_space<vmem>>, vector<1x12x64xbf16>
      %94 = vector.shape_cast %93 : vector<1x12x64xbf16> to vector<12x64xbf16>
      %95 = vector.shape_cast %91 : vector<12x64xbf16> to vector<1x12x64xbf16>
      tpu.vector_store %arg6[%92, %c60, %c0_70], %95 {strides = array<i32>} : memref<2x144x64xbf16, #tpu.memory_space<vmem>>, vector<1x12x64xbf16>,
      %c156 = arith.constant 156 : index
      %c0_71 = arith.constant 0 : index
      %96 = vector.load %arg10[%c156, %c0_71] : memref<312x64xf32, #tpu.memory_space<vmem>>, vector<12x64xf32>
      %c169 = arith.constant 169 : index
      %c0_72 = arith.constant 0 : index
      %97 = vector.load %arg10[%c169, %c0_72] : memref<312x64xf32, #tpu.memory_space<vmem>>, vector<12x64xf32>
      %98 = arith.maximumf %96, %97 : vector<12x64xf32>
      %99 = arith.truncf %98 : vector<12x64xf32> to vector<12x64xbf16>
      %100 = arith.index_cast %4 : i32 to index
      %c72 = arith.constant 72 : index
      %c0_73 = arith.constant 0 : index
      %101 = vector.load %arg6[%100, %c72, %c0_73] : memref<2x144x64xbf16, #tpu.memory_space<vmem>>, vector<1x12x64xbf16>
      %102 = vector.shape_cast %101 : vector<1x12x64xbf16> to vector<12x64xbf16>
      %103 = vector.shape_cast %99 : vector<12x64xbf16> to vector<1x12x64xbf16>
      tpu.vector_store %arg6[%100, %c72, %c0_73], %103 {strides = array<i32>} : memref<2x144x64xbf16, #tpu.memory_space<vmem>>, vector<1x12x64xbf16>,
      %c182 = arith.constant 182 : index
      %c0_74 = arith.constant 0 : index
      %104 = vector.load %arg10[%c182, %c0_74] : memref<312x64xf32, #tpu.memory_space<vmem>>, vector<12x64xf32>
      %c195 = arith.constant 195 : index
      %c0_75 = arith.constant 0 : index
      %105 = vector.load %arg10[%c195, %c0_75] : memref<312x64xf32, #tpu.memory_space<vmem>>, vector<12x64xf32>
      %106 = arith.maximumf %104, %105 : vector<12x64xf32>
      %107 = arith.truncf %106 : vector<12x64xf32> to vector<12x64xbf16>
      %108 = arith.index_cast %4 : i32 to index
      %c84 = arith.constant 84 : index
      %c0_76 = arith.constant 0 : index
      %109 = vector.load %arg6[%108, %c84, %c0_76] : memref<2x144x64xbf16, #tpu.memory_space<vmem>>, vector<1x12x64xbf16>
      %110 = vector.shape_cast %109 : vector<1x12x64xbf16> to vector<12x64xbf16>
      %111 = vector.shape_cast %107 : vector<12x64xbf16> to vector<1x12x64xbf16>
      tpu.vector_store %arg6[%108, %c84, %c0_76], %111 {strides = array<i32>} : memref<2x144x64xbf16, #tpu.memory_space<vmem>>, vector<1x12x64xbf16>,
      %c208 = arith.constant 208 : index
      %c0_77 = arith.constant 0 : index
      %112 = vector.load %arg10[%c208, %c0_77] : memref<312x64xf32, #tpu.memory_space<vmem>>, vector<12x64xf32>
      %c221 = arith.constant 221 : index
      %c0_78 = arith.constant 0 : index
      %113 = vector.load %arg10[%c221, %c0_78] : memref<312x64xf32, #tpu.memory_space<vmem>>, vector<12x64xf32>
      %114 = arith.maximumf %112, %113 : vector<12x64xf32>
      %115 = arith.truncf %114 : vector<12x64xf32> to vector<12x64xbf16>
      %116 = arith.index_cast %4 : i32 to index
      %c96_79 = arith.constant 96 : index
      %c0_80 = arith.constant 0 : index
      %117 = vector.load %arg6[%116, %c96_79, %c0_80] : memref<2x144x64xbf16, #tpu.memory_space<vmem>>, vector<1x12x64xbf16>
      %118 = vector.shape_cast %117 : vector<1x12x64xbf16> to vector<12x64xbf16>
      %119 = vector.shape_cast %115 : vector<12x64xbf16> to vector<1x12x64xbf16>
      tpu.vector_store %arg6[%116, %c96_79, %c0_80], %119 {strides = array<i32>} : memref<2x144x64xbf16, #tpu.memory_space<vmem>>, vector<1x12x64xbf16>,
      %c234 = arith.constant 234 : index
      %c0_81 = arith.constant 0 : index
      %120 = vector.load %arg10[%c234, %c0_81] : memref<312x64xf32, #tpu.memory_space<vmem>>, vector<12x64xf32>
      %c247 = arith.constant 247 : index
      %c0_82 = arith.constant 0 : index
      %121 = vector.load %arg10[%c247, %c0_82] : memref<312x64xf32, #tpu.memory_space<vmem>>, vector<12x64xf32>
      %122 = arith.maximumf %120, %121 : vector<12x64xf32>
      %123 = arith.truncf %122 : vector<12x64xf32> to vector<12x64xbf16>
      %124 = arith.index_cast %4 : i32 to index
      %c108 = arith.constant 108 : index
      %c0_83 = arith.constant 0 : index
      %125 = vector.load %arg6[%124, %c108, %c0_83] : memref<2x144x64xbf16, #tpu.memory_space<vmem>>, vector<1x12x64xbf16>
      %126 = vector.shape_cast %125 : vector<1x12x64xbf16> to vector<12x64xbf16>
      %127 = vector.shape_cast %123 : vector<12x64xbf16> to vector<1x12x64xbf16>
      tpu.vector_store %arg6[%124, %c108, %c0_83], %127 {strides = array<i32>} : memref<2x144x64xbf16, #tpu.memory_space<vmem>>, vector<1x12x64xbf16>,
      %c260 = arith.constant 260 : index
      %c0_84 = arith.constant 0 : index
      %128 = vector.load %arg10[%c260, %c0_84] : memref<312x64xf32, #tpu.memory_space<vmem>>, vector<12x64xf32>
      %c273 = arith.constant 273 : index
      %c0_85 = arith.constant 0 : index
      %129 = vector.load %arg10[%c273, %c0_85] : memref<312x64xf32, #tpu.memory_space<vmem>>, vector<12x64xf32>
      %130 = arith.maximumf %128, %129 : vector<12x64xf32>
      %131 = arith.truncf %130 : vector<12x64xf32> to vector<12x64xbf16>
      %132 = arith.index_cast %4 : i32 to index
      %c120 = arith.constant 120 : index
      %c0_86 = arith.constant 0 : index
      %133 = vector.load %arg6[%132, %c120, %c0_86] : memref<2x144x64xbf16, #tpu.memory_space<vmem>>, vector<1x12x64xbf16>
      %134 = vector.shape_cast %133 : vector<1x12x64xbf16> to vector<12x64xbf16>
      %135 = vector.shape_cast %131 : vector<12x64xbf16> to vector<1x12x64xbf16>
      tpu.vector_store %arg6[%132, %c120, %c0_86], %135 {strides = array<i32>} : memref<2x144x64xbf16, #tpu.memory_space<vmem>>, vector<1x12x64xbf16>,
      %c286 = arith.constant 286 : index
      %c0_87 = arith.constant 0 : index
      %136 = vector.load %arg10[%c286, %c0_87] : memref<312x64xf32, #tpu.memory_space<vmem>>, vector<12x64xf32>
      %c299 = arith.constant 299 : index
      %c0_88 = arith.constant 0 : index
      %137 = vector.load %arg10[%c299, %c0_88] : memref<312x64xf32, #tpu.memory_space<vmem>>, vector<12x64xf32>
      %138 = arith.maximumf %136, %137 : vector<12x64xf32>
      %139 = arith.truncf %138 : vector<12x64xf32> to vector<12x64xbf16>
      %140 = arith.index_cast %4 : i32 to index
      %c132 = arith.constant 132 : index
      %c0_89 = arith.constant 0 : index
      %141 = vector.load %arg6[%140, %c132, %c0_89] : memref<2x144x64xbf16, #tpu.memory_space<vmem>>, vector<1x12x64xbf16>
      %142 = vector.shape_cast %141 : vector<1x12x64xbf16> to vector<12x64xbf16>
      %143 = vector.shape_cast %139 : vector<12x64xbf16> to vector<1x12x64xbf16>
      tpu.vector_store %arg6[%140, %c132, %c0_89], %143 {strides = array<i32>} : memref<2x144x64xbf16, #tpu.memory_space<vmem>>, vector<1x12x64xbf16>,
    }
    %c2_i32_0 = arith.constant 2 : i32
    return
  }
  func.func @transform_0(%arg0: i32) -> (i32, i32, i32) {
    %c0_i32 = arith.constant 0 : i32
    %c0_i32_0 = arith.constant 0 : i32
    %c0_i32_1 = arith.constant 0 : i32
    return %arg0, %c0_i32, %c0_i32_0 : i32, i32, i32
  }
  func.func @transform_1(%arg0: i32) -> (i32, i32) {
    %c0_i32 = arith.constant 0 : i32
    %c0_i32_0 = arith.constant 0 : i32
    %c0_i32_1 = arith.constant 0 : i32
    return %c0_i32, %c0_i32_0 : i32, i32
  }
  func.func @transform_2(%arg0: i32) -> (i32, i32) {
    %c0_i32 = arith.constant 0 : i32
    %c0_i32_0 = arith.constant 0 : i32
    %c0_i32_1 = arith.constant 0 : i32
    return %c0_i32, %c0_i32_0 : i32, i32
  }
  func.func @transform_3(%arg0: i32) -> (i32, i32) {
    %c0_i32 = arith.constant 0 : i32
    %c0_i32_0 = arith.constant 0 : i32
    %c0_i32_1 = arith.constant 0 : i32
    return %c0_i32, %c0_i32_0 : i32, i32
  }
  func.func @transform_4(%arg0: i32) -> (i32, i32) {
    %c0_i32 = arith.constant 0 : i32
    %c0_i32_0 = arith.constant 0 : i32
    %c0_i32_1 = arith.constant 0 : i32
    return %c0_i32, %c0_i32_0 : i32, i32
  }
  func.func @transform_5(%arg0: i32) -> (i32, i32, i32) {
    %c0_i32 = arith.constant 0 : i32
    %c0_i32_0 = arith.constant 0 : i32
    %c0_i32_1 = arith.constant 0 : i32
    return %arg0, %c0_i32, %c0_i32_0 : i32, i32, i32
  }
}

</mosaic_0001>

<bundles_post_ra>
// kernel: net_forward.3
= control target key start
LH: loop header
LB: loop body
LE: loop exit
PB: predicated region body
PF: predicated region fallthrough
CT: control target
= control target key end

     0   :  { %10 = vsyncpa [#allocation3], 0  ;;  %s9213_s0 = inlined_call_operand.vmem [shape: bf16[2,9216], index: 0, kind: input, shape index: {}]   ;;  %s9214_s1 = inlined_call_operand.hbm [shape: bf16[9216,128], index: 1, kind: input, shape index: {}]   ;;  %s9215_s2 = inlined_call_operand.hbm [shape: f32[1,128], index: 2, kind: input, shape index: {}]   ;;  %s9216_s3 = inlined_call_operand.vmem [shape: f32[128,10], index: 3, kind: input, shape index: {}]   ;;  %s9217_s4 = inlined_call_operand.hbm [shape: f32[1,10], index: 4, kind: input, shape index: {}]   ;;  %s9218_s5 = inlined_call_operand.hbm [shape: f32[2,10], index: 5, kind: output, shape index: {}]  }
   0x1   :  { %11 = vsyncpa [#allocation6], 0 }
   0x2   :  { %12 = vsyncpa [#allocation4], 0  ;;  %s8909_s18 = smov [#allocation5]   ;;  %s8910_s20 = smov [#allocation2]  }
   0x3   :  { %s33_s19 = sshll.u32 %s8909_s18, 4  ;;  %s20_s21 = sshll.u32 %s8910_s20, 4  ;;  %s34_s19 = int_to_ptr.vmem [resolvable:$true] %s33_s19  ;;  %s8949_s21 = int_to_ptr.vmem [resolvable:$true] %s20_s21 }
   0x4   :  { %s8815_s24 = scalar_lea.hbm %s9215_s2, 16 }
   0x5   :  { %p8816_p0 = scmp.ne.s32.totalorder %s9215_s2, %s8815_s24  ;;  %p8819_p1 = scmp.lt.u32.totalorder %s8815_s24, %s9215_s2 }
   0x7   :  { %p8821_p2 = pnand %p8819_p1, %p8816_p0 }
   0x9   :  { %8824 = shalt.err (!%p8821_p2)
}
   0xa   :  { %s8825_s29 = scalar_lea.vmem %s34_s19, 16  ;;  %s8829_s30 = scalar_lea.vmem %s34_s19, 32 }
   0xb   :  { %p8826_p3 = scmp.ne.s32.totalorder %s34_s19, %s8825_s29  ;;  %p8830_p4 = scmp.lt.s32.totalorder %s34_s19, %s34_s19 }
   0xc   :  { %p8831_p5 = scmp.lt.s32.totalorder %s8829_s30, %s8825_s29 }
   0xe   :  { %p8832_p6 = por %p8831_p5, %p8830_p4 }
  0x10   :  { %p8833_p7 = pnand %p8832_p6, %p8826_p3 }
  0x12   :  { %8836 = shalt.err (!%p8833_p7)
}
  0x13   :  { %36 = dma.hbm_to_vmem [thread:$0]  %s9215_s2, 16, %s34_s19, [#allocation6]  }
  0x14   :  { %s8837_s10 = scalar_lea.hbm %s9214_s1, 73728 }
  0x15   :  { %p8838_p8 = scmp.ne.s32.totalorder %s9214_s1, %s8837_s10  ;;  %p8841_p9 = scmp.lt.u32.totalorder %s8837_s10, %s9214_s1 }
  0x17   :  { %p8843_p10 = pnand %p8841_p9, %p8838_p8 }
  0x19   :  { %8846 = shalt.err (!%p8843_p10)
}
  0x1a   :  { %s8847_s15 = scalar_lea.vmem %s8949_s21, 73728  ;;  %p8852_p12 = scmp.lt.s32.totalorder %s8949_s21, %s8949_s21 }
  0x1b   :  { %p8848_p11 = scmp.ne.s32.totalorder %s8949_s21, %s8847_s15  ;;  %p8853_p13 = scmp.lt.s32.totalorder %s8847_s15, %s8847_s15 }
  0x1d   :  { %p8854_p0 = por %p8853_p13, %p8852_p12 }
  0x1f   :  { %p8855_p1 = pnand %p8854_p0, %p8848_p11 }
  0x21   :  { %8858 = shalt.err (!%p8855_p1)
}
  0x22   :  { %s8911_s2 = smov 64   ;;  %s8912_s16 = smov 4  }
  0x23   :  { %26 = dma.hbm_to_vmem [thread:$0]  %s9214_s1, 73728, %s8949_s21, [#allocation3], %s8911_s2, %s8911_s2, %s8912_s16  }
  0x24   :  { %s8913_s19 = smov [#allocation7]   ;;  %s8859_s24 = scalar_lea.hbm %s9217_s4, 16 }
  0x25   :  { %s45_s20 = sshll.u32 %s8913_s19, 4  ;;  %p8860_p2 = scmp.ne.s32.totalorder %s9217_s4, %s8859_s24  ;;  %s46_s20 = int_to_ptr.vmem [resolvable:$true] %s45_s20 }
  0x26   :  { %p8863_p3 = scmp.lt.u32.totalorder %s8859_s24, %s9217_s4 }
  0x28   :  { %p8865_p4 = pnand %p8863_p3, %p8860_p2 }
  0x2a   :  { %8868 = shalt.err (!%p8865_p4)
}
  0x2b   :  { %s8869_s29 = scalar_lea.vmem %s46_s20, 16  ;;  %s8873_s1 = scalar_lea.vmem %s46_s20, 32 }
  0x2c   :  { %p8870_p5 = scmp.ne.s32.totalorder %s46_s20, %s8869_s29  ;;  %p8874_p6 = scmp.lt.s32.totalorder %s46_s20, %s46_s20 }
  0x2d   :  { %p8875_p7 = scmp.lt.s32.totalorder %s8873_s1, %s8869_s29 }
  0x2f   :  { %p8876_p8 = por %p8875_p7, %p8874_p6 }
  0x31   :  { %p8877_p9 = pnand %p8876_p8, %p8870_p5 }
  0x33   :  { %8880 = shalt.err (!%p8877_p9)
}
  0x34   :  { %48 = dma.hbm_to_vmem [thread:$0]  %s9217_s4, 16, %s46_s20, [#allocation6]  }
  0x35   :  { %8903 = dma.done.wait [#allocation3], 73728  }
  0x36   :  { %8904 = vsyncadd [#allocation3], 4294893568 }
  0x37   :  { %8905 = dma.done.wait [#allocation6], 32  }
  0x38   :  { %8906 = vsyncadd [#allocation6], 4294967264  ;;  %v8226_v0 = vld [vmem:[#allocation2 + $0x40] sm:$0xff]   ;;  %v8230_v4 = vld [vmem:[#allocation2 + $0x48] sm:$0xff]   ;;  %v8914_v22 = vmov 1966171168   ;;  %v1240_v24 = vlaneseq }
  0x39   :  { %v8227_v1 = vld [vmem:[#allocation2 + $0xc0] sm:$0xff]   ;;  %7348 = vmatprep.subr.bf16.mxu0 %v8226_v0  ;;  %v8231_v5 = vld [vmem:[#allocation2 + $0xc8] sm:$0xff]   ;;  %v8234_v8 = vld [vmem:[#allocation2 + $0x50] sm:$0xff]   ;;  %v1238_v23 = vunpack.c.l.s4 %v8914_v22  ;;  %vm8916_vm0 = vmmov 0   ;;  %vm6739_vm1 = vcmask 74752  }
  0x3a   :  { %v8228_v2 = vld [vmem:[#allocation2] sm:$0xff]   ;;  %7370 = vmatprep.subr.bf16.mxu1 %v8227_v1  ;;  %v8232_v6 = vld [vmem:[#allocation2 + $0x8] sm:$0xff]   ;;  %v8235_v9 = vld [vmem:[#allocation2 + $0xd0] sm:$0xff]   ;;  %v1241_v30 = vshrl.u32 %v1240_v24, 7 }
  0x3b   :  { %v8229_v3 = vld [vmem:[#allocation2 + $0x80] sm:$0xff]   ;;  %7349 = vmatpush3.bf16.msra.mxu0 %v8228_v2  ;;  %v8233_v7 = vld [vmem:[#allocation2 + $0x88] sm:$0xff]   ;;  %v8236_v10 = vld [vmem:[#allocation2 + $0x10] sm:$0xff]   ;;  %v1239_v29 = vunpack.c.0.s8 %v1238_v23 }
  0x3c   :  { %7371 = vmatpush3.bf16.msra.mxu1 %v8229_v3  ;;  %7350 = vmatprep.subr.bf16.mxu0 %v8230_v4  ;;  %v8237_v11 = vld [vmem:[#allocation2 + $0x90] sm:$0xff]   ;;  %v8238_v12 = vld [vmem:[#allocation2 + $0x58] sm:$0xff]   ;;  %v8242_v16 = vld [vmem:[#allocation2 + $0x60] sm:$0xff]  }
  0x3d   :  { %7372 = vmatprep.subr.bf16.mxu1 %v8231_v5  ;;  %v8239_v13 = vld [vmem:[#allocation2 + $0xd8] sm:$0xff]   ;;  %v8243_v17 = vld [vmem:[#allocation2 + $0xe0] sm:$0xff]   ;;  %v8246_v20 = vld [vmem:[#allocation2 + $0x68] sm:$0xff]   ;;  %v8992_v35 = vsub.s32 %v1239_v29, %v1241_v30 }
  0x3e   :  { %v8240_v14 = vld [vmem:[#allocation2 + $0x18] sm:$0xff]   ;;  %v8244_v18 = vld [vmem:[#allocation2 + $0x20] sm:$0xff]   ;;  %v8247_v21 = vld [vmem:[#allocation2 + $0xe8] sm:$0xff]  }
  0x3f   :  { %7351 = vmatpush3.bf16.msra.mxu0 %v8232_v6  ;;  %v8241_v15 = vld [vmem:[#allocation2 + $0x98] sm:$0xff]   ;;  %v8245_v19 = vld [vmem:[#allocation2 + $0xa0] sm:$0xff]   ;;  %v8248_v25 = vld [vmem:[#allocation2 + $0x28] sm:$0xff]  }
  0x40   :  { %7373 = vmatpush3.bf16.msra.mxu1 %v8233_v7  ;;  %7352 = vmatprep.subr.bf16.mxu0 %v8234_v8  ;;  %v8249_v26 = vld [vmem:[#allocation2 + $0xa8] sm:$0xff]   ;;  %v8250_v27 = vld [vmem:[#allocation2 + $0x70] sm:$0xff]   ;;  %v8254_v33 = vld [vmem:[#allocation2 + $0x78] sm:$0xff]  }
  0x41   :  { %7374 = vmatprep.subr.bf16.mxu1 %v8235_v9  ;;  %v8251_v28 = vld [vmem:[#allocation2 + $0xf0] sm:$0xff]   ;;  %v8255_v34 = vld [vmem:[#allocation2 + $0xf8] sm:$0xff]   ;;  %v59_v38 = vld [vmem:[%s9213_s0] sm:$0xff] }
  0x42   :  { %v8252_v31 = vld [vmem:[#allocation2 + $0x30] sm:$0xff]   ;;  %v8256_v36 = vld [vmem:[#allocation2 + $0x38] sm:$0xff]   ;;  %v1236_v39 = vcombine.high %v59_v38, %v59_v38  ;;  %v1243_v40 = vrot.slane %v59_v38, %v8992_v35  ;;  %v8259_v41 = vld [vmem:[#allocation2 + $0x140] sm:$0xff]  }
  0x43   :  { %7353 = vmatpush3.bf16.msra.mxu0 %v8236_v10  ;;  %v8253_v32 = vld [vmem:[#allocation2 + $0xb0] sm:$0xff]   ;;  %v8257_v37 = vld [vmem:[#allocation2 + $0xb8] sm:$0xff]   ;;  %v8260_v42 = vld [vmem:[#allocation2 + $0x1c0] sm:$0xff]  }
  0x44   :  { %7375 = vmatpush3.bf16.msra.mxu1 %v8237_v11  ;;  %7354 = vmatprep.subr.bf16.mxu0 %v8238_v12  ;;  %v1251_v43 = vcombine.high %v1243_v40, %v1243_v40  ;;  %v1259_v44 = vrot.slane %v1243_v40, %v8992_v35  ;;  %v9000_v45 = vrot.slane %v1236_v39, %v8992_v35  ;;  %v8261_v46 = vld [vmem:[#allocation2 + $0x100] sm:$0xff]   ;;  %v8263_v51 = vld [vmem:[#allocation2 + $0x148] sm:$0xff]   ;;  %v8267_v58 = vld [vmem:[#allocation2 + $0x150] sm:$0xff]  }
  0x45   :  { %7376 = vmatprep.subr.bf16.mxu1 %v8239_v13  ;;  %v8262_v48 = vld [vmem:[#allocation2 + $0x180] sm:$0xff]   ;;  %v8264_v53 = vld [vmem:[#allocation2 + $0x1c8] sm:$0xff]   ;;  %v8268_v59 = vld [vmem:[#allocation2 + $0x1d0] sm:$0xff]  }
  0x46   :  { %v1273_v47 = vrot.slane %v1251_v43, %v8992_v35  ;;  %v1252_v49 = vcombine.high %v9000_v45, %v9000_v45  ;;  %v1281_v50 = vcombine.high %v1259_v44, %v1259_v44  ;;  %v8265_v55 = vld [vmem:[#allocation2 + $0x108] sm:$0xff]   ;;  %v8269_v60 = vld [vmem:[#allocation2 + $0x110] sm:$0xff]   ;;  %v8271_v62 = vld [vmem:[#allocation2 + $0x158] sm:$0xff]  }
  0x47   :  { %7355 = vmatpush3.bf16.msra.mxu0 %v8240_v14  ;;  %v8266_v56 = vld [vmem:[#allocation2 + $0x188] sm:$0xff]   ;;  %v8270_v61 = vld [vmem:[#allocation2 + $0x190] sm:$0xff]   ;;  %v8272_v63 = vld [vmem:[#allocation2 + $0x1d8] sm:$0xff]  }
  0x48   :  { %7377 = vmatpush3.bf16.msra.mxu1 %v8241_v15  ;;  %7356 = vmatprep.subr.bf16.mxu0 %v8242_v16  ;;  %v1283_v52 = vcombine.high %v1273_v47, %v1273_v47  ;;  %v1280_v54 = vrot.slane %v1252_v49, %v8992_v35  ;;  %v8273_v0 = vld [vmem:[#allocation2 + $0x118] sm:$0xff]   ;;  %v8275_v2 = vld [vmem:[#allocation2 + $0x160] sm:$0xff]   ;;  %v8279_v6 = vld [vmem:[#allocation2 + $0x168] sm:$0xff]  }
  0x49   :  { %7378 = vmatprep.subr.bf16.mxu1 %v8243_v17  ;;  %5237 = vmatprep.mubr.bf16.mxu0 %v1273_v47  ;;  %v8274_v1 = vld [vmem:[#allocation2 + $0x198] sm:$0xff]   ;;  %v8276_v3 = vld [vmem:[#allocation2 + $0x1e0] sm:$0xff]   ;;  %v8280_v7 = vld [vmem:[#allocation2 + $0x1e8] sm:$0xff]  }
  0x4a   :  { %5277 = vmatprep.mubr.bf16.mxu1 %v1283_v52  ;;  %v1284_v57 = vcombine.high %v1280_v54, %v1280_v54  ;;  %v8277_v4 = vld [vmem:[#allocation2 + $0x120] sm:$0xff]   ;;  %v8281_v8 = vld [vmem:[#allocation2 + $0x128] sm:$0xff]   ;;  %v8283_v10 = vld [vmem:[#allocation2 + $0x170] sm:$0xff]  }
  0x4b   :  { %7357 = vmatpush3.bf16.msra.mxu0 %v8244_v18  ;;  %v8278_v5 = vld [vmem:[#allocation2 + $0x1a0] sm:$0xff]   ;;  %v8282_v9 = vld [vmem:[#allocation2 + $0x1a8] sm:$0xff]   ;;  %v8284_v11 = vld [vmem:[#allocation2 + $0x1f0] sm:$0xff]   ;;  %v1266_v18 = vrot.slane %v9000_v45, %v8992_v35 }
  0x4c   :  { %7379 = vmatpush3.bf16.msra.mxu1 %v8245_v19  ;;  %7358 = vmatprep.subr.bf16.mxu0 %v8246_v20  ;;  %v8285_v12 = vld [vmem:[#allocation2 + $0x130] sm:$0xff]   ;;  %v8287_v14 = vld [vmem:[#allocation2 + $0x178] sm:$0xff]   ;;  %v8291_v19 = vld [vmem:[#allocation2 + $0x240] sm:$0xff]  }
  0x4d   :  { %7380 = vmatprep.subr.bf16.mxu1 %v8247_v21  ;;  %v8286_v13 = vld [vmem:[#allocation2 + $0x1b0] sm:$0xff]   ;;  %v8288_v15 = vld [vmem:[#allocation2 + $0x1f8] sm:$0xff]   ;;  %v8292_v20 = vld [vmem:[#allocation2 + $0x2c0] sm:$0xff]   ;;  %v1282_v23 = vcombine.high %v1266_v18, %v1266_v18 }
  0x4e   :  { %v8289_v16 = vld [vmem:[#allocation2 + $0x138] sm:$0xff]   ;;  %v8293_v21 = vld [vmem:[#allocation2 + $0x200] sm:$0xff]   ;;  %v8295_v24 = vld [vmem:[#allocation2 + $0x248] sm:$0xff]  }
  0x4f   :  { %7359 = vmatpush3.bf16.msra.mxu0 %v8248_v25  ;;  %v8290_v17 = vld [vmem:[#allocation2 + $0x1b8] sm:$0xff]   ;;  %v8294_v22 = vld [vmem:[#allocation2 + $0x280] sm:$0xff]   ;;  %v8296_v25 = vld [vmem:[#allocation2 + $0x2c8] sm:$0xff]  }
  0x50   :  { %7381 = vmatpush3.bf16.msra.mxu1 %v8249_v26  ;;  %7360 = vmatprep.subr.bf16.mxu0 %v8250_v27  ;;  %v8297_v26 = vld [vmem:[#allocation2 + $0x208] sm:$0xff]   ;;  %v8300_v29 = vld [vmem:[#allocation2 + $0x2d0] sm:$0xff]   ;;  %v8308_v38 = vld [vmem:[#allocation2 + $0x2e0] sm:$0xff]  }
  0x51   :  { %7382 = vmatprep.subr.bf16.mxu1 %v8251_v28  ;;  %v8298_v27 = vld [vmem:[#allocation2 + $0x288] sm:$0xff]   ;;  %v8299_v28 = vld [vmem:[#allocation2 + $0x250] sm:$0xff]   ;;  %v8309_v39 = vld [vmem:[#allocation2 + $0x220] sm:$0xff]  }
  0x52   :  { %v8301_v30 = vld [vmem:[#allocation2 + $0x210] sm:$0xff]   ;;  %v8310_v40 = vld [vmem:[#allocation2 + $0x2a0] sm:$0xff]   ;;  %v8313_v43 = vld [vmem:[#allocation2 + $0x228] sm:$0xff]  }
  0x53   :  { %7361 = vmatpush3.bf16.msra.mxu0 %v8252_v31  ;;  %v8302_v31 = vld [vmem:[#allocation2 + $0x290] sm:$0xff]   ;;  %v8319_v49 = vld [vmem:[#allocation2 + $0x278] sm:$0xff]   ;;  %v60_v52 = vld [vmem:[%s9213_s0 + $0x8] sm:$0xff] }
  0x54   :  { %7383 = vmatpush3.bf16.msra.mxu1 %v8253_v32  ;;  %7362 = vmatprep.subr.bf16.mxu0 %v8254_v33  ;;  %v8303_v32 = vld [vmem:[#allocation2 + $0x258] sm:$0xff]   ;;  %v8315_v45 = vld [vmem:[#allocation2 + $0x270] sm:$0xff]  }
  0x55   :  { %7384 = vmatprep.subr.bf16.mxu1 %v8255_v34  ;;  %v8304_v33 = vld [vmem:[#allocation2 + $0x2d8] sm:$0xff]   ;;  %v8317_v47 = vld [vmem:[#allocation2 + $0x230] sm:$0xff]  }
  0x56   :  { %v8305_v34 = vld [vmem:[#allocation2 + $0x218] sm:$0xff]  }
  0x57   :  { %7363 = vmatpush3.bf16.msra.mxu0 %v8256_v36  ;;  %v8306_v36 = vld [vmem:[#allocation2 + $0x298] sm:$0xff]  }
  0x58   :  { %7385 = vmatpush3.bf16.msra.mxu1 %v8257_v37  ;;  %7392 = vmatprep.subr.bf16.mxu0 %v8259_v41  ;;  %v8307_v37 = vld [vmem:[#allocation2 + $0x260] sm:$0xff]   ;;  %v8311_v41 = vld [vmem:[#allocation2 + $0x268] sm:$0xff]  }
  0x59   :  { %7414 = vmatprep.subr.bf16.mxu1 %v8260_v42  ;;  %v8312_v42 = vld [vmem:[#allocation2 + $0x2e8] sm:$0xff]  }
  0x5a   :  { %5238 = vmatmul.mubr.bf16.vlgmr.msra.gmra.mrb[0].mxu0 %v1259_v44  ;;  %v8314_v44 = vld [vmem:[#allocation2 + $0x2a8] sm:$0xff]  }
  0x5b   :  { %7393 = vmatpush3.bf16.msra.mxu0 %v8261_v46  ;;  %5278 = vmatmul.mubr.bf16.vlgmr.msra.gmra.mrb[0].mxu1 %v1281_v50  ;;  %v8316_v46 = vld [vmem:[#allocation2 + $0x2f0] sm:$0xff]   ;;  %v8320_v50 = vld [vmem:[#allocation2 + $0x2f8] sm:$0xff]  }
  0x5c   :  { %7394 = vmatprep.subr.bf16.mxu0 %v8263_v51  ;;  %7415 = vmatpush3.bf16.msra.mxu1 %v8262_v48  ;;  %v8318_v48 = vld [vmem:[#allocation2 + $0x2b0] sm:$0xff]   ;;  %v8321_v51 = vld [vmem:[#allocation2 + $0x238] sm:$0xff]  }
  0x5d   :  { %5317 = vmatprep.mubr.bf16.mxu0 %v1280_v54  ;;  %7416 = vmatprep.subr.bf16.mxu1 %v8264_v53  ;;  %v8322_v53 = vld [vmem:[#allocation2 + $0x2b8] sm:$0xff]   ;;  %v1292_v54 = vrot.slane %v60_v52, %v8992_v35 }
  0x5e   :  { %5357 = vmatprep.mubr.bf16.mxu1 %v1284_v57 }
  0x5f   :  { %7395 = vmatpush3.bf16.msra.mxu0 %v8265_v55  ;;  %v1285_v55 = vcombine.high %v60_v52, %v60_v52  ;;  %v1300_v57 = vcombine.high %v1292_v54, %v1292_v54  ;;  %v8372_v52 = vld [vmem:[#allocation2 + $0x460] sm:$0xff]  }
  0x60   :  { %7396 = vmatprep.subr.bf16.mxu0 %v8267_v58  ;;  %7417 = vmatpush3.bf16.msra.mxu1 %v8266_v56  ;;  %v8323_v56 = vld [vmem:[#allocation2 + $0x340] sm:$0xff]   ;;  %v1308_v58 = vrot.slane %v1292_v54, %v8992_v35 }
  0x61   :  { %7418 = vmatprep.subr.bf16.mxu1 %v8268_v59  ;;  %v8324_v59 = vld [vmem:[#allocation2 + $0x3c0] sm:$0xff]  }
  0x62   :  { %v8374_v54 = vld [vmem:[#allocation2 + $0x420] sm:$0xff]  }
  0x63   :  { %7397 = vmatpush3.bf16.msra.mxu0 %v8269_v60  ;;  %v9014_v60 = vrot.slane %v1285_v55, %v8992_v35  ;;  %v8375_v55 = vld [vmem:[#allocation2 + $0x4a0] sm:$0xff]  }
  0x64   :  { %7398 = vmatprep.subr.bf16.mxu0 %v8271_v62  ;;  %7419 = vmatpush3.bf16.msra.mxu1 %v8270_v61  ;;  %v8325_v61 = vld [vmem:[#allocation2 + $0x300] sm:$0xff]   ;;  %v1322_v62 = vrot.slane %v1300_v57, %v8992_v35  ;;  %v8377_v57 = vld [vmem:[#allocation2 + $0x4e8] sm:$0xff]  }
  0x65   :  { %7420 = vmatprep.subr.bf16.mxu1 %v8272_v63  ;;  %v8326_v63 = vld [vmem:[#allocation2 + $0x380] sm:$0xff]  }
  0x67   :  { %7399 = vmatpush3.bf16.msra.mxu0 %v8273_v0  ;;  %v1301_v0 = vcombine.high %v9014_v60, %v9014_v60 }
  0x68   :  { %7400 = vmatprep.subr.bf16.mxu0 %v8275_v2  ;;  %7421 = vmatpush3.bf16.msra.mxu1 %v8274_v1  ;;  %v1330_v1 = vcombine.high %v1308_v58, %v1308_v58  ;;  %v8327_v2 = vld [vmem:[#allocation2 + $0x348] sm:$0xff]  }
  0x69   :  { %7422 = vmatprep.subr.bf16.mxu1 %v8276_v3  ;;  %v1332_v3 = vcombine.high %v1322_v62, %v1322_v62 }
  0x6b   :  { %7401 = vmatpush3.bf16.msra.mxu0 %v8277_v4  ;;  %v8328_v4 = vld [vmem:[#allocation2 + $0x3c8] sm:$0xff]  }
  0x6c   :  { %7402 = vmatprep.subr.bf16.mxu0 %v8279_v6  ;;  %7423 = vmatpush3.bf16.msra.mxu1 %v8278_v5  ;;  %v1329_v5 = vrot.slane %v1301_v0, %v8992_v35  ;;  %v8329_v6 = vld [vmem:[#allocation2 + $0x308] sm:$0xff]   ;;  %v8384_v0 = vld [vmem:[#allocation2 + $0x478] sm:$0xff]  }
  0x6d   :  { %7424 = vmatprep.subr.bf16.mxu1 %v8280_v7  ;;  %v8330_v7 = vld [vmem:[#allocation2 + $0x388] sm:$0xff]  }
  0x6f   :  { %7403 = vmatpush3.bf16.msra.mxu0 %v8281_v8  ;;  %v1333_v8 = vcombine.high %v1329_v5, %v1329_v5 }
  0x70   :  { %7404 = vmatprep.subr.bf16.mxu0 %v8283_v10  ;;  %7425 = vmatpush3.bf16.msra.mxu1 %v8282_v9  ;;  %v8331_v9 = vld [vmem:[#allocation2 + $0x350] sm:$0xff]  }
  0x71   :  { %7426 = vmatprep.subr.bf16.mxu1 %v8284_v11  ;;  %v8332_v10 = vld [vmem:[#allocation2 + $0x3d0] sm:$0xff]  }
  0x72   :  { %v8333_v11 = vld [vmem:[#allocation2 + $0x310] sm:$0xff]  }
  0x73   :  { %7405 = vmatpush3.bf16.msra.mxu0 %v8285_v12  ;;  %v8334_v12 = vld [vmem:[#allocation2 + $0x390] sm:$0xff]  }
  0x74   :  { %7406 = vmatprep.subr.bf16.mxu0 %v8287_v14  ;;  %7427 = vmatpush3.bf16.msra.mxu1 %v8286_v13  ;;  %v8335_v13 = vld [vmem:[#allocation2 + $0x358] sm:$0xff]  }
  0x75   :  { %7428 = vmatprep.subr.bf16.mxu1 %v8288_v15  ;;  %v8336_v14 = vld [vmem:[#allocation2 + $0x3d8] sm:$0xff]  }
  0x76   :  { %v8337_v15 = vld [vmem:[#allocation2 + $0x318] sm:$0xff]  }
  0x77   :  { %7407 = vmatpush3.bf16.msra.mxu0 %v8289_v16  ;;  %v8338_v16 = vld [vmem:[#allocation2 + $0x398] sm:$0xff]  }
  0x78   :  { %7436 = vmatprep.subr.bf16.mxu0 %v8291_v19  ;;  %7429 = vmatpush3.bf16.msra.mxu1 %v8290_v17  ;;  %v8339_v17 = vld [vmem:[#allocation2 + $0x360] sm:$0xff]  }
  0x79   :  { %7458 = vmatprep.subr.bf16.mxu1 %v8292_v20  ;;  %v8341_v19 = vld [vmem:[#allocation2 + $0x320] sm:$0xff]  }
  0x7a   :  { %5318 = vmatmul.mubr.bf16.vlgmr.msra.gmra.mrb[4].mxu0 %v1266_v18  ;;  %v8340_v18 = vld [vmem:[#allocation2 + $0x3e0] sm:$0xff]  }
  0x7b   :  { %7437 = vmatpush3.bf16.msra.mxu0 %v8293_v21  ;;  %5358 = vmatmul.mubr.bf16.vlgmr.msra.gmra.mrb[4].mxu1 %v1282_v23  ;;  %v8342_v20 = vld [vmem:[#allocation2 + $0x3a0] sm:$0xff]   ;;  %v8343_v21 = vld [vmem:[#allocation2 + $0x368] sm:$0xff]  }
  0x7c   :  { %7438 = vmatprep.subr.bf16.mxu0 %v8295_v24  ;;  %7459 = vmatpush3.bf16.msra.mxu1 %v8294_v22  ;;  %v8344_v22 = vld [vmem:[#allocation2 + $0x3e8] sm:$0xff]  }
  0x7d   :  { %7460 = vmatprep.subr.bf16.mxu1 %v8296_v25  ;;  %5397 = vmatprep.mubr.bf16.mxu0 %v1322_v62  ;;  %v8345_v23 = vld [vmem:[#allocation2 + $0x328] sm:$0xff]   ;;  %v8347_v25 = vld [vmem:[#allocation2 + $0x370] sm:$0xff]  }
  0x7e   :  { %5437 = vmatprep.mubr.bf16.mxu1 %v1332_v3  ;;  %v8346_v24 = vld [vmem:[#allocation2 + $0x3a8] sm:$0xff]   ;;  %v8382_v62 = vld [vmem:[#allocation2 + $0x430] sm:$0xff]  }
  0x7f   :  { %7439 = vmatpush3.bf16.msra.mxu0 %v8297_v26  ;;  %v8348_v26 = vld [vmem:[#allocation2 + $0x3f0] sm:$0xff]  }
  0x80   :  { %7440 = vmatprep.subr.bf16.mxu0 %v8299_v28  ;;  %7461 = vmatpush3.bf16.msra.mxu1 %v8298_v27  ;;  %v8349_v27 = vld [vmem:[#allocation2 + $0x330] sm:$0xff]  }
  0x81   :  { %7462 = vmatprep.subr.bf16.mxu1 %v8300_v29  ;;  %v8350_v28 = vld [vmem:[#allocation2 + $0x3b0] sm:$0xff]   ;;  %v8351_v29 = vld [vmem:[#allocation2 + $0x378] sm:$0xff]  }
  0x82   :  { %v61_v3 = vld [vmem:[%s9213_s0 + $0x10] sm:$0xff] }
  0x83   :  { %7441 = vmatpush3.bf16.msra.mxu0 %v8301_v30  ;;  %v8352_v30 = vld [vmem:[#allocation2 + $0x3f8] sm:$0xff]  }
  0x84   :  { %7442 = vmatprep.subr.bf16.mxu0 %v8303_v32  ;;  %7463 = vmatpush3.bf16.msra.mxu1 %v8302_v31  ;;  %v8353_v31 = vld [vmem:[#allocation2 + $0x338] sm:$0xff]  }
  0x85   :  { %7464 = vmatprep.subr.bf16.mxu1 %v8304_v33  ;;  %v8354_v32 = vld [vmem:[#allocation2 + $0x3b8] sm:$0xff]   ;;  %v1315_v33 = vrot.slane %v9014_v60, %v8992_v35  ;;  %v8380_v60 = vld [vmem:[#allocation2 + $0x470] sm:$0xff]  }
  0x87   :  { %7443 = vmatpush3.bf16.msra.mxu0 %v8305_v34  ;;  %v8356_v34 = vld [vmem:[#allocation2 + $0x440] sm:$0xff]  }
  0x88   :  { %7444 = vmatprep.subr.bf16.mxu0 %v8307_v37  ;;  %7465 = vmatpush3.bf16.msra.mxu1 %v8306_v36  ;;  %v8357_v36 = vld [vmem:[#allocation2 + $0x4c0] sm:$0xff]  }
  0x89   :  { %7466 = vmatprep.subr.bf16.mxu1 %v8308_v38  ;;  %v8358_v37 = vld [vmem:[#allocation2 + $0x400] sm:$0xff]  }
  0x8a   :  { %v8359_v38 = vld [vmem:[#allocation2 + $0x480] sm:$0xff]  }
  0x8b   :  { %7445 = vmatpush3.bf16.msra.mxu0 %v8309_v39  ;;  %v1331_v39 = vcombine.high %v1315_v33, %v1315_v33 }
  0x8c   :  { %7446 = vmatprep.subr.bf16.mxu0 %v8311_v41  ;;  %7467 = vmatpush3.bf16.msra.mxu1 %v8310_v40  ;;  %v8360_v40 = vld [vmem:[#allocation2 + $0x448] sm:$0xff]  }
  0x8d   :  { %7468 = vmatprep.subr.bf16.mxu1 %v8312_v42  ;;  %v8361_v41 = vld [vmem:[#allocation2 + $0x4c8] sm:$0xff]  }
  0x8e   :  { %v8362_v42 = vld [vmem:[#allocation2 + $0x408] sm:$0xff]  }
  0x8f   :  { %7447 = vmatpush3.bf16.msra.mxu0 %v8313_v43  ;;  %v8363_v43 = vld [vmem:[#allocation2 + $0x488] sm:$0xff]  }
  0x90   :  { %7448 = vmatprep.subr.bf16.mxu0 %v8315_v45  ;;  %7469 = vmatpush3.bf16.msra.mxu1 %v8314_v44  ;;  %v8364_v44 = vld [vmem:[#allocation2 + $0x450] sm:$0xff]  }
  0x91   :  { %7470 = vmatprep.subr.bf16.mxu1 %v8316_v46  ;;  %v8365_v45 = vld [vmem:[#allocation2 + $0x4d0] sm:$0xff]  }
  0x92   :  { %v8366_v46 = vld [vmem:[#allocation2 + $0x410] sm:$0xff]  }
  0x93   :  { %7449 = vmatpush3.bf16.msra.mxu0 %v8317_v47  ;;  %v8367_v47 = vld [vmem:[#allocation2 + $0x490] sm:$0xff]  }
  0x94   :  { %7450 = vmatprep.subr.bf16.mxu0 %v8319_v49  ;;  %7471 = vmatpush3.bf16.msra.mxu1 %v8318_v48  ;;  %v8368_v48 = vld [vmem:[#allocation2 + $0x458] sm:$0xff]  }
  0x95   :  { %7472 = vmatprep.subr.bf16.mxu1 %v8320_v50  ;;  %v8369_v49 = vld [vmem:[#allocation2 + $0x4d8] sm:$0xff]  }
  0x96   :  { %v8370_v50 = vld [vmem:[#allocation2 + $0x418] sm:$0xff]  }
  0x97   :  { %7451 = vmatpush3.bf16.msra.mxu0 %v8321_v51  ;;  %v8371_v51 = vld [vmem:[#allocation2 + $0x498] sm:$0xff]  }
  0x98   :  { %7480 = vmatprep.subr.bf16.mxu0 %v8323_v56  ;;  %7473 = vmatpush3.bf16.msra.mxu1 %v8322_v53  ;;  %v8373_v53 = vld [vmem:[#allocation2 + $0x4e0] sm:$0xff]   ;;  %v8376_v56 = vld [vmem:[#allocation2 + $0x468] sm:$0xff]  }
  0x99   :  { %7502 = vmatprep.subr.bf16.mxu1 %v8324_v59  ;;  %v8379_v59 = vld [vmem:[#allocation2 + $0x4a8] sm:$0xff]  }
  0x9a   :  { %5398 = vmatmul.mubr.bf16.vlgmr.msra.gmra.mrb[8].mxu0 %v1308_v58  ;;  %v8378_v58 = vld [vmem:[#allocation2 + $0x428] sm:$0xff]  }
  0x9b   :  { %7481 = vmatpush3.bf16.msra.mxu0 %v8325_v61  ;;  %5438 = vmatmul.mubr.bf16.vlgmr.msra.gmra.mrb[8].mxu1 %v1330_v1  ;;  %v8381_v61 = vld [vmem:[#allocation2 + $0x4f0] sm:$0xff]   ;;  %v8385_v1 = vld [vmem:[#allocation2 + $0x4f8] sm:$0xff]  }
  0x9c   :  { %7482 = vmatprep.subr.bf16.mxu0 %v8327_v2  ;;  %7503 = vmatpush3.bf16.msra.mxu1 %v8326_v63  ;;  %v8383_v63 = vld [vmem:[#allocation2 + $0x4b0] sm:$0xff]   ;;  %v8386_v2 = vld [vmem:[#allocation2 + $0x438] sm:$0xff]  }
  0x9d   :  { %5477 = vmatprep.mubr.bf16.mxu0 %v1329_v5  ;;  %7504 = vmatprep.subr.bf16.mxu1 %v8328_v4  ;;  %v8387_v4 = vld [vmem:[#allocation2 + $0x4b8] sm:$0xff]   ;;  %v1341_v5 = vrot.slane %v61_v3, %v8992_v35 }
  0x9e   :  { %5517 = vmatprep.mubr.bf16.mxu1 %v1333_v8 }
  0x9f   :  { %7483 = vmatpush3.bf16.msra.mxu0 %v8329_v6  ;;  %v1334_v6 = vcombine.high %v61_v3, %v61_v3  ;;  %v1349_v8 = vcombine.high %v1341_v5, %v1341_v5  ;;  %v8437_v3 = vld [vmem:[#allocation2 + $0x660] sm:$0xff]  }
  0xa0   :  { %7484 = vmatprep.subr.bf16.mxu0 %v8331_v9  ;;  %7505 = vmatpush3.bf16.msra.mxu1 %v8330_v7  ;;  %v8388_v7 = vld [vmem:[#allocation2 + $0x540] sm:$0xff]   ;;  %v1357_v9 = vrot.slane %v1341_v5, %v8992_v35 }
  0xa1   :  { %7506 = vmatprep.subr.bf16.mxu1 %v8332_v10  ;;  %v8389_v10 = vld [vmem:[#allocation2 + $0x5c0] sm:$0xff]  }
  0xa2   :  { %v8439_v5 = vld [vmem:[#allocation2 + $0x620] sm:$0xff]  }
  0xa3   :  { %7485 = vmatpush3.bf16.msra.mxu0 %v8333_v11  ;;  %v9028_v11 = vrot.slane %v1334_v6, %v8992_v35  ;;  %v8440_v6 = vld [vmem:[#allocation2 + $0x6a0] sm:$0xff]  }
  0xa4   :  { %7486 = vmatprep.subr.bf16.mxu0 %v8335_v13  ;;  %7507 = vmatpush3.bf16.msra.mxu1 %v8334_v12  ;;  %v8390_v12 = vld [vmem:[#allocation2 + $0x500] sm:$0xff]   ;;  %v1371_v13 = vrot.slane %v1349_v8, %v8992_v35  ;;  %v8442_v8 = vld [vmem:[#allocation2 + $0x6e8] sm:$0xff]  }
  0xa5   :  { %7508 = vmatprep.subr.bf16.mxu1 %v8336_v14  ;;  %v8391_v14 = vld [vmem:[#allocation2 + $0x580] sm:$0xff]  }
  0xa7   :  { %7487 = vmatpush3.bf16.msra.mxu0 %v8337_v15  ;;  %v1350_v15 = vcombine.high %v9028_v11, %v9028_v11 }
  0xa8   :  { %7488 = vmatprep.subr.bf16.mxu0 %v8339_v17  ;;  %7509 = vmatpush3.bf16.msra.mxu1 %v8338_v16  ;;  %v1379_v16 = vcombine.high %v1357_v9, %v1357_v9  ;;  %v8392_v17 = vld [vmem:[#allocation2 + $0x548] sm:$0xff]  }
  0xa9   :  { %7510 = vmatprep.subr.bf16.mxu1 %v8340_v18  ;;  %v1381_v18 = vcombine.high %v1371_v13, %v1371_v13 }
  0xab   :  { %7489 = vmatpush3.bf16.msra.mxu0 %v8341_v19  ;;  %v8393_v19 = vld [vmem:[#allocation2 + $0x5c8] sm:$0xff]  }
  0xac   :  { %7490 = vmatprep.subr.bf16.mxu0 %v8343_v21  ;;  %7511 = vmatpush3.bf16.msra.mxu1 %v8342_v20  ;;  %v1378_v20 = vrot.slane %v1350_v15, %v8992_v35  ;;  %v8394_v21 = vld [vmem:[#allocation2 + $0x508] sm:$0xff]   ;;  %v8449_v15 = vld [vmem:[#allocation2 + $0x678] sm:$0xff]  }
  0xad   :  { %7512 = vmatprep.subr.bf16.mxu1 %v8344_v22  ;;  %v8395_v22 = vld [vmem:[#allocation2 + $0x588] sm:$0xff]  }
  0xaf   :  { %7491 = vmatpush3.bf16.msra.mxu0 %v8345_v23  ;;  %v1382_v23 = vcombine.high %v1378_v20, %v1378_v20 }
  0xb0   :  { %7492 = vmatprep.subr.bf16.mxu0 %v8347_v25  ;;  %7513 = vmatpush3.bf16.msra.mxu1 %v8346_v24  ;;  %v8396_v24 = vld [vmem:[#allocation2 + $0x550] sm:$0xff]  }
  0xb1   :  { %7514 = vmatprep.subr.bf16.mxu1 %v8348_v26  ;;  %v8397_v25 = vld [vmem:[#allocation2 + $0x5d0] sm:$0xff]  }
  0xb2   :  { %v8398_v26 = vld [vmem:[#allocation2 + $0x510] sm:$0xff]  }
  0xb3   :  { %7493 = vmatpush3.bf16.msra.mxu0 %v8349_v27  ;;  %v8399_v27 = vld [vmem:[#allocation2 + $0x590] sm:$0xff]  }
  0xb4   :  { %7494 = vmatprep.subr.bf16.mxu0 %v8351_v29  ;;  %7515 = vmatpush3.bf16.msra.mxu1 %v8350_v28  ;;  %v8400_v28 = vld [vmem:[#allocation2 + $0x558] sm:$0xff]  }
  0xb5   :  { %7516 = vmatprep.subr.bf16.mxu1 %v8352_v30  ;;  %v8401_v29 = vld [vmem:[#allocation2 + $0x5d8] sm:$0xff]  }
  0xb6   :  { %v8402_v30 = vld [vmem:[#allocation2 + $0x518] sm:$0xff]  }
  0xb7   :  { %7495 = vmatpush3.bf16.msra.mxu0 %v8353_v31  ;;  %v8403_v31 = vld [vmem:[#allocation2 + $0x598] sm:$0xff]  }
  0xb8   :  { %7524 = vmatprep.subr.bf16.mxu0 %v8356_v34  ;;  %7517 = vmatpush3.bf16.msra.mxu1 %v8354_v32  ;;  %v8404_v32 = vld [vmem:[#allocation2 + $0x560] sm:$0xff]  }
  0xb9   :  { %7546 = vmatprep.subr.bf16.mxu1 %v8357_v36  ;;  %v8406_v34 = vld [vmem:[#allocation2 + $0x520] sm:$0xff]  }
  0xba   :  { %5478 = vmatmul.mubr.bf16.vlgmr.msra.gmra.mrb[12].mxu0 %v1315_v33  ;;  %v8405_v33 = vld [vmem:[#allocation2 + $0x5e0] sm:$0xff]  }
  0xbb   :  { %7525 = vmatpush3.bf16.msra.mxu0 %v8358_v37  ;;  %5518 = vmatmul.mubr.bf16.vlgmr.msra.gmra.mrb[12].mxu1 %v1331_v39  ;;  %v8407_v36 = vld [vmem:[#allocation2 + $0x5a0] sm:$0xff]   ;;  %v8408_v37 = vld [vmem:[#allocation2 + $0x568] sm:$0xff]  }
  0xbc   :  { %7526 = vmatprep.subr.bf16.mxu0 %v8360_v40  ;;  %7547 = vmatpush3.bf16.msra.mxu1 %v8359_v38  ;;  %v8409_v38 = vld [vmem:[#allocation2 + $0x5e8] sm:$0xff]  }
  0xbd   :  { %7548 = vmatprep.subr.bf16.mxu1 %v8361_v41  ;;  %5557 = vmatprep.mubr.bf16.mxu0 %v1371_v13  ;;  %v8410_v39 = vld [vmem:[#allocation2 + $0x528] sm:$0xff]   ;;  %v8412_v41 = vld [vmem:[#allocation2 + $0x570] sm:$0xff]  }
  0xbe   :  { %5597 = vmatprep.mubr.bf16.mxu1 %v1381_v18  ;;  %v8411_v40 = vld [vmem:[#allocation2 + $0x5a8] sm:$0xff]   ;;  %v8447_v13 = vld [vmem:[#allocation2 + $0x630] sm:$0xff]   ;;  %v62_v18 = vld [vmem:[%s9213_s0 + $0x18] sm:$0xff] }
  0xbf   :  { %7527 = vmatpush3.bf16.msra.mxu0 %v8362_v42  ;;  %v8413_v42 = vld [vmem:[#allocation2 + $0x5f0] sm:$0xff]  }
  0xc0   :  { %7528 = vmatprep.subr.bf16.mxu0 %v8364_v44  ;;  %7549 = vmatpush3.bf16.msra.mxu1 %v8363_v43  ;;  %v8414_v43 = vld [vmem:[#allocation2 + $0x530] sm:$0xff]  }
  0xc1   :  { %7550 = vmatprep.subr.bf16.mxu1 %v8365_v45  ;;  %v8415_v44 = vld [vmem:[#allocation2 + $0x5b0] sm:$0xff]   ;;  %v8416_v45 = vld [vmem:[#allocation2 + $0x578] sm:$0xff]  }
  0xc3   :  { %7529 = vmatpush3.bf16.msra.mxu0 %v8366_v46  ;;  %v8417_v46 = vld [vmem:[#allocation2 + $0x5f8] sm:$0xff]  }
  0xc4   :  { %7530 = vmatprep.subr.bf16.mxu0 %v8368_v48  ;;  %7551 = vmatpush3.bf16.msra.mxu1 %v8367_v47  ;;  %v8418_v47 = vld [vmem:[#allocation2 + $0x538] sm:$0xff]  }
  0xc5   :  { %7552 = vmatprep.subr.bf16.mxu1 %v8369_v49  ;;  %v8419_v48 = vld [vmem:[#allocation2 + $0x5b8] sm:$0xff]   ;;  %v1364_v49 = vrot.slane %v9028_v11, %v8992_v35  ;;  %v8445_v11 = vld [vmem:[#allocation2 + $0x670] sm:$0xff]  }
  0xc7   :  { %7531 = vmatpush3.bf16.msra.mxu0 %v8370_v50  ;;  %v8421_v50 = vld [vmem:[#allocation2 + $0x640] sm:$0xff]  }
  0xc8   :  { %7532 = vmatprep.subr.bf16.mxu0 %v8372_v52  ;;  %7553 = vmatpush3.bf16.msra.mxu1 %v8371_v51  ;;  %v8422_v51 = vld [vmem:[#allocation2 + $0x6c0] sm:$0xff]  }
  0xc9   :  { %7554 = vmatprep.subr.bf16.mxu1 %v8373_v53  ;;  %v8423_v52 = vld [vmem:[#allocation2 + $0x600] sm:$0xff]  }
  0xca   :  { %v8424_v53 = vld [vmem:[#allocation2 + $0x680] sm:$0xff]  }
  0xcb   :  { %7533 = vmatpush3.bf16.msra.mxu0 %v8374_v54  ;;  %v1380_v54 = vcombine.high %v1364_v49, %v1364_v49 }
  0xcc   :  { %7534 = vmatprep.subr.bf16.mxu0 %v8376_v56  ;;  %7555 = vmatpush3.bf16.msra.mxu1 %v8375_v55  ;;  %v8425_v55 = vld [vmem:[#allocation2 + $0x648] sm:$0xff]  }
  0xcd   :  { %7556 = vmatprep.subr.bf16.mxu1 %v8377_v57  ;;  %v8426_v56 = vld [vmem:[#allocation2 + $0x6c8] sm:$0xff]  }
  0xce   :  { %v8427_v57 = vld [vmem:[#allocation2 + $0x608] sm:$0xff]  }
  0xcf   :  { %7535 = vmatpush3.bf16.msra.mxu0 %v8378_v58  ;;  %v8428_v58 = vld [vmem:[#allocation2 + $0x688] sm:$0xff]  }
  0xd0   :  { %7536 = vmatprep.subr.bf16.mxu0 %v8380_v60  ;;  %7557 = vmatpush3.bf16.msra.mxu1 %v8379_v59  ;;  %v8429_v59 = vld [vmem:[#allocation2 + $0x650] sm:$0xff]  }
  0xd1   :  { %7558 = vmatprep.subr.bf16.mxu1 %v8381_v61  ;;  %v8430_v60 = vld [vmem:[#allocation2 + $0x6d0] sm:$0xff]  }
  0xd2   :  { %v8431_v61 = vld [vmem:[#allocation2 + $0x610] sm:$0xff]  }
  0xd3   :  { %7537 = vmatpush3.bf16.msra.mxu0 %v8382_v62  ;;  %v8432_v62 = vld [vmem:[#allocation2 + $0x690] sm:$0xff]  }
  0xd4   :  { %7538 = vmatprep.subr.bf16.mxu0 %v8384_v0  ;;  %7559 = vmatpush3.bf16.msra.mxu1 %v8383_v63  ;;  %v8433_v63 = vld [vmem:[#allocation2 + $0x658] sm:$0xff]  }
  0xd5   :  { %7560 = vmatprep.subr.bf16.mxu1 %v8385_v1  ;;  %v8434_v0 = vld [vmem:[#allocation2 + $0x6d8] sm:$0xff]  }
  0xd6   :  { %v8435_v1 = vld [vmem:[#allocation2 + $0x618] sm:$0xff]  }
  0xd7   :  { %7539 = vmatpush3.bf16.msra.mxu0 %v8386_v2  ;;  %v8436_v2 = vld [vmem:[#allocation2 + $0x698] sm:$0xff]  }
  0xd8   :  { %7568 = vmatprep.subr.bf16.mxu0 %v8388_v7  ;;  %7561 = vmatpush3.bf16.msra.mxu1 %v8387_v4  ;;  %v8438_v4 = vld [vmem:[#allocation2 + $0x6e0] sm:$0xff]   ;;  %v8441_v7 = vld [vmem:[#allocation2 + $0x668] sm:$0xff]  }
  0xd9   :  { %7590 = vmatprep.subr.bf16.mxu1 %v8389_v10  ;;  %v8444_v10 = vld [vmem:[#allocation2 + $0x6a8] sm:$0xff]  }
  0xda   :  { %5558 = vmatmul.mubr.bf16.vlgmr.msra.gmra.mrb[16].mxu0 %v1357_v9  ;;  %v8443_v9 = vld [vmem:[#allocation2 + $0x628] sm:$0xff]  }
  0xdb   :  { %7569 = vmatpush3.bf16.msra.mxu0 %v8390_v12  ;;  %5598 = vmatmul.mubr.bf16.vlgmr.msra.gmra.mrb[16].mxu1 %v1379_v16  ;;  %v8446_v12 = vld [vmem:[#allocation2 + $0x6f0] sm:$0xff]   ;;  %v8450_v16 = vld [vmem:[#allocation2 + $0x6f8] sm:$0xff]  }
  0xdc   :  { %7570 = vmatprep.subr.bf16.mxu0 %v8392_v17  ;;  %7591 = vmatpush3.bf16.msra.mxu1 %v8391_v14  ;;  %v8448_v14 = vld [vmem:[#allocation2 + $0x6b0] sm:$0xff]   ;;  %v8451_v17 = vld [vmem:[#allocation2 + $0x638] sm:$0xff]  }
  0xdd   :  { %5637 = vmatprep.mubr.bf16.mxu0 %v1378_v20  ;;  %7592 = vmatprep.subr.bf16.mxu1 %v8393_v19  ;;  %v1390_v19 = vrot.slane %v62_v18, %v8992_v35  ;;  %v8453_v20 = vld [vmem:[#allocation2 + $0x740] sm:$0xff]  }
  0xde   :  { %5677 = vmatprep.mubr.bf16.mxu1 %v1382_v23 }
  0xdf   :  { %7571 = vmatpush3.bf16.msra.mxu0 %v8394_v21  ;;  %v1383_v21 = vcombine.high %v62_v18, %v62_v18  ;;  %v1398_v23 = vcombine.high %v1390_v19, %v1390_v19 }
  0xe0   :  { %7572 = vmatprep.subr.bf16.mxu0 %v8396_v24  ;;  %7593 = vmatpush3.bf16.msra.mxu1 %v8395_v22  ;;  %v8452_v22 = vld [vmem:[#allocation2 + $0x6b8] sm:$0xff]   ;;  %v1406_v24 = vrot.slane %v1390_v19, %v8992_v35  ;;  %v8490_v19 = vld [vmem:[#allocation2 + $0x848] sm:$0xff]  }
  0xe1   :  { %7594 = vmatprep.subr.bf16.mxu1 %v8397_v25  ;;  %v8454_v25 = vld [vmem:[#allocation2 + $0x7c0] sm:$0xff]  }
  0xe3   :  { %7573 = vmatpush3.bf16.msra.mxu0 %v8398_v26  ;;  %v9042_v26 = vrot.slane %v1383_v21, %v8992_v35  ;;  %v8492_v21 = vld [vmem:[#allocation2 + $0x808] sm:$0xff]  }
  0xe4   :  { %7574 = vmatprep.subr.bf16.mxu0 %v8400_v28  ;;  %7595 = vmatpush3.bf16.msra.mxu1 %v8399_v27  ;;  %v1420_v27 = vrot.slane %v1398_v23, %v8992_v35  ;;  %v8455_v28 = vld [vmem:[#allocation2 + $0x700] sm:$0xff]   ;;  %v8494_v23 = vld [vmem:[#allocation2 + $0x850] sm:$0xff]  }
  0xe5   :  { %7596 = vmatprep.subr.bf16.mxu1 %v8401_v29  ;;  %v1399_v29 = vcombine.high %v9042_v26, %v9042_v26 }
  0xe7   :  { %7575 = vmatpush3.bf16.msra.mxu0 %v8402_v30  ;;  %v1428_v30 = vcombine.high %v1406_v24, %v1406_v24 }
  0xe8   :  { %7576 = vmatprep.subr.bf16.mxu0 %v8404_v32  ;;  %7597 = vmatpush3.bf16.msra.mxu1 %v8403_v31  ;;  %v8457_v31 = vld [vmem:[#allocation2 + $0x748] sm:$0xff]   ;;  %v1430_v32 = vcombine.high %v1420_v27, %v1420_v27 }
  0xe9   :  { %7598 = vmatprep.subr.bf16.mxu1 %v8405_v33  ;;  %v8456_v33 = vld [vmem:[#allocation2 + $0x780] sm:$0xff]  }
  0xeb   :  { %7577 = vmatpush3.bf16.msra.mxu0 %v8406_v34  ;;  %v1427_v34 = vrot.slane %v1399_v29, %v8992_v35  ;;  %v8500_v29 = vld [vmem:[#allocation2 + $0x818] sm:$0xff]  }
  0xec   :  { %7578 = vmatprep.subr.bf16.mxu0 %v8408_v37  ;;  %7599 = vmatpush3.bf16.msra.mxu1 %v8407_v36  ;;  %v8458_v36 = vld [vmem:[#allocation2 + $0x7c8] sm:$0xff]  }
  0xed   :  { %7600 = vmatprep.subr.bf16.mxu1 %v8409_v38  ;;  %v8459_v37 = vld [vmem:[#allocation2 + $0x708] sm:$0xff]   ;;  %v1431_v38 = vcombine.high %v1427_v34, %v1427_v34 }
  0xef   :  { %7579 = vmatpush3.bf16.msra.mxu0 %v8410_v39  ;;  %v8461_v39 = vld [vmem:[#allocation2 + $0x750] sm:$0xff]  }
  0xf0   :  { %7580 = vmatprep.subr.bf16.mxu0 %v8412_v41  ;;  %7601 = vmatpush3.bf16.msra.mxu1 %v8411_v40  ;;  %v8460_v40 = vld [vmem:[#allocation2 + $0x788] sm:$0xff]   ;;  %v8462_v41 = vld [vmem:[#allocation2 + $0x7d0] sm:$0xff]  }
  0xf1   :  { %7602 = vmatprep.subr.bf16.mxu1 %v8413_v42  ;;  %v8463_v42 = vld [vmem:[#allocation2 + $0x710] sm:$0xff]  }
  0xf3   :  { %7581 = vmatpush3.bf16.msra.mxu0 %v8414_v43  ;;  %v8465_v43 = vld [vmem:[#allocation2 + $0x758] sm:$0xff]  }
  0xf4   :  { %7582 = vmatprep.subr.bf16.mxu0 %v8416_v45  ;;  %7603 = vmatpush3.bf16.msra.mxu1 %v8415_v44  ;;  %v8464_v44 = vld [vmem:[#allocation2 + $0x790] sm:$0xff]   ;;  %v8466_v45 = vld [vmem:[#allocation2 + $0x7d8] sm:$0xff]  }
  0xf5   :  { %7604 = vmatprep.subr.bf16.mxu1 %v8417_v46  ;;  %v8467_v46 = vld [vmem:[#allocation2 + $0x718] sm:$0xff]  }
  0xf7   :  { %7583 = vmatpush3.bf16.msra.mxu0 %v8418_v47  ;;  %v8469_v47 = vld [vmem:[#allocation2 + $0x760] sm:$0xff]  }
  0xf8   :  { %7612 = vmatprep.subr.bf16.mxu0 %v8421_v50  ;;  %7605 = vmatpush3.bf16.msra.mxu1 %v8419_v48  ;;  %v8468_v48 = vld [vmem:[#allocation2 + $0x798] sm:$0xff]   ;;  %v8471_v50 = vld [vmem:[#allocation2 + $0x720] sm:$0xff]  }
  0xf9   :  { %7634 = vmatprep.subr.bf16.mxu1 %v8422_v51  ;;  %v8473_v51 = vld [vmem:[#allocation2 + $0x768] sm:$0xff]  }
  0xfa   :  { %5638 = vmatmul.mubr.bf16.vlgmr.msra.gmra.mrb[20].mxu0 %v1364_v49  ;;  %v8470_v49 = vld [vmem:[#allocation2 + $0x7e0] sm:$0xff]  }
  0xfb   :  { %7613 = vmatpush3.bf16.msra.mxu0 %v8423_v52  ;;  %5678 = vmatmul.mubr.bf16.vlgmr.msra.gmra.mrb[20].mxu1 %v1380_v54  ;;  %v8472_v52 = vld [vmem:[#allocation2 + $0x7a0] sm:$0xff]  }
  0xfc   :  { %7614 = vmatprep.subr.bf16.mxu0 %v8425_v55  ;;  %7635 = vmatpush3.bf16.msra.mxu1 %v8424_v53  ;;  %v8474_v53 = vld [vmem:[#allocation2 + $0x7e8] sm:$0xff]   ;;  %v6770_v54 = vld [vmem:[#allocation5] ss:$0 sm:$0xff] }
  0xfd   :  { %7636 = vmatprep.subr.bf16.mxu1 %v8426_v56  ;;  %5717 = vmatprep.mubr.bf16.mxu0 %v1420_v27  ;;  %v8475_v55 = vld [vmem:[#allocation2 + $0x728] sm:$0xff]   ;;  %v8498_v27 = vld [vmem:[#allocation2 + $0x858] sm:$0xff]  }
  0xfe   :  { %5757 = vmatprep.mubr.bf16.mxu1 %v1430_v32  ;;  %v8503_v32 = vld [vmem:[#allocation2 + $0x8e0] sm:$0xff]  }
  0xff   :  { %7615 = vmatpush3.bf16.msra.mxu0 %v8427_v57  ;;  %v8477_v57 = vld [vmem:[#allocation2 + $0x770] sm:$0xff]  }
 0x100   :  { %7616 = vmatprep.subr.bf16.mxu0 %v8429_v59  ;;  %7637 = vmatpush3.bf16.msra.mxu1 %v8428_v58  ;;  %v8476_v59 = vld [vmem:[#allocation2 + $0x7a8] sm:$0xff]  }
 0x101   :  { %7638 = vmatprep.subr.bf16.mxu1 %v8430_v60 }
 0x103   :  { %7617 = vmatpush3.bf16.msra.mxu0 %v8431_v61 }
 0x104   :  { %7618 = vmatprep.subr.bf16.mxu0 %v8433_v63  ;;  %7639 = vmatpush3.bf16.msra.mxu1 %v8432_v62  ;;  %v8478_v63 = vld [vmem:[#allocation2 + $0x7f0] sm:$0xff]  }
 0x105   :  { %7640 = vmatprep.subr.bf16.mxu1 %v8434_v0  ;;  %v8479_v0 = vld [vmem:[#allocation2 + $0x730] sm:$0xff]  }
 0x107   :  { %7619 = vmatpush3.bf16.msra.mxu0 %v8435_v1 }
 0x108   :  { %7620 = vmatprep.subr.bf16.mxu0 %v8437_v3  ;;  %7641 = vmatpush3.bf16.msra.mxu1 %v8436_v2  ;;  %v8480_v3 = vld [vmem:[#allocation2 + $0x7b0] sm:$0xff]  }
 0x109   :  { %7642 = vmatprep.subr.bf16.mxu1 %v8438_v4 }
 0x10b   :  { %7621 = vmatpush3.bf16.msra.mxu0 %v8439_v5 }
 0x10c   :  { %7622 = vmatprep.subr.bf16.mxu0 %v8441_v7  ;;  %7643 = vmatpush3.bf16.msra.mxu1 %v8440_v6  ;;  %v8481_v7 = vld [vmem:[#allocation2 + $0x778] sm:$0xff]  }
 0x10d   :  { %7644 = vmatprep.subr.bf16.mxu1 %v8442_v8 }
 0x10f   :  { %7623 = vmatpush3.bf16.msra.mxu0 %v8443_v9  ;;  %v8482_v9 = vld [vmem:[#allocation2 + $0x7f8] sm:$0xff]  }
 0x110   :  { %7624 = vmatprep.subr.bf16.mxu0 %v8445_v11  ;;  %7645 = vmatpush3.bf16.msra.mxu1 %v8444_v10  ;;  %v8483_v11 = vld [vmem:[#allocation2 + $0x738] sm:$0xff]  }
 0x111   :  { %7646 = vmatprep.subr.bf16.mxu1 %v8446_v12  ;;  %v8484_v12 = vld [vmem:[#allocation2 + $0x7b8] sm:$0xff]  }
 0x113   :  { %7625 = vmatpush3.bf16.msra.mxu0 %v8447_v13  ;;  %v1413_v13 = vrot.slane %v9042_v26, %v8992_v35  ;;  %v8497_v26 = vld [vmem:[#allocation2 + $0x890] sm:$0xff]  }
 0x114   :  { %7626 = vmatprep.subr.bf16.mxu0 %v8449_v15  ;;  %7647 = vmatpush3.bf16.msra.mxu1 %v8448_v14  ;;  %v8486_v14 = vld [vmem:[#allocation2 + $0x840] sm:$0xff]  }
 0x115   :  { %7648 = vmatprep.subr.bf16.mxu1 %v8450_v16  ;;  %v8487_v15 = vld [vmem:[#allocation2 + $0x8c0] sm:$0xff]   ;;  %v1429_v18 = vcombine.high %v1413_v13, %v1413_v13 }
 0x116   :  { %v8488_v16 = vld [vmem:[#allocation2 + $0x800] sm:$0xff]  }
 0x117   :  { %7627 = vmatpush3.bf16.msra.mxu0 %v8451_v17  ;;  %v8489_v17 = vld [vmem:[#allocation2 + $0x880] sm:$0xff]  }
 0x118   :  { %7656 = vmatprep.subr.bf16.mxu0 %v8453_v20  ;;  %7649 = vmatpush3.bf16.msra.mxu1 %v8452_v22  ;;  %v8491_v20 = vld [vmem:[#allocation2 + $0x8c8] sm:$0xff]  }
 0x119   :  { %7678 = vmatprep.subr.bf16.mxu1 %v8454_v25  ;;  %v8493_v22 = vld [vmem:[#allocation2 + $0x888] sm:$0xff]   ;;  %v8496_v25 = vld [vmem:[#allocation2 + $0x810] sm:$0xff]  }
 0x11a   :  { %5718 = vmatmul.mubr.bf16.vlgmr.msra.gmra.mrb[24].mxu0 %v1406_v24  ;;  %v8495_v24 = vld [vmem:[#allocation2 + $0x8d0] sm:$0xff]  }
 0x11b   :  { %7657 = vmatpush3.bf16.msra.mxu0 %v8455_v28  ;;  %5758 = vmatmul.mubr.bf16.vlgmr.msra.gmra.mrb[24].mxu1 %v1428_v30  ;;  %v8499_v28 = vld [vmem:[#allocation2 + $0x8d8] sm:$0xff]  }
 0x11c   :  { %7658 = vmatprep.subr.bf16.mxu0 %v8457_v31  ;;  %7679 = vmatpush3.bf16.msra.mxu1 %v8456_v33  ;;  %v8501_v30 = vld [vmem:[#allocation2 + $0x898] sm:$0xff]   ;;  %v8502_v31 = vld [vmem:[#allocation2 + $0x860] sm:$0xff]  }
 0x11d   :  { %5797 = vmatprep.mubr.bf16.mxu0 %v1427_v34  ;;  %7680 = vmatprep.subr.bf16.mxu1 %v8458_v36  ;;  %v8504_v33 = vld [vmem:[#allocation2 + $0x820] sm:$0xff]   ;;  %v8506_v36 = vld [vmem:[#allocation2 + $0x868] sm:$0xff]  }
 0x11e   :  { %5837 = vmatprep.mubr.bf16.mxu1 %v1431_v38  ;;  %v8505_v34 = vld [vmem:[#allocation2 + $0x8a0] sm:$0xff]   ;;  %v8508_v38 = vld [vmem:[#allocation2 + $0x828] sm:$0xff]  }
 0x11f   :  { %7659 = vmatpush3.bf16.msra.mxu0 %v8459_v37  ;;  %v8507_v37 = vld [vmem:[#allocation2 + $0x8e8] sm:$0xff]  }
 0x120   :  { %7660 = vmatprep.subr.bf16.mxu0 %v8461_v39  ;;  %7681 = vmatpush3.bf16.msra.mxu1 %v8460_v40  ;;  %v8509_v39 = vld [vmem:[#allocation2 + $0x8a8] sm:$0xff]  }
 0x121   :  { %7682 = vmatprep.subr.bf16.mxu1 %v8462_v41  ;;  %v8510_v41 = vld [vmem:[#allocation2 + $0x870] sm:$0xff]  }
 0x123   :  { %7661 = vmatpush3.bf16.msra.mxu0 %v8463_v42 }
 0x124   :  { %7662 = vmatprep.subr.bf16.mxu0 %v8465_v43  ;;  %7683 = vmatpush3.bf16.msra.mxu1 %v8464_v44  ;;  %v8511_v43 = vld [vmem:[#allocation2 + $0x8f0] sm:$0xff]  }
 0x125   :  { %7684 = vmatprep.subr.bf16.mxu1 %v8466_v45 }
 0x127   :  { %7663 = vmatpush3.bf16.msra.mxu0 %v8467_v46 }
 0x128   :  { %7664 = vmatprep.subr.bf16.mxu0 %v8469_v47  ;;  %7685 = vmatpush3.bf16.msra.mxu1 %v8468_v48 }
 0x129   :  { %7686 = vmatprep.subr.bf16.mxu1 %v8470_v49  ;;  %v8512_v49 = vld [vmem:[#allocation2 + $0x830] sm:$0xff]  }
 0x12b   :  { %7665 = vmatpush3.bf16.msra.mxu0 %v8471_v50  ;;  %v8513_v50 = vld [vmem:[#allocation2 + $0x8b0] sm:$0xff]  }
 0x12c   :  { %7666 = vmatprep.subr.bf16.mxu0 %v8473_v51  ;;  %7687 = vmatpush3.bf16.msra.mxu1 %v8472_v52 }
 0x12d   :  { %v7364_v56 = vpop.f32.mrb[0].mxu0  ;;  %7688 = vmatprep.subr.bf16.mxu1 %v8474_v53 }
 0x12e   :  { %v7365_v58 = vpop.f32.mrb[1].mxu0  ;;  %v7386_v60 = vpop.f32.mrb[0].mxu1 }
 0x12f   :  { %v7366_v61 = vadd.f32 %v7365_v58, %v7364_v56  ;;  %v7367_v62 = vpop.f32.mrb[2].mxu0  ;;  %v7387_v1 = vpop.f32.mrb[1].mxu1  ;;  %7667 = vmatpush3.bf16.msra.mxu0 %v8475_v55  ;;  %v8515_v56 = vld [vmem:[#allocation2 + $0x8f8] sm:$0xff]  }
 0x130   :  { %v7368_v2 = vpop.f32.mrb[3].mxu0  ;;  %v7388_v5 = vadd.f32 %v7387_v1, %v7386_v60  ;;  %v7389_v6 = vpop.f32.mrb[2].mxu1  ;;  %7668 = vmatprep.subr.bf16.mxu0 %v8477_v57  ;;  %7689 = vmatpush3.bf16.msra.mxu1 %v8476_v59  ;;  %v8516_v58 = vld [vmem:[#allocation2 + $0x838] sm:$0xff]   ;;  %v63_v59 = vld [vmem:[%s9213_s0 + $0x20] sm:$0xff] }
 0x131   :  { %v5240_v4 = vadd.f32 %v7366_v61, %v6770_v54  ;;  %v7390_v8 = vpop.f32.mrb[3].mxu1  ;;  %7690 = vmatprep.subr.bf16.mxu1 %v8478_v63  ;;  %v8514_v54 = vld [vmem:[#allocation2 + $0x878] sm:$0xff]   ;;  %v1439_v60 = vrot.slane %v63_v59, %v8992_v35  ;;  %v8518_v61 = vld [vmem:[#allocation2 + $0x940] sm:$0xff]   ;;  %v1432_v62 = vcombine.high %v63_v59, %v63_v59  ;;  %v8555_v59 = vld [vmem:[#allocation2 + $0xa48] sm:$0xff]  }
 0x132   :  { %v8517_v63 = vld [vmem:[#allocation2 + $0x8b8] sm:$0xff]   ;;  %v8519_v2 = vld [vmem:[#allocation2 + $0x9c0] sm:$0xff]  }
 0x133   :  { %v9048_v10 = vadd.f32 %v7388_v5, %v5240_v4  ;;  %7669 = vmatpush3.bf16.msra.mxu0 %v8479_v0  ;;  %v1447_v0 = vcombine.high %v1439_v60, %v1439_v60  ;;  %v1455_v1 = vrot.slane %v1439_v60, %v8992_v35  ;;  %v8520_v4 = vld [vmem:[#allocation2 + $0x900] sm:$0xff]   ;;  %v8556_v60 = vld [vmem:[#allocation2 + $0xac8] sm:$0xff]  }
 0x134   :  { %7670 = vmatprep.subr.bf16.mxu0 %v8481_v7  ;;  %7691 = vmatpush3.bf16.msra.mxu1 %v8480_v3  ;;  %v9061_v3 = vrot.slane %v1432_v62, %v8992_v35  ;;  %v8521_v6 = vld [vmem:[#allocation2 + $0x980] sm:$0xff]   ;;  %v8558_v62 = vld [vmem:[#allocation2 + $0xa88] sm:$0xff]  }
 0x135   :  { %7692 = vmatprep.subr.bf16.mxu1 %v8482_v9  ;;  %v1469_v5 = vrot.slane %v1447_v0, %v8992_v35  ;;  %v1477_v8 = vcombine.high %v1455_v1, %v1455_v1  ;;  %v8522_v9 = vld [vmem:[#allocation2 + $0x948] sm:$0xff]   ;;  %v8560_v0 = vld [vmem:[#allocation2 + $0xad0] sm:$0xff]  }
 0x136   :  { %v1448_v7 = vcombine.high %v9061_v3, %v9061_v3 }
 0x137   :  { %7671 = vmatpush3.bf16.msra.mxu0 %v8483_v11  ;;  %v8523_v11 = vld [vmem:[#allocation2 + $0x9c8] sm:$0xff]  }
 0x138   :  { %7700 = vmatprep.subr.bf16.mxu0 %v8486_v14  ;;  %7693 = vmatpush3.bf16.msra.mxu1 %v8484_v12  ;;  %v1476_v12 = vrot.slane %v1448_v7, %v8992_v35  ;;  %v8525_v14 = vld [vmem:[#allocation2 + $0x988] sm:$0xff]   ;;  %v8567_v7 = vld [vmem:[#allocation2 + $0xa60] sm:$0xff]  }
 0x139   :  { %7722 = vmatprep.subr.bf16.mxu1 %v8487_v15 }
 0x13a   :  { %5798 = vmatmul.mubr.bf16.vlgmr.msra.gmra.mrb[28].mxu0 %v1413_v13  ;;  %v8524_v13 = vld [vmem:[#allocation2 + $0x908] sm:$0xff]   ;;  %v1480_v15 = vcombine.high %v1476_v12, %v1476_v12 }
 0x13b   :  { %7701 = vmatpush3.bf16.msra.mxu0 %v8488_v16  ;;  %5838 = vmatmul.mubr.bf16.vlgmr.msra.gmra.mrb[28].mxu1 %v1429_v18  ;;  %v8526_v16 = vld [vmem:[#allocation2 + $0x950] sm:$0xff]  }
 0x13c   :  { %7702 = vmatprep.subr.bf16.mxu0 %v8490_v19  ;;  %7723 = vmatpush3.bf16.msra.mxu1 %v8489_v17  ;;  %v8527_v17 = vld [vmem:[#allocation2 + $0x9d0] sm:$0xff]  }
 0x13d   :  { %7724 = vmatprep.subr.bf16.mxu1 %v8491_v20  ;;  %5877 = vmatprep.mubr.bf16.mxu0 %v1469_v5  ;;  %v8528_v18 = vld [vmem:[#allocation2 + $0x910] sm:$0xff]   ;;  %v8530_v20 = vld [vmem:[#allocation2 + $0x958] sm:$0xff]  }
 0x13e   :  { %v8529_v19 = vld [vmem:[#allocation2 + $0x990] sm:$0xff]  }
 0x13f   :  { %7703 = vmatpush3.bf16.msra.mxu0 %v8492_v21  ;;  %v8531_v21 = vld [vmem:[#allocation2 + $0x9d8] sm:$0xff]  }
 0x140   :  { %7704 = vmatprep.subr.bf16.mxu0 %v8494_v23  ;;  %7725 = vmatpush3.bf16.msra.mxu1 %v8493_v22  ;;  %v8532_v22 = vld [vmem:[#allocation2 + $0x918] sm:$0xff]  }
 0x141   :  { %7726 = vmatprep.subr.bf16.mxu1 %v8495_v24  ;;  %v8533_v23 = vld [vmem:[#allocation2 + $0x998] sm:$0xff]   ;;  %v8534_v24 = vld [vmem:[#allocation2 + $0x960] sm:$0xff]  }
 0x143   :  { %7705 = vmatpush3.bf16.msra.mxu0 %v8496_v25  ;;  %v8535_v25 = vld [vmem:[#allocation2 + $0x9e0] sm:$0xff]  }
 0x144   :  { %7706 = vmatprep.subr.bf16.mxu0 %v8498_v27  ;;  %7727 = vmatpush3.bf16.msra.mxu1 %v8497_v26  ;;  %v8536_v26 = vld [vmem:[#allocation2 + $0x920] sm:$0xff]  }
 0x145   :  { %7728 = vmatprep.subr.bf16.mxu1 %v8499_v28  ;;  %v8537_v27 = vld [vmem:[#allocation2 + $0x9a0] sm:$0xff]   ;;  %v8538_v28 = vld [vmem:[#allocation2 + $0x968] sm:$0xff]  }
 0x147   :  { %7707 = vmatpush3.bf16.msra.mxu0 %v8500_v29  ;;  %v8539_v29 = vld [vmem:[#allocation2 + $0x9e8] sm:$0xff]  }
 0x148   :  { %7708 = vmatprep.subr.bf16.mxu0 %v8502_v31  ;;  %7729 = vmatpush3.bf16.msra.mxu1 %v8501_v30  ;;  %v8540_v30 = vld [vmem:[#allocation2 + $0x928] sm:$0xff]  }
 0x149   :  { %7730 = vmatprep.subr.bf16.mxu1 %v8503_v32  ;;  %v8541_v32 = vld [vmem:[#allocation2 + $0x9a8] sm:$0xff]  }
 0x14b   :  { %7709 = vmatpush3.bf16.msra.mxu0 %v8504_v33 }
 0x14c   :  { %7710 = vmatprep.subr.bf16.mxu0 %v8506_v36  ;;  %7731 = vmatpush3.bf16.msra.mxu1 %v8505_v34  ;;  %v8542_v34 = vld [vmem:[#allocation2 + $0x970] sm:$0xff]  }
 0x14d   :  { %v7408_v40 = vpop.f32.mrb[4].mxu0  ;;  %7732 = vmatprep.subr.bf16.mxu1 %v8507_v37 }
 0x14e   :  { %v7409_v42 = vpop.f32.mrb[5].mxu0  ;;  %v7430_v44 = vpop.f32.mrb[4].mxu1 }
 0x14f   :  { %v7410_v45 = vadd.f32 %v7409_v42, %v7408_v40  ;;  %v7411_v46 = vpop.f32.mrb[6].mxu0  ;;  %v7431_v47 = vpop.f32.mrb[5].mxu1  ;;  %7711 = vmatpush3.bf16.msra.mxu0 %v8508_v38  ;;  %v8544_v40 = vld [vmem:[#allocation2 + $0x930] sm:$0xff]  }
 0x150   :  { %v7412_v48 = vpop.f32.mrb[7].mxu0  ;;  %v7432_v52 = vadd.f32 %v7431_v47, %v7430_v44  ;;  %v7433_v53 = vpop.f32.mrb[6].mxu1  ;;  %7712 = vmatprep.subr.bf16.mxu0 %v8510_v41  ;;  %7733 = vmatpush3.bf16.msra.mxu1 %v8509_v39  ;;  %v8543_v39 = vld [vmem:[#allocation2 + $0x9f0] sm:$0xff]  }
 0x151   :  { %v5320_v51 = vadd.f32 %v7410_v45, %v9048_v10  ;;  %v7434_v55 = vpop.f32.mrb[7].mxu1  ;;  %7734 = vmatprep.subr.bf16.mxu1 %v8511_v43  ;;  %v1479_v10 = vcombine.high %v1469_v5, %v1469_v5  ;;  %v8545_v46 = vld [vmem:[#allocation2 + $0x9b0] sm:$0xff]   ;;  %v8546_v48 = vld [vmem:[#allocation2 + $0x978] sm:$0xff]   ;;  %v1462_v53 = vrot.slane %v9061_v3, %v8992_v35 }
 0x152   :  { %v8552_v55 = vld [vmem:[#allocation2 + $0xac0] sm:$0xff]   ;;  %v8563_v3 = vld [vmem:[#allocation2 + $0xa58] sm:$0xff]  }
 0x153   :  { %v9053_v57 = vadd.f32 %v7432_v52, %v5320_v51  ;;  %7713 = vmatpush3.bf16.msra.mxu0 %v8512_v49  ;;  %5917 = vmatprep.mubr.bf16.mxu1 %v1479_v10  ;;  %v8548_v51 = vld [vmem:[#allocation2 + $0x938] sm:$0xff]   ;;  %v8570_v10 = vld [vmem:[#allocation2 + $0xaa0] sm:$0xff]  }
 0x154   :  { %7714 = vmatprep.subr.bf16.mxu0 %v8514_v54  ;;  %7735 = vmatpush3.bf16.msra.mxu1 %v8513_v50  ;;  %v8547_v50 = vld [vmem:[#allocation2 + $0x9f8] sm:$0xff]   ;;  %v8551_v54 = vld [vmem:[#allocation2 + $0xa40] sm:$0xff]  }
 0x155   :  { %7736 = vmatprep.subr.bf16.mxu1 %v8515_v56  ;;  %v8549_v52 = vld [vmem:[#allocation2 + $0x9b8] sm:$0xff]   ;;  %v8553_v56 = vld [vmem:[#allocation2 + $0xa00] sm:$0xff]  }
 0x156   :  { %v8565_v5 = vld [vmem:[#allocation2 + $0xa18] sm:$0xff]  }
 0x157   :  { %7715 = vmatpush3.bf16.msra.mxu0 %v8516_v58  ;;  %v1478_v58 = vcombine.high %v1462_v53, %v1462_v53 }
 0x158   :  { %7744 = vmatprep.subr.bf16.mxu0 %v8518_v61  ;;  %7737 = vmatpush3.bf16.msra.mxu1 %v8517_v63  ;;  %v8557_v61 = vld [vmem:[#allocation2 + $0xa08] sm:$0xff]   ;;  %v8559_v63 = vld [vmem:[#allocation2 + $0xa50] sm:$0xff]  }
 0x159   :  { %7766 = vmatprep.subr.bf16.mxu1 %v8519_v2  ;;  %v8562_v2 = vld [vmem:[#allocation2 + $0xa90] sm:$0xff]  }
 0x15a   :  { %5878 = vmatmul.mubr.bf16.vlgmr.msra.gmra.mrb[32].mxu0 %v1455_v1  ;;  %v8561_v1 = vld [vmem:[#allocation2 + $0xa10] sm:$0xff]  }
 0x15b   :  { %7745 = vmatpush3.bf16.msra.mxu0 %v8520_v4  ;;  %5918 = vmatmul.mubr.bf16.vlgmr.msra.gmra.mrb[32].mxu1 %v1477_v8  ;;  %v8564_v4 = vld [vmem:[#allocation2 + $0xad8] sm:$0xff]   ;;  %v8568_v8 = vld [vmem:[#allocation2 + $0xae0] sm:$0xff]  }
 0x15c   :  { %7746 = vmatprep.subr.bf16.mxu0 %v8522_v9  ;;  %7767 = vmatpush3.bf16.msra.mxu1 %v8521_v6  ;;  %v8566_v6 = vld [vmem:[#allocation2 + $0xa98] sm:$0xff]   ;;  %v8569_v9 = vld [vmem:[#allocation2 + $0xa20] sm:$0xff]  }
 0x15d   :  { %5957 = vmatprep.mubr.bf16.mxu0 %v1476_v12  ;;  %7768 = vmatprep.subr.bf16.mxu1 %v8523_v11  ;;  %v8571_v11 = vld [vmem:[#allocation2 + $0xa68] sm:$0xff]  }
 0x15e   :  { %5997 = vmatprep.mubr.bf16.mxu1 %v1480_v15  ;;  %v8572_v12 = vld [vmem:[#allocation2 + $0xae8] sm:$0xff]  }
 0x15f   :  { %7747 = vmatpush3.bf16.msra.mxu0 %v8524_v13  ;;  %v8573_v13 = vld [vmem:[#allocation2 + $0xa28] sm:$0xff]  }
 0x160   :  { %7748 = vmatprep.subr.bf16.mxu0 %v8526_v16  ;;  %7769 = vmatpush3.bf16.msra.mxu1 %v8525_v14  ;;  %v8574_v15 = vld [vmem:[#allocation2 + $0xaa8] sm:$0xff]  }
 0x161   :  { %7770 = vmatprep.subr.bf16.mxu1 %v8527_v17  ;;  %v8575_v17 = vld [vmem:[#allocation2 + $0xa70] sm:$0xff]  }
 0x163   :  { %7749 = vmatpush3.bf16.msra.mxu0 %v8528_v18 }
 0x164   :  { %7750 = vmatprep.subr.bf16.mxu0 %v8530_v20  ;;  %7771 = vmatpush3.bf16.msra.mxu1 %v8529_v19 }
 0x165   :  { %7772 = vmatprep.subr.bf16.mxu1 %v8531_v21 }
 0x167   :  { %7751 = vmatpush3.bf16.msra.mxu0 %v8532_v22 }
 0x168   :  { %7752 = vmatprep.subr.bf16.mxu0 %v8534_v24  ;;  %7773 = vmatpush3.bf16.msra.mxu1 %v8533_v23  ;;  %v8576_v23 = vld [vmem:[#allocation2 + $0xaf0] sm:$0xff]  }
 0x169   :  { %7774 = vmatprep.subr.bf16.mxu1 %v8535_v25  ;;  %v8577_v24 = vld [vmem:[#allocation2 + $0xa30] sm:$0xff]  }
 0x16b   :  { %7753 = vmatpush3.bf16.msra.mxu0 %v8536_v26 }
 0x16c   :  { %7754 = vmatprep.subr.bf16.mxu0 %v8538_v28  ;;  %7775 = vmatpush3.bf16.msra.mxu1 %v8537_v27  ;;  %v8578_v28 = vld [vmem:[#allocation2 + $0xab0] sm:$0xff]  }
 0x16d   :  { %v7452_v31 = vpop.f32.mrb[8].mxu0  ;;  %7776 = vmatprep.subr.bf16.mxu1 %v8539_v29 }
 0x16e   :  { %v7453_v33 = vpop.f32.mrb[9].mxu0  ;;  %v7474_v36 = vpop.f32.mrb[8].mxu1 }
 0x16f   :  { %v7454_v37 = vadd.f32 %v7453_v33, %v7452_v31  ;;  %v7455_v38 = vpop.f32.mrb[10].mxu0  ;;  %v7475_v41 = vpop.f32.mrb[9].mxu1  ;;  %7755 = vmatpush3.bf16.msra.mxu0 %v8540_v30  ;;  %v8579_v30 = vld [vmem:[#allocation2 + $0xa78] sm:$0xff]  }
 0x170   :  { %v7456_v42 = vpop.f32.mrb[11].mxu0  ;;  %v7476_v44 = vadd.f32 %v7475_v41, %v7474_v36  ;;  %v7477_v45 = vpop.f32.mrb[10].mxu1  ;;  %7756 = vmatprep.subr.bf16.mxu0 %v8542_v34  ;;  %7777 = vmatpush3.bf16.msra.mxu1 %v8541_v32  ;;  %v8580_v32 = vld [vmem:[#allocation2 + $0xaf8] sm:$0xff]   ;;  %v64_v34 = vld [vmem:[%s9213_s0 + $0x28] sm:$0xff] }
 0x171   :  { %v5400_v43 = vadd.f32 %v7454_v37, %v9053_v57  ;;  %v7478_v47 = vpop.f32.mrb[11].mxu1  ;;  %7778 = vmatprep.subr.bf16.mxu1 %v8543_v39  ;;  %v8554_v57 = vld [vmem:[#allocation2 + $0xa80] sm:$0xff]   ;;  %v8581_v33 = vld [vmem:[#allocation2 + $0xa38] sm:$0xff]   ;;  %v1488_v36 = vrot.slane %v64_v34, %v8992_v35  ;;  %v1481_v38 = vcombine.high %v64_v34, %v64_v34  ;;  %v8620_v34 = vld [vmem:[#allocation2 + $0xc48] sm:$0xff]  }
 0x172   :  { %v8583_v37 = vld [vmem:[#allocation2 + $0xb40] sm:$0xff]   ;;  %v8582_v39 = vld [vmem:[#allocation2 + $0xab8] sm:$0xff]  }
 0x173   :  { %v9068_v49 = vadd.f32 %v7476_v44, %v5400_v43  ;;  %7757 = vmatpush3.bf16.msra.mxu0 %v8544_v40  ;;  %v1496_v40 = vcombine.high %v1488_v36, %v1488_v36  ;;  %v1504_v41 = vrot.slane %v1488_v36, %v8992_v35  ;;  %v8584_v42 = vld [vmem:[#allocation2 + $0xbc0] sm:$0xff]   ;;  %v9081_v43 = vrot.slane %v1481_v38, %v8992_v35  ;;  %v8621_v36 = vld [vmem:[#allocation2 + $0xcc8] sm:$0xff]  }
 0x174   :  { %7758 = vmatprep.subr.bf16.mxu0 %v8546_v48  ;;  %7779 = vmatpush3.bf16.msra.mxu1 %v8545_v46  ;;  %v8585_v44 = vld [vmem:[#allocation2 + $0xb00] sm:$0xff]   ;;  %v8623_v38 = vld [vmem:[#allocation2 + $0xc88] sm:$0xff]  }
 0x175   :  { %7780 = vmatprep.subr.bf16.mxu1 %v8547_v50  ;;  %v1518_v45 = vrot.slane %v1496_v40, %v8992_v35  ;;  %v8586_v46 = vld [vmem:[#allocation2 + $0xb80] sm:$0xff]   ;;  %v1497_v47 = vcombine.high %v9081_v43, %v9081_v43  ;;  %v1526_v48 = vcombine.high %v1504_v41, %v1504_v41  ;;  %v8625_v40 = vld [vmem:[#allocation2 + $0xcd0] sm:$0xff]  }
 0x177   :  { %7759 = vmatpush3.bf16.msra.mxu0 %v8548_v51  ;;  %v1528_v50 = vcombine.high %v1518_v45, %v1518_v45  ;;  %v8588_v51 = vld [vmem:[#allocation2 + $0xbc8] sm:$0xff]  }
 0x178   :  { %7788 = vmatprep.subr.bf16.mxu0 %v8551_v54  ;;  %7781 = vmatpush3.bf16.msra.mxu1 %v8549_v52  ;;  %v1525_v52 = vrot.slane %v1497_v47, %v8992_v35  ;;  %v8590_v54 = vld [vmem:[#allocation2 + $0xb88] sm:$0xff]   ;;  %v8632_v47 = vld [vmem:[#allocation2 + $0xc60] sm:$0xff]  }
 0x179   :  { %7810 = vmatprep.subr.bf16.mxu1 %v8552_v55 }
 0x17a   :  { %5958 = vmatmul.mubr.bf16.vlgmr.msra.gmra.mrb[36].mxu0 %v1462_v53  ;;  %v8589_v53 = vld [vmem:[#allocation2 + $0xb08] sm:$0xff]   ;;  %v1529_v55 = vcombine.high %v1525_v52, %v1525_v52 }
 0x17b   :  { %7789 = vmatpush3.bf16.msra.mxu0 %v8553_v56  ;;  %5998 = vmatmul.mubr.bf16.vlgmr.msra.gmra.mrb[36].mxu1 %v1478_v58  ;;  %v8591_v56 = vld [vmem:[#allocation2 + $0xb50] sm:$0xff]  }
 0x17c   :  { %7790 = vmatprep.subr.bf16.mxu0 %v8555_v59  ;;  %7811 = vmatpush3.bf16.msra.mxu1 %v8554_v57  ;;  %v8592_v57 = vld [vmem:[#allocation2 + $0xbd0] sm:$0xff]  }
 0x17d   :  { %7812 = vmatprep.subr.bf16.mxu1 %v8556_v60  ;;  %6037 = vmatprep.mubr.bf16.mxu0 %v1518_v45  ;;  %v8593_v58 = vld [vmem:[#allocation2 + $0xb10] sm:$0xff]   ;;  %v8595_v60 = vld [vmem:[#allocation2 + $0xb58] sm:$0xff]  }
 0x17e   :  { %6077 = vmatprep.mubr.bf16.mxu1 %v1528_v50  ;;  %v8594_v59 = vld [vmem:[#allocation2 + $0xb90] sm:$0xff]   ;;  %v8630_v45 = vld [vmem:[#allocation2 + $0xc18] sm:$0xff]   ;;  %v8635_v50 = vld [vmem:[#allocation2 + $0xca0] sm:$0xff]  }
 0x17f   :  { %7791 = vmatpush3.bf16.msra.mxu0 %v8557_v61  ;;  %v8596_v61 = vld [vmem:[#allocation2 + $0xbd8] sm:$0xff]  }
 0x180   :  { %7792 = vmatprep.subr.bf16.mxu0 %v8559_v63  ;;  %7813 = vmatpush3.bf16.msra.mxu1 %v8558_v62  ;;  %v8597_v62 = vld [vmem:[#allocation2 + $0xb18] sm:$0xff]  }
 0x181   :  { %7814 = vmatprep.subr.bf16.mxu1 %v8560_v0  ;;  %v8598_v63 = vld [vmem:[#allocation2 + $0xb98] sm:$0xff]   ;;  %v8599_v0 = vld [vmem:[#allocation2 + $0xb60] sm:$0xff]  }
 0x183   :  { %7793 = vmatpush3.bf16.msra.mxu0 %v8561_v1  ;;  %v8600_v1 = vld [vmem:[#allocation2 + $0xbe0] sm:$0xff]  }
 0x184   :  { %7794 = vmatprep.subr.bf16.mxu0 %v8563_v3  ;;  %7815 = vmatpush3.bf16.msra.mxu1 %v8562_v2  ;;  %v8601_v2 = vld [vmem:[#allocation2 + $0xb20] sm:$0xff]  }
 0x185   :  { %7816 = vmatprep.subr.bf16.mxu1 %v8564_v4  ;;  %v8602_v3 = vld [vmem:[#allocation2 + $0xba0] sm:$0xff]   ;;  %v8603_v4 = vld [vmem:[#allocation2 + $0xb68] sm:$0xff]  }
 0x187   :  { %7795 = vmatpush3.bf16.msra.mxu0 %v8565_v5  ;;  %v8604_v5 = vld [vmem:[#allocation2 + $0xbe8] sm:$0xff]  }
 0x188   :  { %7796 = vmatprep.subr.bf16.mxu0 %v8567_v7  ;;  %7817 = vmatpush3.bf16.msra.mxu1 %v8566_v6  ;;  %v8605_v7 = vld [vmem:[#allocation2 + $0xb28] sm:$0xff]  }
 0x189   :  { %7818 = vmatprep.subr.bf16.mxu1 %v8568_v8 }
 0x18b   :  { %7797 = vmatpush3.bf16.msra.mxu0 %v8569_v9  ;;  %v8606_v9 = vld [vmem:[#allocation2 + $0xba8] sm:$0xff]  }
 0x18c   :  { %7798 = vmatprep.subr.bf16.mxu0 %v8571_v11  ;;  %7819 = vmatpush3.bf16.msra.mxu1 %v8570_v10 }
 0x18d   :  { %v7496_v14 = vpop.f32.mrb[12].mxu0  ;;  %7820 = vmatprep.subr.bf16.mxu1 %v8572_v12 }
 0x18e   :  { %v7497_v16 = vpop.f32.mrb[13].mxu0  ;;  %v7518_v18 = vpop.f32.mrb[12].mxu1 }
 0x18f   :  { %v7498_v19 = vadd.f32 %v7497_v16, %v7496_v14  ;;  %v7499_v20 = vpop.f32.mrb[14].mxu0  ;;  %v7519_v21 = vpop.f32.mrb[13].mxu1  ;;  %7799 = vmatpush3.bf16.msra.mxu0 %v8573_v13  ;;  %v8607_v13 = vld [vmem:[#allocation2 + $0xb70] sm:$0xff]  }
 0x190   :  { %v7500_v22 = vpop.f32.mrb[15].mxu0  ;;  %v7520_v26 = vadd.f32 %v7519_v21, %v7518_v18  ;;  %v7521_v27 = vpop.f32.mrb[14].mxu1  ;;  %7800 = vmatprep.subr.bf16.mxu0 %v8575_v17  ;;  %7821 = vmatpush3.bf16.msra.mxu1 %v8574_v15  ;;  %v8608_v14 = vld [vmem:[#allocation2 + $0xbf0] sm:$0xff]  }
 0x191   :  { %v5480_v25 = vadd.f32 %v7498_v19, %v9068_v49  ;;  %v7522_v29 = vpop.f32.mrb[15].mxu1  ;;  %7822 = vmatprep.subr.bf16.mxu1 %v8576_v23  ;;  %v8587_v49 = vld [vmem:[#allocation2 + $0xb48] sm:$0xff]   ;;  %v8609_v20 = vld [vmem:[#allocation2 + $0xb30] sm:$0xff]   ;;  %v8614_v27 = vld [vmem:[#allocation2 + $0xbb8] sm:$0xff]  }
 0x192   :  { %v8610_v22 = vld [vmem:[#allocation2 + $0xbb0] sm:$0xff]   ;;  %v8616_v29 = vld [vmem:[#allocation2 + $0xc40] sm:$0xff]  }
 0x193   :  { %v9073_v31 = vadd.f32 %v7520_v26, %v5480_v25  ;;  %7801 = vmatpush3.bf16.msra.mxu0 %v8577_v24  ;;  %v8611_v24 = vld [vmem:[#allocation2 + $0xb78] sm:$0xff]  }
 0x194   :  { %7802 = vmatprep.subr.bf16.mxu0 %v8579_v30  ;;  %7823 = vmatpush3.bf16.msra.mxu1 %v8578_v28  ;;  %v8612_v25 = vld [vmem:[#allocation2 + $0xbf8] sm:$0xff]   ;;  %v1511_v28 = vrot.slane %v9081_v43, %v8992_v35  ;;  %v8617_v30 = vld [vmem:[#allocation2 + $0xcc0] sm:$0xff]  }
 0x195   :  { %7824 = vmatprep.subr.bf16.mxu1 %v8580_v32  ;;  %v8613_v26 = vld [vmem:[#allocation2 + $0xb38] sm:$0xff]   ;;  %v8619_v32 = vld [vmem:[#allocation2 + $0xc80] sm:$0xff]  }
 0x196   :  { %v8628_v43 = vld [vmem:[#allocation2 + $0xc58] sm:$0xff]  }
 0x197   :  { %7803 = vmatpush3.bf16.msra.mxu0 %v8581_v33  ;;  %v1527_v33 = vcombine.high %v1511_v28, %v1511_v28 }
 0x198   :  { %7832 = vmatprep.subr.bf16.mxu0 %v8583_v37  ;;  %7825 = vmatpush3.bf16.msra.mxu1 %v8582_v39  ;;  %v8622_v37 = vld [vmem:[#allocation2 + $0xc08] sm:$0xff]   ;;  %v8624_v39 = vld [vmem:[#allocation2 + $0xc50] sm:$0xff]  }
 0x199   :  { %7854 = vmatprep.subr.bf16.mxu1 %v8584_v42  ;;  %v8627_v42 = vld [vmem:[#allocation2 + $0xc90] sm:$0xff]  }
 0x19a   :  { %6038 = vmatmul.mubr.bf16.vlgmr.msra.gmra.mrb[40].mxu0 %v1504_v41  ;;  %v8626_v41 = vld [vmem:[#allocation2 + $0xc10] sm:$0xff]  }
 0x19b   :  { %7833 = vmatpush3.bf16.msra.mxu0 %v8585_v44  ;;  %6078 = vmatmul.mubr.bf16.vlgmr.msra.gmra.mrb[40].mxu1 %v1526_v48  ;;  %v8629_v44 = vld [vmem:[#allocation2 + $0xcd8] sm:$0xff]   ;;  %v8633_v48 = vld [vmem:[#allocation2 + $0xce0] sm:$0xff]  }
 0x19c   :  { %7834 = vmatprep.subr.bf16.mxu0 %v8587_v49  ;;  %7855 = vmatpush3.bf16.msra.mxu1 %v8586_v46  ;;  %v8631_v46 = vld [vmem:[#allocation2 + $0xc98] sm:$0xff]   ;;  %v8634_v49 = vld [vmem:[#allocation2 + $0xc20] sm:$0xff]  }
 0x19d   :  { %6117 = vmatprep.mubr.bf16.mxu0 %v1525_v52  ;;  %7856 = vmatprep.subr.bf16.mxu1 %v8588_v51  ;;  %v8636_v51 = vld [vmem:[#allocation2 + $0xc68] sm:$0xff]  }
 0x19e   :  { %6157 = vmatprep.mubr.bf16.mxu1 %v1529_v55  ;;  %v8637_v52 = vld [vmem:[#allocation2 + $0xce8] sm:$0xff]  }
 0x19f   :  { %7835 = vmatpush3.bf16.msra.mxu0 %v8589_v53 }
 0x1a0   :  { %7836 = vmatprep.subr.bf16.mxu0 %v8591_v56  ;;  %7857 = vmatpush3.bf16.msra.mxu1 %v8590_v54  ;;  %v8638_v54 = vld [vmem:[#allocation2 + $0xc28] sm:$0xff]   ;;  %v8640_v56 = vld [vmem:[#allocation2 + $0xc70] sm:$0xff]  }
 0x1a1   :  { %7858 = vmatprep.subr.bf16.mxu1 %v8592_v57 }
 0x1a3   :  { %7837 = vmatpush3.bf16.msra.mxu0 %v8593_v58 }
 0x1a4   :  { %7838 = vmatprep.subr.bf16.mxu0 %v8595_v60  ;;  %7859 = vmatpush3.bf16.msra.mxu1 %v8594_v59 }
 0x1a5   :  { %7860 = vmatprep.subr.bf16.mxu1 %v8596_v61  ;;  %v8639_v61 = vld [vmem:[#allocation2 + $0xca8] sm:$0xff]  }
 0x1a7   :  { %7839 = vmatpush3.bf16.msra.mxu0 %v8597_v62 }
 0x1a8   :  { %7840 = vmatprep.subr.bf16.mxu0 %v8599_v0  ;;  %7861 = vmatpush3.bf16.msra.mxu1 %v8598_v63  ;;  %v8641_v63 = vld [vmem:[#allocation2 + $0xcf0] sm:$0xff]  }
 0x1a9   :  { %7862 = vmatprep.subr.bf16.mxu1 %v8600_v1 }
 0x1ab   :  { %7841 = vmatpush3.bf16.msra.mxu0 %v8601_v2 }
 0x1ac   :  { %7842 = vmatprep.subr.bf16.mxu0 %v8603_v4  ;;  %7863 = vmatpush3.bf16.msra.mxu1 %v8602_v3  ;;  %v8642_v3 = vld [vmem:[#allocation2 + $0xc30] sm:$0xff]  }
 0x1ad   :  { %v7540_v6 = vpop.f32.mrb[16].mxu0  ;;  %7864 = vmatprep.subr.bf16.mxu1 %v8604_v5  ;;  %v8644_v5 = vld [vmem:[#allocation2 + $0xc78] sm:$0xff]  }
 0x1ae   :  { %v7541_v8 = vpop.f32.mrb[17].mxu0  ;;  %v7562_v10 = vpop.f32.mrb[16].mxu1 }
 0x1af   :  { %v7542_v11 = vadd.f32 %v7541_v8, %v7540_v6  ;;  %v7543_v12 = vpop.f32.mrb[18].mxu0  ;;  %v7563_v15 = vpop.f32.mrb[17].mxu1  ;;  %7843 = vmatpush3.bf16.msra.mxu0 %v8605_v7  ;;  %v8643_v7 = vld [vmem:[#allocation2 + $0xcb0] sm:$0xff]   ;;  %v8645_v8 = vld [vmem:[#allocation2 + $0xcf8] sm:$0xff]  }
 0x1b0   :  { %v7544_v16 = vpop.f32.mrb[19].mxu0  ;;  %v7564_v18 = vadd.f32 %v7563_v15, %v7562_v10  ;;  %v7565_v19 = vpop.f32.mrb[18].mxu1  ;;  %7844 = vmatprep.subr.bf16.mxu0 %v8607_v13  ;;  %7865 = vmatpush3.bf16.msra.mxu1 %v8606_v9  ;;  %v8646_v9 = vld [vmem:[#allocation2 + $0xc38] sm:$0xff]   ;;  %v65_v10 = vld [vmem:[%s9213_s0 + $0x30] sm:$0xff]  ;;  %v8648_v12 = vld [vmem:[#allocation2 + $0xd40] sm:$0xff]  }
 0x1b1   :  { %v5560_v17 = vadd.f32 %v7542_v11, %v9073_v31  ;;  %v7566_v21 = vpop.f32.mrb[19].mxu1  ;;  %7866 = vmatprep.subr.bf16.mxu1 %v8608_v14  ;;  %v8618_v31 = vld [vmem:[#allocation2 + $0xc00] sm:$0xff]   ;;  %v1537_v11 = vrot.slane %v65_v10, %v8992_v35  ;;  %v1530_v13 = vcombine.high %v65_v10, %v65_v10  ;;  %v8647_v14 = vld [vmem:[#allocation2 + $0xcb8] sm:$0xff]   ;;  %v8685_v10 = vld [vmem:[#allocation2 + $0xe48] sm:$0xff]  }
 0x1b2   :  { %v8650_v19 = vld [vmem:[#allocation2 + $0xd00] sm:$0xff]  }
 0x1b3   :  { %v9088_v23 = vadd.f32 %v7564_v18, %v5560_v17  ;;  %7845 = vmatpush3.bf16.msra.mxu0 %v8609_v20  ;;  %v1545_v15 = vcombine.high %v1537_v11, %v1537_v11  ;;  %v1553_v16 = vrot.slane %v1537_v11, %v8992_v35  ;;  %v8649_v17 = vld [vmem:[#allocation2 + $0xdc0] sm:$0xff]   ;;  %v9101_v18 = vrot.slane %v1530_v13, %v8992_v35  ;;  %v8686_v11 = vld [vmem:[#allocation2 + $0xec8] sm:$0xff]  }
 0x1b4   :  { %7846 = vmatprep.subr.bf16.mxu0 %v8611_v24  ;;  %7867 = vmatpush3.bf16.msra.mxu1 %v8610_v22  ;;  %v8651_v21 = vld [vmem:[#allocation2 + $0xd80] sm:$0xff]   ;;  %v8652_v24 = vld [vmem:[#allocation2 + $0xd48] sm:$0xff]  }
 0x1b5   :  { %7868 = vmatprep.subr.bf16.mxu1 %v8612_v25  ;;  %v1567_v20 = vrot.slane %v1545_v15, %v8992_v35  ;;  %v1546_v22 = vcombine.high %v9101_v18, %v9101_v18  ;;  %v8688_v13 = vld [vmem:[#allocation2 + $0xe88] sm:$0xff]   ;;  %v8690_v15 = vld [vmem:[#allocation2 + $0xed0] sm:$0xff]  }
 0x1b7   :  { %7847 = vmatpush3.bf16.msra.mxu0 %v8613_v26  ;;  %v1577_v25 = vcombine.high %v1567_v20, %v1567_v20  ;;  %v8653_v26 = vld [vmem:[#allocation2 + $0xdc8] sm:$0xff]  }
 0x1b8   :  { %7876 = vmatprep.subr.bf16.mxu0 %v8616_v29  ;;  %7869 = vmatpush3.bf16.msra.mxu1 %v8614_v27  ;;  %v1574_v27 = vrot.slane %v1546_v22, %v8992_v35  ;;  %v8655_v29 = vld [vmem:[#allocation2 + $0xd88] sm:$0xff]   ;;  %v8697_v22 = vld [vmem:[#allocation2 + $0xe60] sm:$0xff]  }
 0x1b9   :  { %7898 = vmatprep.subr.bf16.mxu1 %v8617_v30 }
 0x1ba   :  { %6118 = vmatmul.mubr.bf16.vlgmr.msra.gmra.mrb[44].mxu0 %v1511_v28  ;;  %v8654_v28 = vld [vmem:[#allocation2 + $0xd08] sm:$0xff]   ;;  %v1578_v30 = vcombine.high %v1574_v27, %v1574_v27 }
 0x1bb   :  { %7877 = vmatpush3.bf16.msra.mxu0 %v8618_v31  ;;  %6158 = vmatmul.mubr.bf16.vlgmr.msra.gmra.mrb[44].mxu1 %v1527_v33  ;;  %v8656_v31 = vld [vmem:[#allocation2 + $0xd50] sm:$0xff]  }
 0x1bc   :  { %7878 = vmatprep.subr.bf16.mxu0 %v8620_v34  ;;  %7899 = vmatpush3.bf16.msra.mxu1 %v8619_v32  ;;  %v8657_v32 = vld [vmem:[#allocation2 + $0xdd0] sm:$0xff]  }
 0x1bd   :  { %7900 = vmatprep.subr.bf16.mxu1 %v8621_v36  ;;  %6197 = vmatprep.mubr.bf16.mxu0 %v1567_v20  ;;  %v8658_v33 = vld [vmem:[#allocation2 + $0xd10] sm:$0xff]   ;;  %v8660_v36 = vld [vmem:[#allocation2 + $0xd58] sm:$0xff]  }
 0x1be   :  { %6237 = vmatprep.mubr.bf16.mxu1 %v1577_v25  ;;  %v8659_v34 = vld [vmem:[#allocation2 + $0xd90] sm:$0xff]   ;;  %v8695_v20 = vld [vmem:[#allocation2 + $0xe18] sm:$0xff]   ;;  %v8700_v25 = vld [vmem:[#allocation2 + $0xea0] sm:$0xff]  }
 0x1bf   :  { %7879 = vmatpush3.bf16.msra.mxu0 %v8622_v37  ;;  %v8661_v37 = vld [vmem:[#allocation2 + $0xdd8] sm:$0xff]  }
 0x1c0   :  { %7880 = vmatprep.subr.bf16.mxu0 %v8624_v39  ;;  %7901 = vmatpush3.bf16.msra.mxu1 %v8623_v38  ;;  %v8662_v38 = vld [vmem:[#allocation2 + $0xd18] sm:$0xff]  }
 0x1c1   :  { %7902 = vmatprep.subr.bf16.mxu1 %v8625_v40  ;;  %v8663_v39 = vld [vmem:[#allocation2 + $0xd98] sm:$0xff]   ;;  %v8664_v40 = vld [vmem:[#allocation2 + $0xd60] sm:$0xff]  }
 0x1c3   :  { %7881 = vmatpush3.bf16.msra.mxu0 %v8626_v41  ;;  %v8665_v41 = vld [vmem:[#allocation2 + $0xde0] sm:$0xff]  }
 0x1c4   :  { %7882 = vmatprep.subr.bf16.mxu0 %v8628_v43  ;;  %7903 = vmatpush3.bf16.msra.mxu1 %v8627_v42  ;;  %v8666_v42 = vld [vmem:[#allocation2 + $0xd20] sm:$0xff]  }
 0x1c5   :  { %7904 = vmatprep.subr.bf16.mxu1 %v8629_v44  ;;  %v8667_v43 = vld [vmem:[#allocation2 + $0xda0] sm:$0xff]   ;;  %v8668_v44 = vld [vmem:[#allocation2 + $0xd68] sm:$0xff]  }
 0x1c7   :  { %7883 = vmatpush3.bf16.msra.mxu0 %v8630_v45  ;;  %v8669_v45 = vld [vmem:[#allocation2 + $0xde8] sm:$0xff]  }
 0x1c8   :  { %7884 = vmatprep.subr.bf16.mxu0 %v8632_v47  ;;  %7905 = vmatpush3.bf16.msra.mxu1 %v8631_v46  ;;  %v8670_v47 = vld [vmem:[#allocation2 + $0xd28] sm:$0xff]  }
 0x1c9   :  { %7906 = vmatprep.subr.bf16.mxu1 %v8633_v48 }
 0x1cb   :  { %7885 = vmatpush3.bf16.msra.mxu0 %v8634_v49  ;;  %v8671_v49 = vld [vmem:[#allocation2 + $0xda8] sm:$0xff]  }
 0x1cc   :  { %7886 = vmatprep.subr.bf16.mxu0 %v8636_v51  ;;  %7907 = vmatpush3.bf16.msra.mxu1 %v8635_v50 }
 0x1cd   :  { %v7584_v53 = vpop.f32.mrb[20].mxu0  ;;  %7908 = vmatprep.subr.bf16.mxu1 %v8637_v52 }
 0x1ce   :  { %v7585_v55 = vpop.f32.mrb[21].mxu0  ;;  %v7606_v57 = vpop.f32.mrb[20].mxu1 }
 0x1cf   :  { %v7586_v58 = vadd.f32 %v7585_v55, %v7584_v53  ;;  %v7587_v59 = vpop.f32.mrb[22].mxu0  ;;  %v7607_v60 = vpop.f32.mrb[21].mxu1  ;;  %7887 = vmatpush3.bf16.msra.mxu0 %v8638_v54  ;;  %v8672_v53 = vld [vmem:[#allocation2 + $0xd70] sm:$0xff]  }
 0x1d0   :  { %v7588_v62 = vpop.f32.mrb[23].mxu0  ;;  %v7608_v1 = vadd.f32 %v7607_v60, %v7606_v57  ;;  %v7609_v2 = vpop.f32.mrb[22].mxu1  ;;  %7888 = vmatprep.subr.bf16.mxu0 %v8640_v56  ;;  %7909 = vmatpush3.bf16.msra.mxu1 %v8639_v61  ;;  %v8673_v54 = vld [vmem:[#allocation2 + $0xdf0] sm:$0xff]  }
 0x1d1   :  { %v5640_v0 = vadd.f32 %v7586_v58, %v9088_v23  ;;  %v7610_v4 = vpop.f32.mrb[23].mxu1  ;;  %7910 = vmatprep.subr.bf16.mxu1 %v8641_v63  ;;  %v1575_v23 = vcombine.high %v1553_v16, %v1553_v16  ;;  %v8674_v60 = vld [vmem:[#allocation2 + $0xd30] sm:$0xff]   ;;  %v8678_v2 = vld [vmem:[#allocation2 + $0xd38] sm:$0xff]  }
 0x1d2   :  { %v8675_v62 = vld [vmem:[#allocation2 + $0xdb0] sm:$0xff]   ;;  %v1560_v4 = vrot.slane %v9101_v18, %v8992_v35  ;;  %v8693_v18 = vld [vmem:[#allocation2 + $0xe58] sm:$0xff]  }
 0x1d3   :  { %v9093_v6 = vadd.f32 %v7608_v1, %v5640_v0  ;;  %7889 = vmatpush3.bf16.msra.mxu0 %v8642_v3  ;;  %v8676_v0 = vld [vmem:[#allocation2 + $0xd78] sm:$0xff]  }
 0x1d4   :  { %7890 = vmatprep.subr.bf16.mxu0 %v8644_v5  ;;  %7911 = vmatpush3.bf16.msra.mxu1 %v8643_v7  ;;  %v8677_v1 = vld [vmem:[#allocation2 + $0xdf8] sm:$0xff]   ;;  %v8681_v5 = vld [vmem:[#allocation2 + $0xe40] sm:$0xff]  }
 0x1d5   :  { %7912 = vmatprep.subr.bf16.mxu1 %v8645_v8  ;;  %v8679_v3 = vld [vmem:[#allocation2 + $0xdb8] sm:$0xff]   ;;  %v8683_v7 = vld [vmem:[#allocation2 + $0xe00] sm:$0xff]  }
 0x1d6   :  { %v8684_v8 = vld [vmem:[#allocation2 + $0xe80] sm:$0xff]  }
 0x1d7   :  { %7891 = vmatpush3.bf16.msra.mxu0 %v8646_v9  ;;  %v1576_v9 = vcombine.high %v1560_v4, %v1560_v4 }
 0x1d8   :  { %7920 = vmatprep.subr.bf16.mxu0 %v8648_v12  ;;  %7913 = vmatpush3.bf16.msra.mxu1 %v8647_v14  ;;  %v8687_v12 = vld [vmem:[#allocation2 + $0xe08] sm:$0xff]   ;;  %v8689_v14 = vld [vmem:[#allocation2 + $0xe50] sm:$0xff]  }
 0x1d9   :  { %7942 = vmatprep.subr.bf16.mxu1 %v8649_v17  ;;  %v8692_v17 = vld [vmem:[#allocation2 + $0xe90] sm:$0xff]  }
 0x1da   :  { %6198 = vmatmul.mubr.bf16.vlgmr.msra.gmra.mrb[48].mxu0 %v1553_v16  ;;  %v8691_v16 = vld [vmem:[#allocation2 + $0xe10] sm:$0xff]  }
 0x1db   :  { %7921 = vmatpush3.bf16.msra.mxu0 %v8650_v19  ;;  %6238 = vmatmul.mubr.bf16.vlgmr.msra.gmra.mrb[48].mxu1 %v1575_v23  ;;  %v8694_v19 = vld [vmem:[#allocation2 + $0xed8] sm:$0xff]   ;;  %v8698_v23 = vld [vmem:[#allocation2 + $0xee0] sm:$0xff]  }
 0x1dc   :  { %7922 = vmatprep.subr.bf16.mxu0 %v8652_v24  ;;  %7943 = vmatpush3.bf16.msra.mxu1 %v8651_v21  ;;  %v8696_v21 = vld [vmem:[#allocation2 + $0xe98] sm:$0xff]   ;;  %v8699_v24 = vld [vmem:[#allocation2 + $0xe20] sm:$0xff]  }
 0x1dd   :  { %6277 = vmatprep.mubr.bf16.mxu0 %v1574_v27  ;;  %7944 = vmatprep.subr.bf16.mxu1 %v8653_v26  ;;  %v8701_v26 = vld [vmem:[#allocation2 + $0xe68] sm:$0xff]  }
 0x1de   :  { %6317 = vmatprep.mubr.bf16.mxu1 %v1578_v30  ;;  %v8702_v27 = vld [vmem:[#allocation2 + $0xee8] sm:$0xff]  }
 0x1df   :  { %7923 = vmatpush3.bf16.msra.mxu0 %v8654_v28 }
 0x1e0   :  { %7924 = vmatprep.subr.bf16.mxu0 %v8656_v31  ;;  %7945 = vmatpush3.bf16.msra.mxu1 %v8655_v29  ;;  %v8703_v29 = vld [vmem:[#allocation2 + $0xe28] sm:$0xff]   ;;  %v8705_v31 = vld [vmem:[#allocation2 + $0xe70] sm:$0xff]  }
 0x1e1   :  { %7946 = vmatprep.subr.bf16.mxu1 %v8657_v32 }
 0x1e3   :  { %7925 = vmatpush3.bf16.msra.mxu0 %v8658_v33 }
 0x1e4   :  { %7926 = vmatprep.subr.bf16.mxu0 %v8660_v36  ;;  %7947 = vmatpush3.bf16.msra.mxu1 %v8659_v34 }
 0x1e5   :  { %7948 = vmatprep.subr.bf16.mxu1 %v8661_v37  ;;  %v8704_v37 = vld [vmem:[#allocation2 + $0xea8] sm:$0xff]  }
 0x1e7   :  { %7927 = vmatpush3.bf16.msra.mxu0 %v8662_v38 }
 0x1e8   :  { %7928 = vmatprep.subr.bf16.mxu0 %v8664_v40  ;;  %7949 = vmatpush3.bf16.msra.mxu1 %v8663_v39  ;;  %v8706_v39 = vld [vmem:[#allocation2 + $0xef0] sm:$0xff]  }
 0x1e9   :  { %7950 = vmatprep.subr.bf16.mxu1 %v8665_v41 }
 0x1eb   :  { %7929 = vmatpush3.bf16.msra.mxu0 %v8666_v42 }
 0x1ec   :  { %7930 = vmatprep.subr.bf16.mxu0 %v8668_v44  ;;  %7951 = vmatpush3.bf16.msra.mxu1 %v8667_v43  ;;  %v8707_v43 = vld [vmem:[#allocation2 + $0xe30] sm:$0xff]  }
 0x1ed   :  { %v7628_v46 = vpop.f32.mrb[24].mxu0  ;;  %7952 = vmatprep.subr.bf16.mxu1 %v8669_v45  ;;  %v8709_v45 = vld [vmem:[#allocation2 + $0xe78] sm:$0xff]  }
 0x1ee   :  { %v7629_v48 = vpop.f32.mrb[25].mxu0  ;;  %v7650_v50 = vpop.f32.mrb[24].mxu1 }
 0x1ef   :  { %v7630_v51 = vadd.f32 %v7629_v48, %v7628_v46  ;;  %v7631_v52 = vpop.f32.mrb[26].mxu0  ;;  %v7651_v55 = vpop.f32.mrb[25].mxu1  ;;  %7931 = vmatpush3.bf16.msra.mxu0 %v8670_v47  ;;  %v8708_v47 = vld [vmem:[#allocation2 + $0xeb0] sm:$0xff]   ;;  %v8710_v48 = vld [vmem:[#allocation2 + $0xef8] sm:$0xff]  }
 0x1f0   :  { %v7632_v56 = vpop.f32.mrb[27].mxu0  ;;  %v7652_v58 = vadd.f32 %v7651_v55, %v7650_v50  ;;  %v7653_v59 = vpop.f32.mrb[26].mxu1  ;;  %7932 = vmatprep.subr.bf16.mxu0 %v8672_v53  ;;  %7953 = vmatpush3.bf16.msra.mxu1 %v8671_v49  ;;  %v8711_v49 = vld [vmem:[#allocation2 + $0xe38] sm:$0xff]   ;;  %v8713_v52 = vld [vmem:[#allocation2 + $0xf40] sm:$0xff]  }
 0x1f1   :  { %v5720_v57 = vadd.f32 %v7630_v51, %v9093_v6  ;;  %v7654_v61 = vpop.f32.mrb[27].mxu1  ;;  %7954 = vmatprep.subr.bf16.mxu1 %v8673_v54  ;;  %v8682_v6 = vld [vmem:[#allocation2 + $0xec0] sm:$0xff]   ;;  %v66_v50 = vld [vmem:[%s9213_s0 + $0x38] sm:$0xff] }
 0x1f2   :  { %v1586_v51 = vrot.slane %v66_v50, %v8992_v35  ;;  %v1579_v53 = vcombine.high %v66_v50, %v66_v50  ;;  %v8712_v54 = vld [vmem:[#allocation2 + $0xeb8] sm:$0xff]   ;;  %v8715_v59 = vld [vmem:[#allocation2 + $0xf00] sm:$0xff]   ;;  %v8750_v50 = vld [vmem:[#allocation2 + $0x1048] sm:$0xff]  }
 0x1f3   :  { %v9108_v63 = vadd.f32 %v7652_v58, %v5720_v57  ;;  %7933 = vmatpush3.bf16.msra.mxu0 %v8674_v60  ;;  %v8714_v57 = vld [vmem:[#allocation2 + $0xfc0] sm:$0xff]  }
 0x1f4   :  { %7934 = vmatprep.subr.bf16.mxu0 %v8676_v0  ;;  %7955 = vmatpush3.bf16.msra.mxu1 %v8675_v62  ;;  %v1594_v55 = vcombine.high %v1586_v51, %v1586_v51  ;;  %v1602_v56 = vrot.slane %v1586_v51, %v8992_v35  ;;  %v9121_v58 = vrot.slane %v1579_v53, %v8992_v35  ;;  %v8716_v61 = vld [vmem:[#allocation2 + $0xf80] sm:$0xff]   ;;  %v8717_v0 = vld [vmem:[#allocation2 + $0xf48] sm:$0xff]  }
 0x1f5   :  { %7956 = vmatprep.subr.bf16.mxu1 %v8677_v1  ;;  %v8751_v51 = vld [vmem:[#allocation2 + $0x10c8] sm:$0xff]  }
 0x1f6   :  { %v1616_v60 = vrot.slane %v1594_v55, %v8992_v35  ;;  %v1595_v62 = vcombine.high %v9121_v58, %v9121_v58  ;;  %v8753_v53 = vld [vmem:[#allocation2 + $0x1088] sm:$0xff]   ;;  %v8755_v55 = vld [vmem:[#allocation2 + $0x10d0] sm:$0xff]  }
 0x1f7   :  { %7935 = vmatpush3.bf16.msra.mxu0 %v8678_v2  ;;  %v8718_v2 = vld [vmem:[#allocation2 + $0xfc8] sm:$0xff]  }
 0x1f8   :  { %7964 = vmatprep.subr.bf16.mxu0 %v8681_v5  ;;  %7957 = vmatpush3.bf16.msra.mxu1 %v8679_v3  ;;  %v1626_v1 = vcombine.high %v1616_v60, %v1616_v60  ;;  %v1623_v3 = vrot.slane %v1595_v62, %v8992_v35  ;;  %v8720_v5 = vld [vmem:[#allocation2 + $0xf88] sm:$0xff]   ;;  %v8762_v62 = vld [vmem:[#allocation2 + $0x1060] sm:$0xff]  }
 0x1f9   :  { %7986 = vmatprep.subr.bf16.mxu1 %v8682_v6 }
 0x1fa   :  { %6278 = vmatmul.mubr.bf16.vlgmr.msra.gmra.mrb[52].mxu0 %v1560_v4  ;;  %v8719_v4 = vld [vmem:[#allocation2 + $0xf08] sm:$0xff]   ;;  %v1627_v6 = vcombine.high %v1623_v3, %v1623_v3 }
 0x1fb   :  { %7965 = vmatpush3.bf16.msra.mxu0 %v8683_v7  ;;  %6318 = vmatmul.mubr.bf16.vlgmr.msra.gmra.mrb[52].mxu1 %v1576_v9  ;;  %v8721_v7 = vld [vmem:[#allocation2 + $0xf50] sm:$0xff]  }
 0x1fc   :  { %7966 = vmatprep.subr.bf16.mxu0 %v8685_v10  ;;  %7987 = vmatpush3.bf16.msra.mxu1 %v8684_v8  ;;  %v8722_v8 = vld [vmem:[#allocation2 + $0xfd0] sm:$0xff]  }
 0x1fd   :  { %7988 = vmatprep.subr.bf16.mxu1 %v8686_v11  ;;  %6357 = vmatprep.mubr.bf16.mxu0 %v1616_v60  ;;  %v8723_v9 = vld [vmem:[#allocation2 + $0xf10] sm:$0xff]   ;;  %v8725_v11 = vld [vmem:[#allocation2 + $0xf58] sm:$0xff]  }
 0x1fe   :  { %6397 = vmatprep.mubr.bf16.mxu1 %v1626_v1  ;;  %v8724_v10 = vld [vmem:[#allocation2 + $0xf90] sm:$0xff]   ;;  %v8760_v60 = vld [vmem:[#allocation2 + $0x1018] sm:$0xff]   ;;  %v8765_v1 = vld [vmem:[#allocation2 + $0x10a0] sm:$0xff]  }
 0x1ff   :  { %7967 = vmatpush3.bf16.msra.mxu0 %v8687_v12  ;;  %v8726_v12 = vld [vmem:[#allocation2 + $0xfd8] sm:$0xff]  }
 0x200   :  { %7968 = vmatprep.subr.bf16.mxu0 %v8689_v14  ;;  %7989 = vmatpush3.bf16.msra.mxu1 %v8688_v13  ;;  %v8727_v13 = vld [vmem:[#allocation2 + $0xf18] sm:$0xff]  }
 0x201   :  { %7990 = vmatprep.subr.bf16.mxu1 %v8690_v15  ;;  %v8728_v14 = vld [vmem:[#allocation2 + $0xf98] sm:$0xff]   ;;  %v8729_v15 = vld [vmem:[#allocation2 + $0xf60] sm:$0xff]  }
 0x203   :  { %7969 = vmatpush3.bf16.msra.mxu0 %v8691_v16  ;;  %v8730_v16 = vld [vmem:[#allocation2 + $0xfe0] sm:$0xff]  }
 0x204   :  { %7970 = vmatprep.subr.bf16.mxu0 %v8693_v18  ;;  %7991 = vmatpush3.bf16.msra.mxu1 %v8692_v17  ;;  %v8731_v17 = vld [vmem:[#allocation2 + $0xf20] sm:$0xff]  }
 0x205   :  { %7992 = vmatprep.subr.bf16.mxu1 %v8694_v19  ;;  %v8732_v18 = vld [vmem:[#allocation2 + $0xfa0] sm:$0xff]   ;;  %v8733_v19 = vld [vmem:[#allocation2 + $0xf68] sm:$0xff]  }
 0x207   :  { %7971 = vmatpush3.bf16.msra.mxu0 %v8695_v20  ;;  %v8734_v20 = vld [vmem:[#allocation2 + $0xfe8] sm:$0xff]  }
 0x208   :  { %7972 = vmatprep.subr.bf16.mxu0 %v8697_v22  ;;  %7993 = vmatpush3.bf16.msra.mxu1 %v8696_v21  ;;  %v8735_v22 = vld [vmem:[#allocation2 + $0xf28] sm:$0xff]  }
 0x209   :  { %7994 = vmatprep.subr.bf16.mxu1 %v8698_v23 }
 0x20b   :  { %7973 = vmatpush3.bf16.msra.mxu0 %v8699_v24  ;;  %v8736_v24 = vld [vmem:[#allocation2 + $0xfa8] sm:$0xff]  }
 0x20c   :  { %7974 = vmatprep.subr.bf16.mxu0 %v8701_v26  ;;  %7995 = vmatpush3.bf16.msra.mxu1 %v8700_v25 }
 0x20d   :  { %v7672_v28 = vpop.f32.mrb[28].mxu0  ;;  %7996 = vmatprep.subr.bf16.mxu1 %v8702_v27 }
 0x20e   :  { %v7673_v30 = vpop.f32.mrb[29].mxu0  ;;  %v7694_v32 = vpop.f32.mrb[28].mxu1 }
 0x20f   :  { %v7674_v33 = vadd.f32 %v7673_v30, %v7672_v28  ;;  %v7675_v34 = vpop.f32.mrb[30].mxu0  ;;  %v7695_v36 = vpop.f32.mrb[29].mxu1  ;;  %7975 = vmatpush3.bf16.msra.mxu0 %v8703_v29  ;;  %v8737_v28 = vld [vmem:[#allocation2 + $0xf70] sm:$0xff]  }
 0x210   :  { %v7676_v38 = vpop.f32.mrb[31].mxu0  ;;  %v7696_v41 = vadd.f32 %v7695_v36, %v7694_v32  ;;  %v7697_v42 = vpop.f32.mrb[30].mxu1  ;;  %7976 = vmatprep.subr.bf16.mxu0 %v8705_v31  ;;  %7997 = vmatpush3.bf16.msra.mxu1 %v8704_v37  ;;  %v8738_v29 = vld [vmem:[#allocation2 + $0xff0] sm:$0xff]  }
 0x211   :  { %v5800_v40 = vadd.f32 %v7674_v33, %v9108_v63  ;;  %v7698_v44 = vpop.f32.mrb[31].mxu1  ;;  %7998 = vmatprep.subr.bf16.mxu1 %v8706_v39  ;;  %v1624_v63 = vcombine.high %v1602_v56, %v1602_v56  ;;  %v8739_v36 = vld [vmem:[#allocation2 + $0xf30] sm:$0xff]   ;;  %v8743_v42 = vld [vmem:[#allocation2 + $0xf38] sm:$0xff]  }
 0x212   :  { %v8740_v38 = vld [vmem:[#allocation2 + $0xfb0] sm:$0xff]   ;;  %v1609_v44 = vrot.slane %v9121_v58, %v8992_v35  ;;  %v8758_v58 = vld [vmem:[#allocation2 + $0x1058] sm:$0xff]  }
 0x213   :  { %v9113_v46 = vadd.f32 %v7696_v41, %v5800_v40  ;;  %7977 = vmatpush3.bf16.msra.mxu0 %v8707_v43  ;;  %v8741_v40 = vld [vmem:[#allocation2 + $0xf78] sm:$0xff]  }
 0x214   :  { %7978 = vmatprep.subr.bf16.mxu0 %v8709_v45  ;;  %7999 = vmatpush3.bf16.msra.mxu1 %v8708_v47  ;;  %v8742_v41 = vld [vmem:[#allocation2 + $0xff8] sm:$0xff]   ;;  %v8746_v45 = vld [vmem:[#allocation2 + $0x1040] sm:$0xff]  }
 0x215   :  { %8000 = vmatprep.subr.bf16.mxu1 %v8710_v48  ;;  %v8744_v43 = vld [vmem:[#allocation2 + $0xfb8] sm:$0xff]   ;;  %v8748_v47 = vld [vmem:[#allocation2 + $0x1000] sm:$0xff]  }
 0x216   :  { %v8749_v48 = vld [vmem:[#allocation2 + $0x1080] sm:$0xff]  }
 0x217   :  { %7979 = vmatpush3.bf16.msra.mxu0 %v8711_v49  ;;  %v1625_v49 = vcombine.high %v1609_v44, %v1609_v44 }
 0x218   :  { %8008 = vmatprep.subr.bf16.mxu0 %v8713_v52  ;;  %8001 = vmatpush3.bf16.msra.mxu1 %v8712_v54  ;;  %v8752_v52 = vld [vmem:[#allocation2 + $0x1008] sm:$0xff]   ;;  %v8754_v54 = vld [vmem:[#allocation2 + $0x1050] sm:$0xff]  }
 0x219   :  { %8030 = vmatprep.subr.bf16.mxu1 %v8714_v57  ;;  %v8757_v57 = vld [vmem:[#allocation2 + $0x1090] sm:$0xff]  }
 0x21a   :  { %6358 = vmatmul.mubr.bf16.vlgmr.msra.gmra.mrb[56].mxu0 %v1602_v56  ;;  %v8756_v56 = vld [vmem:[#allocation2 + $0x1010] sm:$0xff]  }
 0x21b   :  { %8009 = vmatpush3.bf16.msra.mxu0 %v8715_v59  ;;  %6398 = vmatmul.mubr.bf16.vlgmr.msra.gmra.mrb[56].mxu1 %v1624_v63  ;;  %v8759_v59 = vld [vmem:[#allocation2 + $0x10d8] sm:$0xff]   ;;  %v8763_v63 = vld [vmem:[#allocation2 + $0x10e0] sm:$0xff]  }
 0x21c   :  { %8010 = vmatprep.subr.bf16.mxu0 %v8717_v0  ;;  %8031 = vmatpush3.bf16.msra.mxu1 %v8716_v61  ;;  %v8761_v61 = vld [vmem:[#allocation2 + $0x1098] sm:$0xff]   ;;  %v8764_v0 = vld [vmem:[#allocation2 + $0x1020] sm:$0xff]  }
 0x21d   :  { %6437 = vmatprep.mubr.bf16.mxu0 %v1623_v3  ;;  %8032 = vmatprep.subr.bf16.mxu1 %v8718_v2  ;;  %v8766_v2 = vld [vmem:[#allocation2 + $0x1068] sm:$0xff]  }
 0x21e   :  { %6477 = vmatprep.mubr.bf16.mxu1 %v1627_v6  ;;  %v8767_v3 = vld [vmem:[#allocation2 + $0x10e8] sm:$0xff]  }
 0x21f   :  { %8011 = vmatpush3.bf16.msra.mxu0 %v8719_v4 }
 0x220   :  { %8012 = vmatprep.subr.bf16.mxu0 %v8721_v7  ;;  %8033 = vmatpush3.bf16.msra.mxu1 %v8720_v5  ;;  %v8768_v5 = vld [vmem:[#allocation2 + $0x1028] sm:$0xff]   ;;  %v8770_v7 = vld [vmem:[#allocation2 + $0x1070] sm:$0xff]  }
 0x221   :  { %8034 = vmatprep.subr.bf16.mxu1 %v8722_v8 }
 0x223   :  { %8013 = vmatpush3.bf16.msra.mxu0 %v8723_v9 }
 0x224   :  { %8014 = vmatprep.subr.bf16.mxu0 %v8725_v11  ;;  %8035 = vmatpush3.bf16.msra.mxu1 %v8724_v10 }
 0x225   :  { %8036 = vmatprep.subr.bf16.mxu1 %v8726_v12  ;;  %v8769_v12 = vld [vmem:[#allocation2 + $0x10a8] sm:$0xff]  }
 0x227   :  { %8015 = vmatpush3.bf16.msra.mxu0 %v8727_v13 }
 0x228   :  { %8016 = vmatprep.subr.bf16.mxu0 %v8729_v15  ;;  %8037 = vmatpush3.bf16.msra.mxu1 %v8728_v14  ;;  %v8771_v14 = vld [vmem:[#allocation2 + $0x10f0] sm:$0xff]  }
 0x229   :  { %8038 = vmatprep.subr.bf16.mxu1 %v8730_v16 }
 0x22b   :  { %8017 = vmatpush3.bf16.msra.mxu0 %v8731_v17 }
 0x22c   :  { %8018 = vmatprep.subr.bf16.mxu0 %v8733_v19  ;;  %8039 = vmatpush3.bf16.msra.mxu1 %v8732_v18  ;;  %v8772_v18 = vld [vmem:[#allocation2 + $0x1030] sm:$0xff]  }
 0x22d   :  { %v7716_v21 = vpop.f32.mrb[32].mxu0  ;;  %8040 = vmatprep.subr.bf16.mxu1 %v8734_v20  ;;  %v8774_v20 = vld [vmem:[#allocation2 + $0x1078] sm:$0xff]  }
 0x22e   :  { %v7717_v23 = vpop.f32.mrb[33].mxu0  ;;  %v7738_v25 = vpop.f32.mrb[32].mxu1 }
 0x22f   :  { %v7718_v26 = vadd.f32 %v7717_v23, %v7716_v21  ;;  %v7719_v27 = vpop.f32.mrb[34].mxu0  ;;  %v7739_v30 = vpop.f32.mrb[33].mxu1  ;;  %8019 = vmatpush3.bf16.msra.mxu0 %v8735_v22  ;;  %v8773_v22 = vld [vmem:[#allocation2 + $0x10b0] sm:$0xff]   ;;  %v8775_v23 = vld [vmem:[#allocation2 + $0x10f8] sm:$0xff]  }
 0x230   :  { %v7720_v31 = vpop.f32.mrb[35].mxu0  ;;  %v7740_v33 = vadd.f32 %v7739_v30, %v7738_v25  ;;  %v7741_v34 = vpop.f32.mrb[34].mxu1  ;;  %8020 = vmatprep.subr.bf16.mxu0 %v8737_v28  ;;  %8041 = vmatpush3.bf16.msra.mxu1 %v8736_v24  ;;  %v8776_v24 = vld [vmem:[#allocation2 + $0x1038] sm:$0xff]   ;;  %v67_v25 = vld [vmem:[%s9213_s0 + $0x40] sm:$0xff] }
 0x231   :  { %v5880_v32 = vadd.f32 %v7718_v26, %v9113_v46  ;;  %v7742_v37 = vpop.f32.mrb[35].mxu1  ;;  %8042 = vmatprep.subr.bf16.mxu1 %v8738_v29  ;;  %v8747_v46 = vld [vmem:[#allocation2 + $0x10c0] sm:$0xff]   ;;  %v1635_v26 = vrot.slane %v67_v25, %v8992_v35  ;;  %v1628_v28 = vcombine.high %v67_v25, %v67_v25  ;;  %v8777_v29 = vld [vmem:[#allocation2 + $0x10b8] sm:$0xff]  }
 0x232   :  { %v8778_v27 = vld [vmem:[#allocation2 + $0x1140] sm:$0xff]  }
 0x233   :  { %v9128_v39 = vadd.f32 %v7740_v33, %v5880_v32  ;;  %8021 = vmatpush3.bf16.msra.mxu0 %v8739_v36  ;;  %v1643_v30 = vcombine.high %v1635_v26, %v1635_v26  ;;  %v1651_v31 = vrot.slane %v1635_v26, %v8992_v35  ;;  %v8779_v32 = vld [vmem:[#allocation2 + $0x11c0] sm:$0xff]   ;;  %v9141_v33 = vrot.slane %v1628_v28, %v8992_v35 }
 0x234   :  { %8022 = vmatprep.subr.bf16.mxu0 %v8741_v40  ;;  %8043 = vmatpush3.bf16.msra.mxu1 %v8740_v38  ;;  %v8780_v36 = vld [vmem:[#allocation2 + $0x1100] sm:$0xff]  }
 0x235   :  { %8044 = vmatprep.subr.bf16.mxu1 %v8742_v41  ;;  %v1665_v34 = vrot.slane %v1643_v30, %v8992_v35  ;;  %v1644_v37 = vcombine.high %v9141_v33, %v9141_v33  ;;  %v1673_v38 = vcombine.high %v1651_v31, %v1651_v31  ;;  %v8781_v41 = vld [vmem:[#allocation2 + $0x1180] sm:$0xff]  }
 0x237   :  { %8023 = vmatpush3.bf16.msra.mxu0 %v8743_v42  ;;  %v1675_v40 = vcombine.high %v1665_v34, %v1665_v34  ;;  %v1672_v42 = vrot.slane %v1644_v37, %v8992_v35 }
 0x238   :  { %8052 = vmatprep.subr.bf16.mxu0 %v8746_v45  ;;  %8045 = vmatpush3.bf16.msra.mxu1 %v8744_v43  ;;  %v8783_v43 = vld [vmem:[#allocation2 + $0x11c8] sm:$0xff]  }
 0x239   :  { %8074 = vmatprep.subr.bf16.mxu1 %v8747_v46  ;;  %v1676_v45 = vcombine.high %v1672_v42, %v1672_v42  ;;  %v8786_v46 = vld [vmem:[#allocation2 + $0x1150] sm:$0xff]  }
 0x23a   :  { %6438 = vmatmul.mubr.bf16.vlgmr.msra.gmra.mrb[60].mxu0 %v1609_v44  ;;  %v8784_v44 = vld [vmem:[#allocation2 + $0x1108] sm:$0xff]  }
 0x23b   :  { %8053 = vmatpush3.bf16.msra.mxu0 %v8748_v47  ;;  %6478 = vmatmul.mubr.bf16.vlgmr.msra.gmra.mrb[60].mxu1 %v1625_v49  ;;  %v8785_v47 = vld [vmem:[#allocation2 + $0x1188] sm:$0xff]   ;;  %v8788_v49 = vld [vmem:[#allocation2 + $0x1110] sm:$0xff]  }
 0x23c   :  { %8054 = vmatprep.subr.bf16.mxu0 %v8750_v50  ;;  %8075 = vmatpush3.bf16.msra.mxu1 %v8749_v48  ;;  %v8787_v48 = vld [vmem:[#allocation2 + $0x11d0] sm:$0xff]   ;;  %v8790_v50 = vld [vmem:[#allocation2 + $0x1158] sm:$0xff]  }
 0x23d   :  { %8076 = vmatprep.subr.bf16.mxu1 %v8751_v51  ;;  %6517 = vmatprep.mubr.bf16.mxu0 %v1665_v34  ;;  %v8789_v51 = vld [vmem:[#allocation2 + $0x1190] sm:$0xff]  }
 0x23e   :  { %6557 = vmatprep.mubr.bf16.mxu1 %v1675_v40 }
 0x23f   :  { %8055 = vmatpush3.bf16.msra.mxu0 %v8752_v52  ;;  %v8791_v52 = vld [vmem:[#allocation2 + $0x11d8] sm:$0xff]  }
 0x240   :  { %8056 = vmatprep.subr.bf16.mxu0 %v8754_v54  ;;  %8077 = vmatpush3.bf16.msra.mxu1 %v8753_v53  ;;  %v8792_v53 = vld [vmem:[#allocation2 + $0x1118] sm:$0xff]   ;;  %v8794_v54 = vld [vmem:[#allocation2 + $0x1160] sm:$0xff]  }
 0x241   :  { %8078 = vmatprep.subr.bf16.mxu1 %v8755_v55  ;;  %v8793_v55 = vld [vmem:[#allocation2 + $0x1198] sm:$0xff]  }
 0x243   :  { %8057 = vmatpush3.bf16.msra.mxu0 %v8756_v56  ;;  %v8795_v56 = vld [vmem:[#allocation2 + $0x11e0] sm:$0xff]  }
 0x244   :  { %8058 = vmatprep.subr.bf16.mxu0 %v8758_v58  ;;  %8079 = vmatpush3.bf16.msra.mxu1 %v8757_v57  ;;  %v8796_v57 = vld [vmem:[#allocation2 + $0x1120] sm:$0xff]   ;;  %v8798_v58 = vld [vmem:[#allocation2 + $0x1168] sm:$0xff]  }
 0x245   :  { %8080 = vmatprep.subr.bf16.mxu1 %v8759_v59  ;;  %v8797_v59 = vld [vmem:[#allocation2 + $0x11a0] sm:$0xff]  }
 0x247   :  { %8059 = vmatpush3.bf16.msra.mxu0 %v8760_v60 }
 0x248   :  { %8060 = vmatprep.subr.bf16.mxu0 %v8762_v62  ;;  %8081 = vmatpush3.bf16.msra.mxu1 %v8761_v61  ;;  %v8799_v61 = vld [vmem:[#allocation2 + $0x11e8] sm:$0xff]  }
 0x249   :  { %8082 = vmatprep.subr.bf16.mxu1 %v8763_v63  ;;  %v8800_v63 = vld [vmem:[#allocation2 + $0x1128] sm:$0xff]  }
 0x24b   :  { %8061 = vmatpush3.bf16.msra.mxu0 %v8764_v0 }
 0x24c   :  { %8062 = vmatprep.subr.bf16.mxu0 %v8766_v2  ;;  %8083 = vmatpush3.bf16.msra.mxu1 %v8765_v1 }
 0x24d   :  { %v7760_v4 = vpop.f32.mrb[36].mxu0  ;;  %8084 = vmatprep.subr.bf16.mxu1 %v8767_v3  ;;  %v8801_v3 = vld [vmem:[#allocation2 + $0x11a8] sm:$0xff]  }
 0x24e   :  { %v7761_v6 = vpop.f32.mrb[37].mxu0  ;;  %v7782_v8 = vpop.f32.mrb[36].mxu1 }
 0x24f   :  { %v7762_v9 = vadd.f32 %v7761_v6, %v7760_v4  ;;  %v7763_v10 = vpop.f32.mrb[38].mxu0  ;;  %v7783_v11 = vpop.f32.mrb[37].mxu1  ;;  %8063 = vmatpush3.bf16.msra.mxu0 %v8768_v5  ;;  %v8802_v4 = vld [vmem:[#allocation2 + $0x1170] sm:$0xff]  }
 0x250   :  { %v7764_v13 = vpop.f32.mrb[39].mxu0  ;;  %v7784_v16 = vadd.f32 %v7783_v11, %v7782_v8  ;;  %v7785_v17 = vpop.f32.mrb[38].mxu1  ;;  %8064 = vmatprep.subr.bf16.mxu0 %v8770_v7  ;;  %8085 = vmatpush3.bf16.msra.mxu1 %v8769_v12  ;;  %v8803_v10 = vld [vmem:[#allocation2 + $0x11f0] sm:$0xff]  }
 0x251   :  { %v5960_v15 = vadd.f32 %v7762_v9, %v9128_v39  ;;  %v7786_v19 = vpop.f32.mrb[39].mxu1  ;;  %8086 = vmatprep.subr.bf16.mxu1 %v8771_v14  ;;  %v8782_v39 = vld [vmem:[#allocation2 + $0x1148] sm:$0xff]   ;;  %v8804_v12 = vld [vmem:[#allocation2 + $0x1130] sm:$0xff]   ;;  %v8806_v14 = vld [vmem:[#allocation2 + $0x1178] sm:$0xff]  }
 0x252   :  { %v8808_v17 = vld [vmem:[#allocation2 + $0x1138] sm:$0xff]  }
 0x253   :  { %v9133_v21 = vadd.f32 %v7784_v16, %v5960_v15  ;;  %8065 = vmatpush3.bf16.msra.mxu0 %v8772_v18  ;;  %v8805_v15 = vld [vmem:[#allocation2 + $0x11b0] sm:$0xff]   ;;  %v8807_v16 = vld [vmem:[#allocation2 + $0x11f8] sm:$0xff]   ;;  %v1658_v18 = vrot.slane %v9141_v33, %v8992_v35 }
 0x254   :  { %8066 = vmatprep.subr.bf16.mxu0 %v8774_v20  ;;  %8087 = vmatpush3.bf16.msra.mxu1 %v8773_v22  ;;  %v8809_v19 = vld [vmem:[#allocation2 + $0x11b8] sm:$0xff]  }
 0x255   :  { %8088 = vmatprep.subr.bf16.mxu1 %v8775_v23  ;;  %v1674_v20 = vcombine.high %v1658_v18, %v1658_v18 }
 0x257   :  { %8067 = vmatpush3.bf16.msra.mxu0 %v8776_v24 }
 0x258   :  { %8096 = vmatprep.subr.bf16.mxu0 %v8778_v27  ;;  %8089 = vmatpush3.bf16.msra.mxu1 %v8777_v29 }
 0x259   :  { %8118 = vmatprep.subr.bf16.mxu1 %v8779_v32 }
 0x25a   :  { %6518 = vmatmul.mubr.bf16.vlgmr.msra.gmra.mrb[64].mxu0 %v1651_v31 }
 0x25b   :  { %8097 = vmatpush3.bf16.msra.mxu0 %v8780_v36  ;;  %6558 = vmatmul.mubr.bf16.vlgmr.msra.gmra.mrb[64].mxu1 %v1673_v38 }
 0x25c   :  { %8098 = vmatprep.subr.bf16.mxu0 %v8782_v39  ;;  %8119 = vmatpush3.bf16.msra.mxu1 %v8781_v41 }
 0x25d   :  { %6597 = vmatprep.mubr.bf16.mxu0 %v1672_v42  ;;  %8120 = vmatprep.subr.bf16.mxu1 %v8783_v43 }
 0x25e   :  { %6637 = vmatprep.mubr.bf16.mxu1 %v1676_v45  ;;  %v6646_v45 = vld [vmem:[%s9216_s3] sm:$0xff] }
 0x25f   :  { %8099 = vmatpush3.bf16.msra.mxu0 %v8784_v44 }
 0x260   :  { %8100 = vmatprep.subr.bf16.mxu0 %v8786_v46  ;;  %8121 = vmatpush3.bf16.msra.mxu1 %v8785_v47  ;;  %v6647_v46 = vld [vmem:[%s9216_s3 + $0x8] sm:$0xff]  ;;  %v6648_v47 = vld [vmem:[%s9216_s3 + $0x10] sm:$0xff] }
 0x261   :  { %8122 = vmatprep.subr.bf16.mxu1 %v8787_v48  ;;  %v8915_v48 = vmov 0.0|0.0  }
 0x263   :  { %8101 = vmatpush3.bf16.msra.mxu0 %v8788_v49  ;;  %v8193_v49 = vpack.c.bf16 %v6647_v46, %v6646_v45 }
 0x264   :  { %8102 = vmatprep.subr.bf16.mxu0 %v8790_v50  ;;  %8123 = vmatpush3.bf16.msra.mxu1 %v8789_v51  ;;  %v6649_v50 = vld [vmem:[%s9216_s3 + $0x18] sm:$0xff] }
 0x265   :  { %8124 = vmatprep.subr.bf16.mxu1 %v8791_v52  ;;  %v8196_v51 = vpack.c.bf16 %v6649_v50, %v6648_v47  ;;  %v6650_v52 = vld [vmem:[%s9216_s3 + $0x20] sm:$0xff] }
 0x267   :  { %8103 = vmatpush3.bf16.msra.mxu0 %v8792_v53  ;;  %v6651_v53 = vld [vmem:[%s9216_s3 + $0x28] sm:$0xff] }
 0x268   :  { %8104 = vmatprep.subr.bf16.mxu0 %v8794_v54  ;;  %8125 = vmatpush3.bf16.msra.mxu1 %v8793_v55  ;;  %v8199_v54 = vpack.c.bf16 %v6651_v53, %v6650_v52  ;;  %v6652_v55 = vld [vmem:[%s9216_s3 + $0x30] sm:$0xff] }
 0x269   :  { %8126 = vmatprep.subr.bf16.mxu1 %v8795_v56  ;;  %v6653_v56 = vld [vmem:[%s9216_s3 + $0x38] sm:$0xff] }
 0x26b   :  { %8105 = vmatpush3.bf16.msra.mxu0 %v8796_v57  ;;  %v8202_v57 = vpack.c.bf16 %v6653_v56, %v6652_v55 }
 0x26c   :  { %8106 = vmatprep.subr.bf16.mxu0 %v8798_v58  ;;  %8127 = vmatpush3.bf16.msra.mxu1 %v8797_v59  ;;  %v6654_v58 = vld [vmem:[%s9216_s3 + $0x40] sm:$0xff]  ;;  %v6655_v59 = vld [vmem:[%s9216_s3 + $0x48] sm:$0xff] }
 0x26d   :  { %v7804_v60 = vpop.f32.mrb[40].mxu0  ;;  %8128 = vmatprep.subr.bf16.mxu1 %v8799_v61  ;;  %v6656_v61 = vld [vmem:[%s9216_s3 + $0x50] sm:$0xff] }
 0x26e   :  { %v7805_v62 = vpop.f32.mrb[41].mxu0  ;;  %v7826_v0 = vpop.f32.mrb[40].mxu1 }
 0x26f   :  { %v7806_v1 = vadd.f32 %v7805_v62, %v7804_v60  ;;  %v7807_v2 = vpop.f32.mrb[42].mxu0  ;;  %v7827_v5 = vpop.f32.mrb[41].mxu1  ;;  %8107 = vmatpush3.bf16.msra.mxu0 %v8800_v63  ;;  %v8205_v60 = vpack.c.bf16 %v6655_v59, %v6654_v58  ;;  %v6657_v62 = vld [vmem:[%s9216_s3 + $0x58] sm:$0xff] }
 0x270   :  { %v7808_v6 = vpop.f32.mrb[43].mxu0  ;;  %v7828_v8 = vadd.f32 %v7827_v5, %v7826_v0  ;;  %v7829_v9 = vpop.f32.mrb[42].mxu1  ;;  %8108 = vmatprep.subr.bf16.mxu0 %v8802_v4  ;;  %8129 = vmatpush3.bf16.msra.mxu1 %v8801_v3  ;;  %v8208_v63 = vpack.c.bf16 %v6657_v62, %v6656_v61 }
 0x271   :  { %v6040_v7 = vadd.f32 %v7806_v1, %v9133_v21  ;;  %v7830_v11 = vpop.f32.mrb[43].mxu1  ;;  %8130 = vmatprep.subr.bf16.mxu1 %v8803_v10  ;;  %v6658_v10 = vld [vmem:[%s9216_s3 + $0x60] sm:$0xff] }
 0x272   :  { %v6659_v11 = vld [vmem:[%s9216_s3 + $0x68] sm:$0xff] }
 0x273   :  { %v6080_v13 = vadd.f32 %v7828_v8, %v6040_v7  ;;  %8109 = vmatpush3.bf16.msra.mxu0 %v8804_v12 }
 0x274   :  { %8110 = vmatprep.subr.bf16.mxu0 %v8806_v14  ;;  %8131 = vmatpush3.bf16.msra.mxu1 %v8805_v15  ;;  %v6660_v15 = vld [vmem:[%s9216_s3 + $0x70] sm:$0xff] }
 0x275   :  { %8132 = vmatprep.subr.bf16.mxu1 %v8807_v16  ;;  %v6661_v16 = vld [vmem:[%s9216_s3 + $0x78] sm:$0xff]  ;;  %s8918_s3 = smov [#allocation8]  }
 0x276   :  { %s6760_s25 = sshll.u32 %s8918_s3, 4  ;;  %s6761_s25 = int_to_ptr.vmem [resolvable:$true] %s6760_s25 }
 0x277   :  { %8111 = vmatpush3.bf16.msra.mxu0 %v8808_v17  ;;  %v8214_v17 = vpack.c.bf16 %v6661_v16, %v6660_v15  ;;  %s8881_s26 = scalar_lea.vmem %s6761_s25, 32  ;;  %p8886_p11 = scmp.lt.s32.totalorder %s6761_s25, %s6761_s25 }
 0x278   :  { %8133 = vmatpush3.bf16.msra.mxu1 %v8809_v19  ;;  %8192 = vmatprep.subr.bf16.mxu0 %v8915_v48  ;;  %p8882_p10 = scmp.ne.s32.totalorder %s6761_s25, %s8881_s26  ;;  %p8887_p12 = scmp.lt.s32.totalorder %s8881_s26, %s8881_s26 }
 0x27a   :  { %6598 = vmatmul.mubr.bf16.vlgmr.msra.gmra.mrb[68].mxu0 %v1658_v18  ;;  %v8917_v18 = vmov 0.0   ;;  %p8888_p13 = por %p8887_p12, %p8886_p11 }
 0x27b   :  { %6638 = vmatmul.mubr.bf16.vlgmr.msra.gmra.mrb[68].mxu1 %v1674_v20  ;;  %8194 = vmatpush3.bf16.msra.mxu0 %v8193_v49 }
 0x27c   :  { %8195 = vmatprep.subr.bf16.mxu0 %v8915_v48  ;;  %8189 = vmatprep.mubr.msk.f32.mxu0 %vm8916_vm0, %v8917_v18  ;;  %p8889_p0 = pnand %p8888_p13, %p8882_p10 }
 0x27f   :  { %8197 = vmatpush3.bf16.msra.mxu0 %v8196_v51 }
 0x280   :  { %8198 = vmatprep.subr.bf16.mxu0 %v8915_v48 }
 0x283   :  { %8200 = vmatpush3.bf16.msra.mxu0 %v8199_v54 }
 0x284   :  { %8201 = vmatprep.subr.bf16.mxu0 %v8915_v48 }
 0x287   :  { %8203 = vmatpush3.bf16.msra.mxu0 %v8202_v57 }
 0x288   :  { %8204 = vmatprep.subr.bf16.mxu0 %v8915_v48 }
 0x28b   :  { %8206 = vmatpush3.bf16.msra.mxu0 %v8205_v60 }
 0x28c   :  { %8207 = vmatprep.subr.bf16.mxu0 %v8915_v48 }
 0x28d   :  { %v7848_v21 = vpop.f32.mrb[44].mxu0 }
 0x28e   :  { %v7849_v22 = vpop.f32.mrb[45].mxu0  ;;  %v7870_v23 = vpop.f32.mrb[44].mxu1 }
 0x28f   :  { %v7850_v24 = vadd.f32 %v7849_v22, %v7848_v21  ;;  %v7851_v25 = vpop.f32.mrb[46].mxu0  ;;  %v7871_v26 = vpop.f32.mrb[45].mxu1  ;;  %8209 = vmatpush3.bf16.msra.mxu0 %v8208_v63 }
 0x290   :  { %v7852_v27 = vpop.f32.mrb[47].mxu0  ;;  %v7872_v29 = vadd.f32 %v7871_v26, %v7870_v23  ;;  %v7873_v30 = vpop.f32.mrb[46].mxu1  ;;  %8210 = vmatprep.subr.bf16.mxu0 %v8915_v48 }
 0x291   :  { %v6120_v28 = vadd.f32 %v7850_v24, %v6080_v13  ;;  %v7874_v31 = vpop.f32.mrb[47].mxu1  ;;  %v8211_v13 = vpack.c.bf16 %v6659_v11, %v6658_v10 }
 0x293   :  { %v6160_v35 = vadd.f32 %v7872_v29, %v6120_v28  ;;  %8212 = vmatpush3.bf16.msra.mxu0 %v8211_v13 }
 0x294   :  { %8213 = vmatprep.subr.bf16.mxu0 %v8915_v48 }
 0x297   :  { %8215 = vmatpush3.bf16.msra.mxu0 %v8214_v17 }
 0x2ad   :  { %v7892_v32 = vpop.f32.mrb[48].mxu0 }
 0x2ae   :  { %v7893_v33 = vpop.f32.mrb[49].mxu0  ;;  %v7914_v34 = vpop.f32.mrb[48].mxu1 }
 0x2af   :  { %v7894_v36 = vadd.f32 %v7893_v33, %v7892_v32  ;;  %v7895_v37 = vpop.f32.mrb[50].mxu0  ;;  %v7915_v38 = vpop.f32.mrb[49].mxu1 }
 0x2b0   :  { %v7896_v39 = vpop.f32.mrb[51].mxu0  ;;  %v7916_v41 = vadd.f32 %v7915_v38, %v7914_v34  ;;  %v7917_v42 = vpop.f32.mrb[50].mxu1 }
 0x2b1   :  { %v6200_v40 = vadd.f32 %v7894_v36, %v6160_v35  ;;  %v7918_v43 = vpop.f32.mrb[51].mxu1 }
 0x2b3   :  { %v6240_v44 = vadd.f32 %v7916_v41, %v6200_v40 }
 0x2cd   :  { %v7936_v0 = vpop.f32.mrb[52].mxu0 }
 0x2ce   :  { %v7937_v1 = vpop.f32.mrb[53].mxu0  ;;  %v7958_v2 = vpop.f32.mrb[52].mxu1 }
 0x2cf   :  { %v7938_v3 = vadd.f32 %v7937_v1, %v7936_v0  ;;  %v7939_v4 = vpop.f32.mrb[54].mxu0  ;;  %v7959_v5 = vpop.f32.mrb[53].mxu1 }
 0x2d0   :  { %v7940_v6 = vpop.f32.mrb[55].mxu0  ;;  %v7960_v8 = vadd.f32 %v7959_v5, %v7958_v2  ;;  %v7961_v9 = vpop.f32.mrb[54].mxu1  ;;  %v7347_v4 = vld [vmem:[#allocation7] ss:$0 sm:$0xff] }
 0x2d1   :  { %v6280_v7 = vadd.f32 %v7938_v3, %v6240_v44  ;;  %v7962_v12 = vpop.f32.mrb[55].mxu1 }
 0x2d3   :  { %v6320_v14 = vadd.f32 %v7960_v8, %v6280_v7 }
 0x2ed   :  { %v7980_v19 = vpop.f32.mrb[56].mxu0 }
 0x2ee   :  { %v7981_v20 = vpop.f32.mrb[57].mxu0  ;;  %v8002_v21 = vpop.f32.mrb[56].mxu1 }
 0x2ef   :  { %v7982_v22 = vadd.f32 %v7981_v20, %v7980_v19  ;;  %v7983_v23 = vpop.f32.mrb[58].mxu0  ;;  %v8003_v24 = vpop.f32.mrb[57].mxu1 }
 0x2f0   :  { %v7984_v25 = vpop.f32.mrb[59].mxu0  ;;  %v8004_v27 = vadd.f32 %v8003_v24, %v8002_v21  ;;  %v8005_v28 = vpop.f32.mrb[58].mxu1 }
 0x2f1   :  { %v6360_v26 = vadd.f32 %v7982_v22, %v6320_v14  ;;  %v8006_v29 = vpop.f32.mrb[59].mxu1 }
 0x2f3   :  { %v6400_v30 = vadd.f32 %v8004_v27, %v6360_v26 }
 0x30d   :  { %v8024_v31 = vpop.f32.mrb[60].mxu0 }
 0x30e   :  { %v8025_v35 = vpop.f32.mrb[61].mxu0  ;;  %v8046_v32 = vpop.f32.mrb[60].mxu1 }
 0x30f   :  { %v8026_v33 = vadd.f32 %v8025_v35, %v8024_v31  ;;  %v8027_v34 = vpop.f32.mrb[62].mxu0  ;;  %v8047_v36 = vpop.f32.mrb[61].mxu1 }
 0x310   :  { %v8028_v37 = vpop.f32.mrb[63].mxu0  ;;  %v8048_v39 = vadd.f32 %v8047_v36, %v8046_v32  ;;  %v8049_v40 = vpop.f32.mrb[62].mxu1 }
 0x311   :  { %v6440_v38 = vadd.f32 %v8026_v33, %v6400_v30  ;;  %v8050_v41 = vpop.f32.mrb[63].mxu1 }
 0x313   :  { %v6480_v42 = vadd.f32 %v8048_v39, %v6440_v38 }
 0x32d   :  { %v8068_v43 = vpop.f32.mrb[64].mxu0 }
 0x32e   :  { %v8069_v44 = vpop.f32.mrb[65].mxu0  ;;  %v8090_v45 = vpop.f32.mrb[64].mxu1 }
 0x32f   :  { %v8070_v46 = vadd.f32 %v8069_v44, %v8068_v43  ;;  %v8071_v47 = vpop.f32.mrb[66].mxu0  ;;  %v8091_v48 = vpop.f32.mrb[65].mxu1 }
 0x330   :  { %v8072_v49 = vpop.f32.mrb[67].mxu0  ;;  %v8092_v51 = vadd.f32 %v8091_v48, %v8090_v45  ;;  %v8093_v52 = vpop.f32.mrb[66].mxu1 }
 0x331   :  { %v6520_v50 = vadd.f32 %v8070_v46, %v6480_v42  ;;  %v8094_v53 = vpop.f32.mrb[67].mxu1 }
 0x333   :  { %v6560_v54 = vadd.f32 %v8092_v51, %v6520_v50 }
 0x34d   :  { %v8112_v55 = vpop.f32.mrb[68].mxu0 }
 0x34e   :  { %v8113_v56 = vpop.f32.mrb[69].mxu0  ;;  %v8134_v57 = vpop.f32.mrb[68].mxu1 }
 0x34f   :  { %v8114_v58 = vadd.f32 %v8113_v56, %v8112_v55  ;;  %v8115_v59 = vpop.f32.mrb[70].mxu0  ;;  %v8135_v60 = vpop.f32.mrb[69].mxu1 }
 0x350   :  { %v8116_v61 = vpop.f32.mrb[71].mxu0  ;;  %v8136_v63 = vadd.f32 %v8135_v60, %v8134_v57  ;;  %v8137_v0 = vpop.f32.mrb[70].mxu1 }
 0x351   :  { %v6600_v62 = vadd.f32 %v8114_v58, %v6560_v54  ;;  %v8138_v1 = vpop.f32.mrb[71].mxu1 }
 0x353   :  { %v6640_v2 = vadd.f32 %v8136_v63, %v6600_v62 }
 0x355   :  { %v6645_v3 = vmax.f32 %v6640_v2, 0.0 }
 0x357   :  { %8190 = vmatmul.mubr.f32.vlgmr.msra.gmra.mrb[72].mxu0 %v6645_v3 }
 0x42a   :  { %v6735_v5 = vpop.f32.mrb[72].mxu0 }
 0x42b   :  { %v6736_v6 = vadd.f32 %v7347_v4, %v6735_v5  ;;  %v8191_v7 = vpop.f32.mrb[73].mxu0 }
 0x42d   :  { %v6740_v8 = vsel %vm6739_vm1, %v6736_v6, -inf }
 0x42e   :  { %6741 = vmax.xlane.f32.xlu0 %v6740_v8 }
 0x4bb   :  { %v6742_v9 = vpop.xlane.xlu0 %6741 }
 0x4bc   :  { %v6743_v10 = vsub.f32 %v6736_v6, %v6742_v9 }
 0x4be   :  { %v6744_v11 = vmul.f32 1.442695, %v6743_v10 }
 0x4c0   :  { %8811 = vpow2.f32 %v6744_v11 }
 0x4ca   :  { %v8812_v12 = vpop.eup %8811 }
 0x4cb   :  { %v6746_v13 = vsel %vm6739_vm1, %v8812_v12, 0.0 }
 0x4cc   :  { %6747 = vadd.xlane.f32.xlu0 %v6746_v13 }
 0x559   :  { %v6748_v14 = vpop.xlane.xlu0 %6747 }
 0x55a   :  { %8813 = vlog2.f32 %v6748_v14 }
 0x564   :  { %v8814_v15 = vpop.eup %8813 }
 0x565   :  { %v6750_v16 = vmul.f32 0.6931472, %v8814_v15 }
 0x567   :  { %v6751_v17 = vadd.f32 %v6750_v16, %v6742_v9 }
 0x569   :  { %v6752_v18 = vsub.f32 %v6736_v6, %v6751_v17 }
 0x56b   :  { %6753 = vst.msk [vmem:[#allocation8] sm:$0x3] %vm6739_vm1, %v6752_v18 }
 0x56c   :  { %8892 = shalt.err (!%p8889_p0)
}
 0x56d   :  { %s8893_s29 = scalar_lea.hbm %s9218_s5, 32 }
 0x56e   :  { %p8894_p1 = scmp.ne.s32.totalorder %s9218_s5, %s8893_s29  ;;  %p8897_p2 = scmp.lt.u32.totalorder %s8893_s29, %s9218_s5 }
 0x570   :  { %p8899_p3 = pnand %p8897_p2, %p8894_p1 }
 0x572   :  { %8902 = shalt.err (!%p8899_p3)
}
 0x573   :  { %6763 = dma.vmem_to_hbm [thread:$0]  %s6761_s25, 32, %s9218_s5, [#allocation4]  }
 0x574   :  { %8907 = dma.done.wait [#allocation4], 32  }
 0x575   :  { %8908 = vsyncadd [#allocation4], 4294967264 }
 0x576   :  { %6767 = vsyncpa [#allocation3], 1 }
 0x577   :  { %6768 = vsyncpa [#allocation6], 1 }
 0x578   :  { %6769 = vsyncpa [#allocation4], 1 }

// kernel: net_forward.2
= control target key start
LH: loop header
LB: loop body
LE: loop exit
PB: predicated region body
PF: predicated region fallthrough
CT: control target
= control target key end

     0   :  { %10 = vsyncpa [#allocation7], 0  ;;  %s13738_s0 = inlined_call_operand.vmem [shape: bf16[2,676,9], index: 0, kind: input, shape index: {}]   ;;  %s13739_s1 = inlined_call_operand.hbm [shape: bf16[9,32], index: 1, kind: input, shape index: {}]   ;;  %s13740_s2 = inlined_call_operand.hbm [shape: f32[1,32], index: 2, kind: input, shape index: {}]   ;;  %s13741_s3 = inlined_call_operand.vmem [shape: bf16[288,64], index: 3, kind: input, shape index: {}]   ;;  %s13742_s4 = inlined_call_operand.hbm [shape: f32[1,64], index: 4, kind: input, shape index: {}]   ;;  %s13743_s5 = inlined_call_operand.vmem [shape: bf16[2,144,64], index: 5, kind: output, shape index: {}]  }
   0x1   :  { %11 = vsyncpa [#allocation9], 0  ;;  %s10065_s18 = smov [#allocation8]   ;;  %s10066_s20 = smov [#allocation6]  }
   0x2   :  { %s32_s19 = sshll.u32 %s10065_s18, 4  ;;  %s19_s21 = sshll.u32 %s10066_s20, 4  ;;  %s33_s19 = int_to_ptr.vmem [resolvable:$true] %s32_s19  ;;  %s10107_s21 = int_to_ptr.vmem [resolvable:$true] %s19_s21 }
   0x3   :  { %s9987_s24 = scalar_lea.hbm %s13740_s2, 16 }
   0x4   :  { %p9988_p0 = scmp.ne.s32.totalorder %s13740_s2, %s9987_s24  ;;  %p9991_p1 = scmp.lt.u32.totalorder %s9987_s24, %s13740_s2 }
   0x6   :  { %p9993_p2 = pnand %p9991_p1, %p9988_p0 }
   0x8   :  { %9996 = shalt.err (!%p9993_p2)
}
   0x9   :  { %s9997_s29 = scalar_lea.vmem %s33_s19, 16  ;;  %s10001_s30 = scalar_lea.vmem %s33_s19, 32 }
   0xa   :  { %p9998_p3 = scmp.ne.s32.totalorder %s33_s19, %s9997_s29  ;;  %p10002_p4 = scmp.lt.s32.totalorder %s33_s19, %s33_s19 }
   0xb   :  { %p10003_p5 = scmp.lt.s32.totalorder %s10001_s30, %s9997_s29 }
   0xd   :  { %p10004_p6 = por %p10003_p5, %p10002_p4 }
   0xf   :  { %p10005_p7 = pnand %p10004_p6, %p9998_p3 }
  0x11   :  { %10008 = shalt.err (!%p10005_p7)
}
  0x12   :  { %35 = dma.hbm_to_vmem [thread:$0]  %s13740_s2, 16, %s33_s19, [#allocation9]  }
  0x13   :  { %s10009_s10 = scalar_lea.hbm %s13739_s1, 128 }
  0x14   :  { %p10010_p8 = scmp.ne.s32.totalorder %s13739_s1, %s10009_s10  ;;  %p10013_p9 = scmp.lt.u32.totalorder %s10009_s10, %s13739_s1 }
  0x16   :  { %p10015_p10 = pnand %p10013_p9, %p10010_p8 }
  0x18   :  { %10018 = shalt.err (!%p10015_p10)
}
  0x19   :  { %s10019_s15 = scalar_lea.vmem %s10107_s21, 128  ;;  %p10024_p12 = scmp.lt.s32.totalorder %s10107_s21, %s10107_s21 }
  0x1a   :  { %p10020_p11 = scmp.ne.s32.totalorder %s10107_s21, %s10019_s15  ;;  %p10025_p13 = scmp.lt.s32.totalorder %s10019_s15, %s10019_s15 }
  0x1c   :  { %p10026_p0 = por %p10025_p13, %p10024_p12 }
  0x1e   :  { %p10027_p1 = pnand %p10026_p0, %p10020_p11 }
  0x20   :  { %10030 = shalt.err (!%p10027_p1)
}
  0x21   :  { %s10067_s2 = smov 64   ;;  %s10068_s16 = smov 4  }
  0x22   :  { %25 = dma.hbm_to_vmem [thread:$0]  %s13739_s1, 128, %s10107_s21, [#allocation7], %s10067_s2, %s10067_s2, %s10068_s16  }
  0x23   :  { %s10069_s19 = smov [#allocation10]   ;;  %s10031_s24 = scalar_lea.hbm %s13742_s4, 16 }
  0x24   :  { %s44_s20 = sshll.u32 %s10069_s19, 4  ;;  %p10032_p2 = scmp.ne.s32.totalorder %s13742_s4, %s10031_s24  ;;  %s45_s20 = int_to_ptr.vmem [resolvable:$true] %s44_s20 }
  0x25   :  { %p10035_p3 = scmp.lt.u32.totalorder %s10031_s24, %s13742_s4 }
  0x27   :  { %p10037_p4 = pnand %p10035_p3, %p10032_p2 }
  0x29   :  { %10040 = shalt.err (!%p10037_p4)
}
  0x2a   :  { %s10041_s29 = scalar_lea.vmem %s45_s20, 16  ;;  %s10045_s1 = scalar_lea.vmem %s45_s20, 32 }
  0x2b   :  { %p10042_p5 = scmp.ne.s32.totalorder %s45_s20, %s10041_s29  ;;  %p10046_p6 = scmp.lt.s32.totalorder %s45_s20, %s45_s20 }
  0x2c   :  { %p10047_p7 = scmp.lt.s32.totalorder %s10045_s1, %s10041_s29 }
  0x2e   :  { %p10048_p8 = por %p10047_p7, %p10046_p6 }
  0x30   :  { %p10049_p9 = pnand %p10048_p8, %p10042_p5 }
  0x32   :  { %10052 = shalt.err (!%p10049_p9)
}
  0x33   :  { %47 = dma.hbm_to_vmem [thread:$0]  %s13742_s4, 16, %s45_s20, [#allocation9]  }
  0x34   :  { %10057 = dma.done.wait [#allocation7], 128  }
  0x35   :  { %10058 = vsyncadd [#allocation7], 4294967168 }
  0x36   :  { %10059 = dma.done.wait [#allocation9], 32  }
  0x37   :  { %10060 = vsyncadd [#allocation9], 4294967264  ;;  %s10150_s6 = smov 0  }
  0x38 LB: > { %vm511_vm0 = vcmask 1043456   ;;  %v13749_v0 = vmov 0.0   ;;  %v9601_v1 = vld [vmem:[#allocation6] sm:$0x1f]   ;;  %vm512_vm1 = vcmask 1044480   ;;  %v10071_v2 = vmov 65535   ;;  %s10063_s6 = sphi %s10150_s6, %s65_s6  }
  0x39   : > { %9022 = vmatprep.subr.bf16.mxu0 %v13749_v0  ;;  %v513_v3 = vsel %vm511_vm0, 4294967295, %v10071_v2  ;;  %vm10072_vm2 = vmmov 0   ;;  %s8826_s4 = smul.u32 340, %s10063_s6  ;;  %vm381_vm3 = vcmask 72704   ;;  %v10271_v33 = vld [vmem:[#allocation8] ss:$0 sm:$0xff] }
  0x3a   : > { %9024 = vmatprep.mubr.msk.bf16.mxu0 %vm10072_vm2, %v13749_v0  ;;  %v514_v4 = vsel %vm512_vm1, %v513_v3, 0  ;;  %vm1320_vm4 = vcmask 257024   ;;  %vm1719_vm5 = vcmask 261120   ;;  %vm3814_vm6 = vsmask.f32 6400  ;;  %s10074_s28 = smov 64  }
  0x3b   : > { %v516_v5 = vand.u32 %v9601_v1, %v514_v4  ;;  %s10163_s9 = scalar_lea.vmem %s13738_s0, %s8826_s4  ;;  %vm2787_vm7 = vcmask 1046528   ;;  %vm2036_vm8 = vsmask.f32 7424  ;;  %s10075_s29 = smov 32   ;;  %vm4529_vm9 = vcmask 1045504  }
  0x3c   : > { %v9602_v6 = vld [vmem:[%s10163_s9] sm:$0xff]   ;;  %v9603_v7 = vld [vmem:[%s10163_s9 + $0x8] sm:$0xff]   ;;  %v9604_v8 = vld [vmem:[%s10163_s9 + $0x10] sm:$0xff]   ;;  %s10076_s7 = smov 96   ;;  %vm5554_vm10 = vsmask.f32 5376 }
  0x3d   : > { %9023 = vmatpush3.bf16.msra.mxu0 %v516_v5  ;;  %v9605_v9 = vld [vmem:[%s10163_s9 + $0x18] sm:$0xff]   ;;  %v9606_v10 = vld [vmem:[%s10163_s9 + $0x20] sm:$0xff]   ;;  %v9607_v11 = vld [vmem:[%s10163_s9 + $0x28] sm:$0xff]   ;;  %vm2470_vm11 = vcmask 523520   ;;  %vm2984_vm12 = vcmask 785920   ;;  %vm3497_vm13 = vcmask 1048320  }
  0x3e   : > { %v9608_v12 = vld [vmem:[%s10163_s9 + $0x30] sm:$0xff]   ;;  %v9609_v13 = vld [vmem:[%s10163_s9 + $0x38] sm:$0xff]   ;;  %v9610_v14 = vld [vmem:[%s10163_s9 + $0x40] sm:$0xff]   ;;  %vm1405_vm14 = vcmask 254976   ;;  %vm7658_vm15 = vcmask 523264   ;;  %s8914_s22 = smul.u32 72, %s10063_s6 }
  0x3f   : > { %v9611_v15 = vld [vmem:[%s10163_s9 + $0x48] sm:$0xff]   ;;  %v9612_v16 = vld [vmem:[%s10163_s9 + $0x50] sm:$0xff]   ;;  %v9613_v17 = vld [vmem:[%s10163_s9 + $0x58] sm:$0xff]   ;;  %vm7987_vm0 = vcmask 519168   ;;  %s65_s6 = sadd.s32 1, %s10063_s6  }
  0x40   : > { %9025 = vmatmul.mubr.msk.bf16.vlgmr.msra.gmra.mrb[0].mxu0 %vm381_vm3, %v9602_v6  ;;  %v9614_v18 = vld [vmem:[%s10163_s9 + $0x60] sm:$0xff]   ;;  %v9615_v19 = vld [vmem:[%s10163_s9 + $0x68] sm:$0xff]   ;;  %v9616_v20 = vld [vmem:[%s10163_s9 + $0x70] sm:$0xff]   ;;  %s13392_s25 = scalar_lea.vmem %s13743_s5, %s8914_s22  ;;  %p62_p10 = scmp.ge.s32.totalorder %s65_s6, 2  }
  0x41   : > { %9028 = vmatprep.mubr.msk.bf16.mxu0 %vm10072_vm2, %v13749_v0  ;;  %v9617_v21 = vld [vmem:[%s10163_s9 + $0x78] sm:$0xff]   ;;  %v9618_v22 = vld [vmem:[%s10163_s9 + $0x80] sm:$0xff]   ;;  %v9619_v23 = vld [vmem:[%s10163_s9 + $0x88] sm:$0xff]  }
  0x42   : > { %v9620_v24 = vld [vmem:[%s10163_s9 + $0x90] sm:$0xff]   ;;  %v9621_v25 = vld [vmem:[%s10163_s9 + $0x98] sm:$0xff]   ;;  %v9622_v26 = vld [vmem:[%s10163_s9 + $0xa0] sm:$0xff]  }
  0x43   : > { %v9623_v27 = vld [vmem:[%s10163_s9 + $0xa8] sm:$0xff]   ;;  %v9624_v28 = vld [vmem:[%s10163_s9 + $0xb0] sm:$0xff]   ;;  %v9625_v29 = vld [vmem:[%s10163_s9 + $0xb8] sm:$0xff]  }
  0x44   : > { %v9626_v30 = vld [vmem:[%s10163_s9 + $0xc0] sm:$0xff]   ;;  %v9627_v31 = vld [vmem:[%s10163_s9 + $0xc8] sm:$0xff]   ;;  %v9628_v32 = vld [vmem:[%s10163_s9 + $0xd0] sm:$0xff]  }
  0x45   : > { %v9629_v37 = vld [vmem:[%s10163_s9 + $0xd8] sm:$0xff]   ;;  %v9630_v48 = vld [vmem:[%s10163_s9 + $0xe0] sm:$0xff]   ;;  %v9631_v59 = vld [vmem:[%s10163_s9 + $0xe8] sm:$0xff]  }
  0x48   : > { %9029 = vmatmul.mubr.msk.bf16.gmra.mrb[4].mxu0 %vm381_vm3, %v9603_v7 }
  0x49   : > { %9032 = vmatprep.mubr.msk.bf16.mxu0 %vm10072_vm2, %v13749_v0 }
  0x50   : > { %9033 = vmatmul.mubr.msk.bf16.gmra.mrb[8].mxu0 %vm381_vm3, %v9604_v8  ;;  %v9632_v8 = vld [vmem:[%s10163_s9 + $0xf0] sm:$0xff]  }
  0x51   : > { %9036 = vmatprep.mubr.msk.bf16.mxu0 %vm10072_vm2, %v13749_v0 }
  0x58   : > { %9037 = vmatmul.mubr.msk.bf16.gmra.mrb[12].mxu0 %vm381_vm3, %v9605_v9 }
  0x59   : > { %9040 = vmatprep.mubr.msk.bf16.mxu0 %vm10072_vm2, %v13749_v0 }
  0x60   : > { %9041 = vmatmul.mubr.msk.bf16.gmra.mrb[16].mxu0 %vm381_vm3, %v9606_v10 }
  0x61   : > { %9044 = vmatprep.mubr.msk.bf16.mxu0 %vm10072_vm2, %v13749_v0 }
  0x68   : > { %9045 = vmatmul.mubr.msk.bf16.gmra.mrb[20].mxu0 %vm381_vm3, %v9607_v11 }
  0x69   : > { %9048 = vmatprep.mubr.msk.bf16.mxu0 %vm10072_vm2, %v13749_v0 }
  0x70   : > { %9049 = vmatmul.mubr.msk.bf16.gmra.mrb[24].mxu0 %vm381_vm3, %v9608_v12 }
  0x71   : > { %9052 = vmatprep.mubr.msk.bf16.mxu0 %vm10072_vm2, %v13749_v0 }
  0x78   : > { %9053 = vmatmul.mubr.msk.bf16.gmra.mrb[28].mxu0 %vm381_vm3, %v9609_v13 }
  0x79   : > { %9056 = vmatprep.mubr.msk.bf16.mxu0 %vm10072_vm2, %v13749_v0 }
  0x80   : > { %9057 = vmatmul.mubr.msk.bf16.gmra.mrb[32].mxu0 %vm381_vm3, %v9610_v14 }
  0x81   : > { %9060 = vmatprep.mubr.msk.bf16.mxu0 %vm10072_vm2, %v13749_v0 }
  0x88   : > { %9061 = vmatmul.mubr.msk.bf16.gmra.mrb[36].mxu0 %vm381_vm3, %v9611_v15 }
  0x89   : > { %9064 = vmatprep.mubr.msk.bf16.mxu0 %vm10072_vm2, %v13749_v0 }
  0x90   : > { %9065 = vmatmul.mubr.msk.bf16.gmra.mrb[40].mxu0 %vm381_vm3, %v9612_v16 }
  0x91   : > { %9068 = vmatprep.mubr.msk.bf16.mxu0 %vm10072_vm2, %v13749_v0 }
  0x98   : > { %9069 = vmatmul.mubr.msk.bf16.gmra.mrb[44].mxu0 %vm381_vm3, %v9613_v17 }
  0x99   : > { %9072 = vmatprep.mubr.msk.bf16.mxu0 %vm10072_vm2, %v13749_v0 }
  0xa0   : > { %9073 = vmatmul.mubr.msk.bf16.gmra.mrb[48].mxu0 %vm381_vm3, %v9614_v18 }
  0xa1   : > { %9076 = vmatprep.mubr.msk.bf16.mxu0 %vm10072_vm2, %v13749_v0 }
  0xa8   : > { %9077 = vmatmul.mubr.msk.bf16.gmra.mrb[52].mxu0 %vm381_vm3, %v9615_v19 }
  0xa9   : > { %9080 = vmatprep.mubr.msk.bf16.mxu0 %vm10072_vm2, %v13749_v0 }
  0xb0   : > { %9081 = vmatmul.mubr.msk.bf16.gmra.mrb[56].mxu0 %vm381_vm3, %v9616_v20  ;;  %v9633_v20 = vld [vmem:[%s10163_s9 + $0xf8] sm:$0xff]  }
  0xb1   : > { %9084 = vmatprep.mubr.msk.bf16.mxu0 %vm10072_vm2, %v13749_v0 }
  0xb8   : > { %9085 = vmatmul.mubr.msk.bf16.gmra.mrb[60].mxu0 %vm381_vm3, %v9617_v21 }
  0xb9   : > { %9088 = vmatprep.mubr.msk.bf16.mxu0 %vm10072_vm2, %v13749_v0 }
  0xc0   : > { %9089 = vmatmul.mubr.msk.bf16.gmra.mrb[64].mxu0 %vm381_vm3, %v9618_v22 }
  0xc1   : > { %9092 = vmatprep.mubr.msk.bf16.mxu0 %vm10072_vm2, %v13749_v0 }
  0xc8   : > { %9093 = vmatmul.mubr.msk.bf16.gmra.mrb[68].mxu0 %vm381_vm3, %v9619_v23 }
  0xc9   : > { %9096 = vmatprep.mubr.msk.bf16.mxu0 %vm10072_vm2, %v13749_v0 }
  0xd0   : > { %9097 = vmatmul.mubr.msk.bf16.gmra.mrb[72].mxu0 %vm381_vm3, %v9620_v24 }
  0xd1   : > { %9100 = vmatprep.mubr.msk.bf16.mxu0 %vm10072_vm2, %v13749_v0 }
  0xd8   : > { %9101 = vmatmul.mubr.msk.bf16.gmra.mrb[76].mxu0 %vm381_vm3, %v9621_v25 }
  0xd9   : > { %9104 = vmatprep.mubr.msk.bf16.mxu0 %vm10072_vm2, %v13749_v0 }
  0xe0   : > { %9105 = vmatmul.mubr.msk.bf16.gmra.mrb[80].mxu0 %vm381_vm3, %v9622_v26 }
  0xe1   : > { %9108 = vmatprep.mubr.msk.bf16.mxu0 %vm10072_vm2, %v13749_v0 }
  0xe8   : > { %9109 = vmatmul.mubr.msk.bf16.gmra.mrb[84].mxu0 %vm381_vm3, %v9623_v27 }
  0xe9   : > { %9112 = vmatprep.mubr.msk.bf16.mxu0 %vm10072_vm2, %v13749_v0 }
  0xf0   : > { %9113 = vmatmul.mubr.msk.bf16.gmra.mrb[88].mxu0 %vm381_vm3, %v9624_v28 }
  0xf1   : > { %9116 = vmatprep.mubr.msk.bf16.mxu0 %vm10072_vm2, %v13749_v0 }
  0xf8   : > { %9117 = vmatmul.mubr.msk.bf16.gmra.mrb[92].mxu0 %vm381_vm3, %v9625_v29 }
  0xf9   : > { %9120 = vmatprep.mubr.msk.bf16.mxu0 %vm10072_vm2, %v13749_v0 }
 0x100   : > { %9121 = vmatmul.mubr.msk.bf16.gmra.mrb[96].mxu0 %vm381_vm3, %v9626_v30 }
 0x101   : > { %9124 = vmatprep.mubr.msk.bf16.mxu0 %vm10072_vm2, %v13749_v0 }
 0x108   : > { %9125 = vmatmul.mubr.msk.bf16.gmra.mrb[100].mxu0 %vm381_vm3, %v9627_v31 }
 0x109   : > { %9128 = vmatprep.mubr.msk.bf16.mxu0 %vm10072_vm2, %v13749_v0 }
 0x110   : > { %9129 = vmatmul.mubr.msk.bf16.gmra.mrb[104].mxu0 %vm381_vm3, %v9628_v32  ;;  %v9634_v32 = vld [vmem:[%s10163_s9 + $0x100] sm:$0xff]  }
 0x111   : > { %9132 = vmatprep.mubr.msk.bf16.mxu0 %vm10072_vm2, %v13749_v0 }
 0x113   : > { %v552_v34 = vpop.f32.mrb[0].mxu0 }
 0x114   : > { %v553_v35 = vadd.f32 %v10271_v33, %v552_v34  ;;  %v9026_v36 = vpop.f32.mrb[1].mxu0 }
 0x115   : > { %v555_v38 = vpop.f32.mrb[2].mxu0 }
 0x116   : > { %v894_v39 = vmax.f32 %v553_v35, 0.0  ;;  %v556_v40 = vadd.f32 %v10271_v33, %v555_v38  ;;  %v9027_v41 = vpop.f32.mrb[3].mxu0 }
 0x118   : > { %v8827_v42 = vpack.c.bf16 %v894_v39, %v894_v39  ;;  %v895_v43 = vmax.f32 %v556_v40, 0.0  ;;  %9133 = vmatmul.mubr.msk.bf16.gmra.mrb[108].mxu0 %vm381_vm3, %v9629_v37 }
 0x119   : > { %9136 = vmatprep.mubr.msk.bf16.mxu0 %vm10072_vm2, %v13749_v0 }
 0x11a   : > { %1321 = vst.msk [vmem:[#allocation2] sm:$0xf] %vm1320_vm4, %v8827_v42  ;;  %v8828_v44 = vpack.c.bf16 %v895_v43, %v895_v43 }
 0x11b   : > { %v560_v45 = vpop.f32.mrb[4].mxu0 }
 0x11c   : > { %1322 = vst.msk [vmem:[#allocation2 + $0x4] sm:$0xf] %vm1320_vm4, %v8828_v44  ;;  %v561_v46 = vadd.f32 %v10271_v33, %v560_v45  ;;  %v9030_v47 = vpop.f32.mrb[5].mxu0 }
 0x11d   : > { %v563_v49 = vpop.f32.mrb[6].mxu0 }
 0x11e   : > { %v896_v50 = vmax.f32 %v561_v46, 0.0  ;;  %v564_v51 = vadd.f32 %v10271_v33, %v563_v49  ;;  %v9031_v52 = vpop.f32.mrb[7].mxu0 }
 0x120   : > { %v8829_v53 = vpack.c.bf16 %v896_v50, %v896_v50  ;;  %v897_v54 = vmax.f32 %v564_v51, 0.0  ;;  %9137 = vmatmul.mubr.msk.bf16.gmra.mrb[112].mxu0 %vm381_vm3, %v9630_v48  ;;  %v9635_v50 = vld [vmem:[%s10163_s9 + $0x108] sm:$0xff]  }
 0x121   : > { %9140 = vmatprep.mubr.msk.bf16.mxu0 %vm10072_vm2, %v13749_v0 }
 0x122   : > { %1323 = vst.msk [vmem:[#allocation2 + $0x8] sm:$0xf] %vm1320_vm4, %v8829_v53  ;;  %v8830_v55 = vpack.c.bf16 %v897_v54, %v897_v54 }
 0x123   : > { %v568_v56 = vpop.f32.mrb[8].mxu0  ;;  %v9876_v60 = vld [vmem:[#allocation2] sm:$0xff]  }
 0x124   : > { %1324 = vst.msk [vmem:[#allocation2 + $0xc] sm:$0xf] %vm1320_vm4, %v8830_v55  ;;  %v569_v57 = vadd.f32 %v10271_v33, %v568_v56  ;;  %v9034_v58 = vpop.f32.mrb[9].mxu0 }
 0x125   : > { %v571_v61 = vpop.f32.mrb[10].mxu0  ;;  %1720 = vst.msk [vmem:[#allocation3] sm:$0xff] %vm1719_vm5, %v9876_v60 }
 0x126   : > { %v898_v62 = vmax.f32 %v569_v57, 0.0  ;;  %v572_v63 = vadd.f32 %v10271_v33, %v571_v61  ;;  %v9035_v1 = vpop.f32.mrb[11].mxu0 }
 0x128   : > { %v8831_v2 = vpack.c.bf16 %v898_v62, %v898_v62  ;;  %v899_v3 = vmax.f32 %v572_v63, 0.0  ;;  %9141 = vmatmul.mubr.msk.bf16.gmra.mrb[116].mxu0 %vm381_vm3, %v9631_v59 }
 0x129   : > { %9144 = vmatprep.mubr.msk.bf16.mxu0 %vm10072_vm2, %v13749_v0 }
 0x12a   : > { %1325 = vst.msk [vmem:[#allocation2 + $0x10] sm:$0xf] %vm1320_vm4, %v8831_v2  ;;  %v8832_v4 = vpack.c.bf16 %v899_v3, %v899_v3 }
 0x12b   : > { %v576_v5 = vpop.f32.mrb[12].mxu0  ;;  %v9883_v10 = vld [vmem:[#allocation2 + $0x8] sm:$0xff]  }
 0x12c   : > { %1326 = vst.msk [vmem:[#allocation2 + $0x14] sm:$0xf] %vm1320_vm4, %v8832_v4  ;;  %v577_v6 = vadd.f32 %v10271_v33, %v576_v5  ;;  %v9038_v7 = vpop.f32.mrb[13].mxu0  ;;  %v9636_v4 = vld [vmem:[%s10163_s9 + $0x110] sm:$0xff]  }
 0x12d   : > { %v579_v9 = vpop.f32.mrb[14].mxu0  ;;  %1721 = vst.msk [vmem:[#allocation3 + $0x18] sm:$0xff] %vm1719_vm5, %v9883_v10 }
 0x12e   : > { %v900_v11 = vmax.f32 %v577_v6, 0.0  ;;  %v580_v12 = vadd.f32 %v10271_v33, %v579_v9  ;;  %v9039_v13 = vpop.f32.mrb[15].mxu0 }
 0x130   : > { %v8833_v14 = vpack.c.bf16 %v900_v11, %v900_v11  ;;  %v901_v15 = vmax.f32 %v580_v12, 0.0  ;;  %9145 = vmatmul.mubr.msk.bf16.gmra.mrb[120].mxu0 %vm381_vm3, %v9632_v8 }
 0x131   : > { %9148 = vmatprep.mubr.msk.bf16.mxu0 %vm10072_vm2, %v13749_v0 }
 0x132   : > { %1327 = vst.msk [vmem:[#allocation2 + $0x18] sm:$0xf] %vm1320_vm4, %v8833_v14  ;;  %v8834_v16 = vpack.c.bf16 %v901_v15, %v901_v15 }
 0x133   : > { %v584_v17 = vpop.f32.mrb[16].mxu0  ;;  %v9892_v22 = vld [vmem:[#allocation2 + $0x10] sm:$0xff]  }
 0x134   : > { %1328 = vst.msk [vmem:[#allocation2 + $0x1c] sm:$0xf] %vm1320_vm4, %v8834_v16  ;;  %v585_v18 = vadd.f32 %v10271_v33, %v584_v17  ;;  %v9042_v19 = vpop.f32.mrb[17].mxu0 }
 0x135   : > { %v587_v21 = vpop.f32.mrb[18].mxu0  ;;  %1722 = vst.msk [vmem:[#allocation3 + $0x30] sm:$0xff] %vm1719_vm5, %v9892_v22 }
 0x136   : > { %v902_v23 = vmax.f32 %v585_v18, 0.0  ;;  %v588_v24 = vadd.f32 %v10271_v33, %v587_v21  ;;  %v9043_v25 = vpop.f32.mrb[19].mxu0 }
 0x138   : > { %v8835_v26 = vpack.c.bf16 %v902_v23, %v902_v23  ;;  %v903_v27 = vmax.f32 %v588_v24, 0.0  ;;  %9149 = vmatmul.mubr.msk.bf16.gmra.mrb[124].mxu0 %vm381_vm3, %v9633_v20  ;;  %v9637_v20 = vld [vmem:[%s10163_s9 + $0x118] sm:$0xff]  }
 0x139   : > { %9152 = vmatprep.mubr.msk.bf16.mxu0 %vm10072_vm2, %v13749_v0  ;;  %v6070_v41 = vld [vmem:[#allocation2 + $0x18] sm:$0x8] }
 0x13a   : > { %1329 = vst.msk [vmem:[#allocation2 + $0x20] sm:$0xf] %vm1320_vm4, %v8835_v26  ;;  %v8836_v28 = vpack.c.bf16 %v903_v27, %v903_v27 }
 0x13b   : > { %v592_v29 = vpop.f32.mrb[20].mxu0  ;;  %v6071_v38 = vld [vmem:[#allocation2 + $0x1c] sm:$0xf] }
 0x13c   : > { %1330 = vst.msk [vmem:[#allocation2 + $0x24] sm:$0xf] %vm1320_vm4, %v8836_v28  ;;  %v593_v30 = vadd.f32 %v10271_v33, %v592_v29  ;;  %v9046_v31 = vpop.f32.mrb[21].mxu0  ;;  %v8703_v42 = vcombine.low %v6070_v41, %v6071_v38 }
 0x13d   : > { %v595_v34 = vpop.f32.mrb[22].mxu0 }
 0x13e   : > { %v904_v35 = vmax.f32 %v593_v30, 0.0  ;;  %v596_v36 = vadd.f32 %v10271_v33, %v595_v34  ;;  %v9047_v37 = vpop.f32.mrb[23].mxu0  ;;  %v6348_v52 = vrot.slane %v8703_v42, 3 }
 0x13f   : > { %v9638_v37 = vld [vmem:[%s10163_s9 + $0x120] sm:$0xff]  }
 0x140   : > { %v8837_v39 = vpack.c.bf16 %v904_v35, %v904_v35  ;;  %v905_v40 = vmax.f32 %v596_v36, 0.0  ;;  %9153 = vmatmul.mubr.msk.bf16.gmra.mrb[128].mxu0 %vm381_vm3, %v9634_v32 }
 0x141   : > { %9156 = vmatprep.mubr.msk.bf16.mxu0 %vm10072_vm2, %v13749_v0  ;;  %v6072_v43 = vld [vmem:[#allocation2 + $0x20] sm:$0xf] }
 0x142   : > { %1331 = vst.msk [vmem:[#allocation2 + $0x28] sm:$0xf] %vm1320_vm4, %v8837_v39  ;;  %v8838_v44 = vpack.c.bf16 %v905_v40, %v905_v40 }
 0x143   : > { %v6073_v45 = vld [vmem:[#allocation2 + $0x24] sm:$0xf]  ;;  %v600_v46 = vpop.f32.mrb[24].mxu0 }
 0x144   : > { %v8704_v47 = vcombine.low %v6072_v43, %v6073_v45  ;;  %1332 = vst.msk [vmem:[#allocation2 + $0x2c] sm:$0xf] %vm1320_vm4, %v8838_v44  ;;  %v601_v48 = vadd.f32 %v10271_v33, %v600_v46  ;;  %v9050_v49 = vpop.f32.mrb[25].mxu0 }
 0x145   : > { %v603_v51 = vpop.f32.mrb[26].mxu0 }
 0x146   : > { %v6349_v53 = vrot.slane %v8704_v47, 3  ;;  %v906_v54 = vmax.f32 %v601_v48, 0.0  ;;  %v604_v55 = vadd.f32 %v10271_v33, %v603_v51  ;;  %v9051_v56 = vpop.f32.mrb[27].mxu0 }
 0x148   : > { %v8839_v57 = vpack.c.bf16 %v906_v54, %v906_v54  ;;  %v907_v58 = vmax.f32 %v604_v55, 0.0  ;;  %9157 = vmatmul.mubr.msk.bf16.gmra.mrb[132].mxu0 %vm381_vm3, %v9635_v50  ;;  %v6350_v59 = vsel %vm512_vm1, %v6348_v52, %v6349_v53 }
 0x149   : > { %9160 = vmatprep.mubr.msk.bf16.mxu0 %vm10072_vm2, %v13749_v0  ;;  %6466 = vst.msk [vmem:[#allocation3 + $0x10] sm:$0xff] %vm1719_vm5, %v6350_v59  ;;  %v6074_v60 = vld [vmem:[#allocation2 + $0x28] sm:$0xf] }
 0x14a   : > { %1333 = vst.msk [vmem:[#allocation2 + $0x30] sm:$0xf] %vm1320_vm4, %v8839_v57  ;;  %v8840_v61 = vpack.c.bf16 %v907_v58, %v907_v58 }
 0x14b   : > { %v6075_v62 = vld [vmem:[#allocation2 + $0x2c] sm:$0xf]  ;;  %v608_v63 = vpop.f32.mrb[28].mxu0 }
 0x14c   : > { %v8705_v1 = vcombine.low %v6074_v60, %v6075_v62  ;;  %1334 = vst.msk [vmem:[#allocation2 + $0x34] sm:$0xf] %vm1320_vm4, %v8840_v61  ;;  %v609_v2 = vadd.f32 %v10271_v33, %v608_v63  ;;  %v9054_v3 = vpop.f32.mrb[29].mxu0 }
 0x14d   : > { %v611_v5 = vpop.f32.mrb[30].mxu0 }
 0x14e   : > { %v6351_v6 = vrot.slane %v8705_v1, 3  ;;  %v908_v7 = vmax.f32 %v609_v2, 0.0  ;;  %v612_v8 = vadd.f32 %v10271_v33, %v611_v5  ;;  %v9055_v9 = vpop.f32.mrb[31].mxu0 }
 0x150   : > { %v8841_v10 = vpack.c.bf16 %v908_v7, %v908_v7  ;;  %v909_v11 = vmax.f32 %v612_v8, 0.0  ;;  %9161 = vmatmul.mubr.msk.bf16.gmra.mrb[136].mxu0 %vm381_vm3, %v9636_v4  ;;  %v6352_v12 = vsel %vm512_vm1, %v6349_v53, %v6351_v6  ;;  %v9639_v53 = vld [vmem:[%s10163_s9 + $0x128] sm:$0xff]  }
 0x151   : > { %v6076_v13 = vld [vmem:[#allocation2 + $0x30] sm:$0xf]  ;;  %9164 = vmatprep.mubr.msk.bf16.mxu0 %vm10072_vm2, %v13749_v0  ;;  %6467 = vst.msk [vmem:[#allocation3 + $0x28] sm:$0xff] %vm1719_vm5, %v6352_v12 }
 0x152   : > { %1335 = vst.msk [vmem:[#allocation2 + $0x38] sm:$0xf] %vm1320_vm4, %v8841_v10  ;;  %v8842_v14 = vpack.c.bf16 %v909_v11, %v909_v11 }
 0x153   : > { %v6077_v15 = vld [vmem:[#allocation2 + $0x34] sm:$0xf]  ;;  %v616_v16 = vpop.f32.mrb[32].mxu0 }
 0x154   : > { %v8706_v17 = vcombine.low %v6076_v13, %v6077_v15  ;;  %1336 = vst.msk [vmem:[#allocation2 + $0x3c] sm:$0xf] %vm1320_vm4, %v8842_v14  ;;  %v617_v18 = vadd.f32 %v10271_v33, %v616_v16  ;;  %v9058_v19 = vpop.f32.mrb[33].mxu0 }
 0x155   : > { %v619_v21 = vpop.f32.mrb[34].mxu0  ;;  %v9641_v19 = vld [vmem:[%s10163_s9 + $0x138] sm:$0xff]  }
 0x156   : > { %v6353_v22 = vrot.slane %v8706_v17, 3  ;;  %v910_v23 = vmax.f32 %v617_v18, 0.0  ;;  %v620_v24 = vadd.f32 %v10271_v33, %v619_v21  ;;  %v9059_v25 = vpop.f32.mrb[35].mxu0 }
 0x158   : > { %v8843_v26 = vpack.c.bf16 %v910_v23, %v910_v23  ;;  %v911_v27 = vmax.f32 %v620_v24, 0.0  ;;  %9165 = vmatmul.mubr.msk.bf16.gmra.mrb[140].mxu0 %vm381_vm3, %v9637_v20  ;;  %v6354_v28 = vsel %vm512_vm1, %v6351_v6, %v6353_v22  ;;  %v9640_v6 = vld [vmem:[%s10163_s9 + $0x130] sm:$0xff]  }
 0x159   : > { %9168 = vmatprep.mubr.msk.bf16.mxu0 %vm10072_vm2, %v13749_v0  ;;  %v6078_v29 = vld [vmem:[#allocation2 + $0x38] sm:$0xf]  ;;  %6468 = vst.msk [vmem:[#allocation3 + $0x40] sm:$0xff] %vm1719_vm5, %v6354_v28 }
 0x15a   : > { %1337 = vst.msk [vmem:[#allocation2 + $0x40] sm:$0xf] %vm1320_vm4, %v8843_v26  ;;  %v8844_v30 = vpack.c.bf16 %v911_v27, %v911_v27 }
 0x15b   : > { %v6079_v31 = vld [vmem:[#allocation2 + $0x3c] sm:$0xf]  ;;  %v624_v32 = vpop.f32.mrb[36].mxu0 }
 0x15c   : > { %v8707_v34 = vcombine.low %v6078_v29, %v6079_v31  ;;  %1338 = vst.msk [vmem:[#allocation2 + $0x44] sm:$0xf] %vm1320_vm4, %v8844_v30  ;;  %v625_v35 = vadd.f32 %v10271_v33, %v624_v32  ;;  %v9062_v36 = vpop.f32.mrb[37].mxu0  ;;  %v9642_v30 = vld [vmem:[%s10163_s9 + $0x140] sm:$0xff]  }
 0x15d   : > { %v627_v38 = vpop.f32.mrb[38].mxu0 }
 0x15e   : > { %v912_v39 = vmax.f32 %v625_v35, 0.0  ;;  %v628_v40 = vadd.f32 %v10271_v33, %v627_v38  ;;  %v9063_v41 = vpop.f32.mrb[39].mxu0  ;;  %v6355_v42 = vrot.slane %v8707_v34, 3 }
 0x160   : > { %v8845_v43 = vpack.c.bf16 %v912_v39, %v912_v39  ;;  %v913_v44 = vmax.f32 %v628_v40, 0.0  ;;  %9169 = vmatmul.mubr.msk.bf16.gmra.mrb[144].mxu0 %vm381_vm3, %v9638_v37  ;;  %v6356_v49 = vsel %vm512_vm1, %v6353_v22, %v6355_v42 }
 0x161   : > { %9172 = vmatprep.mubr.msk.bf16.mxu0 %vm10072_vm2, %v13749_v0  ;;  %v6080_v46 = vld [vmem:[#allocation2 + $0x40] sm:$0xf]  ;;  %6469 = vst.msk [vmem:[#allocation3 + $0x58] sm:$0xff] %vm1719_vm5, %v6356_v49 }
 0x162   : > { %1339 = vst.msk [vmem:[#allocation2 + $0x48] sm:$0xf] %vm1320_vm4, %v8845_v43  ;;  %v8846_v45 = vpack.c.bf16 %v913_v44, %v913_v44 }
 0x163   : > { %v6081_v47 = vld [vmem:[#allocation2 + $0x44] sm:$0xf]  ;;  %v632_v48 = vpop.f32.mrb[40].mxu0 }
 0x164   : > { %v8708_v50 = vcombine.low %v6080_v46, %v6081_v47  ;;  %1340 = vst.msk [vmem:[#allocation2 + $0x4c] sm:$0xf] %vm1320_vm4, %v8846_v45  ;;  %v633_v51 = vadd.f32 %v10271_v33, %v632_v48  ;;  %v9066_v52 = vpop.f32.mrb[41].mxu0 }
 0x165   : > { %v635_v54 = vpop.f32.mrb[42].mxu0 }
 0x166   : > { %v6357_v55 = vrot.slane %v8708_v50, 3  ;;  %v914_v56 = vmax.f32 %v633_v51, 0.0  ;;  %v636_v57 = vadd.f32 %v10271_v33, %v635_v54  ;;  %v9067_v58 = vpop.f32.mrb[43].mxu0  ;;  %v9884_v51 = vld [vmem:[#allocation2 + $0xc] sm:$0xfe]  }
 0x167   : > { %v9644_v54 = vld [vmem:[%s10163_s9 + $0x150] ss:$0 sps:$4 sm:$0x33]  }
 0x168   : > { %v8847_v59 = vpack.c.bf16 %v914_v56, %v914_v56  ;;  %v915_v60 = vmax.f32 %v636_v57, 0.0  ;;  %9173 = vmatmul.mubr.msk.bf16.gmra.mrb[148].mxu0 %vm381_vm3, %v9639_v53  ;;  %v6358_v61 = vsel %vm512_vm1, %v6355_v42, %v6357_v55  ;;  %v9643_v42 = vld [vmem:[%s10163_s9 + $0x148] sm:$0xff]  }
 0x169   : > { %9176 = vmatprep.mubr.msk.bf16.mxu0 %vm10072_vm2, %v13749_v0  ;;  %v6082_v62 = vld [vmem:[#allocation2 + $0x48] sm:$0xf]  ;;  %6470 = vst.msk [vmem:[#allocation3 + $0x70] sm:$0xff] %vm1719_vm5, %v6358_v61 }
 0x16a   : > { %1341 = vst.msk [vmem:[#allocation2 + $0x50] sm:$0xf] %vm1320_vm4, %v8847_v59  ;;  %v8848_v63 = vpack.c.bf16 %v915_v60, %v915_v60  ;;  %v9885_v59 = vld [vmem:[#allocation2 + $0x14] sm:$0xff]  }
 0x16b   : > { %v6083_v1 = vld [vmem:[#allocation2 + $0x4c] sm:$0xf]  ;;  %v640_v2 = vpop.f32.mrb[44].mxu0 }
 0x16c   : > { %v8709_v3 = vcombine.low %v6082_v62, %v6083_v1  ;;  %1342 = vst.msk [vmem:[#allocation2 + $0x54] sm:$0xf] %vm1320_vm4, %v8848_v63  ;;  %v641_v4 = vadd.f32 %v10271_v33, %v640_v2  ;;  %v9070_v5 = vpop.f32.mrb[45].mxu0  ;;  %v3816_v62 = vshrl.u32 %v9884_v51, 16  ;;  %v3819_v63 = vshll.u32 %v9884_v51, 16 }
 0x16d   : > { %v643_v7 = vpop.f32.mrb[46].mxu0 }
 0x16e   : > { %v10378_v8 = vrot.slane %v8709_v3, 3  ;;  %v916_v9 = vmax.f32 %v641_v4, 0.0  ;;  %v644_v10 = vadd.f32 %v10271_v33, %v643_v7  ;;  %v9071_v11 = vpop.f32.mrb[47].mxu0  ;;  %v3824_v3 = vshrl.u32 %v9885_v59, 16 }
 0x16f   : > { %v3827_v11 = vshll.u32 %v9885_v59, 16 }
 0x170   : > { %v8849_v12 = vpack.c.bf16 %v916_v9, %v916_v9  ;;  %v917_v13 = vmax.f32 %v644_v10, 0.0  ;;  %9177 = vmatmul.mubr.msk.bf16.gmra.mrb[152].mxu0 %vm381_vm3, %v9640_v6  ;;  %v6360_v14 = vsel %vm512_vm1, %v6357_v55, %v10378_v8  ;;  %v3818_v6 = vrot.slane %v3816_v62, 1 }
 0x171   : > { %9180 = vmatprep.mubr.msk.bf16.mxu0 %vm10072_vm2, %v13749_v0  ;;  %6471 = vst.msk [vmem:[#allocation3 + $0x88] sm:$0xff] %vm1719_vm5, %v6360_v14  ;;  %v3821_v9 = vrot.slane %v3819_v63, 2  ;;  %v3826_v10 = vrot.slane %v3824_v3, 1 }
 0x172   : > { %1343 = vst.msk [vmem:[#allocation2 + $0x58] sm:$0xf] %vm1320_vm4, %v8849_v12  ;;  %v8850_v15 = vpack.c.bf16 %v917_v13, %v917_v13 }
 0x173   : > { %v648_v16 = vpop.f32.mrb[48].mxu0 }
 0x174   : > { %1344 = vst.msk [vmem:[#allocation2 + $0x5c] sm:$0xf] %vm1320_vm4, %v8850_v15  ;;  %v649_v17 = vadd.f32 %v10271_v33, %v648_v16  ;;  %v9074_v18 = vpop.f32.mrb[49].mxu0  ;;  %v3829_v15 = vrot.slane %v3827_v11, 2 }
 0x175   : > { %v651_v20 = vpop.f32.mrb[50].mxu0  ;;  %v3822_v18 = vor.u32 %v3821_v9, %v3818_v6  ;;  %v9908_v9 = vld [vmem:[#allocation2 + $0x20] sm:$0xff]  }
 0x176   : > { %v918_v21 = vmax.f32 %v649_v17, 0.0  ;;  %v652_v22 = vadd.f32 %v10271_v33, %v651_v20  ;;  %v9075_v23 = vpop.f32.mrb[51].mxu0  ;;  %1724 = vst.msk [vmem:[#allocation3 + $0x60] sm:$0xff] %vm1719_vm5, %v9908_v9 }
 0x178   : > { %v8851_v24 = vpack.c.bf16 %v918_v21, %v918_v21  ;;  %v919_v25 = vmax.f32 %v652_v22, 0.0  ;;  %9181 = vmatmul.mubr.msk.bf16.gmra.mrb[156].mxu0 %vm381_vm3, %v9641_v19  ;;  %v3830_v19 = vor.u32 %v3829_v15, %v3826_v10  ;;  %v9909_v10 = vld [vmem:[#allocation2 + $0x2c] sm:$0xff]   ;;  %v9694_v15 = vld [vmem:[%s13741_s3] sm:$0xff]  }
 0x179   : > { %9184 = vmatprep.mubr.msk.bf16.mxu0 %vm10072_vm2, %v13749_v0 }
 0x17a   : > { %1345 = vst.msk [vmem:[#allocation2 + $0x60] sm:$0xf] %vm1320_vm4, %v8851_v24  ;;  %v8852_v26 = vpack.c.bf16 %v919_v25, %v919_v25  ;;  %v3831_v22 = vsel %vm3814_vm6, %v3822_v18, %v3830_v19  ;;  %v9893_v25 = vld [vmem:[#allocation2 + $0x1c] sm:$0xff]   ;;  %v3854_v18 = vshll.u32 %v9909_v10, 16 }
 0x17b   : > { %v656_v27 = vpop.f32.mrb[52].mxu0  ;;  %4213 = vst.msk [vmem:[#allocation3 + $0x8] sm:$0xff] %vm1719_vm5, %v3831_v22 }
 0x17c   : > { %1346 = vst.msk [vmem:[#allocation2 + $0x64] sm:$0xf] %vm1320_vm4, %v8852_v26  ;;  %v657_v28 = vadd.f32 %v10271_v33, %v656_v27  ;;  %v9078_v29 = vpop.f32.mrb[53].mxu0  ;;  %v3856_v22 = vrot.slane %v3854_v18, 2 }
 0x17d   : > { %v659_v31 = vpop.f32.mrb[54].mxu0 }
 0x17e   : > { %v920_v32 = vmax.f32 %v657_v28, 0.0  ;;  %v660_v34 = vadd.f32 %v10271_v33, %v659_v31  ;;  %v9079_v35 = vpop.f32.mrb[55].mxu0  ;;  %v3836_v31 = vshll.u32 %v9893_v25, 16 }
 0x180   : > { %v8853_v36 = vpack.c.bf16 %v920_v32, %v920_v32  ;;  %v921_v37 = vmax.f32 %v660_v34, 0.0  ;;  %9185 = vmatmul.mubr.msk.bf16.gmra.mrb[160].mxu0 %vm381_vm3, %v9642_v30  ;;  %v3833_v30 = vshrl.u32 %v9893_v25, 16 }
 0x181   : > { %9188 = vmatprep.mubr.msk.bf16.mxu0 %vm10072_vm2, %v13749_v0 }
 0x182   : > { %1347 = vst.msk [vmem:[#allocation2 + $0x68] sm:$0xf] %vm1320_vm4, %v8853_v36  ;;  %v8854_v38 = vpack.c.bf16 %v921_v37, %v921_v37  ;;  %v3835_v35 = vrot.slane %v3833_v30, 1  ;;  %v3838_v36 = vrot.slane %v3836_v31, 2 }
 0x183   : > { %v664_v39 = vpop.f32.mrb[56].mxu0 }
 0x184   : > { %1348 = vst.msk [vmem:[#allocation2 + $0x6c] sm:$0xf] %vm1320_vm4, %v8854_v38  ;;  %v665_v40 = vadd.f32 %v10271_v33, %v664_v39  ;;  %v9082_v41 = vpop.f32.mrb[57].mxu0  ;;  %v3839_v39 = vor.u32 %v3838_v36, %v3835_v35  ;;  %v9700_v35 = vld [vmem:[%s13741_s3 + $0x10] sm:$0xff]  }
 0x185   : > { %v667_v43 = vpop.f32.mrb[58].mxu0 }
 0x186   : > { %v922_v44 = vmax.f32 %v665_v40, 0.0  ;;  %v668_v45 = vadd.f32 %v10271_v33, %v667_v43  ;;  %v9083_v46 = vpop.f32.mrb[59].mxu0  ;;  %v3840_v43 = vsel %vm3814_vm6, %v3830_v19, %v3839_v39 }
 0x187   : > { %4214 = vst.msk [vmem:[#allocation3 + $0x20] sm:$0xff] %vm1719_vm5, %v3840_v43 }
 0x188   : > { %v8855_v47 = vpack.c.bf16 %v922_v44, %v922_v44  ;;  %v923_v48 = vmax.f32 %v668_v45, 0.0  ;;  %9189 = vmatmul.mubr.msk.bf16.gmra.mrb[164].mxu0 %vm381_vm3, %v9643_v42 }
 0x189   : > { %9192 = vmatprep.mubr.msk.bf16.mxu0 %vm10072_vm2, %v13749_v0 }
 0x18a   : > { %1349 = vst.msk [vmem:[#allocation2 + $0x70] sm:$0xf] %vm1320_vm4, %v8855_v47  ;;  %v8856_v49 = vpack.c.bf16 %v923_v48, %v923_v48 }
 0x18b   : > { %v672_v50 = vpop.f32.mrb[60].mxu0 }
 0x18c   : > { %1350 = vst.msk [vmem:[#allocation2 + $0x74] sm:$0xf] %vm1320_vm4, %v8856_v49  ;;  %v673_v52 = vadd.f32 %v10271_v33, %v672_v50  ;;  %v9086_v53 = vpop.f32.mrb[61].mxu0  ;;  %v9900_v49 = vld [vmem:[#allocation2 + $0x18] sm:$0xff]   ;;  %v9901_v50 = vld [vmem:[#allocation2 + $0x24] sm:$0xff]  }
 0x18d   : > { %v675_v55 = vpop.f32.mrb[62].mxu0  ;;  %1723 = vst.msk [vmem:[#allocation3 + $0x48] sm:$0xff] %vm1719_vm5, %v9900_v49  ;;  %v3842_v53 = vshrl.u32 %v9901_v50, 16 }
 0x18e   : > { %v924_v56 = vmax.f32 %v673_v52, 0.0  ;;  %v676_v57 = vadd.f32 %v10271_v33, %v675_v55  ;;  %v9087_v58 = vpop.f32.mrb[63].mxu0  ;;  %v10436_v55 = vld [vmem:[#allocation8] ss:$0 sm:$0xff] }
 0x18f   : > { %v3844_v58 = vrot.slane %v3842_v53, 1 }
 0x190   : > { %v8857_v60 = vpack.c.bf16 %v924_v56, %v924_v56  ;;  %v925_v61 = vmax.f32 %v676_v57, 0.0  ;;  %9193 = vmatmul.mubr.msk.bf16.gmra.mrb[168].mxu0 %vm381_vm3, %v9644_v54  ;;  %v3845_v54 = vshll.u32 %v9901_v50, 16  ;;  %vm8003_vm3 = vcmask 1041408  }
 0x192   : > { %1351 = vst.msk [vmem:[#allocation2 + $0x78] sm:$0xf] %vm1320_vm4, %v8857_v60  ;;  %v8858_v1 = vpack.c.bf16 %v925_v61, %v925_v61  ;;  %v3847_v59 = vrot.slane %v3845_v54, 2 }
 0x193   : > { %v680_v2 = vpop.f32.mrb[64].mxu0 }
 0x194   : > { %1352 = vst.msk [vmem:[#allocation2 + $0x7c] sm:$0xf] %vm1320_vm4, %v8858_v1  ;;  %v681_v4 = vadd.f32 %v10271_v33, %v680_v2  ;;  %v9090_v5 = vpop.f32.mrb[65].mxu0  ;;  %v3848_v63 = vor.u32 %v3847_v59, %v3844_v58  ;;  %v9709_v58 = vld [vmem:[%s13741_s3 + $0x28] sm:$0xff]  }
 0x195   : > { %v683_v7 = vpop.f32.mrb[66].mxu0 }
 0x196   : > { %v926_v12 = vmax.f32 %v681_v4, 0.0  ;;  %v684_v13 = vadd.f32 %v10271_v33, %v683_v7  ;;  %v9091_v14 = vpop.f32.mrb[67].mxu0  ;;  %v3849_v3 = vsel %vm3814_vm6, %v3839_v39, %v3848_v63  ;;  %v9917_v39 = vld [vmem:[#allocation2 + $0x34] sm:$0xff]  }
 0x197   : > { %4215 = vst.msk [vmem:[#allocation3 + $0x38] sm:$0xff] %vm1719_vm5, %v3849_v3  ;;  %v3860_v43 = vshrl.u32 %v9917_v39, 16 }
 0x198   : > { %v8859_v16 = vpack.c.bf16 %v926_v12, %v926_v12  ;;  %v927_v17 = vmax.f32 %v684_v13, 0.0 }
 0x19a   : > { %1353 = vst.msk [vmem:[#allocation2 + $0x80] sm:$0xf] %vm1320_vm4, %v8859_v16  ;;  %v8860_v20 = vpack.c.bf16 %v927_v17, %v927_v17  ;;  %v10073_v16 = vmov 0   ;;  %v3851_v17 = vshrl.u32 %v9909_v10, 16 }
 0x19b   : > { %v688_v21 = vpop.f32.mrb[68].mxu0  ;;  %9356 = vmatprep.subr.bf16.mxu1 %v10073_v16  ;;  %6890 = vmatprep.subr.bf16.mxu0 %v10073_v16 }
 0x19c   : > { %1354 = vst.msk [vmem:[#allocation2 + $0x84] sm:$0xf] %vm1320_vm4, %v8860_v20  ;;  %v689_v23 = vadd.f32 %v10271_v33, %v688_v21  ;;  %v9094_v24 = vpop.f32.mrb[69].mxu0  ;;  %9372 = vmatpush1.bf16.msra.mxu1 %v9694_v15  ;;  %6891 = vmatpush1.bf16.msra.mxu0 %v9694_v15  ;;  %v3853_v21 = vrot.slane %v3851_v17, 1 }
 0x19d   : > { %v691_v26 = vpop.f32.mrb[70].mxu0  ;;  %9357 = vmatprep.subr.bf16.mxu1 %v10073_v16  ;;  %6892 = vmatprep.subr.bf16.mxu0 %v10073_v16  ;;  %v9697_v24 = vld [vmem:[%s13741_s3 + $0x8] sm:$0xff]  }
 0x19e   : > { %v928_v27 = vmax.f32 %v689_v23, 0.0  ;;  %v692_v28 = vadd.f32 %v10271_v33, %v691_v26  ;;  %v9095_v29 = vpop.f32.mrb[71].mxu0  ;;  %v3857_v26 = vor.u32 %v3856_v22, %v3853_v21 }
 0x1a0   : > { %v8861_v32 = vpack.c.bf16 %v928_v27, %v928_v27  ;;  %v929_v34 = vmax.f32 %v692_v28, 0.0  ;;  %9373 = vmatpush1.bf16.msra.mxu1 %v9697_v24  ;;  %6893 = vmatpush1.bf16.msra.mxu0 %v9697_v24  ;;  %v3858_v30 = vsel %vm3814_vm6, %v3848_v63, %v3857_v26 }
 0x1a1   : > { %9358 = vmatprep.subr.bf16.mxu1 %v10073_v16  ;;  %6894 = vmatprep.subr.bf16.mxu0 %v10073_v16  ;;  %4216 = vst.msk [vmem:[#allocation3 + $0x50] sm:$0xff] %vm1719_vm5, %v3858_v30 }
 0x1a2   : > { %1355 = vst.msk [vmem:[#allocation2 + $0x88] sm:$0xf] %vm1320_vm4, %v8861_v32  ;;  %v8862_v37 = vpack.c.bf16 %v929_v34, %v929_v34 }
 0x1a3   : > { %v696_v38 = vpop.f32.mrb[72].mxu0 }
 0x1a4   : > { %1356 = vst.msk [vmem:[#allocation2 + $0x8c] sm:$0xf] %vm1320_vm4, %v8862_v37  ;;  %v697_v40 = vadd.f32 %v10271_v33, %v696_v38  ;;  %v9098_v41 = vpop.f32.mrb[73].mxu0  ;;  %9374 = vmatpush1.bf16.msra.mxu1 %v9700_v35  ;;  %6895 = vmatpush1.bf16.msra.mxu0 %v9700_v35  ;;  %v9916_v38 = vld [vmem:[#allocation2 + $0x28] sm:$0xff]  }
 0x1a5   : > { %v699_v42 = vpop.f32.mrb[74].mxu0  ;;  %9359 = vmatprep.subr.bf16.mxu1 %v10073_v16  ;;  %6896 = vmatprep.subr.bf16.mxu0 %v10073_v16  ;;  %v9703_v41 = vld [vmem:[%s13741_s3 + $0x18] sm:$0xff]   ;;  %1725 = vst.msk [vmem:[#allocation3 + $0x78] sm:$0xff] %vm1719_vm5, %v9916_v38 }
 0x1a6   : > { %v930_v44 = vmax.f32 %v697_v40, 0.0  ;;  %v700_v45 = vadd.f32 %v10271_v33, %v699_v42  ;;  %v9099_v46 = vpop.f32.mrb[75].mxu0 }
 0x1a7   : > { %v3863_v46 = vshll.u32 %v9917_v39, 16 }
 0x1a8   : > { %v8863_v47 = vpack.c.bf16 %v930_v44, %v930_v44  ;;  %v931_v48 = vmax.f32 %v700_v45, 0.0  ;;  %9375 = vmatpush1.bf16.msra.mxu1 %v9703_v41  ;;  %6897 = vmatpush1.bf16.msra.mxu0 %v9703_v41 }
 0x1a9   : > { %9360 = vmatprep.subr.bf16.mxu1 %v10073_v16  ;;  %6898 = vmatprep.subr.bf16.mxu0 %v10073_v16  ;;  %v3865_v53 = vrot.slane %v3863_v46, 2 }
 0x1aa   : > { %1357 = vst.msk [vmem:[#allocation2 + $0x90] sm:$0xf] %vm1320_vm4, %v8863_v47  ;;  %v8864_v51 = vpack.c.bf16 %v931_v48, %v931_v48  ;;  %v3862_v48 = vrot.slane %v3860_v43, 1 }
 0x1ab   : > { %v704_v52 = vpop.f32.mrb[76].mxu0 }
 0x1ac   : > { %1358 = vst.msk [vmem:[#allocation2 + $0x94] sm:$0xf] %vm1320_vm4, %v8864_v51  ;;  %v705_v33 = vadd.f32 %v10436_v55, %v704_v52  ;;  %v9102_v56 = vpop.f32.mrb[77].mxu0  ;;  %v9706_v52 = vld [vmem:[%s13741_s3 + $0x20] sm:$0xff]  }
 0x1ad   : > { %v707_v57 = vpop.f32.mrb[78].mxu0  ;;  %9376 = vmatpush1.bf16.msra.mxu1 %v9706_v52  ;;  %6899 = vmatpush1.bf16.msra.mxu0 %v9706_v52  ;;  %v10483_v56 = vor.u32 %v3865_v53, %v3862_v48  ;;  %v9725_v53 = vld [vmem:[%s13741_s3 + $0x48] sm:$0xff]  }
 0x1ae   : > { %v932_v60 = vmax.f32 %v705_v33, 0.0  ;;  %v708_v61 = vadd.f32 %v10436_v55, %v707_v57  ;;  %v9103_v62 = vpop.f32.mrb[79].mxu0  ;;  %9361 = vmatprep.subr.bf16.mxu1 %v10073_v16  ;;  %6900 = vmatprep.subr.bf16.mxu0 %v10073_v16 }
 0x1af   : > { %v3867_v59 = vsel %vm3814_vm6, %v3857_v26, %v10483_v56 }
 0x1b0   : > { %v8865_v1 = vpack.c.bf16 %v932_v60, %v932_v60  ;;  %v933_v2 = vmax.f32 %v708_v61, 0.0  ;;  %4217 = vst.msk [vmem:[#allocation3 + $0x68] sm:$0xff] %vm1719_vm5, %v3867_v59 }
 0x1b1   : > { %9377 = vmatpush1.bf16.msra.mxu1 %v9709_v58  ;;  %6901 = vmatpush1.bf16.msra.mxu0 %v9709_v58 }
 0x1b2   : > { %1359 = vst.msk [vmem:[#allocation2 + $0x98] sm:$0xf] %vm1320_vm4, %v8865_v1  ;;  %v8866_v4 = vpack.c.bf16 %v933_v2, %v933_v2  ;;  %9362 = vmatprep.subr.bf16.mxu1 %v10073_v16  ;;  %6902 = vmatprep.subr.bf16.mxu0 %v10073_v16 }
 0x1b3   : > { %v712_v5 = vpop.f32.mrb[80].mxu0 }
 0x1b4   : > { %1360 = vst.msk [vmem:[#allocation2 + $0x9c] sm:$0xf] %vm1320_vm4, %v8866_v4  ;;  %v713_v6 = vadd.f32 %v10436_v55, %v712_v5  ;;  %v9106_v7 = vpop.f32.mrb[81].mxu0 }
 0x1b5   : > { %v715_v11 = vpop.f32.mrb[82].mxu0 }
 0x1b6   : > { %v934_v12 = vmax.f32 %v713_v6, 0.0  ;;  %v716_v13 = vadd.f32 %v10436_v55, %v715_v11  ;;  %v9107_v14 = vpop.f32.mrb[83].mxu0  ;;  %v9713_v6 = vld [vmem:[%s13741_s3 + $0x30] sm:$0xff]  }
 0x1b7   : > { %9378 = vmatpush1.bf16.msra.mxu1 %v9713_v6  ;;  %6903 = vmatpush1.bf16.msra.mxu0 %v9713_v6 }
 0x1b8   : > { %v8867_v19 = vpack.c.bf16 %v934_v12, %v934_v12  ;;  %v935_v20 = vmax.f32 %v716_v13, 0.0  ;;  %9363 = vmatprep.subr.bf16.mxu1 %v10073_v16  ;;  %6904 = vmatprep.subr.bf16.mxu0 %v10073_v16  ;;  %v9716_v13 = vld [vmem:[%s13741_s3 + $0x38] sm:$0xff]  }
 0x1ba   : > { %1361 = vst.msk [vmem:[#allocation2 + $0xa0] sm:$0xf] %vm1320_vm4, %v8867_v19  ;;  %v8868_v23 = vpack.c.bf16 %v935_v20, %v935_v20 }
 0x1bb   : > { %v720_v25 = vpop.f32.mrb[84].mxu0  ;;  %9379 = vmatpush1.bf16.msra.mxu1 %v9716_v13  ;;  %6905 = vmatpush1.bf16.msra.mxu0 %v9716_v13 }
 0x1bc   : > { %1362 = vst.msk [vmem:[#allocation2 + $0xa4] sm:$0xf] %vm1320_vm4, %v8868_v23  ;;  %v721_v27 = vadd.f32 %v10436_v55, %v720_v25  ;;  %v9110_v28 = vpop.f32.mrb[85].mxu0  ;;  %9364 = vmatprep.subr.bf16.mxu1 %v10073_v16  ;;  %6906 = vmatprep.subr.bf16.mxu0 %v10073_v16 }
 0x1bd   : > { %v723_v29 = vpop.f32.mrb[86].mxu0 }
 0x1be   : > { %v936_v31 = vmax.f32 %v721_v27, 0.0  ;;  %v724_v32 = vadd.f32 %v10436_v55, %v723_v29  ;;  %v9111_v34 = vpop.f32.mrb[87].mxu0  ;;  %v9719_v29 = vld [vmem:[%s13741_s3 + $0x40] sm:$0xff]  }
 0x1bf   : > { %9380 = vmatpush1.bf16.msra.mxu1 %v9719_v29  ;;  %6907 = vmatpush1.bf16.msra.mxu0 %v9719_v29 }
 0x1c0   : > { %v8869_v36 = vpack.c.bf16 %v936_v31, %v936_v31  ;;  %v937_v37 = vmax.f32 %v724_v32, 0.0  ;;  %9365 = vmatprep.subr.bf16.mxu1 %v10073_v16  ;;  %6908 = vmatprep.subr.bf16.mxu0 %v10073_v16 }
 0x1c2   : > { %1363 = vst.msk [vmem:[#allocation2 + $0xa8] sm:$0xf] %vm1320_vm4, %v8869_v36  ;;  %v8870_v40 = vpack.c.bf16 %v937_v37, %v937_v37 }
 0x1c3   : > { %v728_v42 = vpop.f32.mrb[88].mxu0  ;;  %9381 = vmatpush1.bf16.msra.mxu1 %v9725_v53  ;;  %6909 = vmatpush1.bf16.msra.mxu0 %v9725_v53 }
 0x1c4   : > { %1364 = vst.msk [vmem:[#allocation2 + $0xac] sm:$0xf] %vm1320_vm4, %v8870_v40  ;;  %v729_v44 = vadd.f32 %v10436_v55, %v728_v42  ;;  %v9114_v45 = vpop.f32.mrb[89].mxu0  ;;  %9366 = vmatprep.subr.bf16.mxu1 %v10073_v16  ;;  %6910 = vmatprep.subr.bf16.mxu0 %v10073_v16 }
 0x1c5   : > { %v731_v47 = vpop.f32.mrb[90].mxu0 }
 0x1c6   : > { %v938_v49 = vmax.f32 %v729_v44, 0.0  ;;  %v732_v50 = vadd.f32 %v10436_v55, %v731_v47  ;;  %v9115_v51 = vpop.f32.mrb[91].mxu0 }
 0x1c8   : > { %v8871_v54 = vpack.c.bf16 %v938_v49, %v938_v49  ;;  %v939_v33 = vmax.f32 %v732_v50, 0.0 }
 0x1ca   : > { %1365 = vst.msk [vmem:[#allocation2 + $0xb0] sm:$0xf] %vm1320_vm4, %v8871_v54  ;;  %v8872_v57 = vpack.c.bf16 %v939_v33, %v939_v33 }
 0x1cb   : > { %v736_v60 = vpop.f32.mrb[92].mxu0  ;;  %v9647_v63 = vld [vmem:[#allocation2 + $0xa8] sm:$0xff]  }
 0x1cc   : > { %1366 = vst.msk [vmem:[#allocation2 + $0xb4] sm:$0xf] %vm1320_vm4, %v8872_v57  ;;  %v737_v61 = vadd.f32 %v10436_v55, %v736_v60  ;;  %v9118_v62 = vpop.f32.mrb[93].mxu0  ;;  %v9710_v2 = vld [vmem:[#allocation2 + $0xa8] sm:$0xff]   ;;  %v2205_v9 = vshll.u32 %v9647_v63, 16  ;;  %v2209_v27 = vshrl.u32 %v9647_v63, 16 }
 0x1cd   : > { %v739_v1 = vpop.f32.mrb[94].mxu0  ;;  %v10502_v7 = vld [vmem:[#allocation2 + $0xa8] sm:$0xff]   ;;  %1741 = vst.msk [vmem:[#allocation3 + $0x1f8] sm:$0xff] %vm1719_vm5, %v9710_v2 }
 0x1ce   : > { %v940_v3 = vmax.f32 %v737_v61, 0.0  ;;  %v740_v4 = vadd.f32 %v10436_v55, %v739_v1  ;;  %v9119_v5 = vpop.f32.mrb[95].mxu0  ;;  %13768 = vst [vmem:[#allocation13_spill] sm:$0xff] %v10502_v7  ;;  %v13747_v17 = vrot.slane %v10502_v7, 1  ;;  %v10512_v18 = vrot.slane %v2205_v9, 1  ;;  %v9728_v61 = vld [vmem:[%s13741_s3 + $0x50] sm:$0xff]  }
 0x1cf   : > { %9382 = vmatpush1.bf16.msra.mxu1 %v9728_v61  ;;  %6911 = vmatpush1.bf16.msra.mxu0 %v9728_v61 }
 0x1d0   : > { %v8873_v10 = vpack.c.bf16 %v940_v3, %v940_v3  ;;  %v941_v11 = vmax.f32 %v740_v4, 0.0  ;;  %v2211_v35 = vor.u32 %v2209_v27, %v10512_v18  ;;  %9367 = vmatprep.subr.bf16.mxu1 %v10073_v16  ;;  %6912 = vmatprep.subr.bf16.mxu0 %v10073_v16 }
 0x1d2   : > { %1367 = vst.msk [vmem:[#allocation2 + $0xb8] sm:$0xf] %vm1320_vm4, %v8873_v10  ;;  %v8874_v12 = vpack.c.bf16 %v941_v11, %v941_v11 }
 0x1d3   : > { %v744_v14 = vpop.f32.mrb[96].mxu0  ;;  %v9646_v15 = vld [vmem:[#allocation2 + $0xb0] sm:$0xff]  }
 0x1d4   : > { %1368 = vst.msk [vmem:[#allocation2 + $0xbc] sm:$0xf] %vm1320_vm4, %v8874_v12  ;;  %v745_v19 = vadd.f32 %v10436_v55, %v744_v14  ;;  %v9122_v20 = vpop.f32.mrb[97].mxu0  ;;  %v9648_v21 = vld [vmem:[#allocation2 + $0xb0] sm:$0xff]   ;;  %v2831_v23 = vrot.slane %v9646_v15, 1 }
 0x1d5   : > { %v747_v22 = vpop.f32.mrb[98].mxu0  ;;  %v2213_v28 = vshll.u32 %v9648_v21, 16  ;;  %v9720_v30 = vld [vmem:[#allocation2 + $0xb0] sm:$0xff]   ;;  %v2217_v51 = vshrl.u32 %v9648_v21, 16 }
 0x1d6   : > { %v942_v24 = vmax.f32 %v745_v19, 0.0  ;;  %v748_v25 = vadd.f32 %v10436_v55, %v747_v22  ;;  %v9123_v26 = vpop.f32.mrb[99].mxu0  ;;  %v2832_v31 = vsel %vm2787_vm7, %v13747_v17, %v2831_v23  ;;  %1742 = vst.msk [vmem:[#allocation3 + $0x210] sm:$0xff] %vm1719_vm5, %v9720_v30 }
 0x1d7   : > { %2909 = vrot.lane.b32.xlu1 %v2832_v31, %s10074_s28  ;;  %v2215_v36 = vrot.slane %v2213_v28, 1 }
 0x1d8   : > { %v8875_v32 = vpack.c.bf16 %v942_v24, %v942_v24  ;;  %v943_v34 = vmax.f32 %v748_v25, 0.0 }
 0x1d9   : > { %v2216_v38 = vsel %vm2036_vm8, %v2211_v35, %v2215_v36  ;;  %v10545_v52 = vld [vmem:[#allocation2 + $0xb4] sm:$0xff]   ;;  %v2219_v59 = vor.u32 %v2217_v51, %v2215_v36 }
 0x1da   : > { %1369 = vst.msk [vmem:[#allocation2 + $0xc0] sm:$0xf] %vm1320_vm4, %v8875_v32  ;;  %v8876_v37 = vpack.c.bf16 %v943_v34, %v943_v34  ;;  %2395 = vrot.lane.b32.xlu0 %v2216_v38, %s10075_s29  ;;  %13769 = vst [vmem:[#allocation14_spill] sm:$0xff] %v10545_v52  ;;  %v10551_v58 = vld [vmem:[#allocation2 + $0xb4] sm:$0xff]   ;;  %v13745_v3 = vrot.slane %v10545_v52, 2 }
 0x1db   : > { %v752_v39 = vpop.f32.mrb[100].mxu0  ;;  %v10533_v40 = vld [vmem:[#allocation2 + $0xb8] sm:$0xff]   ;;  %13770 = vst [vmem:[#allocation15_spill] sm:$0xff] %v10551_v58  ;;  %v13746_v14 = vrot.slane %v10551_v58, 1 }
 0x1dc   : > { %1370 = vst.msk [vmem:[#allocation2 + $0xc4] sm:$0xf] %vm1320_vm4, %v8876_v37  ;;  %v753_v41 = vadd.f32 %v10436_v55, %v752_v39  ;;  %v9126_v42 = vpop.f32.mrb[101].mxu0  ;;  %v10537_v43 = vld [vmem:[#allocation2 + $0xb8] sm:$0xff]   ;;  %v2833_v45 = vrot.slane %v10533_v40, 1 }
 0x1dd   : > { %v755_v44 = vpop.f32.mrb[102].mxu0  ;;  %v2221_v49 = vshll.u32 %v10537_v43, 16  ;;  %v2225_v28 = vshrl.u32 %v10537_v43, 16 }
 0x1de   : > { %v944_v46 = vmax.f32 %v753_v41, 0.0  ;;  %v756_v47 = vadd.f32 %v10436_v55, %v755_v44  ;;  %v9127_v48 = vpop.f32.mrb[103].mxu0  ;;  %v2834_v50 = vsel %vm2787_vm7, %v2831_v23, %v2833_v45 }
 0x1df   : > { %2911 = vrot.lane.b32.xlu1 %v2834_v50, %s10074_s28  ;;  %v2223_v57 = vrot.slane %v2221_v49, 1 }
 0x1e0   : > { %v8877_v54 = vpack.c.bf16 %v944_v46, %v944_v46  ;;  %v945_v33 = vmax.f32 %v756_v47, 0.0 }
 0x1e1   : > { %v9652_v60 = vld [vmem:[#allocation2 + $0xbc] sm:$0xff]   ;;  %v2224_v2 = vsel %vm2036_vm8, %v2219_v59, %v2223_v57  ;;  %v2227_v44 = vor.u32 %v2225_v28, %v2223_v57 }
 0x1e2   : > { %1371 = vst.msk [vmem:[#allocation2 + $0xc8] sm:$0xf] %vm1320_vm4, %v8877_v54  ;;  %v8878_v62 = vpack.c.bf16 %v945_v33, %v945_v33  ;;  %v10557_v63 = vld [vmem:[#allocation2 + $0xbc] sm:$0xff]   ;;  %v4573_v4 = vrot.slane %v9652_v60, 2 }
 0x1e3   : > { %v760_v1 = vpop.f32.mrb[104].mxu0  ;;  %2397 = vrot.lane.b32.xlu1 %v2224_v2, %s10075_s29  ;;  %v3344_v9 = vrot.slane %v10557_v63, 1  ;;  %v10567_v10 = vld [vmem:[#allocation2 + $0xc0] sm:$0xff]  }
 0x1e4   : > { %1372 = vst.msk [vmem:[#allocation2 + $0xcc] sm:$0xf] %vm1320_vm4, %v8878_v62  ;;  %v761_v5 = vadd.f32 %v10436_v55, %v760_v1  ;;  %v9130_v6 = vpop.f32.mrb[105].mxu0  ;;  %v10569_v11 = vld [vmem:[#allocation2 + $0xc0] sm:$0xff]   ;;  %v4574_v13 = vsel %vm4529_vm9, %v13745_v3, %v4573_v4  ;;  %v2835_v23 = vrot.slane %v10567_v10, 1 }
 0x1e5   : > { %v763_v12 = vpop.f32.mrb[106].mxu0  ;;  %4651 = vrot.lane.b32.xlu0 %v4574_v13, %s10075_s29  ;;  %v9659_v21 = vld [vmem:[#allocation2 + $0xc0] sm:$0xff]   ;;  %v3345_v22 = vsel %vm2787_vm7, %v13746_v14, %v3344_v9  ;;  %v2229_v24 = vshll.u32 %v10569_v11, 16 }
 0x1e6   : > { %v946_v15 = vmax.f32 %v761_v5, 0.0  ;;  %v764_v19 = vadd.f32 %v10436_v55, %v763_v12  ;;  %v9131_v20 = vpop.f32.mrb[107].mxu0  ;;  %v5744_v31 = vshrl.u32 %v9659_v21, 16  ;;  %v2836_v34 = vsel %vm2787_vm7, %v2833_v45, %v2835_v23  ;;  %v10611_v57 = vld [vmem:[#allocation2 + $0xc0] sm:$0xff]  }
 0x1e7   : > { %3422 = vrot.lane.b32.xlu1 %v3345_v22, %s10076_s7  ;;  %v10599_v36 = vrot.slane %v2229_v24, 1  ;;  %v5747_v37 = vshll.u32 %v9659_v21, 16  ;;  %13771 = vst [vmem:[#allocation16_spill] sm:$0xff] %v10611_v57  ;;  %v13744_v21 = vrot.slane %v10611_v57, 2 }
 0x1e8   : > { %v8879_v25 = vpack.c.bf16 %v946_v15, %v946_v15  ;;  %v947_v26 = vmax.f32 %v764_v19, 0.0  ;;  %v5746_v48 = vrot.slane %v5744_v31, 2 }
 0x1e9   : > { %v10587_v27 = vld [vmem:[#allocation2 + $0xc4] sm:$0xff]   ;;  %v2232_v49 = vsel %vm2036_vm8, %v2227_v44, %v10599_v36  ;;  %v5749_v50 = vrot.slane %v5747_v37, 3 }
 0x1ea   : > { %1373 = vst.msk [vmem:[#allocation2 + $0xd0] sm:$0xf] %vm1320_vm4, %v8879_v25  ;;  %v8880_v29 = vpack.c.bf16 %v947_v26, %v947_v26  ;;  %v10591_v30 = vld [vmem:[#allocation2 + $0xc4] sm:$0xff]   ;;  %v4575_v35 = vrot.slane %v10587_v27, 2 }
 0x1eb   : > { %v768_v32 = vpop.f32.mrb[108].mxu0  ;;  %2913 = vrot.lane.b32.xlu1 %v2836_v34, %s10074_s28  ;;  %v9660_v41 = vld [vmem:[#allocation2 + $0xc8] sm:$0xff]   ;;  %v3346_v47 = vrot.slane %v10591_v30, 1  ;;  %v10623_v6 = vor.u32 %v5749_v50, %v5746_v48  ;;  %v2233_v48 = vshrl.u32 %v10569_v11, 16 }
 0x1ec   : > { %1374 = vst.msk [vmem:[#allocation2 + $0xd4] sm:$0xf] %vm1320_vm4, %v8880_v29  ;;  %v769_v38 = vadd.f32 %v10436_v55, %v768_v32  ;;  %v9134_v39 = vpop.f32.mrb[109].mxu0  ;;  %v4576_v43 = vsel %vm4529_vm9, %v4573_v4, %v4575_v35  ;;  %v5753_v51 = vshrl.u32 %v9660_v41, 16  ;;  %v5756_v53 = vshll.u32 %v9660_v41, 16  ;;  %v9662_v54 = vld [vmem:[#allocation2 + $0xc8] sm:$0xff]  }
 0x1ed   : > { %v771_v42 = vpop.f32.mrb[110].mxu0  ;;  %4653 = vrot.lane.b32.xlu0 %v4576_v43, %s10075_s29  ;;  %v10613_v62 = vld [vmem:[#allocation2 + $0xc8] sm:$0xff]   ;;  %v3347_v5 = vsel %vm2787_vm7, %v3344_v9, %v3346_v47  ;;  %13772 = vst [vmem:[#allocation17_spill] sm:$0xff] %v10623_v6  ;;  %v5085_v13 = vrot.slane %v9662_v54, 2  ;;  %v2235_v10 = vor.u32 %v2233_v48, %v10599_v36 }
 0x1ee   : > { %v948_v40 = vmax.f32 %v769_v38, 0.0  ;;  %v772_v45 = vadd.f32 %v10436_v55, %v771_v42  ;;  %v9135_v46 = vpop.f32.mrb[111].mxu0  ;;  %v5755_v60 = vrot.slane %v5753_v51, 2  ;;  %v5758_v61 = vrot.slane %v5756_v53, 3  ;;  %v10625_v15 = vld [vmem:[#allocation2 + $0xc8] sm:$0xff]  }
 0x1ef   : > { %2399 = vrot.lane.b32.xlu1 %v2232_v49, %s10075_s29  ;;  %v2837_v29 = vrot.slane %v10613_v62, 1  ;;  %v5086_v31 = vsel %vm4529_vm9, %v13744_v21, %v5085_v13  ;;  %v2237_v32 = vshll.u32 %v10625_v15, 16 }
 0x1f0   : > { %v8881_v33 = vpack.c.bf16 %v948_v40, %v948_v40  ;;  %v949_v59 = vmax.f32 %v772_v45, 0.0  ;;  %v5759_v12 = vor.u32 %v5758_v61, %v5755_v60 }
 0x1f1   : > { %v10616_v2 = vld [vmem:[#allocation2 + $0xcc] sm:$0xff]   ;;  %v2838_v46 = vsel %vm2787_vm7, %v2835_v23, %v2837_v29  ;;  %v2239_v49 = vrot.slane %v2237_v32, 1 }
 0x1f2   : > { %1375 = vst.msk [vmem:[#allocation2 + $0xd8] sm:$0xf] %vm1320_vm4, %v8881_v33  ;;  %v8882_v1 = vpack.c.bf16 %v949_v59, %v949_v59  ;;  %v5760_v63 = vsel %vm5554_vm10, %v10623_v6, %v5759_v12  ;;  %v4577_v9 = vrot.slane %v10616_v2, 2 }
 0x1f3   : > { %v776_v4 = vpop.f32.mrb[112].mxu0  ;;  %3424 = vrot.lane.b32.xlu1 %v3347_v5, %s10076_s7  ;;  %v10634_v24 = vld [vmem:[#allocation2 + $0xd0] sm:$0xff]   ;;  %5956 = vrot.lane.b32.xlu0 %v5760_v63, %s10076_s7  ;;  %v2240_v5 = vsel %vm2036_vm8, %v2235_v10, %v2239_v49 }
 0x1f4   : > { %1376 = vst.msk [vmem:[#allocation2 + $0xdc] sm:$0xf] %vm1320_vm4, %v8882_v1  ;;  %v777_v19 = vadd.f32 %v10436_v55, %v776_v4  ;;  %v9138_v20 = vpop.f32.mrb[113].mxu0  ;;  %v9667_v25 = vld [vmem:[#allocation2 + $0xd0] sm:$0xff]   ;;  %v4578_v41 = vsel %vm4529_vm9, %v4575_v35, %v4577_v9  ;;  %v5087_v42 = vrot.slane %v10634_v24, 2 }
 0x1f5   : > { %v779_v22 = vpop.f32.mrb[114].mxu0  ;;  %v5762_v34 = vshrl.u32 %v9667_v25, 16  ;;  %v5765_v37 = vshll.u32 %v9667_v25, 16  ;;  %v10656_v35 = vld [vmem:[#allocation2 + $0xcc] sm:$0xff]  }
 0x1f6   : > { %v950_v26 = vmax.f32 %v777_v19, 0.0  ;;  %v780_v27 = vadd.f32 %v10436_v55, %v779_v22  ;;  %v9139_v28 = vpop.f32.mrb[115].mxu0  ;;  %v5088_v53 = vsel %vm4529_vm9, %v5085_v13, %v5087_v42  ;;  %v10669_v33 = vld [vmem:[#allocation2 + $0xd0] sm:$0xff]   ;;  %v3348_v13 = vrot.slane %v10656_v35, 1 }
 0x1f7   : > { %5163 = vrot.lane.b32.xlu1 %v5086_v31, %s10074_s28  ;;  %v5764_v43 = vrot.slane %v5762_v34, 2  ;;  %v5767_v44 = vrot.slane %v5765_v37, 3  ;;  %4655 = vrot.lane.b32.xlu0 %v4578_v41, %s10075_s29  ;;  %v10677_v36 = vld [vmem:[#allocation2 + $0xd0] sm:$0xff]   ;;  %v2839_v32 = vrot.slane %v10669_v33, 1 }
 0x1f8   : > { %v8883_v38 = vpack.c.bf16 %v950_v26, %v950_v26  ;;  %v951_v39 = vmax.f32 %v780_v27, 0.0  ;;  %v3349_v31 = vsel %vm2787_vm7, %v3346_v47, %v3348_v13 }
 0x1f9   : > { %v10665_v23 = vor.u32 %v5767_v44, %v5764_v43  ;;  %v10667_v11 = vld [vmem:[#allocation2 + $0xd4] sm:$0xff]   ;;  %v2840_v2 = vsel %vm2787_vm7, %v2837_v29, %v2839_v32 }
 0x1fa   : > { %1377 = vst.msk [vmem:[#allocation2 + $0xe0] sm:$0xf] %vm1320_vm4, %v8883_v38  ;;  %v8884_v40 = vpack.c.bf16 %v951_v39, %v951_v39  ;;  %v4579_v25 = vrot.slane %v10667_v11, 2  ;;  %v2249_v11 = vshrl.u32 %v10677_v36, 16 }
 0x1fb   : > { %v784_v45 = vpop.f32.mrb[116].mxu0  ;;  %2915 = vrot.lane.b32.xlu1 %v2838_v46, %s10074_s28  ;;  %5165 = vrot.lane.b32.xlu0 %v5088_v53, %s10074_s28  ;;  %v10673_v1 = vld [vmem:[#allocation2 + $0xd8] sm:$0xff]   ;;  %v5769_v22 = vsel %vm5554_vm10, %v5759_v12, %v10665_v23  ;;  %v2245_v12 = vshll.u32 %v10677_v36, 16 }
 0x1fc   : > { %1378 = vst.msk [vmem:[#allocation2 + $0xe4] sm:$0xf] %vm1320_vm4, %v8884_v40  ;;  %v785_v50 = vadd.f32 %v10436_v55, %v784_v45  ;;  %v9142_v51 = vpop.f32.mrb[117].mxu0  ;;  %v9673_v4 = vld [vmem:[#allocation2 + $0xd8] sm:$0xff]   ;;  %v5089_v34 = vrot.slane %v10673_v1, 2  ;;  %v4580_v30 = vsel %vm4529_vm9, %v4577_v9, %v4579_v25  ;;  %v2241_v45 = vshrl.u32 %v10625_v15, 16 }
 0x1fd   : > { %v787_v54 = vpop.f32.mrb[118].mxu0  ;;  %v5771_v63 = vshrl.u32 %v9673_v4, 16  ;;  %v5774_v26 = vshll.u32 %v9673_v4, 16  ;;  %v10704_v46 = vld [vmem:[#allocation2 + $0xd4] sm:$0xff]   ;;  %v2247_v48 = vrot.slane %v2245_v12, 1 }
 0x1fe   : > { %v952_v59 = vmax.f32 %v785_v50, 0.0  ;;  %v788_v60 = vadd.f32 %v10436_v55, %v787_v54  ;;  %v9143_v61 = vpop.f32.mrb[119].mxu0  ;;  %v5090_v15 = vsel %vm4529_vm9, %v5087_v42, %v5089_v34  ;;  %v2243_v54 = vor.u32 %v2241_v45, %v2239_v49  ;;  %v10726_v4 = vld [vmem:[#allocation2 + $0xd8] sm:$0xff]  }
 0x1ff   : > { %2401 = vrot.lane.b32.xlu1 %v2240_v5, %s10075_s29  ;;  %5958 = vrot.lane.b32.xlu0 %v5769_v22, %s10076_s7  ;;  %v5773_v39 = vrot.slane %v5771_v63, 2  ;;  %v5776_v41 = vrot.slane %v5774_v26, 3  ;;  %v10730_v42 = vld [vmem:[#allocation2 + $0xd8] sm:$0xff]   ;;  %v2841_v12 = vrot.slane %v10726_v4, 1 }
 0x200   : > { %v8885_v19 = vpack.c.bf16 %v952_v59, %v952_v59  ;;  %v953_v20 = vmax.f32 %v788_v60, 0.0  ;;  %v2248_v59 = vsel %vm2036_vm8, %v2243_v54, %v2247_v48  ;;  %v3350_v60 = vrot.slane %v10704_v46, 1 }
 0x201   : > { %v10711_v9 = vld [vmem:[#allocation2 + $0xdc] sm:$0xff]   ;;  %v10719_v10 = vor.u32 %v5776_v41, %v5773_v39  ;;  %v2842_v41 = vsel %vm2787_vm7, %v2839_v32, %v2841_v12  ;;  %v2251_v32 = vor.u32 %v2249_v11, %v2247_v48 }
 0x202   : > { %1379 = vst.msk [vmem:[#allocation2 + $0xe8] sm:$0xf] %vm1320_vm4, %v8885_v19  ;;  %v8886_v27 = vpack.c.bf16 %v953_v20, %v953_v20  ;;  %v4581_v61 = vrot.slane %v10711_v9, 2 }
 0x203   : > { %v792_v28 = vpop.f32.mrb[120].mxu0  ;;  %3426 = vrot.lane.b32.xlu1 %v3349_v31, %s10076_s7  ;;  %4657 = vrot.lane.b32.xlu0 %v4580_v30, %s10075_s29  ;;  %v9679_v53 = vld [vmem:[#allocation2 + $0xe0] sm:$0xff]   ;;  %v5778_v20 = vsel %vm5554_vm10, %v10665_v23, %v10719_v10  ;;  %v2253_v23 = vshll.u32 %v10730_v42, 16 }
 0x204   : > { %1380 = vst.msk [vmem:[#allocation2 + $0xec] sm:$0xf] %vm1320_vm4, %v8886_v27  ;;  %v793_v37 = vadd.f32 %v10436_v55, %v792_v28  ;;  %v9146_v38 = vpop.f32.mrb[121].mxu0  ;;  %v10728_v24 = vld [vmem:[#allocation2 + $0xe0] sm:$0xff]   ;;  %v5780_v19 = vshrl.u32 %v9679_v53, 16  ;;  %v5783_v22 = vshll.u32 %v9679_v53, 16  ;;  %v4582_v39 = vsel %vm4529_vm9, %v4579_v25, %v4581_v61 }
 0x205   : > { %v795_v47 = vpop.f32.mrb[122].mxu0  ;;  %v10739_v27 = vld [vmem:[#allocation8] ss:$0 sm:$0xff]  ;;  %v5091_v30 = vrot.slane %v10728_v24, 2  ;;  %v10764_v25 = vld [vmem:[#allocation2 + $0xdc] sm:$0xff]  }
 0x206   : > { %v954_v43 = vmax.f32 %v793_v37, 0.0  ;;  %v796_v44 = vadd.f32 %v10436_v55, %v795_v47  ;;  %v9147_v40 = vpop.f32.mrb[123].mxu0  ;;  %v5782_v47 = vrot.slane %v5780_v19, 2  ;;  %v5785_v35 = vrot.slane %v5783_v22, 3  ;;  %v10786_v48 = vld [vmem:[#allocation2 + $0xe0] sm:$0xff]  }
 0x207   : > { %2917 = vrot.lane.b32.xlu1 %v2840_v2, %s10074_s28  ;;  %5167 = vrot.lane.b32.xlu0 %v5090_v15, %s10074_s28  ;;  %v5092_v33 = vsel %vm4529_vm9, %v5089_v34, %v5091_v30  ;;  %v3352_v34 = vrot.slane %v10764_v25, 1 }
 0x208   : > { %v8887_v50 = vpack.c.bf16 %v954_v43, %v954_v43  ;;  %v955_v51 = vmax.f32 %v796_v44, 0.0  ;;  %v2255_v44 = vrot.slane %v2253_v23, 1  ;;  %v2261_v23 = vshll.u32 %v10786_v48, 16 }
 0x209   : > { %v10776_v36 = vld [vmem:[#allocation2 + $0xe4] sm:$0xff]  }
 0x20a   : > { %1381 = vst.msk [vmem:[#allocation2 + $0xf0] sm:$0xf] %vm1320_vm4, %v8887_v50  ;;  %v8888_v62 = vpack.c.bf16 %v955_v51, %v955_v51  ;;  %v10774_v50 = vor.u32 %v5785_v35, %v5782_v47  ;;  %v2256_v1 = vsel %vm2036_vm8, %v2251_v32, %v2255_v44  ;;  %v10823_v9 = vld [vmem:[#allocation2 + $0xe4] sm:$0xff]  }
 0x20b   : > { %v800_v29 = vpop.f32.mrb[124].mxu0  ;;  %2403 = vrot.lane.b32.xlu1 %v2248_v59, %s10075_s29  ;;  %5960 = vrot.lane.b32.xlu0 %v5778_v20, %s10076_s7  ;;  %v9685_v2 = vld [vmem:[#allocation2 + $0xe8] sm:$0xff]   ;;  %v4583_v20 = vrot.slane %v10776_v36, 2  ;;  %v3354_v24 = vrot.slane %v10823_v9, 1 }
 0x20c   : > { %1382 = vst.msk [vmem:[#allocation2 + $0xf4] sm:$0xf] %vm1320_vm4, %v8888_v62  ;;  %v801_v49 = vadd.f32 %v10436_v55, %v800_v29  ;;  %v9150_v5 = vpop.f32.mrb[125].mxu0  ;;  %v3351_v55 = vsel %vm2787_vm7, %v3348_v13, %v3350_v60  ;;  %v10780_v62 = vld [vmem:[#allocation2 + $0xe0] sm:$0xff]   ;;  %v10782_v29 = vld [vmem:[#allocation2 + $0xe8] sm:$0xff]   ;;  %v5787_v19 = vsel %vm5554_vm10, %v10719_v10, %v10774_v50  ;;  %v2257_v10 = vshrl.u32 %v10730_v42, 16 }
 0x20d   : > { %v803_v63 = vpop.f32.mrb[126].mxu0  ;;  %v5789_v5 = vshrl.u32 %v9685_v2, 16  ;;  %v4584_v46 = vsel %vm4529_vm9, %v4581_v61, %v4583_v20 }
 0x20e   : > { %v956_v26 = vmax.f32 %v801_v49, 0.0  ;;  %v804_v28 = vadd.f32 %v10739_v27, %v803_v63  ;;  %v9151_v31 = vpop.f32.mrb[127].mxu0  ;;  %v5792_v63 = vshll.u32 %v9685_v2, 16  ;;  %v10826_v2 = vld [vmem:[#allocation2 + $0x8] sm:$0xff]   ;;  %v2259_v4 = vor.u32 %v2257_v10, %v2255_v44 }
 0x20f   : > { %3428 = vrot.lane.b32.xlu1 %v3351_v55, %s10076_s7  ;;  %4659 = vrot.lane.b32.xlu0 %v4582_v39, %s10075_s29  ;;  %v5093_v31 = vrot.slane %v10782_v29, 2  ;;  %v5791_v39 = vrot.slane %v5789_v5, 2  ;;  %v10845_v44 = vld [vmem:[#allocation2 + $0xe8] sm:$0xff]  }
 0x210   : > { %v8889_v37 = vpack.c.bf16 %v956_v26, %v956_v26  ;;  %v957_v38 = vmax.f32 %v804_v28, 0.0  ;;  %v2843_v26 = vrot.slane %v10780_v62, 1  ;;  %v3353_v28 = vsel %vm2787_vm7, %v3350_v60, %v3352_v34 }
 0x211   : > { %v5794_v60 = vrot.slane %v5792_v63, 3  ;;  %v5094_v32 = vsel %vm4529_vm9, %v5091_v30, %v5093_v31 }
 0x212   : > { %1383 = vst.msk [vmem:[#allocation2 + $0xf8] sm:$0xf] %vm1320_vm4, %v8889_v37  ;;  %v8890_v13 = vpack.c.bf16 %v957_v38, %v957_v38  ;;  %v10804_v37 = vld [vmem:[#allocation2] sm:$0xff]   ;;  %v2844_v11 = vsel %vm2787_vm7, %v2841_v12, %v2843_v26  ;;  %v10836_v12 = vld [vmem:[#allocation2 + $0xec] sm:$0xff]  }
 0x213   : > { %v808_v43 = vpop.f32.mrb[128].mxu0  ;;  %2919 = vrot.lane.b32.xlu1 %v2842_v41, %s10074_s28  ;;  %5169 = vrot.lane.b32.xlu0 %v5092_v33, %s10074_s28  ;;  %v2040_v33 = vshll.u32 %v10804_v37, 16  ;;  %v10850_v5 = vld [vmem:[#allocation2 + $0xf0] sm:$0xff]   ;;  %v4585_v10 = vrot.slane %v10836_v12, 2 }
 0x214   : > { %1384 = vst.msk [vmem:[#allocation2 + $0xfc] sm:$0xf] %vm1320_vm4, %v8890_v13  ;;  %v809_v40 = vadd.f32 %v10739_v27, %v808_v43  ;;  %v9154_v45 = vpop.f32.mrb[129].mxu0  ;;  %v10816_v43 = vld [vmem:[#allocation2] sm:$0xfe]   ;;  %v5095_v25 = vrot.slane %v10850_v5, 2 }
 0x215   : > { %v811_v51 = vpop.f32.mrb[130].mxu0 }
 0x216   : > { %v958_v53 = vmax.f32 %v809_v40, 0.0  ;;  %v812_v15 = vadd.f32 %v10739_v27, %v811_v51  ;;  %v9155_v54 = vpop.f32.mrb[131].mxu0  ;;  %v2263_v40 = vrot.slane %v2261_v23, 1  ;;  %v10834_v51 = vor.u32 %v5794_v60, %v5791_v39 }
 0x217   : > { %2405 = vrot.lane.b32.xlu1 %v2256_v1, %s10075_s29  ;;  %5962 = vrot.lane.b32.xlu0 %v5787_v19, %s10076_s7  ;;  %v10840_v54 = vld [vmem:[#allocation2 + $0xe8] sm:$0xff]  }
 0x218   : > { %v8891_v59 = vpack.c.bf16 %v958_v53, %v958_v53  ;;  %v959_v49 = vmax.f32 %v812_v15, 0.0  ;;  %v9691_v53 = vld [vmem:[#allocation2 + $0xf0] sm:$0xff]  }
 0x219   : > { %v5798_v23 = vshrl.u32 %v9691_v53, 16 }
 0x21a   : > { %1385 = vst.msk [vmem:[#allocation2 + $0x100] sm:$0xf] %vm1320_vm4, %v8891_v59  ;;  %v8892_v22 = vpack.c.bf16 %v959_v49, %v959_v49  ;;  %v2264_v59 = vsel %vm2036_vm8, %v2259_v4, %v2263_v40  ;;  %v4586_v4 = vsel %vm4529_vm9, %v4583_v20, %v4585_v10 }
 0x21b   : > { %v816_v55 = vpop.f32.mrb[132].mxu0  ;;  %3430 = vrot.lane.b32.xlu1 %v3353_v28, %s10076_s7  ;;  %4661 = vrot.lane.b32.xlu0 %v4584_v46, %s10075_s29  ;;  %v10855_v28 = vld [vmem:[#allocation2 + $0x8] sm:$0xff]  }
 0x21c   : > { %1386 = vst.msk [vmem:[#allocation2 + $0x104] sm:$0xf] %vm1320_vm4, %v8892_v22  ;;  %v817_v38 = vadd.f32 %v10739_v27, %v816_v55  ;;  %v9158_v47 = vpop.f32.mrb[133].mxu0  ;;  %v10853_v22 = vrot.slane %v2040_v33, 1  ;;  %v5796_v55 = vsel %vm5554_vm10, %v10774_v50, %v10834_v51  ;;  %v3355_v50 = vsel %vm2787_vm7, %v3352_v34, %v3354_v24 }
 0x21d   : > { %v819_v42 = vpop.f32.mrb[134].mxu0  ;;  %v2845_v47 = vrot.slane %v10840_v54, 1 }
 0x21e   : > { %v960_v35 = vmax.f32 %v817_v38, 0.0  ;;  %v820_v13 = vadd.f32 %v10739_v27, %v819_v42  ;;  %v9159_v41 = vpop.f32.mrb[135].mxu0  ;;  %v5801_v38 = vshll.u32 %v9691_v53, 16  ;;  %v5800_v53 = vrot.slane %v5798_v23, 2 }
 0x21f   : > { %2921 = vrot.lane.b32.xlu1 %v2844_v11, %s10074_s28  ;;  %5171 = vrot.lane.b32.xlu0 %v5094_v32, %s10074_s28  ;;  %v10867_v41 = vld [vmem:[#allocation2 + $0xc] sm:$0xfc]   ;;  %v2265_v11 = vshrl.u32 %v10786_v48, 16  ;;  %v2846_v36 = vsel %vm2787_vm7, %v2843_v26, %v2845_v47 }
 0x220   : > { %v8893_v61 = vpack.c.bf16 %v960_v35, %v960_v35  ;;  %v961_v45 = vmax.f32 %v820_v13, 0.0  ;;  %v2045_v35 = vshll.u32 %v10826_v2, 16  ;;  %v10865_v13 = vld [vmem:[#allocation2 + $0xc] sm:$0xfe]   ;;  %v5803_v34 = vrot.slane %v5801_v38, 3 }
 0x221   : > { %v2267_v20 = vor.u32 %v2265_v11, %v2263_v40  ;;  %v5096_v40 = vsel %vm4529_vm9, %v5093_v31, %v5095_v25  ;;  %v10967_v32 = vld [vmem:[#allocation2 + $0xfc] sm:$0xff]  }
 0x222   : > { %1387 = vst.msk [vmem:[#allocation2 + $0x108] sm:$0xf] %vm1320_vm4, %v8893_v61  ;;  %v8894_v15 = vpack.c.bf16 %v961_v45, %v961_v45  ;;  %v2269_v61 = vshll.u32 %v10845_v44, 16  ;;  %v10900_v23 = vrot.slane %v2045_v35, 1 }
 0x223   : > { %v824_v30 = vpop.f32.mrb[136].mxu0  ;;  %2407 = vrot.lane.b32.xlu1 %v2264_v59, %s10075_s29  ;;  %5964 = vrot.lane.b32.xlu0 %v5796_v55, %s10076_s7 }
 0x224   : > { %1388 = vst.msk [vmem:[#allocation2 + $0x10c] sm:$0xf] %vm1320_vm4, %v8894_v15  ;;  %v825_v19 = vadd.f32 %v10739_v27, %v824_v30  ;;  %v9162_v63 = vpop.f32.mrb[137].mxu0  ;;  %v10884_v15 = vld [vmem:[#allocation2 + $0x10] sm:$0xff]  }
 0x225   : > { %v827_v39 = vpop.f32.mrb[138].mxu0  ;;  %v10889_v30 = vld [vmem:[#allocation2 + $0x10] sm:$0xff]  }
 0x226   : > { %v962_v46 = vmax.f32 %v825_v19, 0.0  ;;  %v828_v60 = vadd.f32 %v10739_v27, %v827_v39  ;;  %v9163_v42 = vpop.f32.mrb[139].mxu0  ;;  %v10896_v19 = vrot.slane %v2269_v61, 1  ;;  %v10898_v63 = vld [vmem:[#allocation2 + $0xec] sm:$0xff]   ;;  %v9699_v39 = vld [vmem:[#allocation2 + $0xf8] sm:$0xff]  }
 0x227   : > { %3432 = vrot.lane.b32.xlu1 %v3355_v50, %s10076_s7  ;;  %4663 = vrot.lane.b32.xlu0 %v4586_v4, %s10075_s29  ;;  %v10914_v42 = vld [vmem:[#allocation2 + $0xf4] sm:$0xff]   ;;  %v2053_v4 = vshll.u32 %v10884_v15, 16 }
 0x228   : > { %v8895_v45 = vpack.c.bf16 %v962_v46, %v962_v46  ;;  %v963_v33 = vmax.f32 %v828_v60, 0.0  ;;  %v10912_v60 = vor.u32 %v5803_v34, %v5800_v53  ;;  %v10917_v50 = vld [vmem:[#allocation2 + $0xf0] sm:$0xff]   ;;  %v2272_v31 = vsel %vm2036_vm8, %v2267_v20, %v10896_v19 }
 0x229   : > { %v3356_v53 = vrot.slane %v10898_v63, 1  ;;  %v10925_v34 = vld [vmem:[#allocation2 + $0xf0] sm:$0xff]  }
 0x22a   : > { %1389 = vst.msk [vmem:[#allocation2 + $0x110] sm:$0xf] %vm1320_vm4, %v8895_v45  ;;  %v8896_v48 = vpack.c.bf16 %v963_v33, %v963_v33  ;;  %v9721_v33 = vld [vmem:[#allocation2 + $0xb4] sm:$0xff]   ;;  %v2277_v3 = vshll.u32 %v10925_v34, 16 }
 0x22b   : > { %v832_v55 = vpop.f32.mrb[140].mxu0  ;;  %2923 = vrot.lane.b32.xlu1 %v2846_v36, %s10074_s28  ;;  %5173 = vrot.lane.b32.xlu0 %v5096_v40, %s10074_s28  ;;  %v5805_v40 = vsel %vm5554_vm10, %v10834_v51, %v10912_v60  ;;  %v4004_v21 = vshrl.u32 %v9721_v33, 16  ;;  %v2273_v51 = vshrl.u32 %v10845_v44, 16 }
 0x22c   : > { %1390 = vst.msk [vmem:[#allocation2 + $0x114] sm:$0xf] %vm1320_vm4, %v8896_v48  ;;  %v833_v38 = vadd.f32 %v10739_v27, %v832_v55  ;;  %v9166_v46 = vpop.f32.mrb[141].mxu0  ;;  %v10928_v48 = vld [vmem:[#allocation2 + $0xf8] sm:$0xff]   ;;  %v5807_v55 = vshrl.u32 %v9699_v39, 16 }
 0x22d   : > { %v835_v35 = vpop.f32.mrb[142].mxu0  ;;  %v9722_v46 = vld [vmem:[#allocation2 + $0xbc] sm:$0xff]  }
 0x22e   : > { %v964_v11 = vmax.f32 %v833_v38, 0.0  ;;  %v836_v61 = vadd.f32 %v10739_v27, %v835_v35  ;;  %v9167_v45 = vpop.f32.mrb[143].mxu0  ;;  %v4587_v35 = vrot.slane %v10914_v42, 2  ;;  %v4013_v17 = vshrl.u32 %v9722_v46, 16  ;;  %v11085_v42 = vld [vmem:[#allocation2 + $0x6c] sm:$0xf] }
 0x22f   : > { %2409 = vrot.lane.b32.xlu1 %v2272_v31, %s10075_s29  ;;  %v5810_v45 = vshll.u32 %v9699_v39, 16  ;;  %5966 = vrot.lane.b32.xlu0 %v5805_v40, %s10076_s7  ;;  %v4007_v31 = vshll.u32 %v9721_v33, 16  ;;  %v10946_v40 = vld [vmem:[#allocation2 + $0xf4] sm:$0xff]   ;;  %v4016_v29 = vshll.u32 %v9722_v46, 16  ;;  %v9708_v46 = vld [vmem:[#allocation2 + $0x100] sm:$0xff]  }
 0x230   : > { %v8897_v36 = vpack.c.bf16 %v964_v11, %v964_v11  ;;  %v965_v38 = vmax.f32 %v836_v61, 0.0  ;;  %v3357_v11 = vsel %vm2787_vm7, %v3354_v24, %v3356_v53  ;;  %v2847_v61 = vrot.slane %v10917_v50, 1  ;;  %v10950_v24 = vld [vmem:[#allocation2 + $0xc4] sm:$0xff]  }
 0x231   : > { %v4588_v44 = vsel %vm4529_vm9, %v4585_v10, %v4587_v35  ;;  %v5812_v14 = vrot.slane %v5810_v45, 3  ;;  %v2275_v10 = vor.u32 %v2273_v51, %v10896_v19  ;;  %v10965_v45 = vrot.slane %v2277_v3, 1 }
 0x232   : > { %1391 = vst.msk [vmem:[#allocation2 + $0x118] sm:$0xf] %vm1320_vm4, %v8897_v36  ;;  %v8898_v20 = vpack.c.bf16 %v965_v38, %v965_v38  ;;  %v5097_v36 = vrot.slane %v10928_v48, 2  ;;  %v5809_v38 = vrot.slane %v5807_v55, 2  ;;  %v2848_v12 = vsel %vm2787_vm7, %v2845_v47, %v2847_v61 }
 0x233   : > { %v840_v39 = vpop.f32.mrb[144].mxu0  ;;  %3434 = vrot.lane.b32.xlu1 %v3357_v11, %s10076_s7  ;;  %4665 = vrot.lane.b32.xlu0 %v4588_v44, %s10075_s29  ;;  %v4015_v44 = vrot.slane %v4013_v17, 1  ;;  %v3358_v3 = vrot.slane %v10946_v40, 1  ;;  %v10980_v17 = vld [vmem:[#allocation2 + $0xf8] sm:$0xff]   ;;  %v4022_v5 = vshrl.u32 %v10950_v24, 16 }
 0x234   : > { %1392 = vst.msk [vmem:[#allocation2 + $0x11c] sm:$0xf] %vm1320_vm4, %v8898_v20  ;;  %v841_v9 = vadd.f32 %v10739_v27, %v840_v39  ;;  %v9170_v33 = vpop.f32.mrb[145].mxu0  ;;  %v4006_v39 = vrot.slane %v4004_v21, 1  ;;  %v4018_v21 = vrot.slane %v4016_v29, 2  ;;  %v5098_v54 = vsel %vm4529_vm9, %v5095_v25, %v5097_v36 }
 0x235   : > { %v843_v11 = vpop.f32.mrb[146].mxu0  ;;  %v4009_v33 = vrot.slane %v4007_v31, 2  ;;  %v6084_v31 = vld [vmem:[#allocation2 + $0x50] sm:$0xf]  ;;  %v10975_v47 = vor.u32 %v5812_v14, %v5809_v38  ;;  %v2280_v14 = vsel %vm2036_vm8, %v2275_v10, %v10965_v45  ;;  %v4589_v25 = vrot.slane %v10967_v32, 2  ;;  %v10989_v38 = vld [vmem:[#allocation2 + $0x100] sm:$0xff]  }
 0x236   : > { %v966_v55 = vmax.f32 %v841_v9, 0.0  ;;  %v844_v20 = vadd.f32 %v10739_v27, %v843_v11  ;;  %v9171_v26 = vpop.f32.mrb[147].mxu0  ;;  %v6085_v11 = vld [vmem:[#allocation2 + $0x54] sm:$0xf] }
 0x237   : > { %2925 = vrot.lane.b32.xlu1 %v2848_v12, %s10074_s28  ;;  %5175 = vrot.lane.b32.xlu0 %v5098_v54, %s10074_s28  ;;  %v10983_v51 = vor.u32 %v4009_v33, %v4006_v39  ;;  %v8710_v54 = vcombine.low %v6084_v31, %v6085_v11  ;;  %v10998_v10 = vld [vmem:[#allocation2 + $0x14] sm:$0xff]   ;;  %v5819_v31 = vshll.u32 %v9708_v46, 16  ;;  %v4590_v63 = vsel %vm4529_vm9, %v4587_v35, %v4589_v25  ;;  %v11041_v35 = vld [vmem:[#allocation2 + $0x5c] sm:$0xf] }
 0x238   : > { %v8899_v9 = vpack.c.bf16 %v966_v55, %v966_v55  ;;  %v967_v26 = vmax.f32 %v844_v20, 0.0  ;;  %v4019_v55 = vor.u32 %v4018_v21, %v4015_v44  ;;  %v10991_v20 = vld [vmem:[#allocation2 + $0xf8] sm:$0xff]   ;;  %v5814_v21 = vsel %vm5554_vm10, %v10912_v60, %v10975_v47 }
 0x239   : > { %v3359_v60 = vsel %vm2787_vm7, %v3356_v53, %v3358_v3 }
 0x23a   : > { %1393 = vst.msk [vmem:[#allocation2 + $0x120] sm:$0xf] %vm1320_vm4, %v8899_v9  ;;  %v8900_v29 = vpack.c.bf16 %v967_v26, %v967_v26  ;;  %v5816_v9 = vshrl.u32 %v9708_v46, 16  ;;  %v4020_v33 = vsel %vm3814_vm6, %v10983_v51, %v4019_v55  ;;  %v11000_v26 = vld [vmem:[#allocation2 + $0x14] sm:$0xff]   ;;  %v2285_v46 = vshll.u32 %v10991_v20, 16 }
 0x23b   : > { %v848_v12 = vpop.f32.mrb[148].mxu0  ;;  %2411 = vrot.lane.b32.xlu1 %v2280_v14, %s10075_s29  ;;  %4234 = vst.msk [vmem:[#allocation3 + $0x200] sm:$0xff] %vm1719_vm5, %v4020_v33  ;;  %v4024_v14 = vrot.slane %v4022_v5, 1  ;;  %5968 = vrot.lane.b32.xlu0 %v5814_v21, %s10076_s7 }
 0x23c   : > { %1394 = vst.msk [vmem:[#allocation2 + $0x124] sm:$0xf] %vm1320_vm4, %v8900_v29  ;;  %v849_v39 = vadd.f32 %v10739_v27, %v848_v12  ;;  %v9174_v44 = vpop.f32.mrb[149].mxu0  ;;  %v4025_v29 = vshll.u32 %v10950_v24, 16  ;;  %v2849_v12 = vrot.slane %v10980_v17, 1  ;;  %v5099_v24 = vrot.slane %v10989_v38, 2 }
 0x23d   : > { %v851_v11 = vpop.f32.mrb[150].mxu0  ;;  %v2281_v44 = vshrl.u32 %v10925_v34, 16  ;;  %v9732_v34 = vld [vmem:[%s13741_s3 + $0x58] sm:$0xff]   ;;  %v5818_v53 = vrot.slane %v5816_v9, 2  ;;  %v11162_v17 = vld [vmem:[#allocation2 + $0x74] sm:$0xf] }
 0x23e   : > { %v968_v19 = vmax.f32 %v849_v39, 0.0  ;;  %v852_v62 = vadd.f32 %v10739_v27, %v851_v11  ;;  %v9175_v49 = vpop.f32.mrb[151].mxu0  ;;  %v4027_v5 = vrot.slane %v4025_v29, 2  ;;  %v5821_v39 = vrot.slane %v5819_v31, 3  ;;  %v11036_v29 = vld [vmem:[#allocation2 + $0xfc] sm:$0xff]   ;;  %9383 = vmatpush1.bf16.msra.mxu1 %v9732_v34  ;;  %6913 = vmatpush1.bf16.msra.mxu0 %v9732_v34 }
 0x23f   : > { %3436 = vrot.lane.b32.xlu1 %v3359_v60, %s10076_s7  ;;  %v11024_v49 = vrot.slane %v2053_v4, 1  ;;  %4667 = vrot.lane.b32.xlu0 %v4590_v63, %s10075_s29  ;;  %v2283_v9 = vor.u32 %v2281_v44, %v10965_v45  ;;  %v11049_v31 = vrot.slane %v2285_v46, 1  ;;  %v9736_v45 = vld [vmem:[%s13741_s3 + $0x60] sm:$0xff]   ;;  %v5100_v46 = vsel %vm4529_vm9, %v5097_v36, %v5099_v24  ;;  %v6090_v60 = vld [vmem:[#allocation2 + $0x68] sm:$0xf] }
 0x240   : > { %v8901_v33 = vpack.c.bf16 %v968_v19, %v968_v19  ;;  %v969_v21 = vmax.f32 %v852_v62, 0.0  ;;  %v11031_v11 = vor.u32 %v4027_v5, %v4024_v14  ;;  %v9733_v19 = vld [vmem:[#allocation2 + $0xb8] sm:$0xff]   ;;  %v11033_v62 = vrot.slane %v8710_v54, 3  ;;  %v11051_v14 = vld [vmem:[#allocation2 + $0x104] sm:$0xff]   ;;  %9368 = vmatprep.subr.bf16.mxu1 %v10073_v16  ;;  %6914 = vmatprep.subr.bf16.mxu0 %v10073_v16  ;;  %v11069_v44 = vld [vmem:[#allocation2 + $0x60] sm:$0xf] }
 0x241   : > { %v2850_v54 = vsel %vm2787_vm7, %v2847_v61, %v2849_v12  ;;  %1743 = vst.msk [vmem:[#allocation3 + $0x228] sm:$0xff] %vm1719_vm5, %v9733_v19  ;;  %v11076_v34 = vor.u32 %v5821_v39, %v5818_v53  ;;  %v11078_v63 = vld [vmem:[#allocation2 + $0x100] sm:$0xff]   ;;  %v9718_v19 = vld [vmem:[#allocation2 + $0x108] sm:$0xff]   ;;  %v2288_v36 = vsel %vm2036_vm8, %v2283_v9, %v11049_v31  ;;  %v4591_v53 = vrot.slane %v11051_v14, 2 }
 0x242   : > { %1395 = vst.msk [vmem:[#allocation2 + $0x128] sm:$0xf] %vm1320_vm4, %v8901_v33  ;;  %v8902_v4 = vpack.c.bf16 %v969_v21, %v969_v21  ;;  %v4029_v33 = vsel %vm3814_vm6, %v4019_v55, %v11031_v11  ;;  %v11057_v21 = vld [vmem:[#allocation2 + $0x64] sm:$0xf]  ;;  %v11067_v55 = vld [vmem:[#allocation2 + $0x58] sm:$0xf]  ;;  %9384 = vmatpush1.bf16.msra.mxu1 %v9736_v45  ;;  %6915 = vmatpush1.bf16.msra.mxu0 %v9736_v45 }
 0x243   : > { %v856_v5 = vpop.f32.mrb[152].mxu0  ;;  %2927 = vrot.lane.b32.xlu1 %v2850_v54, %s10074_s28  ;;  %4235 = vst.msk [vmem:[#allocation3 + $0x218] sm:$0xff] %vm1719_vm5, %v4029_v33  ;;  %5177 = vrot.lane.b32.xlu0 %v5100_v46, %s10074_s28  ;;  %v3360_v54 = vrot.slane %v11036_v29, 1  ;;  %v11090_v39 = vld [vmem:[#allocation2 + $0x100] sm:$0xff]   ;;  %v8711_v46 = vcombine.low %v11067_v55, %v11041_v35  ;;  %v9739_v9 = vld [vmem:[%s13741_s3 + $0x68] sm:$0xff]   ;;  %v5823_v45 = vsel %vm5554_vm10, %v10975_v47, %v11076_v34  ;;  %v5825_v59 = vshrl.u32 %v9718_v19, 16 }
 0x244   : > { %1396 = vst.msk [vmem:[#allocation2 + $0x12c] sm:$0xf] %vm1320_vm4, %v8902_v4  ;;  %v857_v50 = vadd.f32 %v10739_v27, %v856_v5  ;;  %v9178_v61 = vpop.f32.mrb[153].mxu0  ;;  %v11082_v5 = vld [vmem:[#allocation2 + $0x108] sm:$0xff]   ;;  %9369 = vmatprep.subr.bf16.mxu1 %v10073_v16  ;;  %6916 = vmatprep.subr.bf16.mxu0 %v10073_v16  ;;  %v5828_v35 = vshll.u32 %v9718_v19, 16  ;;  %v6362_v47 = vsel %vm512_vm1, %v10378_v8, %v11033_v62  ;;  %v2289_v19 = vshrl.u32 %v10991_v20, 16 }
 0x245   : > { %v859_v4 = vpop.f32.mrb[154].mxu0  ;;  %v9740_v55 = vld [vmem:[#allocation2 + $0xcc] sm:$0xff]   ;;  %6472 = vst.msk [vmem:[#allocation3 + $0xa0] sm:$0xff] %vm1719_vm5, %v6362_v47  ;;  %v4592_v8 = vsel %vm4529_vm9, %v4589_v25, %v4591_v53  ;;  %v13748_v20 = vrot.slane %v11082_v5, 2  ;;  %v11136_v32 = vrot.slane %v8711_v46, 3  ;;  %v11373_v52 = vld [vmem:[#allocation2 + $0x11c] sm:$0xff]  }
 0x246   : > { %v970_v33 = vmax.f32 %v857_v50, 0.0  ;;  %v860_v61 = vadd.f32 %v10739_v27, %v859_v4  ;;  %v9179_v48 = vpop.f32.mrb[155].mxu0  ;;  %v8712_v50 = vcombine.low %v11069_v44, %v11057_v21  ;;  %v3361_v21 = vsel %vm2787_vm7, %v3358_v3, %v3360_v54  ;;  %9385 = vmatpush1.bf16.msra.mxu1 %v9739_v9  ;;  %6917 = vmatpush1.bf16.msra.mxu0 %v9739_v9 }
 0x247   : > { %2413 = vrot.lane.b32.xlu1 %v2288_v36, %s10075_s29  ;;  %5970 = vrot.lane.b32.xlu0 %v5823_v45, %s10076_s7  ;;  %v13751_v44 = vrot.slane %v11078_v63, 1  ;;  %v11118_v36 = vld [vmem:[#allocation2 + $0x104] sm:$0xff]   ;;  %v4031_v40 = vshrl.u32 %v9740_v55, 16  ;;  %v4034_v1 = vshll.u32 %v9740_v55, 16  ;;  %v8713_v3 = vcombine.low %v6090_v60, %v11085_v42 }
 0x248   : > { %v8903_v4 = vpack.c.bf16 %v970_v33, %v970_v33  ;;  %v971_v48 = vmax.f32 %v860_v61, 0.0  ;;  %v2293_v61 = vshll.u32 %v11090_v39, 16  ;;  %9370 = vmatprep.subr.bf16.mxu1 %v10073_v16  ;;  %6918 = vmatprep.subr.bf16.mxu0 %v10073_v16  ;;  %v5827_v42 = vrot.slane %v5825_v59, 2 }
 0x249   : > { %v5830_v9 = vrot.slane %v5828_v35, 3  ;;  %v4033_v55 = vrot.slane %v4031_v40, 1  ;;  %v11138_v25 = vrot.slane %v8712_v50, 3  ;;  %v2910_v47 = vpop.permute.xlu1 %2909  ;;  %v2852_v59 = vsel %vm2787_vm7, %v2849_v12, %v13751_v44  ;;  %v11153_v50 = vld [vmem:[#allocation2 + $0x108] sm:$0xff]   ;;  %v11155_v35 = vld [vmem:[#allocation2 + $0x110] sm:$0xff]  }
 0x24a   : > { %1397 = vst.msk [vmem:[#allocation2 + $0x130] sm:$0xf] %vm1320_vm4, %v8903_v4  ;;  %v8904_v33 = vpack.c.bf16 %v971_v48, %v971_v48  ;;  %v9743_v48 = vld [vmem:[%s13741_s3 + $0x70] sm:$0xff]   ;;  %v11150_v46 = vrot.slane %v2293_v61, 1  ;;  %v5102_v61 = vsel %vm4529_vm9, %v5099_v24, %v13748_v20  ;;  %v5837_v20 = vshll.u32 %v11155_v35, 16 }
 0x24b   : > { %v864_v45 = vpop.f32.mrb[156].mxu0  ;;  %3438 = vrot.lane.b32.xlu1 %v3361_v21, %s10076_s7  ;;  %v4036_v21 = vrot.slane %v4034_v1, 2  ;;  %4669 = vrot.lane.b32.xlu0 %v4592_v8, %s10075_s29  ;;  %v2291_v1 = vor.u32 %v2289_v19, %v11049_v31  ;;  %v9746_v31 = vld [vmem:[%s13741_s3 + $0x78] sm:$0xff]  }
 0x24c   : > { %1398 = vst.msk [vmem:[#allocation2 + $0x134] sm:$0xf] %vm1320_vm4, %v8904_v33  ;;  %v865_v4 = vadd.f32 %v10739_v27, %v864_v45  ;;  %v2396_v60 = vpop.permute.xlu0 %2395  ;;  %v11142_v33 = vld [vmem:[#allocation2 + $0x10c] sm:$0xff]   ;;  %9386 = vmatpush1.bf16.msra.mxu1 %v9743_v48  ;;  %v9182_v8 = vpop.f32.mrb[157].mxu0  ;;  %6919 = vmatpush1.bf16.msra.mxu0 %v9743_v48  ;;  %v6095_v19 = vld [vmem:[#allocation2 + $0x7c] sm:$0xf] }
 0x24d   : > { %2492 = vst.msk [vmem:[#allocation3 + $0x1f8] sm:$0xff] %vm2470_vm11, %v2396_v60  ;;  %v11157_v40 = vor.u32 %v4036_v21, %v4033_v55  ;;  %9371 = vmatprep.subr.bf16.mxu1 %v10073_v16  ;;  %6920 = vmatprep.subr.bf16.mxu0 %v10073_v16  ;;  %v13755_v48 = vrot.slane %v11118_v36, 1  ;;  %v9747_v55 = vld [vmem:[#allocation2 + $0xc0] sm:$0xff]   ;;  %v867_v21 = vpop.f32.mrb[158].mxu0  ;;  %v13753_v8 = vrot.slane %v11153_v50, 1 }
 0x24e   : > { %v972_v45 = vmax.f32 %v865_v4, 0.0  ;;  %3006 = vst.msk [vmem:[#allocation3 + $0x1f8] sm:$0xff] %vm2984_vm12, %v2910_v47  ;;  %v11160_v4 = vrot.slane %v8713_v3, 3  ;;  %v11174_v3 = vor.u32 %v5830_v9, %v5827_v42  ;;  %v6092_v47 = vld [vmem:[#allocation2 + $0x70] sm:$0xf]  ;;  %v868_v38 = vadd.f32 %v10739_v27, %v867_v21  ;;  %v9183_v24 = vpop.f32.mrb[159].mxu0 }
 0x24f   : > { %2929 = vrot.lane.b32.xlu1 %v2852_v59, %s10074_s28  ;;  %v4038_v60 = vsel %vm3814_vm6, %v11031_v11, %v11157_v40  ;;  %5179 = vrot.lane.b32.xlu0 %v5102_v61, %s10074_s28  ;;  %v11181_v59 = vld [vmem:[#allocation2 + $0x108] sm:$0xff]   ;;  %v6364_v11 = vsel %vm512_vm1, %v11033_v62, %v11136_v32  ;;  %v2296_v42 = vsel %vm2036_vm8, %v2291_v1, %v11150_v46  ;;  %v13754_v9 = vrot.slane %v11142_v33, 2  ;;  %v11193_v61 = vld [vmem:[#allocation2 + $0x110] sm:$0xff]  }
 0x250   : > { %v8905_v12 = vpack.c.bf16 %v972_v45, %v972_v45  ;;  %v6094_v45 = vld [vmem:[#allocation2 + $0x78] sm:$0xf]  ;;  %4236 = vst.msk [vmem:[#allocation3 + $0x230] sm:$0xff] %vm1719_vm5, %v4038_v60  ;;  %9387 = vmatpush1.bf16.msra.mxu1 %v9746_v31  ;;  %1744 = vst.msk [vmem:[#allocation3 + $0x240] sm:$0xff] %vm1719_vm5, %v9747_v55  ;;  %6921 = vmatpush1.bf16.msra.mxu0 %v9746_v31  ;;  %v5834_v62 = vshrl.u32 %v11155_v35, 16  ;;  %v973_v60 = vmax.f32 %v868_v38, 0.0 }
 0x251   : > { %v2912_v16 = vpop.permute.xlu1 %2911  ;;  %9196 = vmatprep.subr.bf16.mxu1 %v13749_v0  ;;  %6473 = vst.msk [vmem:[#allocation3 + $0xb8] sm:$0xff] %vm1719_vm5, %v6364_v11  ;;  %v8714_v21 = vcombine.low %v6092_v47, %v11162_v17  ;;  %v8715_v24 = vcombine.low %v6094_v45, %v6095_v19  ;;  %v5832_v55 = vsel %vm5554_vm10, %v11076_v34, %v11174_v3  ;;  %v9750_v0 = vld [vmem:[#allocation2 + $0xd4] sm:$0xff]   ;;  %v2297_v11 = vshrl.u32 %v11090_v39, 16 }
 0x252   : > { %1399 = vst.msk [vmem:[#allocation2 + $0x138] sm:$0xf] %vm1320_vm4, %v8905_v12  ;;  %v8906_v38 = vpack.c.bf16 %v973_v60, %v973_v60  ;;  %v4040_v34 = vshrl.u32 %v9750_v0, 16  ;;  %v4043_v35 = vshll.u32 %v9750_v0, 16  ;;  %v4594_v39 = vsel %vm4529_vm9, %v4591_v53, %v13754_v9 }
 0x253   : > { %v872_v12 = vpop.f32.mrb[160].mxu0  ;;  %2415 = vrot.lane.b32.xlu1 %v2296_v42, %s10075_s29  ;;  %5972 = vrot.lane.b32.xlu0 %v5832_v55, %s10076_s7  ;;  %v2301_v42 = vshll.u32 %v11181_v59, 16  ;;  %v13752_v19 = vrot.slane %v11193_v61, 2  ;;  %v5836_v0 = vrot.slane %v5834_v62, 2  ;;  %v11227_v60 = vrot.slane %v8715_v24, 3 }
 0x254   : > { %v873_v1 = vadd.f32 %v10739_v27, %v872_v12  ;;  %v3363_v27 = vsel %vm2787_vm7, %v3360_v54, %v13755_v48  ;;  %1400 = vst.msk [vmem:[#allocation2 + $0x13c] sm:$0xf] %vm1320_vm4, %v8906_v38  ;;  %v5839_v54 = vrot.slane %v5837_v20, 3  ;;  %v4042_v47 = vrot.slane %v4040_v34, 1  ;;  %v9186_v55 = vpop.f32.mrb[161].mxu0 }
 0x255   : > { %v2398_v31 = vpop.permute.xlu1 %2397  ;;  %v4045_v45 = vrot.slane %v4043_v35, 2  ;;  %v11225_v12 = vrot.slane %v8714_v21, 3  ;;  %v11230_v53 = vrot.slane %v2301_v42, 1  ;;  %v13773_v20 = vrot.slane %v11078_v63, 1  ;;  %v11242_v21 = vld [vmem:[#allocation2 + $0x114] sm:$0xff]   ;;  %v875_v42 = vpop.f32.mrb[162].mxu0 }
 0x256   : > { %v974_v44 = vmax.f32 %v873_v1, 0.0  ;;  %2493 = vst.msk [vmem:[#allocation3 + $0x210] sm:$0xff] %vm2470_vm11, %v2398_v31  ;;  %v2299_v1 = vor.u32 %v2297_v11, %v11150_v46  ;;  %v9755_v31 = vld [vmem:[#allocation2 + $0xc8] sm:$0xff]   ;;  %v6096_v38 = vld [vmem:[#allocation2 + $0x80] sm:$0xf]  ;;  %v13774_v34 = vrot.slane %v11082_v5, 2  ;;  %v11252_v35 = vor.u32 %v5839_v54, %v5836_v0 }
 0x257   : > { %v4652_v17 = vpop.permute.xlu0 %4651  ;;  %3440 = vrot.lane.b32.xlu1 %v3363_v27, %s10076_s7  ;;  %3007 = vst.msk [vmem:[#allocation3 + $0x210] sm:$0xff] %vm2984_vm12, %v2912_v16  ;;  %4671 = vrot.lane.b32.xlu0 %v4594_v39, %s10075_s29  ;;  %v11232_v16 = vld [vmem:[#allocation2 + $0x10c] sm:$0xff]   ;;  %v2854_v62 = vsel %vm2787_vm7, %v13773_v20, %v13753_v8  ;;  %v11244_v24 = vor.u32 %v4045_v45, %v4042_v47  ;;  %v9742_v46 = vld [vmem:[#allocation2 + $0x118] sm:$0xff]   ;;  %v6098_v0 = vld [vmem:[#allocation2 + $0x88] sm:$0xf]  ;;  %v2305_v8 = vshrl.u32 %v11181_v59, 16 }
 0x258   : > { %v8907_v29 = vpack.c.bf16 %v974_v44, %v974_v44  ;;  %4747 = vst.msk [vmem:[#allocation3 + $0x200] sm:$0xff] %vm2470_vm11, %v4652_v17  ;;  %v6097_v44 = vld [vmem:[#allocation2 + $0x84] sm:$0xf]  ;;  %v6099_v27 = vld [vmem:[#allocation2 + $0x8c] sm:$0xf]  ;;  %v5104_v63 = vsel %vm4529_vm9, %v13774_v34, %v13752_v19  ;;  %v6366_v5 = vsel %vm512_vm1, %v11136_v32, %v11138_v25  ;;  %v3364_v45 = vrot.slane %v11232_v16, 1 }
 0x259   : > { %v3423_v14 = vpop.permute.xlu1 %3422  ;;  %v4047_v11 = vsel %vm3814_vm6, %v11157_v40, %v11244_v24  ;;  %v11257_v17 = vld [vmem:[#allocation8] ss:$0 sm:$0xff]  ;;  %1745 = vst.msk [vmem:[#allocation3 + $0x258] sm:$0xff] %vm1719_vm5, %v9755_v31  ;;  %v6103_v54 = vld [vmem:[#allocation2 + $0x9c] sm:$0xf]  ;;  %v2304_v40 = vsel %vm2036_vm8, %v2299_v1, %v11230_v53  ;;  %v11271_v20 = vld [vmem:[#allocation2 + $0x110] sm:$0xff]   ;;  %v8716_v55 = vcombine.low %v6096_v38, %v6097_v44  ;;  %v5841_v1 = vsel %vm5554_vm10, %v11174_v3, %v11252_v35 }
 0x25a   : > { %1401 = vst.msk [vmem:[#allocation2 + $0x140] sm:$0xf] %vm1320_vm4, %v8907_v29  ;;  %v876_v39 = vadd.f32 %v11257_v17, %v875_v42  ;;  %v6101_v29 = vld [vmem:[#allocation2 + $0x94] sm:$0xf]  ;;  %v6100_v31 = vld [vmem:[#allocation2 + $0x90] sm:$0xf]  ;;  %v8717_v38 = vcombine.low %v6098_v0, %v6099_v27 }
 0x25b   : > { %3519 = vst.msk [vmem:[#allocation3 + $0x1f8] sm:$0xff] %vm3497_vm13, %v3423_v14  ;;  %2931 = vrot.lane.b32.xlu1 %v2854_v62, %s10074_s28  ;;  %5181 = vrot.lane.b32.xlu0 %v5104_v63, %s10074_s28  ;;  %v11269_v14 = vld [vmem:[#allocation2 + $0x110] sm:$0xff]   ;;  %v9758_v34 = vld [vmem:[#allocation2 + $0xdc] sm:$0xff]   ;;  %v6102_v63 = vld [vmem:[#allocation2 + $0x98] sm:$0xf]  ;;  %v5846_v19 = vshll.u32 %v9742_v46, 16  ;;  %v8718_v48 = vcombine.low %v6100_v31, %v6101_v29 }
 0x25c   : > { %4237 = vst.msk [vmem:[#allocation3 + $0x248] sm:$0xff] %vm1719_vm5, %v4047_v11  ;;  %v975_v62 = vmax.f32 %v876_v39, 0.0  ;;  %6474 = vst.msk [vmem:[#allocation3 + $0xd0] sm:$0xff] %vm1719_vm5, %v6366_v5  ;;  %v11280_v11 = vld [vmem:[#allocation2 + $0x118] sm:$0xff]   ;;  %v5843_v39 = vshrl.u32 %v9742_v46, 16  ;;  %v9187_v44 = vpop.f32.mrb[163].mxu0  ;;  %v8719_v59 = vcombine.low %v6102_v63, %v6103_v54  ;;  %v2307_v63 = vor.u32 %v2305_v8, %v11230_v53 }
 0x25d   : > { %v2914_v47 = vpop.permute.xlu1 %2913  ;;  %v4049_v9 = vshrl.u32 %v9758_v34, 16  ;;  %v4052_v32 = vshll.u32 %v9758_v34, 16  ;;  %v13775_v3 = vrot.slane %v11118_v36, 1  ;;  %v13757_v46 = vrot.slane %v11269_v14, 1  ;;  %v11306_v54 = vld [vmem:[#allocation2 + $0x114] sm:$0xff]  }
 0x25e   : > { %v8908_v5 = vpack.c.bf16 %v975_v62, %v975_v62  ;;  %v2309_v27 = vshll.u32 %v11271_v20, 16  ;;  %v11293_v0 = vrot.slane %v8716_v55, 3  ;;  %v13776_v31 = vrot.slane %v11242_v21, 2 }
 0x25f   : > { %v4654_v42 = vpop.permute.xlu0 %4653  ;;  %2417 = vrot.lane.b32.xlu1 %v2304_v40, %s10075_s29  ;;  %5974 = vrot.lane.b32.xlu0 %v5841_v1, %s10076_s7  ;;  %v4051_v29 = vrot.slane %v4049_v9, 1  ;;  %v4054_v62 = vrot.slane %v4052_v32, 2  ;;  %v13777_v36 = vrot.slane %v11142_v33, 2  ;;  %v13756_v1 = vrot.slane %v11280_v11, 2 }
 0x260   : > { %4748 = vst.msk [vmem:[#allocation3 + $0x218] sm:$0xff] %vm2470_vm11, %v4654_v42  ;;  %v3365_v42 = vsel %vm2787_vm7, %v13775_v3, %v3364_v45  ;;  %v5845_v44 = vrot.slane %v5843_v39, 2  ;;  %v11303_v55 = vrot.slane %v8717_v38, 3  ;;  %v11310_v32 = vrot.slane %v8718_v48, 3  ;;  %v9752_v38 = vld [vmem:[#allocation2 + $0x120] sm:$0xff]   ;;  %v880_v3 = vpop.f32.mrb[164].mxu0 }
 0x261   : > { %v2400_v40 = vpop.permute.xlu1 %2399  ;;  %1402 = vst.msk [vmem:[#allocation2 + $0x144] sm:$0xf] %vm1320_vm4, %v8908_v5  ;;  %v4596_v34 = vsel %vm4529_vm9, %v13777_v36, %v13776_v31  ;;  %v9763_v5 = vld [vmem:[#allocation2 + $0xd0] sm:$0xff]   ;;  %v11308_v9 = vor.u32 %v4054_v62, %v4051_v29  ;;  %v13778_v33 = vrot.slane %v11153_v50, 1  ;;  %v11319_v39 = vrot.slane %v2309_v27, 1  ;;  %v9190_v62 = vpop.f32.mrb[165].mxu0 }
 0x262   : > { %2494 = vst.msk [vmem:[#allocation3 + $0x228] sm:$0xff] %vm2470_vm11, %v2400_v40  ;;  %v5848_v40 = vrot.slane %v5846_v19, 3  ;;  %v881_v50 = vadd.f32 %v11257_v17, %v880_v3  ;;  %v13779_v8 = vrot.slane %v11193_v61, 2  ;;  %v883_v31 = vpop.f32.mrb[166].mxu0  ;;  %v11346_v61 = vld [vmem:[#allocation2 + $0x118] sm:$0xff]  }
 0x263   : > { %3008 = vst.msk [vmem:[#allocation3 + $0x228] sm:$0xff] %vm2984_vm12, %v2914_v47  ;;  %3442 = vrot.lane.b32.xlu1 %v3365_v42, %s10076_s7  ;;  %4673 = vrot.lane.b32.xlu0 %v4596_v34, %s10075_s29  ;;  %v2856_v19 = vsel %vm2787_vm7, %v13778_v33, %v13757_v46  ;;  %v11322_v42 = vrot.slane %v8719_v59, 3  ;;  %v4056_v29 = vsel %vm3814_vm6, %v11244_v24, %v11308_v9  ;;  %v11336_v59 = vld [vmem:[#allocation2 + $0x11c] sm:$0xff]   ;;  %v3366_v34 = vrot.slane %v11306_v54, 1 }
 0x264   : > { %1746 = vst.msk [vmem:[#allocation3 + $0x270] sm:$0xff] %vm1719_vm5, %v9763_v5  ;;  %v5106_v53 = vsel %vm4529_vm9, %v13779_v8, %v13756_v1  ;;  %v11334_v27 = vor.u32 %v5848_v40, %v5845_v44  ;;  %4238 = vst.msk [vmem:[#allocation3 + $0x260] sm:$0xff] %vm1719_vm5, %v4056_v29  ;;  %v6368_v24 = vsel %vm512_vm1, %v11138_v25, %v11160_v4  ;;  %v11344_v5 = vld [vmem:[#allocation2 + $0x118] sm:$0xff]   ;;  %v976_v44 = vmax.f32 %v881_v50, 0.0  ;;  %v6104_v8 = vld [vmem:[#allocation2 + $0xa0] sm:$0xf] }
 0x265   : > { %v3425_v47 = vpop.permute.xlu1 %3424  ;;  %v5957_v48 = vpop.permute.xlu0 %5956  ;;  %v884_v40 = vadd.f32 %v11257_v17, %v883_v31  ;;  %6475 = vst.msk [vmem:[#allocation3 + $0xe8] sm:$0xff] %vm1719_vm5, %v6368_v24  ;;  %v2312_v25 = vsel %vm2036_vm8, %v2307_v63, %v11319_v39  ;;  %v5852_v33 = vshrl.u32 %v9752_v38, 16  ;;  %v5855_v29 = vshll.u32 %v9752_v38, 16  ;;  %v11360_v63 = vld [vmem:[#allocation2 + $0x120] sm:$0xff]   ;;  %v6107_v1 = vld [vmem:[#allocation2 + $0xac] sm:$0xf] }
 0x266   : > { %3520 = vst.msk [vmem:[#allocation3 + $0x210] sm:$0xff] %vm3497_vm13, %v3425_v47  ;;  %v6105_v47 = vld [vmem:[#allocation2 + $0xa4] sm:$0xf]  ;;  %v8909_v62 = vpack.c.bf16 %v976_v44, %v976_v44  ;;  %v3367_v44 = vsel %vm2787_vm7, %v3364_v45, %v3366_v34  ;;  %v9771_v45 = vld [vmem:[#allocation2 + $0xd8] sm:$0xff]   ;;  %v13784_v54 = vrot.slane %v11336_v59, 2 }
 0x267   : > { %2933 = vrot.lane.b32.xlu1 %v2856_v19, %s10074_s28  ;;  %5183 = vrot.lane.b32.xlu0 %v5106_v53, %s10074_s28  ;;  %v9766_v19 = vld [vmem:[#allocation2 + $0xe4] sm:$0xff]   ;;  %v977_v50 = vmax.f32 %v884_v40, 0.0  ;;  %v5850_v53 = vsel %vm5554_vm10, %v11252_v35, %v11334_v27  ;;  %v2317_v40 = vshll.u32 %v11346_v61, 16  ;;  %v5854_v57 = vrot.slane %v5852_v33, 2  ;;  %1747 = vst.msk [vmem:[#allocation3 + $0x288] sm:$0xff] %vm1719_vm5, %v9771_v45 }
 0x268   : > { %v4058_v24 = vshrl.u32 %v9766_v19, 16  ;;  %1403 = vst.msk [vmem:[#allocation2 + $0x148] sm:$0xf] %vm1320_vm4, %v8909_v62  ;;  %v5857_v16 = vrot.slane %v5855_v29, 3  ;;  %v6370_v62 = vsel %vm512_vm1, %v11160_v4, %v11225_v12  ;;  %v13761_v33 = vrot.slane %v11360_v63, 2  ;;  %v11386_v29 = vld [vmem:[#allocation2 + $0x124] sm:$0xff]  }
 0x269   : > { %v5164_v36 = vpop.permute.xlu1 %5163  ;;  %v4656_v3 = vpop.permute.xlu0 %4655  ;;  %v8910_v35 = vpack.c.bf16 %v977_v50, %v977_v50  ;;  %6476 = vst.msk [vmem:[#allocation3 + $0x100] sm:$0xff] %vm1719_vm5, %v6370_v62  ;;  %v11427_v62 = vld [vmem:[#allocation2 + $0x128] sm:$0xff]  }
 0x26a   : > { %5259 = vst.msk [vmem:[#allocation3 + $0x200] sm:$0xff] %vm2984_vm12, %v5164_v36  ;;  %v4061_v36 = vshll.u32 %v9766_v19, 16  ;;  %v2313_v19 = vshrl.u32 %v11271_v20, 16  ;;  %v4060_v46 = vrot.slane %v4058_v24, 1  ;;  %v13780_v20 = vrot.slane %v11336_v59, 2  ;;  %v11388_v24 = vld [vmem:[#allocation2 + $0x120] sm:$0xff]  }
 0x26b   : > { %6052 = vst.msk [vmem:[#allocation3 + $0x200] sm:$0xff] %vm3497_vm13, %v5957_v48  ;;  %2419 = vrot.lane.b32.xlu1 %v2312_v25, %s10075_s29  ;;  %v6106_v48 = vld [vmem:[#allocation2 + $0xa8] sm:$0xf]  ;;  %5976 = vrot.lane.b32.xlu0 %v5850_v53, %s10076_s7  ;;  %v9191_v25 = vpop.f32.mrb[167].mxu0  ;;  %v8720_v53 = vcombine.low %v6104_v8, %v6105_v47  ;;  %v13781_v47 = vrot.slane %v11242_v21, 2  ;;  %v11411_v45 = vor.u32 %v5857_v16, %v5854_v57  ;;  %v9774_v57 = vld [vmem:[#allocation2 + $0xec] sm:$0xff]  }
 0x26c   : > { %4749 = vst.msk [vmem:[#allocation3 + $0x230] sm:$0xff] %vm2470_vm11, %v4656_v3  ;;  %v2857_v3 = vrot.slane %v11344_v5, 1  ;;  %v4063_v31 = vrot.slane %v4061_v36, 2  ;;  %v8721_v50 = vcombine.low %v6106_v48, %v6107_v1  ;;  %v11394_v1 = vrot.slane %v2317_v40, 1 }
 0x26d   : > { %v2916_v38 = vpop.permute.xlu1 %2915  ;;  %v5166_v6 = vpop.permute.xlu0 %5165  ;;  %1404 = vst.msk [vmem:[#allocation2 + $0x14c] sm:$0xf] %vm1320_vm4, %v8910_v35  ;;  %v4598_v8 = vsel %vm4529_vm9, %v13781_v47, %v13780_v20  ;;  %v13782_v48 = vrot.slane %v11269_v14, 1  ;;  %v11407_v40 = vrot.slane %v8720_v53, 3  ;;  %v9760_v14 = vld [vmem:[#allocation2 + $0x128] sm:$0xff]   ;;  %v11423_v53 = vld [vmem:[#allocation2 + $0x120] sm:$0xff]  }
 0x26e   : > { %5260 = vst.msk [vmem:[#allocation3 + $0x218] sm:$0xff] %vm2984_vm12, %v5166_v6  ;;  %v11390_v36 = vor.u32 %v4063_v31, %v4060_v46  ;;  %v6568_v6 = vld [vmem:[#allocation3 + $0x1f8] sm:$0xff]  ;;  %v2315_v31 = vor.u32 %v2313_v19, %v11319_v39  ;;  %v888_v35 = vpop.f32.mrb[168].mxu0  ;;  %v11415_v19 = vrot.slane %v8721_v50, 3  ;;  %v2325_v50 = vshll.u32 %v11388_v24, 16 }
 0x26f   : > { %3444 = vrot.lane.b32.xlu1 %v3367_v44, %s10076_s7  ;;  %4675 = vrot.lane.b32.xlu0 %v4598_v8, %s10075_s29  ;;  %v2858_v46 = vsel %vm2787_vm7, %v13782_v48, %v2857_v3  ;;  %v889_v39 = vadd.f32 %v11257_v17, %v888_v35  ;;  %v13762_v17 = vrot.slane %v11373_v52, 1  ;;  %v4599_v47 = vrot.slane %v11386_v29, 2  ;;  %v11434_v8 = vld [vmem:[#allocation2 + $0x124] sm:$0xff]  }
 0x270   : > { %v4065_v44 = vsel %vm3814_vm6, %v11308_v9, %v11390_v36  ;;  %v13783_v9 = vrot.slane %v11280_v11, 2  ;;  %v2320_v11 = vsel %vm2036_vm8, %v2315_v31, %v11394_v1  ;;  %v5859_v48 = vsel %vm5554_vm10, %v11334_v27, %v11411_v45  ;;  %v11449_v27 = vld [vmem:[#allocation2 + $0x128] sm:$0xff]  }
 0x271   : > { %v2402_v4 = vpop.permute.xlu1 %2401  ;;  %v5959_v25 = vpop.permute.xlu0 %5958  ;;  %4239 = vst.msk [vmem:[#allocation3 + $0x278] sm:$0xff] %vm1719_vm5, %v4065_v44  ;;  %v978_v20 = vmax.f32 %v889_v39, 0.0  ;;  %v5861_v44 = vshrl.u32 %v9760_v14, 16  ;;  %v13764_v31 = vrot.slane %v11423_v53, 1  ;;  %v13787_v29 = vrot.slane %v11449_v27, 1 }
 0x272   : > { %2495 = vst.msk [vmem:[#allocation3 + $0x240] sm:$0xff] %vm2470_vm11, %v2402_v4  ;;  %v6569_v21 = vld [vmem:[#allocation3 + $0x200] sm:$0xff]  ;;  %v4067_v4 = vshrl.u32 %v9774_v57, 16  ;;  %vm8004_vm4 = vcmask 1045508  }
 0x273   : > { %3009 = vst.msk [vmem:[#allocation3 + $0x240] sm:$0xff] %vm2984_vm12, %v2916_v38  ;;  %7090 = vmatprep.mubr.bf16.mxu1 %v6569_v21  ;;  %2935 = vrot.lane.b32.xlu1 %v2858_v46, %s10074_s28  ;;  %v5108_v38 = vsel %vm4529_vm9, %v13783_v9, %v13761_v33  ;;  %v2321_v46 = vshrl.u32 %v11346_v61, 16  ;;  %v8911_v35 = vpack.c.bf16 %v978_v20, %v978_v20  ;;  %v3370_v20 = vrot.slane %v11434_v8, 1  ;;  %v9194_v33 = vpop.f32.mrb[169].mxu0 }
 0x274   : > { %6053 = vst.msk [vmem:[#allocation3 + $0x218] sm:$0xff] %vm3497_vm13, %v5959_v25  ;;  %7091 = vmatmul.mubr.bf16.vlgmr.msra.gmra.mrb[0].mxu1 %v6568_v6  ;;  %5185 = vrot.lane.b32.xlu0 %v5108_v38, %s10074_s28  ;;  %v4070_v6 = vshll.u32 %v9774_v57, 16  ;;  %v5864_v25 = vshll.u32 %v9760_v14, 16  ;;  %v4069_v39 = vrot.slane %v4067_v4, 1  ;;  %v13763_v57 = vrot.slane %v11427_v62, 2  ;;  %v11463_v4 = vld [vmem:[#allocation2 + $0x128] sm:$0xff]  }
 0x275   : > { %v3427_v16 = vpop.permute.xlu1 %3426  ;;  %v4658_v21 = vpop.permute.xlu0 %4657  ;;  %1406 = vst.msk [vmem:[#allocation2 + $0x150] sm:$0x3] %vm1405_vm14, %v8911_v35  ;;  %v6372_v61 = vsel %vm512_vm1, %v11225_v12, %v11227_v60  ;;  %v3369_v14 = vsel %vm2787_vm7, %v3366_v34, %v13762_v17  ;;  %v5863_v12 = vrot.slane %v5861_v44, 2  ;;  %v9780_v35 = vld [vmem:[#allocation2 + $0xe0] sm:$0xff]   ;;  %v4600_v34 = vsel %vm4529_vm9, %v13784_v54, %v4599_v47  ;;  %v9768_v17 = vld [vmem:[#allocation2 + $0x130] sm:$0xff]  }
 0x276   : > { %3521 = vst.msk [vmem:[#allocation3 + $0x228] sm:$0xff] %vm3497_vm13, %v3427_v16  ;;  %v4072_v9 = vrot.slane %v4070_v6, 2  ;;  %v11445_v16 = vrot.slane %v2325_v50, 1  ;;  %v11461_v50 = vld [vmem:[#allocation2 + $0x130] sm:$0xff]   ;;  %v2860_v59 = vsel %vm2787_vm7, %v2857_v3, %v13764_v31 }
 0x277   : > { %2421 = vrot.lane.b32.xlu1 %v2320_v11, %s10075_s29  ;;  %4750 = vst.msk [vmem:[#allocation3 + $0x248] sm:$0xff] %vm2470_vm11, %v4658_v21  ;;  %v11447_v11 = vld [vmem:[#allocation2 + $0x12c] sm:$0xff]  }
 0x278   : > { %5978 = vrot.lane.b32.xlu0 %v5859_v48, %s10076_s7  ;;  %v11465_v6 = vor.u32 %v4072_v9, %v4069_v39  ;;  %6477 = vst.msk [vmem:[#allocation3 + $0x118] sm:$0xff] %vm1719_vm5, %v6372_v61  ;;  %v6571_v39 = vld [vmem:[#allocation3 + $0x210] sm:$0xff]  ;;  %v5866_v9 = vrot.slane %v5864_v25, 3  ;;  %v13765_v44 = vrot.slane %v11447_v11, 2  ;;  %1748 = vst.msk [vmem:[#allocation3 + $0x2a0] sm:$0xff] %vm1719_vm5, %v9780_v35  ;;  %v2333_v25 = vshll.u32 %v11463_v4, 16 }
 0x279   : > { %v2918_v38 = vpop.permute.xlu1 %2917  ;;  %v5168_v21 = vpop.permute.xlu0 %5167  ;;  %v13785_v35 = vrot.slane %v11360_v63, 2 }
 0x27a   : > { %5261 = vst.msk [vmem:[#allocation3 + $0x230] sm:$0xff] %vm2984_vm12, %v5168_v21  ;;  %v4074_v61 = vsel %vm3814_vm6, %v11390_v36, %v11465_v6  ;;  %v2323_v36 = vor.u32 %v2321_v46, %v11394_v1  ;;  %v11501_v3 = vor.u32 %v5866_v9, %v5863_v12  ;;  %v11513_v9 = vrot.slane %v2333_v25, 1  ;;  %v9788_v21 = vld [vmem:[#allocation2 + $0xe8] sm:$0xff]  }
 0x27b   : > { %v6572_v48 = vld [vmem:[#allocation3 + $0x218] sm:$0xff]  ;;  %3446 = vrot.lane.b32.xlu1 %v3369_v14, %s10076_s7  ;;  %v891_v14 = vpop.f32.mrb[170].mxu0  ;;  %4240 = vst.msk [vmem:[#allocation3 + $0x290] sm:$0xff] %vm1719_vm5, %v4074_v61  ;;  %v5110_v5 = vsel %vm4529_vm9, %v13785_v35, %v13763_v57  ;;  %v5870_v61 = vshrl.u32 %v9768_v17, 16  ;;  %v11518_v57 = vld [vmem:[#allocation2 + $0x138] sm:$0xff]   ;;  %1749 = vst.msk [vmem:[#allocation3 + $0x2b8] sm:$0xff] %vm1719_vm5, %v9788_v21 }
 0x27c   : > { %7098 = vmatprep.mubr.bf16.mxu1 %v6572_v48  ;;  %4677 = vrot.lane.b32.xlu0 %v4600_v34, %s10075_s29  ;;  %v11491_v48 = vld [vmem:[#allocation2 + $0x12c] sm:$0xff]   ;;  %v9195_v54 = vpop.f32.mrb[171].mxu0  ;;  %v9783_v34 = vld [vmem:[#allocation2 + $0xf4] sm:$0xff]   ;;  %v2328_v12 = vsel %vm2036_vm8, %v2323_v36, %v11445_v16 }
 0x27d   : > { %7099 = vmatmul.mubr.bf16.gmra.mrb[4].mxu1 %v6571_v39  ;;  %v2404_v33 = vpop.permute.xlu1 %2403  ;;  %v5961_v39 = vpop.permute.xlu0 %5960  ;;  %v11505_v14 = vld [vmem:[#allocation2 + $0x130] sm:$0xff]   ;;  %v4076_v63 = vshrl.u32 %v9783_v34, 16  ;;  %v4079_v54 = vshll.u32 %v9783_v34, 16  ;;  %v11524_v34 = vld [vmem:[#allocation2 + $0x138] sm:$0xff]   ;;  %v5872_v1 = vrot.slane %v5870_v61, 2 }
 0x27e   : > { %2496 = vst.msk [vmem:[#allocation3 + $0x258] sm:$0xff] %vm2470_vm11, %v2404_v33  ;;  %v5873_v33 = vshll.u32 %v9768_v17, 16  ;;  %v11516_v35 = vld [vmem:[#allocation2 + $0x130] sm:$0xff]   ;;  %v6374_v17 = vsel %vm512_vm1, %v11227_v60, %v11293_v0  ;;  %v2341_v60 = vshll.u32 %v11505_v14, 16  ;;  %v5882_v61 = vshll.u32 %v11524_v34, 16 }
 0x27f   : > { %3010 = vst.msk [vmem:[#allocation3 + $0x258] sm:$0xff] %vm2984_vm12, %v2918_v38  ;;  %2937 = vrot.lane.b32.xlu1 %v2860_v59, %s10074_s28  ;;  %v11508_v59 = vld [vmem:[#allocation2 + $0x134] sm:$0xff]   ;;  %v4078_v36 = vrot.slane %v4076_v63, 1  ;;  %v4081_v25 = vrot.slane %v4079_v54, 2  ;;  %v13786_v63 = vrot.slane %v11373_v52, 1  ;;  %v5879_v52 = vshrl.u32 %v11524_v34, 16 }
 0x280   : > { %6054 = vst.msk [vmem:[#allocation3 + $0x230] sm:$0xff] %vm3497_vm13, %v5961_v39  ;;  %5187 = vrot.lane.b32.xlu0 %v5110_v5, %s10074_s28  ;;  %v5868_v39 = vsel %vm5554_vm10, %v11411_v45, %v11501_v3  ;;  %v5875_v46 = vrot.slane %v5873_v33, 3  ;;  %v6574_v45 = vld [vmem:[#allocation3 + $0x228] sm:$0xff]  ;;  %v13794_v8 = vrot.slane %v11508_v59, 2 }
 0x281   : > { %v3429_v38 = vpop.permute.xlu1 %3428  ;;  %v4660_v5 = vpop.permute.xlu0 %4659  ;;  %6478 = vst.msk [vmem:[#allocation3 + $0x130] sm:$0xff] %vm1719_vm5, %v6374_v17  ;;  %v11535_v31 = vor.u32 %v4081_v25, %v4078_v36  ;;  %v3371_v54 = vsel %vm2787_vm7, %v13786_v63, %v3370_v20  ;;  %v11551_v25 = vld [vmem:[#allocation2 + $0x134] sm:$0xff]   ;;  %v11563_v36 = vrot.slane %v2341_v60, 1  ;;  %v11566_v17 = vld [vmem:[#allocation2 + $0x13c] sm:$0xff]   ;;  %v13789_v60 = vshrl.u32 %v11388_v24, 16 }
 0x282   : > { %3522 = vst.msk [vmem:[#allocation3 + $0x240] sm:$0xff] %vm3497_vm13, %v3429_v38  ;;  %v11526_v38 = vld [vmem:[#allocation2 + $0x138] ss:$0 sps:$4 sm:$0x11]   ;;  %v6376_v24 = vsel %vm512_vm1, %v11293_v0, %v11303_v55 }
 0x283   : > { %2423 = vrot.lane.b32.xlu1 %v2328_v12, %s10075_s29  ;;  %4751 = vst.msk [vmem:[#allocation3 + $0x260] sm:$0xff] %vm2470_vm11, %v4660_v5  ;;  %v4083_v63 = vsel %vm3814_vm6, %v11465_v6, %v11535_v31  ;;  %v9792_v6 = vld [vmem:[#allocation2 + $0xfc] sm:$0xff]  }
 0x284   : > { %5980 = vrot.lane.b32.xlu0 %v5868_v39, %s10076_s7  ;;  %v9789_v39 = vld [vmem:[%s13741_s3 + $0x80] sm:$0xff]   ;;  %4241 = vst.msk [vmem:[#allocation3 + $0x2a8] sm:$0xff] %vm1719_vm5, %v4083_v63  ;;  %v4088_v63 = vshll.u32 %v9792_v6, 16  ;;  %6479 = vst.msk [vmem:[#allocation3 + $0x148] sm:$0xff] %vm1719_vm5, %v6376_v24 }
 0x285   : > { %v2920_v12 = vpop.permute.xlu1 %2919  ;;  %v5170_v33 = vpop.permute.xlu0 %5169  ;;  %9197 = vmatpush3.bf16.msra.mxu1 %v9789_v39  ;;  %v2331_v39 = vor.u32 %v13789_v60, %v11445_v16  ;;  %v13791_v16 = vrot.slane %v11461_v50, 2  ;;  %v9799_v60 = vld [vmem:[#allocation2 + $0xf0] sm:$0xff]   ;;  %v11614_v24 = vld [vmem:[#allocation2 + $0x140] sm:$0xff]  }
 0x286   : > { %5262 = vst.msk [vmem:[#allocation3 + $0x248] sm:$0xff] %vm2984_vm12, %v5170_v33  ;;  %v2349_v33 = vshll.u32 %v11526_v38, 16 }
 0x287   : > { %v6575_v5 = vld [vmem:[#allocation3 + $0x230] sm:$0xff]  ;;  %3448 = vrot.lane.b32.xlu1 %v3371_v54, %s10076_s7  ;;  %v4602_v54 = vsel %vm4529_vm9, %v4599_v47, %v13765_v44  ;;  %v13788_v47 = vrot.slane %v11423_v53, 1  ;;  %v11587_v44 = vld [vmem:[#allocation2 + $0x13c] sm:$0xff]   ;;  %1750 = vst.msk [vmem:[#allocation3 + $0x2d0] sm:$0xff] %vm1719_vm5, %v9799_v60  ;;  %v13793_v60 = vrot.slane %v11491_v48, 1 }
 0x288   : > { %7106 = vmatprep.mubr.bf16.mxu1 %v6575_v5  ;;  %4679 = vrot.lane.b32.xlu0 %v4602_v54, %s10075_s29  ;;  %v11571_v5 = vld [vmem:[#allocation2 + $0x140] sm:$0xff]   ;;  %v13790_v54 = vmov 0.0  }
 0x289   : > { %7107 = vmatmul.mubr.bf16.gmra.mrb[8].mxu1 %v6574_v45  ;;  %v2406_v21 = vpop.permute.xlu1 %2405  ;;  %v2862_v34 = vsel %vm2787_vm7, %v13788_v47, %v13787_v29  ;;  %v4085_v45 = vshrl.u32 %v9792_v6, 16  ;;  %9198 = vmatprep.subr.bf16.mxu1 %v13790_v54  ;;  %v5963_v38 = vpop.permute.xlu0 %5962  ;;  %v11589_v53 = vld [vmem:[#allocation2 + $0x144] ss:$0 sps:$4 sm:$0x33]   ;;  %v13792_v6 = vrot.slane %v11427_v62, 2  ;;  %v4090_v47 = vrot.slane %v4088_v63, 2 }
 0x28a   : > { %2497 = vst.msk [vmem:[#allocation3 + $0x270] sm:$0xff] %vm2470_vm11, %v2406_v21  ;;  %v11585_v21 = vor.u32 %v5875_v46, %v5872_v1  ;;  %v11602_v46 = vrot.slane %v5879_v52, 2  ;;  %v2336_v62 = vsel %vm2036_vm8, %v2331_v39, %v11513_v9  ;;  %v9814_v39 = vld [vmem:[#allocation2 + $0x10c] sm:$0xff]   ;;  %v6577_v0 = vld [vmem:[#allocation3 + $0x240] sm:$0xff] }
 0x28b   : > { %3011 = vst.msk [vmem:[#allocation3 + $0x270] sm:$0xff] %vm2984_vm12, %v2920_v12  ;;  %2939 = vrot.lane.b32.xlu1 %v2862_v34, %s10074_s28  ;;  %v5112_v12 = vsel %vm4529_vm9, %v13792_v6, %v13791_v16  ;;  %v4087_v29 = vrot.slane %v4085_v45, 1  ;;  %v11604_v34 = vrot.slane %v5882_v61, 3  ;;  %v9803_v16 = vld [vmem:[#allocation2 + $0x104] sm:$0xff]   ;;  %v9810_v45 = vld [vmem:[#allocation2 + $0xf8] sm:$0xff]   ;;  %v4103_v58 = vshrl.u32 %v9814_v39, 16 }
 0x28c   : > { %6055 = vst.msk [vmem:[#allocation3 + $0x248] sm:$0xff] %vm3497_vm13, %v5963_v38  ;;  %5189 = vrot.lane.b32.xlu0 %v5112_v12, %s10074_s28  ;;  %v11612_v38 = vld [vmem:[#allocation2 + $0x138] ss:$0 sps:$4 sm:$0x11]   ;;  %v5877_v6 = vsel %vm5554_vm10, %v11501_v3, %v11585_v21  ;;  %v11620_v12 = vrot.slane %v2349_v33, 1  ;;  %v4097_v33 = vshll.u32 %v9803_v16, 16 }
 0x28d   : > { %v3431_v1 = vpop.permute.xlu1 %3430  ;;  %v4091_v52 = vor.u32 %v4090_v47, %v4087_v29  ;;  %v4662_v61 = vpop.permute.xlu0 %4661  ;;  %v5888_v29 = vshrl.u32 %v11614_v24, 16  ;;  %1751 = vst.msk [vmem:[#allocation3 + $0x2e8] sm:$0xff] %vm1719_vm5, %v9810_v45  ;;  %v4106_v7 = vshll.u32 %v9814_v39, 16  ;;  %v9822_v39 = vld [vmem:[#allocation2 + $0x114] sm:$0xff]  }
 0x28e   : > { %3523 = vst.msk [vmem:[#allocation3 + $0x258] sm:$0xff] %vm3497_vm13, %v3431_v1  ;;  %v4099_v63 = vrot.slane %v4097_v33, 2 }
 0x28f   : > { %2425 = vrot.lane.b32.xlu1 %v2336_v62, %s10075_s29  ;;  %4752 = vst.msk [vmem:[#allocation3 + $0x278] sm:$0xff] %vm2470_vm11, %v4662_v61  ;;  %v4092_v47 = vsel %vm3814_vm6, %v11535_v31, %v4091_v52  ;;  %v4094_v62 = vshrl.u32 %v9803_v16, 16  ;;  %v3373_v61 = vsel %vm2787_vm7, %v3370_v20, %v13793_v60  ;;  %v9819_v31 = vld [vmem:[#allocation2 + $0x100] sm:$0xff]   ;;  %v13795_v20 = vrot.slane %v11447_v11, 2 }
 0x290   : > { %5982 = vrot.lane.b32.xlu0 %v5877_v6, %s10076_s7  ;;  %4242 = vst.msk [vmem:[#allocation3 + $0x2c0] sm:$0xff] %vm1719_vm5, %v4092_v47  ;;  %v6378_v6 = vsel %vm512_vm1, %v11303_v55, %v11310_v32  ;;  %v13796_v55 = vshrl.u32 %v11463_v4, 16  ;;  %v2865_v60 = vrot.slane %v11612_v38, 1  ;;  %1752 = vst.msk [vmem:[#allocation3 + $0x300] sm:$0xff] %vm1719_vm5, %v9819_v31  ;;  %v4108_v11 = vrot.slane %v4106_v7, 2 }
 0x291   : > { %v2922_v3 = vpop.permute.xlu1 %2921  ;;  %v4096_v1 = vrot.slane %v4094_v62, 1  ;;  %v5172_v47 = vpop.permute.xlu0 %5171  ;;  %6480 = vst.msk [vmem:[#allocation3 + $0x160] sm:$0xff] %vm1719_vm5, %v6378_v6  ;;  %v4604_v45 = vsel %vm4529_vm9, %v13795_v20, %v13794_v8  ;;  %v13797_v4 = vrot.slane %v11516_v35, 1  ;;  %v4112_v31 = vshrl.u32 %v9822_v39, 16 }
 0x292   : > { %5263 = vst.msk [vmem:[#allocation3 + $0x260] sm:$0xff] %vm2984_vm12, %v5172_v47  ;;  %v2339_v62 = vor.u32 %v13796_v55, %v11513_v9  ;;  %v4105_v47 = vrot.slane %v4103_v58, 1  ;;  %v13798_v9 = vrot.slane %v11449_v27, 1  ;;  %v4115_v20 = vshll.u32 %v9822_v39, 16  ;;  %v9835_v39 = vld [vmem:[#allocation2 + $0x110] sm:$0xff]  }
 0x293   : > { %v6578_v16 = vld [vmem:[#allocation3 + $0x248] sm:$0xff]  ;;  %3450 = vrot.lane.b32.xlu1 %v3373_v61, %s10076_s7  ;;  %v5891_v61 = vshll.u32 %v11614_v24, 16  ;;  %v4100_v6 = vor.u32 %v4099_v63, %v4096_v1  ;;  %v13799_v27 = vrot.slane %v11518_v57, 2  ;;  %v13800_v1 = vrot.slane %v11461_v50, 2  ;;  %1754 = vst.msk [vmem:[#allocation3 + $0x330] sm:$0xff] %vm1719_vm5, %v9835_v39 }
 0x294   : > { %7114 = vmatprep.mubr.bf16.mxu1 %v6578_v16  ;;  %4681 = vrot.lane.b32.xlu0 %v4604_v45, %s10075_s29  ;;  %v9827_v16 = vld [vmem:[#allocation2 + $0x108] sm:$0xff]   ;;  %v2864_v8 = vsel %vm2787_vm7, %v13798_v9, %v13797_v4  ;;  %v11664_v45 = vrot.slane %v5888_v29, 2  ;;  %v4109_v58 = vor.u32 %v4108_v11, %v4105_v47  ;;  %v9830_v63 = vld [vmem:[#allocation2 + $0x11c] sm:$0xff]   ;;  %v4114_v29 = vrot.slane %v4112_v31, 1 }
 0x295   : > { %7115 = vmatmul.mubr.bf16.gmra.mrb[12].mxu1 %v6577_v0  ;;  %v2408_v33 = vpop.permute.xlu1 %2407  ;;  %v5965_v0 = vpop.permute.xlu0 %5964  ;;  %v4101_v7 = vsel %vm3814_vm6, %v4091_v52, %v4100_v6  ;;  %1753 = vst.msk [vmem:[#allocation3 + $0x318] sm:$0xff] %vm1719_vm5, %v9827_v16  ;;  %v5114_v55 = vsel %vm4529_vm9, %v13800_v1, %v13799_v27  ;;  %v4117_v52 = vrot.slane %v4115_v20, 2  ;;  %v2344_v11 = vsel %vm2036_vm8, %v2339_v62, %v11563_v36  ;;  %v9843_v20 = vld [vmem:[#allocation2 + $0x118] sm:$0xff]   ;;  %v9847_v1 = vld [vmem:[#allocation2 + $0x12c] sm:$0xff]  }
 0x296   : > { %2498 = vst.msk [vmem:[#allocation3 + $0x288] sm:$0xff] %vm2470_vm11, %v2408_v33  ;;  %v9838_v33 = vld [vmem:[#allocation2 + $0x124] sm:$0xff]   ;;  %v4110_v50 = vsel %vm3814_vm6, %v4100_v6, %v4109_v58  ;;  %v4121_v16 = vshrl.u32 %v9830_v63, 16  ;;  %v4124_v4 = vshll.u32 %v9830_v63, 16 }
 0x297   : > { %3012 = vst.msk [vmem:[#allocation3 + $0x288] sm:$0xff] %vm2984_vm12, %v2922_v3  ;;  %2941 = vrot.lane.b32.xlu1 %v2864_v8, %s10074_s28  ;;  %v11676_v3 = vor.u32 %v11604_v34, %v11602_v46  ;;  %v4118_v46 = vor.u32 %v4117_v52, %v4114_v29  ;;  %v4130_v34 = vshrl.u32 %v9838_v33, 16  ;;  %v4133_v9 = vshll.u32 %v9838_v33, 16 }
 0x298   : > { %6056 = vst.msk [vmem:[#allocation3 + $0x260] sm:$0xff] %vm3497_vm13, %v5965_v0  ;;  %5191 = vrot.lane.b32.xlu0 %v5114_v55, %s10074_s28  ;;  %v6380_v8 = vsel %vm512_vm1, %v11310_v32, %v11322_v42  ;;  %v4123_v62 = vrot.slane %v4121_v16, 1  ;;  %v4126_v6 = vrot.slane %v4124_v4, 2  ;;  %v9844_v0 = vld [vmem:[%s13741_s3 + $0x88] sm:$0xff]   ;;  %v9852_v55 = vld [vmem:[#allocation2 + $0x120] sm:$0xff]   ;;  %v13801_v52 = vshrl.u32 %v11505_v14, 16 }
 0x299   : > { %4243 = vst.msk [vmem:[#allocation3 + $0x2d8] sm:$0xff] %vm1719_vm5, %v4101_v7  ;;  %v3433_v47 = vpop.permute.xlu1 %3432  ;;  %4244 = vst.msk [vmem:[#allocation3 + $0x2f0] sm:$0xff] %vm1719_vm5, %v4110_v50  ;;  %v4664_v31 = vpop.permute.xlu0 %4663  ;;  %v5886_v7 = vsel %vm5554_vm10, %v11585_v21, %v11676_v3  ;;  %v4119_v32 = vsel %vm3814_vm6, %v4109_v58, %v4118_v46  ;;  %v4132_v63 = vrot.slane %v4130_v34, 1  ;;  %v4135_v27 = vrot.slane %v4133_v9, 2  ;;  %9199 = vmatpush3.bf16.msra.mxu1 %v9844_v0  ;;  %v6580_v21 = vld [vmem:[#allocation3 + $0x258] sm:$0xff]  ;;  %v9855_v14 = vld [vmem:[#allocation2 + $0x134] sm:$0xff]  }
 0x29a   : > { %3524 = vst.msk [vmem:[#allocation3 + $0x270] sm:$0xff] %vm3497_vm13, %v3433_v47  ;;  %v2347_v39 = vor.u32 %v13801_v52, %v11563_v36  ;;  %v4127_v33 = vor.u32 %v4126_v6, %v4123_v62  ;;  %v13802_v58 = vrot.slane %v11551_v25, 1  ;;  %v13803_v47 = vrot.slane %v11491_v48, 1  ;;  %v9860_v36 = vld [vmem:[#allocation2 + $0x128] sm:$0xff]  }
 0x29b   : > { %2427 = vrot.lane.b32.xlu1 %v2344_v11, %s10075_s29  ;;  %6481 = vst.msk [vmem:[#allocation3 + $0x178] sm:$0xff] %vm1719_vm5, %v6380_v8  ;;  %4245 = vst.msk [vmem:[#allocation3 + $0x308] sm:$0xff] %vm1719_vm5, %v4119_v32  ;;  %v4136_v50 = vor.u32 %v4135_v27, %v4132_v63  ;;  %v4139_v16 = vshrl.u32 %v9847_v1, 16  ;;  %v4142_v4 = vshll.u32 %v9847_v1, 16  ;;  %v13804_v8 = vrot.slane %v11566_v17, 2 }
 0x29c   : > { %4753 = vst.msk [vmem:[#allocation3 + $0x290] sm:$0xff] %vm2470_vm11, %v4664_v31  ;;  %5984 = vrot.lane.b32.xlu0 %v5886_v7, %s10076_s7  ;;  %v3375_v11 = vsel %vm2787_vm7, %v13803_v47, %v13802_v58  ;;  %v13805_v31 = vrot.slane %v11508_v59, 2  ;;  %v5893_v48 = vrot.slane %v5891_v61, 3  ;;  %v4128_v6 = vsel %vm3814_vm6, %v4118_v46, %v4127_v33  ;;  %v9863_v59 = vld [vmem:[#allocation2 + $0x13c] sm:$0xff]   ;;  %v11727_v46 = vld [vmem:[#allocation2 + $0x148] sm:$0xff]  }
 0x29d   : > { %v2924_v29 = vpop.permute.xlu1 %2923  ;;  %1755 = vst.msk [vmem:[#allocation3 + $0x348] sm:$0xff] %vm1719_vm5, %v9843_v20  ;;  %1756 = vst.msk [vmem:[#allocation3 + $0x360] sm:$0xff] %vm1719_vm5, %v9852_v55  ;;  %v5174_v34 = vpop.permute.xlu0 %5173  ;;  %v4137_v20 = vsel %vm3814_vm6, %v4127_v33, %v4136_v50  ;;  %v4141_v0 = vrot.slane %v4139_v16, 1  ;;  %v4144_v7 = vrot.slane %v4142_v4, 2  ;;  %v4148_v32 = vshrl.u32 %v9855_v14, 16  ;;  %v9866_v33 = vld [vmem:[#allocation2 + $0x130] sm:$0xff]  }
 0x29e   : > { %v4606_v62 = vsel %vm4529_vm9, %v13805_v31, %v13804_v8  ;;  %5264 = vst.msk [vmem:[#allocation3 + $0x278] sm:$0xff] %vm2984_vm12, %v5174_v34  ;;  %v2352_v61 = vsel %vm2036_vm8, %v2347_v39, %v11620_v12  ;;  %v4151_v63 = vshll.u32 %v9855_v14, 16  ;;  %v4157_v55 = vshrl.u32 %v9863_v59, 16  ;;  %v11738_v47 = vld [vmem:[#allocation2 + $0x144] ss:$0 sps:$4 sm:$0x11]  }
 0x29f   : > { %v6581_v9 = vld [vmem:[#allocation3 + $0x260] sm:$0xff]  ;;  %3452 = vrot.lane.b32.xlu1 %v3375_v11, %s10076_s7  ;;  %4246 = vst.msk [vmem:[#allocation3 + $0x320] sm:$0xff] %vm1719_vm5, %v4128_v6  ;;  %1757 = vst.msk [vmem:[#allocation3 + $0x378] sm:$0xff] %vm1719_vm5, %v9860_v36  ;;  %v4145_v27 = vor.u32 %v4144_v7, %v4141_v0  ;;  %v4150_v1 = vrot.slane %v4148_v32, 1  ;;  %v4160_v52 = vshll.u32 %v9863_v59, 16  ;;  %v13806_v58 = vrot.slane %v11571_v5, 2 }
 0x2a0   : > { %7122 = vmatprep.mubr.bf16.mxu1 %v6581_v9  ;;  %4683 = vrot.lane.b32.xlu0 %v4606_v62, %s10075_s29  ;;  %4247 = vst.msk [vmem:[#allocation3 + $0x338] sm:$0xff] %vm1719_vm5, %v4137_v20  ;;  %v13807_v12 = vrot.slane %v11518_v57, 2  ;;  %v4153_v11 = vrot.slane %v4151_v63, 2  ;;  %v9869_v16 = vld [vmem:[#allocation2 + $0x144] ss:$0 sps:$4 sm:$0x33]   ;;  %v6382_v4 = vsel %vm512_vm1, %v11322_v42, %v11407_v40 }
 0x2a1   : > { %7123 = vmatmul.mubr.bf16.gmra.mrb[16].mxu1 %v6580_v21  ;;  %v2410_v24 = vpop.permute.xlu1 %2409  ;;  %v5967_v21 = vpop.permute.xlu0 %5966  ;;  %v13809_v14 = vrot.slane %v11551_v25, 1  ;;  %v4146_v57 = vsel %vm3814_vm6, %v4136_v50, %v4145_v27  ;;  %v4159_v34 = vrot.slane %v4157_v55, 1  ;;  %v4162_v9 = vrot.slane %v4160_v52, 2  ;;  %1758 = vst.msk [vmem:[#allocation3 + $0x390] sm:$0xff] %vm1719_vm5, %v9866_v33  ;;  %v9924_v8 = vld [vmem:[#allocation2 + $0x30] sm:$0xff]   ;;  %v9925_v31 = vld [vmem:[#allocation2 + $0x3c] sm:$0xff]  }
 0x2a2   : > { %2499 = vst.msk [vmem:[#allocation3 + $0x2a0] sm:$0xff] %vm2470_vm11, %v2410_v24  ;;  %v5116_v39 = vsel %vm4529_vm9, %v13807_v12, %v13806_v58  ;;  %v11752_v62 = vld [vmem:[#allocation2 + $0xb4] sm:$0xf]  ;;  %v13810_v6 = vrot.slane %v11589_v53, 2  ;;  %v13811_v25 = vrot.slane %v11566_v17, 2  ;;  %v4154_v0 = vor.u32 %v4153_v11, %v4150_v1  ;;  %v11764_v59 = vld [vmem:[#allocation2 + $0x148] sm:$0xff]  }
 0x2a3   : > { %3013 = vst.msk [vmem:[#allocation3 + $0x2a0] sm:$0xff] %vm2984_vm12, %v2924_v29  ;;  %2429 = vrot.lane.b32.xlu1 %v2352_v61, %s10075_s29  ;;  %v13808_v29 = vrot.slane %v11587_v44, 1  ;;  %v11760_v50 = vld [vmem:[#allocation2 + $0x18] sm:$0xfc]   ;;  %v4166_v7 = vshrl.u32 %v9869_v16, 16  ;;  %v4169_v32 = vshll.u32 %v9869_v16, 16  ;;  %v4163_v61 = vor.u32 %v4162_v9, %v4159_v34 }
 0x2a4   : > { %6057 = vst.msk [vmem:[#allocation3 + $0x278] sm:$0xff] %vm3497_vm13, %v5967_v21  ;;  %5193 = vrot.lane.b32.xlu0 %v5116_v39, %s10074_s28  ;;  %v4608_v20 = vsel %vm4529_vm9, %v13811_v25, %v13810_v6  ;;  %v5897_v24 = vshrl.u32 %v11727_v46, 16  ;;  %v3869_v53 = vshrl.u32 %v9925_v31, 16  ;;  %v3872_v17 = vshll.u32 %v9925_v31, 16  ;;  %v11772_v1 = vld [vmem:[#allocation2 + $0x18] sm:$0xfc]  }
 0x2a5   : > { %v3377_v36 = vsel %vm2787_vm7, %v13809_v14, %v13808_v29  ;;  %6482 = vst.msk [vmem:[#allocation3 + $0x190] sm:$0xff] %vm1719_vm5, %v6382_v4  ;;  %v3435_v42 = vpop.permute.xlu1 %3434  ;;  %4248 = vst.msk [vmem:[#allocation3 + $0x350] sm:$0xff] %vm1719_vm5, %v4146_v57  ;;  %v4666_v63 = vpop.permute.xlu0 %4665  ;;  %v11770_v55 = vor.u32 %v5893_v48, %v11664_v45  ;;  %v4155_v52 = vsel %vm3814_vm6, %v4145_v27, %v4154_v0  ;;  %v4168_v33 = vrot.slane %v4166_v7, 1  ;;  %v6108_v16 = vld [vmem:[#allocation2 + $0xb0] sm:$0xf]  ;;  %v11781_v4 = vld [vmem:[#allocation2 + $0x18] sm:$0xff]  }
 0x2a6   : > { %3525 = vst.msk [vmem:[#allocation3 + $0x288] sm:$0xff] %vm3497_vm13, %v3435_v42  ;;  %v4171_v21 = vrot.slane %v4169_v32, 2  ;;  %v5900_v58 = vshll.u32 %v11727_v46, 16  ;;  %v4164_v12 = vsel %vm3814_vm6, %v4154_v0, %v4163_v61  ;;  %v3871_v39 = vrot.slane %v3869_v53, 1  ;;  %v6111_v6 = vld [vmem:[#allocation2 + $0xbc] sm:$0xf] }
 0x2a7   : > { %1726 = vst.msk [vmem:[#allocation3 + $0x90] sm:$0xff] %vm1719_vm5, %v9924_v8  ;;  %3454 = vrot.lane.b32.xlu1 %v3377_v36, %s10076_s7  ;;  %4249 = vst.msk [vmem:[#allocation3 + $0x368] sm:$0xff] %vm1719_vm5, %v4155_v52  ;;  %v3874_v11 = vrot.slane %v3872_v17, 2  ;;  %v3378_v48 = vrot.slane %v11738_v47, 1  ;;  %v8722_v29 = vcombine.low %v6108_v16, %v11752_v62  ;;  %v13812_v46 = vrot.slane %v11516_v35, 1  ;;  %v11812_v0 = vld [vmem:[#allocation2 + $0x1c] sm:$0xff]  }
 0x2a8   : > { %4754 = vst.msk [vmem:[#allocation3 + $0x2a8] sm:$0xff] %vm2470_vm11, %v4666_v63  ;;  %4685 = vrot.lane.b32.xlu0 %v4608_v20, %s10075_s29  ;;  %v4172_v27 = vor.u32 %v4171_v21, %v4168_v33  ;;  %v11790_v36 = vld [vmem:[#allocation2 + $0x150] ss:$0 sps:$4 sm:$0x77]   ;;  %v6384_v47 = vsel %vm512_vm1, %v11407_v40, %v11415_v19  ;;  %v5117_v8 = vrot.slane %v11764_v59, 2  ;;  %v5899_v31 = vrot.slane %v5897_v24, 2 }
 0x2a9   : > { %v2926_v45 = vpop.permute.xlu1 %2925  ;;  %4250 = vst.msk [vmem:[#allocation3 + $0x380] sm:$0xff] %vm1719_vm5, %v4164_v12  ;;  %v2866_v14 = vsel %vm2787_vm7, %v13812_v46, %v2865_v60  ;;  %v11792_v57 = vor.u32 %v3874_v11, %v3871_v39  ;;  %v5176_v34 = vpop.permute.xlu0 %5175  ;;  %v5556_v38 = vshrl.u32 %v11760_v50, 16  ;;  %6483 = vst.msk [vmem:[#allocation3 + $0x1a8] sm:$0xff] %vm1719_vm5, %v6384_v47  ;;  %v6583_v60 = vld [vmem:[#allocation3 + $0x270] sm:$0xff]  ;;  %v5895_v40 = vsel %vm5554_vm10, %v11676_v3, %v11770_v55  ;;  %v9932_v53 = vld [vmem:[#allocation2 + $0x38] sm:$0xff]  }
 0x2aa   : > { %v4173_v35 = vsel %vm3814_vm6, %v4163_v61, %v4172_v27  ;;  %5265 = vst.msk [vmem:[#allocation3 + $0x290] sm:$0xff] %vm2984_vm12, %v5176_v34  ;;  %v5902_v62 = vrot.slane %v5900_v58, 3  ;;  %v5042_v20 = vrot.slane %v11772_v1, 2  ;;  %v5559_v7 = vshll.u32 %v11760_v50, 16  ;;  %v6110_v17 = vld [vmem:[#allocation2 + $0xb8] sm:$0xf] }
 0x2ab   : > { %v6584_v9 = vld [vmem:[#allocation3 + $0x278] sm:$0xff]  ;;  %2943 = vrot.lane.b32.xlu1 %v2866_v14, %s10074_s28  ;;  %4251 = vst.msk [vmem:[#allocation3 + $0x398] sm:$0xff] %vm1719_vm5, %v4173_v35  ;;  %v3876_v42 = vsel %vm3814_vm6, %v10483_v56, %v11792_v57  ;;  %v2061_v3 = vshll.u32 %v11781_v4, 16  ;;  %v11817_v32 = vrot.slane %v8722_v29, 3  ;;  %v13813_v56 = vrot.slane %v11587_v44, 1  ;;  %v11828_v33 = vld [vmem:[#allocation2 + $0x20] sm:$0xff]  }
 0x2ac   : > { %7130 = vmatprep.mubr.bf16.mxu1 %v6584_v9  ;;  %5986 = vrot.lane.b32.xlu0 %v5895_v40, %s10076_s7  ;;  %4218 = vst.msk [vmem:[#allocation3 + $0x80] sm:$0xff] %vm1719_vm5, %v3876_v42  ;;  %v9798_v61 = vld [vmem:[#allocation2 + $0x150] ss:$0 sps:$4 sm:$0x33]   ;;  %v13814_v50 = vshrl.u32 %v10804_v37, 16  ;;  %v11830_v21 = vrot.slane %v5556_v38, 2  ;;  %v11838_v39 = vor.u32 %v5902_v62, %v5899_v31  ;;  %v8723_v27 = vcombine.low %v6110_v17, %v6111_v6 }
 0x2ad   : > { %7131 = vmatmul.mubr.bf16.gmra.mrb[20].mxu1 %v6583_v60  ;;  %v2412_v25 = vpop.permute.xlu1 %2411  ;;  %v3379_v24 = vsel %vm2787_vm7, %v13813_v56, %v3378_v48  ;;  %v5969_v63 = vpop.permute.xlu0 %5968  ;;  %v9933_v58 = vld [vmem:[#allocation2 + $0x44] sm:$0xff]   ;;  %v13815_v44 = vrot.slane %v11571_v5, 2  ;;  %v5906_v11 = vshrl.u32 %v11790_v36, 16  ;;  %v5909_v37 = vshll.u32 %v11790_v36, 16  ;;  %1727 = vst.msk [vmem:[#allocation3 + $0xa8] sm:$0xff] %vm1719_vm5, %v9932_v53  ;;  %v11865_v42 = vld [vmem:[#allocation2 + $0x1c] sm:$0xff]  }
 0x2ae   : > { %2500 = vst.msk [vmem:[#allocation3 + $0x2b8] sm:$0xff] %vm2470_vm11, %v2412_v25  ;;  %v2043_v52 = vor.u32 %v10853_v22, %v13814_v50  ;;  %v3881_v48 = vshll.u32 %v9933_v58, 16  ;;  %v11847_v5 = vrot.slane %v5559_v7, 3  ;;  %v11849_v29 = vrot.slane %v2061_v3, 1  ;;  %v9813_v47 = vld [vmem:[#allocation2 + $0x20] sm:$0xff]  }
 0x2af   : > { %3014 = vst.msk [vmem:[#allocation3 + $0x2b8] sm:$0xff] %vm2984_vm12, %v2926_v45  ;;  %3456 = vrot.lane.b32.xlu1 %v3379_v24, %s10076_s7  ;;  %v5118_v12 = vsel %vm4529_vm9, %v13815_v44, %v5117_v8  ;;  %v3878_v45 = vshrl.u32 %v9933_v58, 16  ;;  %v6386_v46 = vsel %vm512_vm1, %v11415_v19, %v11817_v32  ;;  %v3304_v36 = vrot.slane %v11812_v0, 1  ;;  %v11861_v19 = vld [vmem:[#allocation2 + $0x18] sm:$0xff]   ;;  %v6113_v7 = vld [vmem:[#allocation2 + $0xc4] sm:$0xf] }
 0x2b0   : > { %6058 = vst.msk [vmem:[#allocation3 + $0x290] sm:$0xff] %vm3497_vm13, %v5969_v63  ;;  %5195 = vrot.lane.b32.xlu0 %v5118_v12, %s10074_s28  ;;  %v2048_v16 = vsel %vm2036_vm8, %v2043_v52, %v10900_v23  ;;  %v3883_v9 = vrot.slane %v3881_v48, 2  ;;  %v5904_v31 = vsel %vm5554_vm10, %v11770_v55, %v11838_v39  ;;  %v5119_v38 = vrot.slane %v9798_v61, 2  ;;  %v6586_v3 = vld [vmem:[#allocation3 + $0x288] sm:$0xff] }
 0x2b1   : > { %v3437_v22 = vpop.permute.xlu1 %3436  ;;  %v4668_v14 = vpop.permute.xlu0 %4667  ;;  %v3880_v34 = vrot.slane %v3878_v45, 1  ;;  %6484 = vst.msk [vmem:[#allocation3 + $0x1c0] sm:$0xff] %vm1719_vm5, %v6386_v46  ;;  %v5908_v35 = vrot.slane %v5906_v11, 2  ;;  %v5911_v60 = vrot.slane %v5909_v37, 3  ;;  %v5043_v62 = vrot.slane %v11828_v33, 2  ;;  %v9940_v52 = vld [vmem:[#allocation2 + $0x40] sm:$0xff]  }
 0x2b2   : > { %3526 = vst.msk [vmem:[#allocation3 + $0x2a0] sm:$0xff] %vm3497_vm13, %v3437_v22  ;;  %v11869_v25 = vrot.slane %v8723_v27, 3  ;;  %v13816_v55 = vrot.slane %v10855_v28, 1  ;;  %v13817_v56 = vrot.slane %v10816_v43, 1  ;;  %v5564_v17 = vshrl.u32 %v9813_v47, 16  ;;  %v11895_v45 = vld [vmem:[#allocation2 + $0x20] sm:$0xff]  }
 0x2b3   : > { %2353 = vrot.lane.b32.xlu1 %v2048_v16, %s10075_s29  ;;  %4755 = vst.msk [vmem:[#allocation3 + $0x2c0] sm:$0xff] %vm2470_vm11, %v4668_v14  ;;  %v11867_v6 = vor.u32 %v3883_v9, %v3880_v34  ;;  %v5567_v63 = vshll.u32 %v9813_v47, 16  ;;  %v5120_v43 = vsel %vm4529_vm9, %v5117_v8, %v5119_v38  ;;  %v5912_v58 = vor.u32 %v5911_v60, %v5908_v35  ;;  %v6112_v44 = vld [vmem:[#allocation2 + $0xc0] sm:$0xf]  ;;  %v11902_v46 = vld [vmem:[#allocation2 + $0x28] sm:$0xff]  }
 0x2b4   : > { %5988 = vrot.lane.b32.xlu0 %v5904_v31, %s10076_s7  ;;  %v2790_v24 = vsel %vm2787_vm7, %v13817_v56, %v13816_v55  ;;  %v4533_v11 = vrot.slane %v11865_v42, 2  ;;  %1728 = vst.msk [vmem:[#allocation3 + $0xc0] sm:$0xff] %vm1719_vm5, %v9940_v52  ;;  %v8724_v37 = vcombine.low %v6112_v44, %v6113_v7  ;;  %v13818_v59 = vrot.slane %v10998_v10, 1  ;;  %v11904_v14 = vld [vmem:[#allocation2 + $0x24] sm:$0xff]  }
 0x2b5   : > { %v2928_v40 = vpop.permute.xlu1 %2927  ;;  %v5178_v61 = vpop.permute.xlu0 %5177  ;;  %v3885_v50 = vsel %vm3814_vm6, %v11792_v57, %v11867_v6  ;;  %v9941_v57 = vld [vmem:[#allocation2 + $0x4c] sm:$0xff]   ;;  %v13819_v8 = vrot.slane %v10865_v13, 1  ;;  %v2793_v16 = vrot.slane %v11861_v19, 1  ;;  %v6388_v48 = vsel %vm512_vm1, %v11817_v32, %v11869_v25 }
 0x2b6   : > { %5266 = vst.msk [vmem:[#allocation3 + $0x2a8] sm:$0xff] %vm2984_vm12, %v5178_v61  ;;  %v3887_v13 = vshrl.u32 %v9941_v57, 16  ;;  %v3890_v47 = vshll.u32 %v9941_v57, 16  ;;  %v5913_v34 = vsel %vm5554_vm10, %v11838_v39, %v5912_v58  ;;  %v13820_v32 = vshrl.u32 %v10826_v2, 16  ;;  %v11913_v38 = vld [vmem:[#allocation2 + $0x28] sm:$0xff]  }
 0x2b7   : > { %v6587_v53 = vld [vmem:[#allocation3 + $0x290] sm:$0xff]  ;;  %2867 = vrot.lane.b32.xlu1 %v2790_v24, %s10074_s28  ;;  %4219 = vst.msk [vmem:[#allocation3 + $0x98] sm:$0xff] %vm1719_vm5, %v3885_v50  ;;  %v3303_v22 = vsel %vm2787_vm7, %v13819_v8, %v13818_v59  ;;  %6485 = vst.msk [vmem:[#allocation3 + $0x1d8] sm:$0xff] %vm1719_vm5, %v6388_v48  ;;  %v5566_v31 = vrot.slane %v5564_v17, 2  ;;  %v5569_v60 = vrot.slane %v5567_v63, 3  ;;  %v11918_v55 = vrot.slane %v8724_v37, 3 }
 0x2b8   : > { %7138 = vmatprep.mubr.bf16.mxu1 %v6587_v53  ;;  %5197 = vrot.lane.b32.xlu0 %v5120_v43, %s10074_s28  ;;  %v2051_v9 = vor.u32 %v13820_v32, %v10900_v23  ;;  %v3889_v7 = vrot.slane %v3887_v13, 1  ;;  %v2069_v2 = vshll.u32 %v11895_v45, 16  ;;  %v6115_v23 = vld [vmem:[#allocation2 + $0xcc] sm:$0xf]  ;;  %v13821_v24 = vrot.slane %v11000_v26, 2 }
 0x2b9   : > { %7139 = vmatmul.mubr.bf16.gmra.mrb[24].mxu1 %v6586_v3  ;;  %v2414_v12 = vpop.permute.xlu1 %2413  ;;  %v5971_v27 = vpop.permute.xlu0 %5970  ;;  %v3892_v3 = vrot.slane %v3890_v47, 2  ;;  %v13822_v61 = vrot.slane %v10867_v41, 2  ;;  %v5045_v63 = vrot.slane %v11902_v46, 2  ;;  %v3306_v50 = vrot.slane %v11904_v14, 1  ;;  %v6114_v58 = vld [vmem:[#allocation2 + $0xc8] sm:$0xf] }
 0x2ba   : > { %2501 = vst.msk [vmem:[#allocation3 + $0x2d0] sm:$0xff] %vm2470_vm11, %v2414_v12  ;;  %v2056_v39 = vsel %vm2036_vm8, %v2051_v9, %v11024_v49  ;;  %v5573_v52 = vshrl.u32 %v11913_v38, 16  ;;  %v2065_v43 = vshrl.u32 %v11781_v4, 16  ;;  %v8725_v12 = vcombine.low %v6114_v58, %v6115_v23  ;;  %v6589_v32 = vld [vmem:[#allocation3 + $0x2a0] sm:$0xff]  ;;  %v6121_v4 = vld [vmem:[#allocation2 + $0xe4] sm:$0xf] }
 0x2bb   : > { %3015 = vst.msk [vmem:[#allocation3 + $0x2d0] sm:$0xff] %vm2984_vm12, %v2928_v40  ;;  %3380 = vrot.lane.b32.xlu1 %v3303_v22, %s10076_s7  ;;  %v11916_v40 = vld [vmem:[#allocation2 + $0x24] sm:$0xff]   ;;  %v4532_v53 = vsel %vm4529_vm9, %v13822_v61, %v13821_v24  ;;  %v11930_v17 = vor.u32 %v3892_v3, %v3889_v7  ;;  %v13823_v57 = vrot.slane %v10889_v30, 1  ;;  %v13824_v37 = vrot.slane %v10855_v28, 1  ;;  %v11970_v7 = vld [vmem:[#allocation2 + $0x30] sm:$0xff]  }
 0x2bc   : > { %6059 = vst.msk [vmem:[#allocation3 + $0x2a8] sm:$0xff] %vm3497_vm13, %v5971_v27  ;;  %5990 = vrot.lane.b32.xlu0 %v5913_v34, %s10076_s7  ;;  %v5576_v8 = vshll.u32 %v11913_v38, 16  ;;  %v9948_v22 = vld [vmem:[#allocation2 + $0x48] sm:$0xff]   ;;  %v6390_v48 = vsel %vm512_vm1, %v11869_v25, %v11918_v55  ;;  %v4535_v47 = vrot.slane %v11916_v40, 2  ;;  %v11955_v28 = vld [vmem:[#allocation2 + $0x20] sm:$0xff]   ;;  %v9949_v34 = vld [vmem:[#allocation2 + $0x54] sm:$0xff]   ;;  %v5044_v25 = vsel %vm4529_vm9, %v5042_v20, %v5043_v62 }
 0x2bd   : > { %v3439_v35 = vpop.permute.xlu1 %3438  ;;  %v4670_v56 = vpop.permute.xlu0 %4669  ;;  %v3894_v41 = vsel %vm3814_vm6, %v11867_v6, %v11930_v17  ;;  %v2792_v59 = vsel %vm2787_vm7, %v13824_v37, %v13823_v57  ;;  %v11952_v6 = vrot.slane %v2069_v2, 1  ;;  %6486 = vst.msk [vmem:[#allocation3 + $0x1f0] sm:$0xff] %vm1719_vm5, %v6390_v48  ;;  %v11964_v9 = vor.u32 %v5569_v60, %v5566_v31  ;;  %1729 = vst.msk [vmem:[#allocation3 + $0xd8] sm:$0xff] %vm1719_vm5, %v9948_v22  ;;  %v11972_v3 = vld [vmem:[#allocation2 + $0x2c] sm:$0xff]  }
 0x2be   : > { %3527 = vst.msk [vmem:[#allocation3 + $0x2b8] sm:$0xff] %vm3497_vm13, %v3439_v35  ;;  %v11966_v38 = vrot.slane %v5573_v52, 2  ;;  %v3899_v2 = vshll.u32 %v9949_v34, 16  ;;  %v11974_v23 = vrot.slane %v8725_v12, 3  ;;  %v13825_v1 = vrot.slane %v10998_v10, 1  ;;  %v11984_v60 = vld [vmem:[#allocation2 + $0x30] sm:$0xff]  }
 0x2bf   : > { %2355 = vrot.lane.b32.xlu1 %v2056_v39, %s10075_s29  ;;  %4756 = vst.msk [vmem:[#allocation3 + $0x2d8] sm:$0xff] %vm2470_vm11, %v4670_v56  ;;  %v3896_v39 = vshrl.u32 %v9949_v34, 16  ;;  %v5562_v31 = vor.u32 %v11847_v5, %v11830_v21  ;;  %v6116_v56 = vld [vmem:[#allocation2 + $0xd0] sm:$0xf]  ;;  %v6117_v52 = vld [vmem:[#allocation2 + $0xd4] sm:$0xf]  ;;  %v3307_v33 = vsel %vm2787_vm7, %v3304_v36, %v3306_v50 }
 0x2c0   : > { %4609 = vrot.lane.b32.xlu0 %v4532_v53, %s10075_s29  ;;  %4220 = vst.msk [vmem:[#allocation3 + $0xb0] sm:$0xff] %vm1719_vm5, %v3894_v41  ;;  %v3305_v20 = vsel %vm2787_vm7, %v13825_v1, %v3304_v36  ;;  %v3901_v53 = vrot.slane %v3899_v2, 2  ;;  %v13826_v58 = vshrl.u32 %v10884_v15, 16  ;;  %v5578_v41 = vrot.slane %v5576_v8, 3  ;;  %v11997_v57 = vld [vmem:[#allocation2 + $0x28] sm:$0xff]   ;;  %v9957_v2 = vld [vmem:[#allocation2 + $0x5c] sm:$0xff]  }
 0x2c1   : > { %v2930_v44 = vpop.permute.xlu1 %2929  ;;  %v5180_v27 = vpop.permute.xlu0 %5179  ;;  %v3898_v61 = vrot.slane %v3896_v39, 1  ;;  %v5571_v10 = vsel %vm5554_vm10, %v5562_v31, %v11964_v9  ;;  %v3308_v12 = vrot.slane %v11972_v3, 1  ;;  %v5047_v15 = vrot.slane %v11970_v7, 2  ;;  %v6118_v1 = vld [vmem:[#allocation2 + $0xd8] sm:$0xf] }
 0x2c2   : > { %5267 = vst.msk [vmem:[#allocation3 + $0x2c0] sm:$0xff] %vm2984_vm12, %v5180_v27  ;;  %v2059_v21 = vor.u32 %v13826_v58, %v11024_v49  ;;  %v2073_v49 = vshrl.u32 %v11895_v45, 16  ;;  %v6392_v8 = vsel %vm512_vm1, %v11918_v55, %v11974_v23  ;;  %v8726_v22 = vcombine.low %v6116_v56, %v6117_v52  ;;  %v12032_v56 = vld [vmem:[#allocation2 + $0x38] sm:$0xff]   ;;  %v6125_v7 = vld [vmem:[#allocation2 + $0xf4] sm:$0xf] }
 0x2c3   : > { %v6590_v13 = vld [vmem:[#allocation3 + $0x2a8] sm:$0xff]  ;;  %2869 = vrot.lane.b32.xlu1 %v2792_v59, %s10074_s28  ;;  %v11999_v37 = vor.u32 %v3901_v53, %v3898_v61  ;;  %v5582_v27 = vshrl.u32 %v11984_v60, 16  ;;  %6487 = vst.msk [vmem:[#allocation3 + $0x208] sm:$0xff] %vm1719_vm5, %v6392_v8  ;;  %v13827_v55 = vrot.slane %v11000_v26, 2  ;;  %v13828_v31 = vrot.slane %v10889_v30, 1 }
 0x2c4   : > { %7146 = vmatprep.mubr.bf16.mxu1 %v6590_v13  ;;  %5121 = vrot.lane.b32.xlu0 %v5044_v25, %s10074_s28  ;;  %v2064_v59 = vsel %vm2036_vm8, %v2059_v21, %v11849_v29  ;;  %v12011_v13 = vld [vmem:[#allocation2 + $0x2c] sm:$0xff]   ;;  %v5585_v25 = vshll.u32 %v11984_v60, 16  ;;  %v12035_v60 = vrot.slane %v8726_v22, 3  ;;  %v3905_v53 = vshrl.u32 %v9957_v2, 16 }
 0x2c5   : > { %7147 = vmatmul.mubr.bf16.gmra.mrb[28].mxu1 %v6589_v32  ;;  %v2416_v35 = vpop.permute.xlu1 %2415  ;;  %v5973_v24 = vpop.permute.xlu0 %5972  ;;  %v3903_v34 = vsel %vm3814_vm6, %v11930_v17, %v11999_v37  ;;  %v4534_v32 = vsel %vm4529_vm9, %v13827_v55, %v4533_v11  ;;  %v2077_v17 = vshll.u32 %v11997_v57, 16  ;;  %v2794_v26 = vsel %vm2787_vm7, %v13828_v31, %v2793_v16  ;;  %v12067_v55 = vld [vmem:[#allocation2 + $0x34] sm:$0xff]  }
 0x2c6   : > { %2502 = vst.msk [vmem:[#allocation3 + $0x2e8] sm:$0xff] %vm2470_vm11, %v2416_v35  ;;  %v9956_v35 = vld [vmem:[#allocation2 + $0x50] sm:$0xff]   ;;  %v3908_v52 = vshll.u32 %v9957_v2, 16  ;;  %v5046_v30 = vsel %vm4529_vm9, %v5043_v62, %v5045_v63  ;;  %v12045_v58 = vor.u32 %v5578_v41, %v11966_v38  ;;  %v4537_v21 = vrot.slane %v12011_v13, 2  ;;  %v12059_v38 = vld [vmem:[#allocation2 + $0x28] sm:$0xff]   ;;  %v12061_v41 = vld [vmem:[#allocation2 + $0x38] sm:$0xff]  }
 0x2c7   : > { %3016 = vst.msk [vmem:[#allocation3 + $0x2e8] sm:$0xff] %vm2984_vm12, %v2930_v44  ;;  %3382 = vrot.lane.b32.xlu1 %v3305_v20, %s10076_s7  ;;  %v2795_v44 = vrot.slane %v11955_v28, 1  ;;  %v6119_v20 = vld [vmem:[#allocation2 + $0xdc] sm:$0xf]  ;;  %v12049_v8 = vrot.slane %v5582_v27, 2  ;;  %v3907_v22 = vrot.slane %v3905_v53, 1  ;;  %v6394_v0 = vsel %vm512_vm1, %v11974_v23, %v12035_v60 }
 0x2c8   : > { %6060 = vst.msk [vmem:[#allocation3 + $0x2c0] sm:$0xff] %vm3497_vm13, %v5973_v24  ;;  %5914 = vrot.lane.b32.xlu0 %v5571_v10, %s10076_s7  ;;  %v6592_v10 = vld [vmem:[#allocation3 + $0x2b8] sm:$0xff]  ;;  %v12057_v62 = vrot.slane %v5585_v25, 3  ;;  %v5580_v36 = vsel %vm5554_vm10, %v11964_v9, %v12045_v58  ;;  %v2067_v25 = vor.u32 %v2065_v43, %v11849_v29  ;;  %v12097_v31 = vld [vmem:[#allocation2 + $0x34] sm:$0xff]   ;;  %v5594_v42 = vshll.u32 %v12032_v56, 16 }
 0x2c9   : > { %v3441_v5 = vpop.permute.xlu1 %3440  ;;  %v4672_v48 = vpop.permute.xlu0 %4671  ;;  %4221 = vst.msk [vmem:[#allocation3 + $0xc8] sm:$0xff] %vm1719_vm5, %v3903_v34  ;;  %1730 = vst.msk [vmem:[#allocation3 + $0xf0] sm:$0xff] %vm1719_vm5, %v9956_v35  ;;  %v12065_v34 = vrot.slane %v2077_v17, 1  ;;  %v5591_v35 = vshrl.u32 %v12032_v56, 16  ;;  %v12086_v2 = vld [vmem:[#allocation2 + $0x30] sm:$0xff]   ;;  %v2796_v53 = vsel %vm2787_vm7, %v2793_v16, %v2795_v44  ;;  %v2081_v19 = vshrl.u32 %v11997_v57, 16 }
 0x2ca   : > { %3528 = vst.msk [vmem:[#allocation3 + $0x2d0] sm:$0xff] %vm3497_vm13, %v3441_v5  ;;  %v8727_v5 = vcombine.low %v6118_v1, %v6119_v20  ;;  %v9963_v1 = vld [vmem:[#allocation2 + $0x64] sm:$0xff]   ;;  %v6120_v20 = vld [vmem:[#allocation2 + $0xe0] sm:$0xf]  ;;  %v2072_v29 = vsel %vm2036_vm8, %v2067_v25, %v11952_v6 }
 0x2cb   : > { %2357 = vrot.lane.b32.xlu1 %v2064_v59, %s10075_s29  ;;  %4757 = vst.msk [vmem:[#allocation3 + $0x2f0] sm:$0xff] %vm2470_vm11, %v4672_v48  ;;  %v3910_v48 = vrot.slane %v3908_v52, 2  ;;  %v2797_v52 = vrot.slane %v12059_v38, 1  ;;  %v9967_v56 = vld [vmem:[#allocation2 + $0x68] sm:$0xff]   ;;  %v2083_v3 = vor.u32 %v2081_v19, %v12065_v34 }
 0x2cc   : > { %4611 = vrot.lane.b32.xlu0 %v4534_v32, %s10075_s29  ;;  %6488 = vst.msk [vmem:[#allocation3 + $0x220] sm:$0xff] %vm1719_vm5, %v6394_v0  ;;  %v12083_v17 = vrot.slane %v8727_v5, 3  ;;  %v9966_v5 = vld [vmem:[#allocation2 + $0x6c] sm:$0xff]   ;;  %1733 = vst.msk [vmem:[#allocation3 + $0x138] sm:$0xff] %vm1719_vm5, %v9967_v56  ;;  %v9972_v56 = vld [vmem:[#allocation2 + $0x84] sm:$0xff]  }
 0x2cd   : > { %v2932_v39 = vpop.permute.xlu1 %2931  ;;  %v5182_v24 = vpop.permute.xlu0 %5181  ;;  %v12069_v32 = vor.u32 %v3910_v48, %v3907_v22  ;;  %v3310_v22 = vrot.slane %v12067_v55, 1  ;;  %v3923_v16 = vshrl.u32 %v9966_v5, 16  ;;  %v3926_v0 = vshll.u32 %v9966_v5, 16  ;;  %v9969_v5 = vld [vmem:[#allocation2 + $0x70] sm:$0xff]  }
 0x2ce   : > { %5268 = vst.msk [vmem:[#allocation3 + $0x2d8] sm:$0xff] %vm2984_vm12, %v5182_v24  ;;  %v3917_v24 = vshll.u32 %v9963_v1, 16 }
 0x2cf   : > { %v6593_v61 = vld [vmem:[#allocation3 + $0x2c0] sm:$0xff]  ;;  %2871 = vrot.lane.b32.xlu1 %v2794_v26, %s10074_s28  ;;  %v3912_v9 = vsel %vm3814_vm6, %v11999_v37, %v12069_v32  ;;  %v3914_v37 = vshrl.u32 %v9963_v1, 16  ;;  %v6396_v1 = vsel %vm512_vm1, %v12035_v60, %v12083_v17  ;;  %1734 = vst.msk [vmem:[#allocation3 + $0x150] sm:$0xff] %vm1719_vm5, %v9969_v5  ;;  %v2798_v5 = vsel %vm2787_vm7, %v2795_v44, %v2797_v52 }
 0x2d0   : > { %7154 = vmatprep.mubr.bf16.mxu1 %v6593_v61  ;;  %5123 = vrot.lane.b32.xlu0 %v5046_v30, %s10074_s28  ;;  %4222 = vst.msk [vmem:[#allocation3 + $0xe0] sm:$0xff] %vm1719_vm5, %v3912_v9  ;;  %v12099_v26 = vld [vmem:[#allocation2 + $0x30] sm:$0xff]   ;;  %v4536_v61 = vsel %vm4529_vm9, %v4533_v11, %v4535_v47  ;;  %v9965_v30 = vld [vmem:[#allocation2 + $0x60] sm:$0xff]   ;;  %v3919_v48 = vrot.slane %v3917_v24, 2  ;;  %6489 = vst.msk [vmem:[#allocation3 + $0x238] sm:$0xff] %vm1719_vm5, %v6396_v1 }
 0x2d1   : > { %7155 = vmatmul.mubr.bf16.gmra.mrb[32].mxu1 %v6592_v10  ;;  %v2418_v59 = vpop.permute.xlu1 %2417  ;;  %v5975_v27 = vpop.permute.xlu0 %5974  ;;  %v5049_v10 = vrot.slane %v12061_v41, 2  ;;  %v3916_v11 = vrot.slane %v3914_v37, 1  ;;  %1732 = vst.msk [vmem:[#allocation3 + $0x120] sm:$0xff] %vm1719_vm5, %v9965_v30  ;;  %v4539_v37 = vrot.slane %v12097_v31, 2  ;;  %v2799_v46 = vrot.slane %v12099_v26, 1  ;;  %v12142_v24 = vld [vmem:[#allocation2 + $0x40] sm:$0xff]  }
 0x2d2   : > { %2503 = vst.msk [vmem:[#allocation3 + $0x300] sm:$0xff] %vm2470_vm11, %v2418_v59  ;;  %v2089_v41 = vshrl.u32 %v12086_v2, 16 }
 0x2d3   : > { %3017 = vst.msk [vmem:[#allocation3 + $0x300] sm:$0xff] %vm2984_vm12, %v2932_v39  ;;  %3384 = vrot.lane.b32.xlu1 %v3307_v33, %s10076_s7  ;;  %v9962_v39 = vld [vmem:[#allocation2 + $0x58] sm:$0xff]   ;;  %v8728_v33 = vcombine.low %v6120_v20, %v6121_v4  ;;  %v3920_v9 = vor.u32 %v3919_v48, %v3916_v11  ;;  %v5048_v20 = vsel %vm4529_vm9, %v5045_v63, %v5047_v15  ;;  %v3925_v4 = vrot.slane %v3923_v16, 1 }
 0x2d4   : > { %6061 = vst.msk [vmem:[#allocation3 + $0x2d8] sm:$0xff] %vm3497_vm13, %v5975_v27  ;;  %5916 = vrot.lane.b32.xlu0 %v5580_v36, %s10076_s7  ;;  %v6595_v27 = vld [vmem:[#allocation3 + $0x2d0] sm:$0xff]  ;;  %v12144_v63 = vld [vmem:[#allocation2 + $0x3c] sm:$0xff]   ;;  %v5050_v44 = vsel %vm4529_vm9, %v5047_v15, %v5049_v10 }
 0x2d5   : > { %v3443_v23 = vpop.permute.xlu1 %3442  ;;  %1731 = vst.msk [vmem:[#allocation3 + $0x108] sm:$0xff] %vm1719_vm5, %v9962_v39  ;;  %v4674_v43 = vpop.permute.xlu0 %4673  ;;  %v12120_v39 = vrot.slane %v5591_v35, 2  ;;  %v12134_v35 = vor.u32 %v12057_v62, %v12049_v8  ;;  %v3921_v8 = vsel %vm3814_vm6, %v12069_v32, %v3920_v9  ;;  %v9968_v62 = vld [vmem:[#allocation2 + $0x74] sm:$0xff]  }
 0x2d6   : > { %3529 = vst.msk [vmem:[#allocation3 + $0x2e8] sm:$0xff] %vm3497_vm13, %v3443_v23  ;;  %v2085_v23 = vshll.u32 %v12086_v2, 16  ;;  %v3932_v11 = vshrl.u32 %v9968_v62, 16  ;;  %v3935_v48 = vshll.u32 %v9968_v62, 16  ;;  %v3950_v62 = vshrl.u32 %v9972_v56, 16 }
 0x2d7   : > { %2359 = vrot.lane.b32.xlu1 %v2072_v29, %s10075_s29  ;;  %4758 = vst.msk [vmem:[#allocation3 + $0x308] sm:$0xff] %vm2470_vm11, %v4674_v43  ;;  %v3928_v29 = vrot.slane %v3926_v0, 2  ;;  %v12138_v43 = vrot.slane %v5594_v42, 3  ;;  %v12160_v42 = vld [vmem:[#allocation2 + $0x40] sm:$0xff]   ;;  %v5589_v14 = vsel %vm5554_vm10, %v12045_v58, %v12134_v35  ;;  %v4538_v58 = vsel %vm4529_vm9, %v4535_v47, %v4537_v21 }
 0x2d8   : > { %4613 = vrot.lane.b32.xlu0 %v4536_v61, %s10075_s29  ;;  %v12149_v61 = vrot.slane %v8728_v33, 3  ;;  %4223 = vst.msk [vmem:[#allocation3 + $0xf8] sm:$0xff] %vm1719_vm5, %v3921_v8  ;;  %v6122_v33 = vld [vmem:[#allocation2 + $0xe8] sm:$0xf]  ;;  %v9970_v0 = vld [vmem:[#allocation2 + $0x7c] sm:$0xff]   ;;  %v3934_v45 = vrot.slane %v3932_v11, 1 }
 0x2d9   : > { %v2934_v59 = vpop.permute.xlu1 %2933  ;;  %v5184_v36 = vpop.permute.xlu0 %5183  ;;  %v3929_v30 = vor.u32 %v3928_v29, %v3925_v4  ;;  %v5051_v47 = vrot.slane %v12142_v24, 2  ;;  %v3312_v4 = vrot.slane %v12144_v63, 1 }
 0x2da   : > { %5269 = vst.msk [vmem:[#allocation3 + $0x2f0] sm:$0xff] %vm2984_vm12, %v5184_v36  ;;  %v6398_v1 = vsel %vm512_vm1, %v12083_v17, %v12149_v61 }
 0x2db   : > { %v6596_v25 = vld [vmem:[#allocation3 + $0x2d8] sm:$0xff]  ;;  %2873 = vrot.lane.b32.xlu1 %v2796_v53, %s10074_s28  ;;  %v3309_v53 = vsel %vm2787_vm7, %v3306_v50, %v3308_v12  ;;  %v2075_v50 = vor.u32 %v2073_v49, %v11952_v6  ;;  %v3930_v16 = vsel %vm3814_vm6, %v3920_v9, %v3929_v30  ;;  %v3937_v6 = vrot.slane %v3935_v48, 2  ;;  %v9971_v9 = vld [vmem:[#allocation2 + $0x78] sm:$0xff]   ;;  %6490 = vst.msk [vmem:[#allocation3 + $0x250] sm:$0xff] %vm1719_vm5, %v6398_v1  ;;  %v9973_v48 = vld [vmem:[#allocation2 + $0x80] sm:$0xff]  }
 0x2dc   : > { %7162 = vmatprep.mubr.bf16.mxu1 %v6596_v25  ;;  %5125 = vrot.lane.b32.xlu0 %v5048_v20, %s10074_s28  ;;  %4224 = vst.msk [vmem:[#allocation3 + $0x110] sm:$0xff] %vm1719_vm5, %v3930_v16  ;;  %v3941_v25 = vshrl.u32 %v9970_v0, 16  ;;  %1735 = vst.msk [vmem:[#allocation3 + $0x168] sm:$0xff] %vm1719_vm5, %v9971_v9  ;;  %v6124_v9 = vld [vmem:[#allocation2 + $0xf0] sm:$0xf] }
 0x2dd   : > { %7163 = vmatmul.mubr.bf16.gmra.mrb[36].mxu1 %v6595_v27  ;;  %v2420_v60 = vpop.permute.xlu1 %2419  ;;  %v5977_v32 = vpop.permute.xlu0 %5976  ;;  %v6123_v27 = vld [vmem:[#allocation2 + $0xec] sm:$0xf]  ;;  %v2080_v49 = vsel %vm2036_vm8, %v2075_v50, %v12065_v34  ;;  %v3938_v29 = vor.u32 %v3937_v6, %v3934_v45  ;;  %v3952_v50 = vrot.slane %v3950_v62, 1  ;;  %1736 = vst.msk [vmem:[#allocation3 + $0x180] sm:$0xff] %vm1719_vm5, %v9973_v48  ;;  %v8730_v34 = vcombine.low %v6124_v9, %v6125_v7 }
 0x2de   : > { %2504 = vst.msk [vmem:[#allocation3 + $0x318] sm:$0xff] %vm2470_vm11, %v2420_v60  ;;  %v8729_v40 = vcombine.low %v6122_v33, %v6123_v27  ;;  %v3943_v60 = vrot.slane %v3941_v25, 1  ;;  %v6598_v33 = vld [vmem:[#allocation3 + $0x2e8] sm:$0xff]  ;;  %v5603_v27 = vshll.u32 %v12160_v42, 16  ;;  %v9975_v25 = vld [vmem:[#allocation2 + $0x88] sm:$0xff]  }
 0x2df   : > { %3018 = vst.msk [vmem:[#allocation3 + $0x318] sm:$0xff] %vm2984_vm12, %v2934_v59  ;;  %3386 = vrot.lane.b32.xlu1 %v3309_v53, %s10076_s7  ;;  %v12169_v59 = vrot.slane %v2085_v23, 1  ;;  %v3944_v23 = vshll.u32 %v9970_v0, 16  ;;  %v3953_v53 = vshll.u32 %v9972_v56, 16  ;;  %v3939_v11 = vsel %vm3814_vm6, %v3929_v30, %v3938_v29  ;;  %v9974_v0 = vld [vmem:[#allocation2 + $0x8c] sm:$0xff]  }
 0x2e0   : > { %6062 = vst.msk [vmem:[#allocation3 + $0x2f0] sm:$0xff] %vm3497_vm13, %v5977_v32  ;;  %5918 = vrot.lane.b32.xlu0 %v5589_v14, %s10076_s7  ;;  %v5600_v32 = vshrl.u32 %v12160_v42, 16  ;;  %v12212_v30 = vor.u32 %v12138_v43, %v12120_v39  ;;  %v3959_v6 = vshrl.u32 %v9974_v0, 16  ;;  %v3311_v39 = vsel %vm2787_vm7, %v3308_v12, %v3310_v22  ;;  %v12232_v12 = vld [vmem:[#allocation2 + $0x38] sm:$0xff]  }
 0x2e1   : > { %v3445_v36 = vpop.permute.xlu1 %3444  ;;  %v4676_v20 = vpop.permute.xlu0 %4675  ;;  %v3946_v8 = vrot.slane %v3944_v23, 2  ;;  %4225 = vst.msk [vmem:[#allocation3 + $0x128] sm:$0xff] %vm1719_vm5, %v3939_v11  ;;  %v3955_v16 = vrot.slane %v3953_v53, 2  ;;  %v9976_v23 = vld [vmem:[#allocation2 + $0x94] sm:$0xff]   ;;  %1737 = vst.msk [vmem:[#allocation3 + $0x198] sm:$0xff] %vm1719_vm5, %v9975_v25  ;;  %v12263_v25 = vrot.slane %v8730_v34, 3 }
 0x2e2   : > { %3530 = vst.msk [vmem:[#allocation3 + $0x300] sm:$0xff] %vm3497_vm13, %v3445_v36  ;;  %v12202_v36 = vrot.slane %v8729_v40, 3  ;;  %v3961_v56 = vrot.slane %v3959_v6, 1  ;;  %v3968_v40 = vshrl.u32 %v9976_v23, 16  ;;  %v5598_v53 = vsel %vm5554_vm10, %v12134_v35, %v12212_v30  ;;  %v9981_v6 = vld [vmem:[#allocation2 + $0xa0] sm:$0xff]  }
 0x2e3   : > { %2361 = vrot.lane.b32.xlu1 %v2080_v49, %s10075_s29  ;;  %4759 = vst.msk [vmem:[#allocation3 + $0x320] sm:$0xff] %vm2470_vm11, %v4676_v20  ;;  %v3947_v14 = vor.u32 %v3946_v8, %v3943_v60  ;;  %v3956_v45 = vor.u32 %v3955_v16, %v3952_v50  ;;  %v3962_v49 = vshll.u32 %v9974_v0, 16  ;;  %v9977_v20 = vld [vmem:[#allocation2 + $0x90] sm:$0xff]   ;;  %v3971_v60 = vshll.u32 %v9976_v23, 16  ;;  %v9978_v8 = vld [vmem:[#allocation2 + $0x9c] sm:$0xff]   ;;  %v9980_v50 = vld [vmem:[#allocation2 + $0xa4] sm:$0xff]  }
 0x2e4   : > { %4615 = vrot.lane.b32.xlu0 %v4538_v58, %s10075_s29  ;;  %v6400_v62 = vsel %vm512_vm1, %v12149_v61, %v12202_v36  ;;  %v3970_v57 = vrot.slane %v3968_v40, 1  ;;  %1738 = vst.msk [vmem:[#allocation3 + $0x1b0] sm:$0xff] %vm1719_vm5, %v9977_v20  ;;  %v3977_v48 = vshrl.u32 %v9978_v8, 16  ;;  %v3980_v61 = vshll.u32 %v9978_v8, 16  ;;  %1740 = vst.msk [vmem:[#allocation3 + $0x1e0] sm:$0xff] %vm1719_vm5, %v9981_v6 }
 0x2e5   : > { %v2936_v17 = vpop.permute.xlu1 %2935  ;;  %v3948_v42 = vsel %vm3814_vm6, %v3938_v29, %v3947_v14  ;;  %v3957_v43 = vsel %vm3814_vm6, %v3947_v14, %v3956_v45  ;;  %v3964_v1 = vrot.slane %v3962_v49, 2  ;;  %6491 = vst.msk [vmem:[#allocation3 + $0x268] sm:$0xff] %vm1719_vm5, %v6400_v62  ;;  %v3973_v11 = vrot.slane %v3971_v60, 2  ;;  %v9982_v49 = vld [vmem:[#allocation2 + $0xac] sm:$0xff]  }
 0x2e6   : > { %v5186_v58 = vpop.permute.xlu0 %5185  ;;  %4226 = vst.msk [vmem:[#allocation3 + $0x140] sm:$0xff] %vm1719_vm5, %v3948_v42  ;;  %4227 = vst.msk [vmem:[#allocation3 + $0x158] sm:$0xff] %vm1719_vm5, %v3957_v43  ;;  %v2088_v35 = vsel %vm2036_vm8, %v2083_v3, %v12169_v59  ;;  %v3986_v42 = vshrl.u32 %v9980_v50, 16  ;;  %v2093_v9 = vshll.u32 %v12232_v12, 16  ;;  %v9854_v3 = vld [vmem:[#allocation2 + $0x48] sm:$0xff]   ;;  %v6402_v34 = vsel %vm512_vm1, %v12202_v36, %v12263_v25 }
 0x2e7   : > { %v6599_v28 = vld [vmem:[#allocation3 + $0x2f0] sm:$0xff]  ;;  %2875 = vrot.lane.b32.xlu1 %v2798_v5, %s10074_s28  ;;  %5270 = vst.msk [vmem:[#allocation3 + $0x308] sm:$0xff] %vm2984_vm12, %v5186_v58  ;;  %v3965_v5 = vor.u32 %v3964_v1, %v3961_v56  ;;  %v3974_v0 = vor.u32 %v3973_v11, %v3970_v57  ;;  %v3979_v58 = vrot.slane %v3977_v48, 1  ;;  %v12273_v1 = vld [vmem:[#allocation2 + $0x3c] sm:$0xff]   ;;  %v6126_v11 = vld [vmem:[#allocation2 + $0xf8] sm:$0xf] }
 0x2e8   : > { %7170 = vmatprep.mubr.bf16.mxu1 %v6599_v28  ;;  %5127 = vrot.lane.b32.xlu0 %v5050_v44, %s10074_s28  ;;  %v3982_v28 = vrot.slane %v3980_v61, 2  ;;  %v2800_v44 = vsel %vm2787_vm7, %v2797_v52, %v2799_v46  ;;  %v3988_v7 = vrot.slane %v3986_v42, 1  ;;  %v3995_v52 = vshrl.u32 %v9982_v49, 16  ;;  %v6127_v48 = vld [vmem:[#allocation2 + $0xfc] sm:$0xf]  ;;  %6492 = vst.msk [vmem:[#allocation3 + $0x280] sm:$0xff] %vm1719_vm5, %v6402_v34 }
 0x2e9   : > { %7171 = vmatmul.mubr.bf16.gmra.mrb[40].mxu1 %v6598_v33  ;;  %v2422_v15 = vpop.permute.xlu1 %2421  ;;  %v9979_v33 = vld [vmem:[#allocation2 + $0x98] sm:$0xff]   ;;  %v3966_v14 = vsel %vm3814_vm6, %v3956_v45, %v3965_v5  ;;  %v3989_v45 = vshll.u32 %v9980_v50, 16  ;;  %v3975_v13 = vsel %vm3814_vm6, %v3965_v5, %v3974_v0  ;;  %v4541_v61 = vrot.slane %v12273_v1, 2  ;;  %v12309_v36 = vld [vmem:[#allocation2 + $0x48] sm:$0xff]  }
 0x2ea   : > { %2505 = vst.msk [vmem:[#allocation3 + $0x330] sm:$0xff] %vm2470_vm11, %v2422_v15  ;;  %v5979_v29 = vpop.permute.xlu0 %5978  ;;  %v3998_v15 = vshll.u32 %v9982_v49, 16  ;;  %v6601_v20 = vld [vmem:[#allocation3 + $0x300] sm:$0xff]  ;;  %v3997_v8 = vrot.slane %v3995_v52, 1  ;;  %v2097_v52 = vshrl.u32 %v12232_v12, 16 }
 0x2eb   : > { %3019 = vst.msk [vmem:[#allocation3 + $0x330] sm:$0xff] %vm2984_vm12, %v2936_v17  ;;  %3388 = vrot.lane.b32.xlu1 %v3311_v39, %s10076_s7  ;;  %v5602_v17 = vrot.slane %v5600_v32, 2  ;;  %v5605_v32 = vrot.slane %v5603_v27, 3  ;;  %v4540_v27 = vsel %vm4529_vm9, %v4537_v21, %v4539_v37  ;;  %v3983_v21 = vor.u32 %v3982_v28, %v3979_v58  ;;  %v12293_v5 = vld [vmem:[#allocation2 + $0x38] sm:$0xff]   ;;  %v12323_v58 = vld [vmem:[#allocation2 + $0x40] sm:$0xff]  }
 0x2ec   : > { %6063 = vst.msk [vmem:[#allocation3 + $0x308] sm:$0xff] %vm3497_vm13, %v5979_v29  ;;  %5920 = vrot.lane.b32.xlu0 %v5598_v53, %s10076_s7  ;;  %v3991_v38 = vrot.slane %v3989_v45, 2  ;;  %v5052_v29 = vsel %vm4529_vm9, %v5049_v10, %v5051_v47  ;;  %v4000_v62 = vrot.slane %v3998_v15, 2  ;;  %v12291_v10 = vrot.slane %v2093_v9, 1  ;;  %v12362_v15 = vld [vmem:[#allocation2 + $0x40] sm:$0xff]  }
 0x2ed   : > { %v3447_v19 = vpop.permute.xlu1 %3446  ;;  %4228 = vst.msk [vmem:[#allocation3 + $0x170] sm:$0xff] %vm1719_vm5, %v3966_v14  ;;  %1739 = vst.msk [vmem:[#allocation3 + $0x1c8] sm:$0xff] %vm1719_vm5, %v9979_v33  ;;  %v12271_v56 = vor.u32 %v5605_v32, %v5602_v17  ;;  %v3984_v40 = vsel %vm3814_vm6, %v3974_v0, %v3983_v21  ;;  %v3313_v17 = vsel %vm2787_vm7, %v3310_v22, %v3312_v4  ;;  %v5609_v33 = vshrl.u32 %v9854_v3, 16  ;;  %v12321_v0 = vld [vmem:[#allocation2 + $0x44] sm:$0xff]  }
 0x2ee   : > { %3531 = vst.msk [vmem:[#allocation3 + $0x318] sm:$0xff] %vm3497_vm13, %v3447_v19  ;;  %v4678_v16 = vpop.permute.xlu0 %4677  ;;  %v3992_v60 = vor.u32 %v3991_v38, %v3988_v7  ;;  %v4001_v19 = vor.u32 %v4000_v62, %v3997_v8  ;;  %v2091_v22 = vor.u32 %v2089_v41, %v12169_v59  ;;  %v4542_v28 = vsel %vm4529_vm9, %v4539_v37, %v4541_v61  ;;  %v9862_v7 = vld [vmem:[#allocation2 + $0x50] sm:$0xff]   ;;  %v12384_v41 = vld [vmem:[#allocation2 + $0x48] sm:$0xff]  }
 0x2ef   : > { %2363 = vrot.lane.b32.xlu1 %v2088_v35, %s10075_s29  ;;  %4760 = vst.msk [vmem:[#allocation3 + $0x338] sm:$0xff] %vm2470_vm11, %v4678_v16  ;;  %v5607_v2 = vsel %vm5554_vm10, %v12212_v30, %v12271_v56  ;;  %v5612_v35 = vshll.u32 %v9854_v3, 16  ;;  %v8731_v30 = vcombine.low %v6126_v11, %v6127_v48  ;;  %v2801_v16 = vrot.slane %v12293_v5, 1 }
 0x2f0   : > { %4617 = vrot.lane.b32.xlu0 %v4540_v27, %s10075_s29  ;;  %4229 = vst.msk [vmem:[#allocation3 + $0x188] sm:$0xff] %vm1719_vm5, %v3975_v13  ;;  %4230 = vst.msk [vmem:[#allocation3 + $0x1a0] sm:$0xff] %vm1719_vm5, %v3984_v40  ;;  %v3993_v57 = vsel %vm3814_vm6, %v3983_v21, %v3992_v60  ;;  %v4002_v32 = vsel %vm3814_vm6, %v3992_v60, %v4001_v19  ;;  %v4011_v14 = vsel %vm3814_vm6, %v4001_v19, %v10983_v51  ;;  %v6129_v40 = vld [vmem:[#allocation2 + $0x104] sm:$0xf] }
 0x2f1   : > { %v2938_v23 = vpop.permute.xlu1 %2937  ;;  %4231 = vst.msk [vmem:[#allocation3 + $0x1b8] sm:$0xff] %vm1719_vm5, %v3993_v57  ;;  %4232 = vst.msk [vmem:[#allocation3 + $0x1d0] sm:$0xff] %vm1719_vm5, %v4002_v32  ;;  %v2096_v50 = vsel %vm2036_vm8, %v2091_v22, %v12291_v10  ;;  %v5053_v27 = vrot.slane %v12309_v36, 2  ;;  %v5614_v42 = vrot.slane %v5612_v35, 3  ;;  %v12334_v6 = vrot.slane %v8731_v30, 3  ;;  %v12413_v32 = vld [vmem:[#allocation2 + $0x4c] sm:$0xff]  }
 0x2f2   : > { %v5188_v39 = vpop.permute.xlu0 %5187  ;;  %4233 = vst.msk [vmem:[#allocation3 + $0x1e8] sm:$0xff] %vm1719_vm5, %v4011_v14  ;;  %v2802_v49 = vsel %vm2787_vm7, %v2799_v46, %v2801_v16  ;;  %v2101_v31 = vshll.u32 %v12323_v58, 16  ;;  %v12352_v46 = vld [vmem:[#allocation2 + $0x44] sm:$0xff]   ;;  %v5621_v3 = vshll.u32 %v9862_v7, 16  ;;  %v2109_v1 = vshll.u32 %v12384_v41, 16  ;;  %v9871_v14 = vld [vmem:[#allocation2 + $0x58] sm:$0xff]  }
 0x2f3   : > { %v6602_v43 = vld [vmem:[#allocation3 + $0x308] sm:$0xff]  ;;  %2877 = vrot.lane.b32.xlu1 %v2800_v44, %s10074_s28  ;;  %5271 = vst.msk [vmem:[#allocation3 + $0x320] sm:$0xff] %vm2984_vm12, %v5188_v39  ;;  %v5611_v44 = vrot.slane %v5609_v33, 2  ;;  %v5054_v26 = vsel %vm4529_vm9, %v5051_v47, %v5053_v27  ;;  %v6404_v39 = vsel %vm512_vm1, %v12263_v25, %v12334_v6  ;;  %v12376_v25 = vld [vmem:[#allocation2 + $0x50] sm:$0xff]   ;;  %v2105_v30 = vshrl.u32 %v12323_v58, 16 }
 0x2f4   : > { %7178 = vmatprep.mubr.bf16.mxu1 %v6602_v43  ;;  %5129 = vrot.lane.b32.xlu0 %v5052_v29, %s10074_s28  ;;  %v2103_v47 = vrot.slane %v2101_v31, 1  ;;  %v6128_v43 = vld [vmem:[#allocation2 + $0x100] sm:$0xf]  ;;  %6493 = vst.msk [vmem:[#allocation3 + $0x298] sm:$0xff] %vm1719_vm5, %v6404_v39  ;;  %v5618_v29 = vshrl.u32 %v9862_v7, 16  ;;  %v5055_v57 = vrot.slane %v12376_v25, 2 }
 0x2f5   : > { %7179 = vmatmul.mubr.bf16.gmra.mrb[44].mxu1 %v6601_v20  ;;  %v2424_v53 = vpop.permute.xlu1 %2423  ;;  %v6604_v13 = vld [vmem:[#allocation3 + $0x318] sm:$0xff]  ;;  %v12350_v21 = vor.u32 %v5614_v42, %v5611_v44  ;;  %v2099_v20 = vor.u32 %v2097_v52, %v12291_v10  ;;  %v8732_v8 = vcombine.low %v6128_v43, %v6129_v40  ;;  %v5623_v19 = vrot.slane %v5621_v3, 3  ;;  %v9878_v3 = vld [vmem:[#allocation2 + $0x60] sm:$0xff]  }
 0x2f6   : > { %2506 = vst.msk [vmem:[#allocation3 + $0x348] sm:$0xff] %vm2470_vm11, %v2424_v53  ;;  %v5981_v55 = vpop.permute.xlu0 %5980  ;;  %v2803_v53 = vrot.slane %v12362_v15, 1  ;;  %v5620_v34 = vrot.slane %v5618_v29, 2  ;;  %v5056_v5 = vsel %vm4529_vm9, %v5053_v27, %v5055_v57  ;;  %v6131_v27 = vld [vmem:[#allocation2 + $0x10c] sm:$0xf]  ;;  %v2107_v44 = vor.u32 %v2105_v30, %v2103_v47  ;;  %v12474_v29 = vld [vmem:[#allocation2 + $0x54] sm:$0xff]  }
 0x2f7   : > { %3020 = vst.msk [vmem:[#allocation3 + $0x348] sm:$0xff] %vm2984_vm12, %v2938_v23  ;;  %3390 = vrot.lane.b32.xlu1 %v3313_v17, %s10076_s7  ;;  %v3314_v23 = vrot.slane %v12321_v0, 1  ;;  %v5616_v63 = vsel %vm5554_vm10, %v12271_v56, %v12350_v21  ;;  %v2104_v62 = vsel %vm2036_vm8, %v2099_v20, %v2103_v47  ;;  %v12382_v17 = vld [vmem:[#allocation2 + $0x4c] sm:$0xff]   ;;  %v12395_v48 = vrot.slane %v8732_v8, 3 }
 0x2f8   : > { %6064 = vst.msk [vmem:[#allocation3 + $0x320] sm:$0xff] %vm3497_vm13, %v5981_v55  ;;  %5922 = vrot.lane.b32.xlu0 %v5607_v2, %s10076_s7  ;;  %v2804_v55 = vsel %vm2787_vm7, %v2801_v16, %v2803_v53  ;;  %v3316_v2 = vrot.slane %v12382_v17, 1  ;;  %v12411_v35 = vor.u32 %v5623_v19, %v5620_v34  ;;  %v12423_v16 = vld [vmem:[#allocation2 + $0x48] sm:$0xff]   ;;  %v4545_v42 = vrot.slane %v12413_v32, 2 }
 0x2f9   : > { %v3449_v59 = vpop.permute.xlu1 %3448  ;;  %v3315_v24 = vsel %vm2787_vm7, %v3312_v4, %v3314_v23  ;;  %v4543_v4 = vrot.slane %v12352_v46, 2  ;;  %v2113_v8 = vshrl.u32 %v12384_v41, 16  ;;  %v4547_v19 = vrot.slane %v12474_v29, 2 }
 0x2fa   : > { %3532 = vst.msk [vmem:[#allocation3 + $0x330] sm:$0xff] %vm3497_vm13, %v3449_v59  ;;  %v4680_v51 = vpop.permute.xlu0 %4679  ;;  %v3317_v36 = vsel %vm2787_vm7, %v3314_v23, %v3316_v2  ;;  %v5625_v0 = vsel %vm5554_vm10, %v12350_v21, %v12411_v35 }
 0x2fb   : > { %2365 = vrot.lane.b32.xlu1 %v2096_v50, %s10075_s29  ;;  %4761 = vst.msk [vmem:[#allocation3 + $0x350] sm:$0xff] %vm2470_vm11, %v4680_v51  ;;  %v4544_v10 = vsel %vm4529_vm9, %v4541_v61, %v4543_v4  ;;  %v2111_v50 = vrot.slane %v2109_v1, 1  ;;  %v6406_v51 = vsel %vm512_vm1, %v12334_v6, %v12395_v48  ;;  %v5627_v6 = vshrl.u32 %v9871_v14, 16 }
 0x2fc   : > { %4619 = vrot.lane.b32.xlu0 %v4542_v28, %s10075_s29  ;;  %v6130_v28 = vld [vmem:[#allocation2 + $0x108] sm:$0xf]  ;;  %6494 = vst.msk [vmem:[#allocation3 + $0x2b0] sm:$0xff] %vm1719_vm5, %v6406_v51  ;;  %v4546_v7 = vsel %vm4529_vm9, %v4543_v4, %v4545_v42 }
 0x2fd   : > { %v2940_v45 = vpop.permute.xlu1 %2939  ;;  %v8733_v31 = vcombine.low %v6130_v28, %v6131_v27  ;;  %v5629_v52 = vrot.slane %v5627_v6, 2  ;;  %v2115_v41 = vor.u32 %v2113_v8, %v2111_v50 }
 0x2fe   : > { %v5190_v37 = vpop.permute.xlu0 %5189 }
 0x2ff   : > { %v6605_v9 = vld [vmem:[#allocation3 + $0x320] sm:$0xff]  ;;  %2879 = vrot.lane.b32.xlu1 %v2802_v49, %s10074_s28  ;;  %5272 = vst.msk [vmem:[#allocation3 + $0x338] sm:$0xff] %vm2984_vm12, %v5190_v37  ;;  %v5630_v49 = vshll.u32 %v9871_v14, 16  ;;  %v2112_v37 = vsel %vm2036_vm8, %v2107_v44, %v2111_v50  ;;  %v12455_v39 = vrot.slane %v8733_v31, 3  ;;  %v4548_v14 = vsel %vm4529_vm9, %v4545_v42, %v4547_v19  ;;  %v9887_v42 = vld [vmem:[#allocation2 + $0x68] sm:$0xff]  }
 0x300   : > { %7186 = vmatprep.mubr.bf16.mxu1 %v6605_v9  ;;  %5131 = vrot.lane.b32.xlu0 %v5054_v26, %s10074_s28  ;;  %v2805_v9 = vrot.slane %v12423_v16, 1  ;;  %v12444_v26 = vld [vmem:[#allocation2 + $0x50] sm:$0xff]   ;;  %v12534_v16 = vld [vmem:[#allocation2 + $0x5c] sm:$0xff]  }
 0x301   : > { %7187 = vmatmul.mubr.bf16.gmra.mrb[48].mxu1 %v6604_v13  ;;  %v2426_v38 = vpop.permute.xlu1 %2425  ;;  %v6607_v33 = vld [vmem:[#allocation3 + $0x330] sm:$0xff]  ;;  %v12442_v13 = vld [vmem:[#allocation2 + $0x54] sm:$0xff]   ;;  %v2117_v40 = vshll.u32 %v12444_v26, 16 }
 0x302   : > { %2507 = vst.msk [vmem:[#allocation3 + $0x360] sm:$0xff] %vm2470_vm11, %v2426_v38  ;;  %v5983_v12 = vpop.permute.xlu0 %5982  ;;  %v2806_v43 = vsel %vm2787_vm7, %v2803_v53, %v2805_v9  ;;  %v3318_v46 = vrot.slane %v12442_v13, 1  ;;  %v12484_v53 = vld [vmem:[#allocation2 + $0x50] sm:$0xff]   ;;  %v12546_v31 = vld [vmem:[#allocation2 + $0x58] sm:$0xff]  }
 0x303   : > { %3021 = vst.msk [vmem:[#allocation3 + $0x360] sm:$0xff] %vm2984_vm12, %v2940_v45  ;;  %3392 = vrot.lane.b32.xlu1 %v3315_v24, %s10076_s7  ;;  %v12436_v45 = vld [vmem:[#allocation2 + $0x58] sm:$0xff]   ;;  %v5632_v24 = vrot.slane %v5630_v49, 3  ;;  %v2121_v49 = vshrl.u32 %v12444_v26, 16 }
 0x304   : > { %6065 = vst.msk [vmem:[#allocation3 + $0x338] sm:$0xff] %vm3497_vm13, %v5983_v12  ;;  %5924 = vrot.lane.b32.xlu0 %v5616_v63, %s10076_s7  ;;  %v5057_v38 = vrot.slane %v12436_v45, 2  ;;  %v3319_v25 = vsel %vm2787_vm7, %v3316_v2, %v3318_v46 }
 0x305   : > { %v3451_v60 = vpop.permute.xlu1 %3450  ;;  %v12472_v4 = vor.u32 %v5632_v24, %v5629_v52  ;;  %v4549_v24 = vrot.slane %v12534_v16, 2 }
 0x306   : > { %3533 = vst.msk [vmem:[#allocation3 + $0x348] sm:$0xff] %vm3497_vm13, %v3451_v60  ;;  %v4682_v56 = vpop.permute.xlu0 %4681  ;;  %v5058_v15 = vsel %vm4529_vm9, %v5055_v57, %v5057_v38  ;;  %v6133_v57 = vld [vmem:[#allocation2 + $0x114] sm:$0xf] }
 0x307   : > { %2367 = vrot.lane.b32.xlu1 %v2104_v62, %s10075_s29  ;;  %4762 = vst.msk [vmem:[#allocation3 + $0x368] sm:$0xff] %vm2470_vm11, %v4682_v56  ;;  %v2119_v62 = vrot.slane %v2117_v40, 1  ;;  %v6408_v56 = vsel %vm512_vm1, %v12395_v48, %v12455_v39  ;;  %v5634_v17 = vsel %vm5554_vm10, %v12411_v35, %v12472_v4  ;;  %v5639_v48 = vshll.u32 %v9878_v3, 16 }
 0x308   : > { %4621 = vrot.lane.b32.xlu0 %v4544_v10, %s10075_s29  ;;  %v6132_v10 = vld [vmem:[#allocation2 + $0x110] sm:$0xf]  ;;  %6495 = vst.msk [vmem:[#allocation3 + $0x2c8] sm:$0xff] %vm1719_vm5, %v6408_v56 }
 0x309   : > { %v2942_v11 = vpop.permute.xlu1 %2941  ;;  %v8734_v1 = vcombine.low %v6132_v10, %v6133_v57 }
 0x30a   : > { %v5192_v22 = vpop.permute.xlu0 %5191 }
 0x30b   : > { %v6608_v61 = vld [vmem:[#allocation3 + $0x338] sm:$0xff]  ;;  %2881 = vrot.lane.b32.xlu1 %v2804_v55, %s10074_s28  ;;  %5273 = vst.msk [vmem:[#allocation3 + $0x350] sm:$0xff] %vm2984_vm12, %v5192_v22  ;;  %v5636_v55 = vshrl.u32 %v9878_v3, 16  ;;  %v2120_v22 = vsel %vm2036_vm8, %v2115_v41, %v2119_v62  ;;  %v12515_v51 = vrot.slane %v8734_v1, 3  ;;  %v4550_v3 = vsel %vm4529_vm9, %v4547_v19, %v4549_v24 }
 0x30c   : > { %7194 = vmatprep.mubr.bf16.mxu1 %v6608_v61  ;;  %5133 = vrot.lane.b32.xlu0 %v5056_v5, %s10074_s28  ;;  %v2807_v61 = vrot.slane %v12484_v53, 1  ;;  %v12504_v5 = vld [vmem:[#allocation2 + $0x58] sm:$0xff]  }
 0x30d   : > { %7195 = vmatmul.mubr.bf16.gmra.mrb[52].mxu1 %v6607_v33  ;;  %v2428_v59 = vpop.permute.xlu1 %2427  ;;  %v6610_v63 = vld [vmem:[#allocation3 + $0x348] sm:$0xff]  ;;  %v5638_v30 = vrot.slane %v5636_v55, 2  ;;  %v2125_v27 = vshll.u32 %v12504_v5, 16  ;;  %v12597_v55 = vld [vmem:[#allocation2 + $0x64] sm:$0xff]   ;;  %v2129_v1 = vshrl.u32 %v12504_v5, 16 }
 0x30e   : > { %2508 = vst.msk [vmem:[#allocation3 + $0x378] sm:$0xff] %vm2470_vm11, %v2428_v59  ;;  %v5985_v58 = vpop.permute.xlu0 %5984  ;;  %v12502_v33 = vld [vmem:[#allocation2 + $0x5c] sm:$0xff]   ;;  %v2808_v28 = vsel %vm2787_vm7, %v2805_v9, %v2807_v61  ;;  %v6134_v9 = vld [vmem:[#allocation2 + $0x118] sm:$0xf] }
 0x30f   : > { %3022 = vst.msk [vmem:[#allocation3 + $0x378] sm:$0xff] %vm2984_vm12, %v2942_v11  ;;  %3394 = vrot.lane.b32.xlu1 %v3317_v36, %s10076_s7  ;;  %v12496_v11 = vld [vmem:[#allocation2 + $0x60] sm:$0xff]   ;;  %v5641_v36 = vrot.slane %v5639_v48, 3  ;;  %v3320_v32 = vrot.slane %v12502_v33, 1  ;;  %v9895_v48 = vld [vmem:[#allocation2 + $0x70] sm:$0xff]  }
 0x310   : > { %6066 = vst.msk [vmem:[#allocation3 + $0x350] sm:$0xff] %vm3497_vm13, %v5985_v58  ;;  %5926 = vrot.lane.b32.xlu0 %v5625_v0, %s10076_s7  ;;  %v5059_v59 = vrot.slane %v12496_v11, 2 }
 0x311   : > { %v3453_v23 = vpop.permute.xlu1 %3452  ;;  %v12532_v0 = vor.u32 %v5641_v36, %v5638_v30  ;;  %v3321_v45 = vsel %vm2787_vm7, %v3318_v46, %v3320_v32  ;;  %v4551_v36 = vrot.slane %v12597_v55, 2 }
 0x312   : > { %3534 = vst.msk [vmem:[#allocation3 + $0x360] sm:$0xff] %vm3497_vm13, %v3453_v23  ;;  %v4684_v21 = vpop.permute.xlu0 %4683  ;;  %v5060_v44 = vsel %vm4529_vm9, %v5057_v38, %v5059_v59  ;;  %v12544_v23 = vrot.slane %v2125_v27, 1  ;;  %v2123_v38 = vor.u32 %v2121_v49, %v2119_v62 }
 0x313   : > { %2369 = vrot.lane.b32.xlu1 %v2112_v37, %s10075_s29  ;;  %4763 = vst.msk [vmem:[#allocation3 + $0x380] sm:$0xff] %vm2470_vm11, %v4684_v21  ;;  %v6410_v37 = vsel %vm512_vm1, %v12455_v39, %v12515_v51  ;;  %v6135_v21 = vld [vmem:[#allocation2 + $0x11c] sm:$0xf]  ;;  %v5643_v52 = vsel %vm5554_vm10, %v12472_v4, %v12532_v0  ;;  %v5645_v39 = vshrl.u32 %v9887_v42, 16 }
 0x314   : > { %4623 = vrot.lane.b32.xlu0 %v4546_v7, %s10075_s29  ;;  %6496 = vst.msk [vmem:[#allocation3 + $0x2e0] sm:$0xff] %vm1719_vm5, %v6410_v37  ;;  %v8735_v40 = vcombine.low %v6134_v9, %v6135_v21  ;;  %v2131_v5 = vor.u32 %v2129_v1, %v12544_v23 }
 0x315   : > { %v2430_v47 = vpop.permute.xlu1 %2429  ;;  %v5647_v8 = vrot.slane %v5645_v39, 2  ;;  %v12660_v39 = vld [vmem:[#allocation2 + $0x6c] sm:$0xff]  }
 0x316   : > { %2509 = vst.msk [vmem:[#allocation3 + $0x390] sm:$0xff] %vm2470_vm11, %v2430_v47  ;;  %v5194_v12 = vpop.permute.xlu0 %5193  ;;  %v12558_v47 = vld [vmem:[#allocation2 + $0x68] sm:$0xff]   ;;  %v12578_v56 = vrot.slane %v8735_v40, 3 }
 0x317   : > { %v6611_v20 = vld [vmem:[#allocation3 + $0x350] sm:$0xff]  ;;  %2883 = vrot.lane.b32.xlu1 %v2806_v43, %s10074_s28  ;;  %5274 = vst.msk [vmem:[#allocation3 + $0x368] sm:$0xff] %vm2984_vm12, %v5194_v12  ;;  %v5648_v43 = vshll.u32 %v9887_v42, 16  ;;  %v2128_v12 = vsel %vm2036_vm8, %v2123_v38, %v12544_v23  ;;  %v12626_v42 = vld [vmem:[#allocation2 + $0x6c] sm:$0xff]  }
 0x318   : > { %7202 = vmatprep.mubr.bf16.mxu1 %v6611_v20  ;;  %5135 = vrot.lane.b32.xlu0 %v5058_v15, %s10074_s28  ;;  %v2809_v20 = vrot.slane %v12546_v31, 1  ;;  %v12567_v15 = vld [vmem:[#allocation2 + $0x60] sm:$0xff]   ;;  %v3324_v38 = vrot.slane %v12626_v42, 1 }
 0x319   : > { %7203 = vmatmul.mubr.bf16.gmra.mrb[56].mxu1 %v6610_v63  ;;  %v3455_v60 = vpop.permute.xlu1 %3454  ;;  %v6613_v13 = vld [vmem:[#allocation3 + $0x360] sm:$0xff]  ;;  %v12565_v63 = vld [vmem:[#allocation2 + $0x64] sm:$0xff]   ;;  %v2133_v57 = vshll.u32 %v12567_v15, 16  ;;  %v2137_v40 = vshrl.u32 %v12567_v15, 16 }
 0x31a   : > { %3535 = vst.msk [vmem:[#allocation3 + $0x378] sm:$0xff] %vm3497_vm13, %v3455_v60  ;;  %v4686_v34 = vpop.permute.xlu0 %4685  ;;  %v5061_v60 = vrot.slane %v12558_v47, 2  ;;  %v2810_v10 = vsel %vm2787_vm7, %v2807_v61, %v2809_v20  ;;  %v3322_v29 = vrot.slane %v12565_v63, 1  ;;  %v12607_v61 = vld [vmem:[#allocation2 + $0x60] sm:$0xff]  }
 0x31b   : > { %3396 = vrot.lane.b32.xlu1 %v3319_v25, %s10076_s7  ;;  %4764 = vst.msk [vmem:[#allocation3 + $0x398] sm:$0xff] %vm2470_vm11, %v4686_v34  ;;  %v5650_v25 = vrot.slane %v5648_v43, 3  ;;  %v9903_v43 = vld [vmem:[#allocation2 + $0x78] sm:$0xff]  }
 0x31c   : > { %5928 = vrot.lane.b32.xlu0 %v5634_v17, %s10076_s7  ;;  %v5062_v53 = vsel %vm4529_vm9, %v5059_v59, %v5061_v60  ;;  %v3323_v11 = vsel %vm2787_vm7, %v3320_v32, %v3322_v29  ;;  %v6137_v59 = vld [vmem:[#allocation2 + $0x124] sm:$0xf]  ;;  %v3325_v47 = vsel %vm2787_vm7, %v3322_v29, %v3324_v38  ;;  %v5666_v29 = vshll.u32 %v9903_v43, 16 }
 0x31d   : > { %v2944_v2 = vpop.permute.xlu1 %2943  ;;  %v12595_v19 = vor.u32 %v5650_v25, %v5647_v8  ;;  %v6507_v25 = vld [vmem:[#allocation3 + $0x10] sm:$0xff] }
 0x31e   : > { %3023 = vst.msk [vmem:[#allocation3 + $0x390] sm:$0xff] %vm2984_vm12, %v2944_v2  ;;  %v5987_v35 = vpop.permute.xlu0 %5986 }
 0x31f   : > { %2371 = vrot.lane.b32.xlu1 %v2120_v22, %s10075_s29  ;;  %6067 = vst.msk [vmem:[#allocation3 + $0x368] sm:$0xff] %vm3497_vm13, %v5987_v35  ;;  %v2135_v22 = vrot.slane %v2133_v57, 1  ;;  %v6412_v35 = vsel %vm512_vm1, %v12515_v51, %v12578_v56  ;;  %v5652_v33 = vsel %vm5554_vm10, %v12532_v0, %v12595_v19  ;;  %v5654_v51 = vshrl.u32 %v9895_v48, 16 }
 0x320   : > { %4625 = vrot.lane.b32.xlu0 %v4548_v14, %s10075_s29  ;;  %v6136_v14 = vld [vmem:[#allocation2 + $0x120] sm:$0xf]  ;;  %6497 = vst.msk [vmem:[#allocation3 + $0x2f8] sm:$0xff] %vm1719_vm5, %v6412_v35 }
 0x321   : > { %v3457_v50 = vpop.permute.xlu1 %3456  ;;  %v6616_v17 = vld [vmem:[#allocation3 + $0x378] sm:$0xff]  ;;  %v8736_v27 = vcombine.low %v6136_v14, %v6137_v59  ;;  %v5656_v9 = vrot.slane %v5654_v51, 2  ;;  %v2139_v15 = vor.u32 %v2137_v40, %v2135_v22  ;;  %v5668_v14 = vrot.slane %v5666_v29, 3 }
 0x322   : > { %3536 = vst.msk [vmem:[#allocation3 + $0x390] sm:$0xff] %vm3497_vm13, %v3457_v50  ;;  %v5196_v58 = vpop.permute.xlu0 %5195  ;;  %v12620_v50 = vld [vmem:[#allocation2 + $0x70] sm:$0xff]  }
 0x323   : > { %2885 = vrot.lane.b32.xlu1 %v2808_v28, %s10074_s28  ;;  %5275 = vst.msk [vmem:[#allocation3 + $0x380] sm:$0xff] %vm2984_vm12, %v5196_v58  ;;  %v5657_v28 = vshll.u32 %v9895_v48, 16  ;;  %v2136_v58 = vsel %vm2036_vm8, %v2131_v5, %v2135_v22  ;;  %v5063_v37 = vrot.slane %v12620_v50, 2 }
 0x324   : > { %5137 = vrot.lane.b32.xlu0 %v5060_v44, %s10074_s28  ;;  %v2811_v44 = vrot.slane %v12607_v61, 1  ;;  %v12726_v61 = vld [vmem:[#allocation2 + $0x74] sm:$0xff]  }
 0x325   : > { %v2354_v6 = vpop.permute.xlu1 %2353  ;;  %v5659_v21 = vrot.slane %v5657_v28, 3  ;;  %v5064_v31 = vsel %vm4529_vm9, %v5061_v60, %v5063_v37  ;;  %v6139_v60 = vld [vmem:[#allocation2 + $0x12c] sm:$0xf]  ;;  %v6510_v28 = vld [vmem:[#allocation3 + $0x28] sm:$0xff] }
 0x326   : > { %2471 = vst.msk [vmem:[#allocation3] sm:$0xff] %vm2470_vm11, %v2354_v6  ;;  %v5989_v7 = vpop.permute.xlu0 %5988  ;;  %v6614_v26 = vld [vmem:[#allocation3 + $0x368] sm:$0xff]  ;;  %v12628_v6 = vld [vmem:[#allocation2 + $0x68] sm:$0xff]   ;;  %v2812_v16 = vsel %vm2787_vm7, %v2809_v20, %v2811_v44 }
 0x327   : > { %3398 = vrot.lane.b32.xlu1 %v3321_v45, %s10076_s7  ;;  %6068 = vst.msk [vmem:[#allocation3 + $0x380] sm:$0xff] %vm3497_vm13, %v5989_v7  ;;  %7210 = vmatprep.mubr.bf16.mxu1 %v6614_v26  ;;  %v4552_v45 = vsel %vm4529_vm9, %v4549_v24, %v4551_v36  ;;  %v12639_v26 = vrot.slane %v8736_v27, 3  ;;  %v12658_v24 = vor.u32 %v5659_v21, %v5656_v9  ;;  %v12672_v20 = vld [vmem:[#allocation2 + $0x68] sm:$0xff]   ;;  %v9911_v27 = vld [vmem:[#allocation2 + $0x80] sm:$0xff]   ;;  %v4555_v21 = vrot.slane %v12726_v61, 2 }
 0x328   : > { %7211 = vmatmul.mubr.bf16.gmra.mrb[60].mxu1 %v6613_v13  ;;  %5930 = vrot.lane.b32.xlu0 %v5643_v52, %s10076_s7  ;;  %v2141_v13 = vshll.u32 %v12628_v6, 16 }
 0x329   : > { %v2868_v46 = vpop.permute.xlu1 %2867  ;;  %v6619_v23 = vld [vmem:[#allocation3 + $0x390] sm:$0xff]  ;;  %v5661_v63 = vsel %vm5554_vm10, %v12595_v19, %v12658_v24  ;;  %v12696_v19 = vld [vmem:[#allocation2 + $0x70] sm:$0xff]  }
 0x32a   : > { %2985 = vst.msk [vmem:[#allocation3] sm:$0xff] %vm2984_vm12, %v2868_v46  ;;  %v5198_v4 = vpop.permute.xlu0 %5197 }
 0x32b   : > { %2373 = vrot.lane.b32.xlu1 %v2128_v12, %s10075_s29  ;;  %5276 = vst.msk [vmem:[#allocation3 + $0x398] sm:$0xff] %vm2984_vm12, %v5198_v4  ;;  %v12670_v12 = vrot.slane %v2141_v13, 1  ;;  %v6414_v4 = vsel %vm512_vm1, %v12578_v56, %v12639_v26  ;;  %v5663_v56 = vshrl.u32 %v9903_v43, 16  ;;  %v12761_v43 = vld [vmem:[#allocation2 + $0x7c] sm:$0xff]  }
 0x32c   : > { %4627 = vrot.lane.b32.xlu0 %v4550_v3, %s10075_s29  ;;  %v6138_v3 = vld [vmem:[#allocation2 + $0x128] sm:$0xf]  ;;  %6498 = vst.msk [vmem:[#allocation3 + $0x310] sm:$0xff] %vm1719_vm5, %v6414_v4 }
 0x32d   : > { %v3381_v62 = vpop.permute.xlu1 %3380  ;;  %v5665_v35 = vrot.slane %v5663_v56, 2 }
 0x32e   : > { %3498 = vst.msk [vmem:[#allocation3] sm:$0xff] %vm3497_vm13, %v3381_v62  ;;  %v5991_v34 = vpop.permute.xlu0 %5990  ;;  %v6617_v41 = vld [vmem:[#allocation3 + $0x380] sm:$0xff]  ;;  %v4553_v62 = vrot.slane %v12660_v39, 2 }
 0x32f   : > { %2887 = vrot.lane.b32.xlu1 %v2810_v10, %s10074_s28  ;;  %6069 = vst.msk [vmem:[#allocation3 + $0x398] sm:$0xff] %vm3497_vm13, %v5991_v34  ;;  %7218 = vmatprep.mubr.bf16.mxu1 %v6617_v41  ;;  %v12684_v10 = vld [vmem:[#allocation2 + $0x78] sm:$0xff]   ;;  %v8737_v34 = vcombine.low %v6138_v3, %v6139_v60  ;;  %v2144_v41 = vsel %vm2036_vm8, %v2139_v15, %v12670_v12 }
 0x330   : > { %7219 = vmatmul.mubr.bf16.gmra.mrb[64].mxu1 %v6616_v17  ;;  %5139 = vrot.lane.b32.xlu0 %v5062_v53, %s10074_s28  ;;  %v2813_v17 = vrot.slane %v12672_v20, 1  ;;  %v12694_v53 = vld [vmem:[#allocation2 + $0x74] sm:$0xff]   ;;  %v4554_v1 = vsel %vm4529_vm9, %v4551_v36, %v4553_v62  ;;  %v5065_v22 = vrot.slane %v12684_v10, 2 }
 0x331   : > { %v2356_v2 = vpop.permute.xlu1 %2355  ;;  %v3326_v5 = vrot.slane %v12694_v53, 1 }
 0x332   : > { %2472 = vst.msk [vmem:[#allocation3 + $0x18] sm:$0xff] %vm2470_vm11, %v2356_v2  ;;  %v4610_v30 = vpop.permute.xlu0 %4609  ;;  %v2814_v55 = vsel %vm2787_vm7, %v2811_v44, %v2813_v17  ;;  %v5066_v51 = vsel %vm4529_vm9, %v5063_v37, %v5065_v22  ;;  %v2145_v44 = vshrl.u32 %v12628_v6, 16  ;;  %v6140_v6 = vld [vmem:[#allocation2 + $0x130] sm:$0xf] }
 0x333   : > { %3400 = vrot.lane.b32.xlu1 %v3323_v11, %s10076_s7  ;;  %4726 = vst.msk [vmem:[#allocation3 + $0x8] sm:$0xff] %vm2470_vm11, %v4610_v30  ;;  %v12707_v30 = vrot.slane %v8737_v34, 3  ;;  %v3327_v50 = vsel %vm2787_vm7, %v3324_v38, %v3326_v5  ;;  %v9919_v34 = vld [vmem:[#allocation2 + $0x88] sm:$0xff]  }
 0x334   : > { %5932 = vrot.lane.b32.xlu0 %v5652_v33, %s10076_s7  ;;  %v2149_v33 = vshll.u32 %v12696_v19, 16  ;;  %v2147_v42 = vor.u32 %v2145_v44, %v12670_v12 }
 0x335   : > { %v2870_v32 = vpop.permute.xlu1 %2869  ;;  %v6505_v11 = vld [vmem:[#allocation3] sm:$0xff] }
 0x336   : > { %2986 = vst.msk [vmem:[#allocation3 + $0x18] sm:$0xff] %vm2984_vm12, %v2870_v32  ;;  %v5122_v0 = vpop.permute.xlu0 %5121  ;;  %v6620_v49 = vld [vmem:[#allocation3 + $0x398] sm:$0xff]  ;;  %v12724_v32 = vor.u32 %v5668_v14, %v5665_v35 }
 0x337   : > { %2375 = vrot.lane.b32.xlu1 %v2136_v58, %s10075_s29  ;;  %5238 = vst.msk [vmem:[#allocation3 + $0x8] sm:$0xff] %vm2984_vm12, %v5122_v0  ;;  %7226 = vmatprep.mubr.bf16.mxu1 %v6620_v49  ;;  %v12739_v0 = vrot.slane %v2149_v33, 1  ;;  %v12741_v49 = vld [vmem:[#allocation2 + $0x70] sm:$0xff]  }
 0x338   : > { %4629 = vrot.lane.b32.xlu0 %v4552_v45, %s10075_s29  ;;  %7227 = vmatmul.mubr.bf16.gmra.mrb[68].mxu1 %v6619_v23  ;;  %v6416_v45 = vsel %vm512_vm1, %v12639_v26, %v12707_v30  ;;  %v6141_v23 = vld [vmem:[#allocation2 + $0x134] sm:$0xf]  ;;  %v5670_v9 = vsel %vm5554_vm10, %v12658_v24, %v12724_v32  ;;  %v5672_v26 = vshrl.u32 %v9911_v27, 16  ;;  %v12763_v24 = vld [vmem:[#allocation2 + $0x78] sm:$0xff]  }
 0x339   : > { %v3383_v7 = vpop.permute.xlu1 %3382  ;;  %9200 = vmatprep.mubr.msk.bf16.mxu1 %vm10072_vm2, %v13790_v54  ;;  %6499 = vst.msk [vmem:[#allocation3 + $0x328] sm:$0xff] %vm1719_vm5, %v6416_v45  ;;  %v8738_v13 = vcombine.low %v6140_v6, %v6141_v23 }
 0x33a   : > { %3499 = vst.msk [vmem:[#allocation3 + $0x18] sm:$0xff] %vm3497_vm13, %v3383_v7  ;;  %v5915_v52 = vpop.permute.xlu0 %5914  ;;  %v12754_v7 = vld [vmem:[#allocation2 + $0x80] sm:$0xff]   ;;  %v5674_v3 = vrot.slane %v5672_v26, 2 }
 0x33b   : > { %2889 = vrot.lane.b32.xlu1 %v2812_v16, %s10074_s28  ;;  %6031 = vst.msk [vmem:[#allocation3 + $0x8] sm:$0xff] %vm3497_vm13, %v5915_v52  ;;  %v5675_v16 = vshll.u32 %v9911_v27, 16  ;;  %v2152_v52 = vsel %vm2036_vm8, %v2147_v42, %v12739_v0  ;;  %v5067_v4 = vrot.slane %v12754_v7, 2  ;;  %v12831_v27 = vld [vmem:[#allocation2 + $0x80] sm:$0xff]  }
 0x33c   : > { %5141 = vrot.lane.b32.xlu0 %v5064_v31, %s10074_s28  ;;  %v2815_v31 = vrot.slane %v12741_v49, 1  ;;  %v12863_v49 = vld [vmem:[#allocation2 + $0x84] sm:$0xff]  }
 0x33d   : > { %v2358_v46 = vpop.permute.xlu1 %2357  ;;  %v5677_v60 = vrot.slane %v5675_v16, 3  ;;  %v5068_v20 = vsel %vm4529_vm9, %v5065_v22, %v5067_v4  ;;  %v6143_v22 = vld [vmem:[#allocation2 + $0x13c] sm:$0xf] }
 0x33e   : > { %2473 = vst.msk [vmem:[#allocation3 + $0x30] sm:$0xff] %vm2470_vm11, %v2358_v46  ;;  %v4612_v8 = vpop.permute.xlu0 %4611  ;;  %v2816_v39 = vsel %vm2787_vm7, %v2813_v17, %v2815_v31  ;;  %v2153_v17 = vshrl.u32 %v12696_v19, 16 }
 0x33f   : > { %3402 = vrot.lane.b32.xlu1 %v3325_v47, %s10076_s7  ;;  %4727 = vst.msk [vmem:[#allocation3 + $0x20] sm:$0xff] %vm2470_vm11, %v4612_v8  ;;  %v4556_v47 = vsel %vm4529_vm9, %v4553_v62, %v4555_v21  ;;  %v6513_v8 = vld [vmem:[#allocation3 + $0x40] sm:$0xff]  ;;  %v2157_v62 = vshll.u32 %v12763_v24, 16  ;;  %v12794_v29 = vor.u32 %v5677_v60, %v5674_v3 }
 0x340   : > { %5934 = vrot.lane.b32.xlu0 %v5661_v63, %s10076_s7  ;;  %9201 = vmatmul.mubr.msk.bf16.vlgmr.msra.gmra.mrb[72].mxu1 %vm1719_vm5, %v6507_v25  ;;  %v12774_v63 = vrot.slane %v8738_v13, 3  ;;  %v3328_v25 = vrot.slane %v12761_v43, 1  ;;  %v2155_v19 = vor.u32 %v2153_v17, %v12739_v0  ;;  %v9927_v13 = vld [vmem:[#allocation2 + $0x90] sm:$0xff]  }
 0x341   : > { %v2872_v57 = vpop.permute.xlu1 %2871  ;;  %9204 = vmatprep.mubr.msk.bf16.mxu1 %vm10072_vm2, %v13790_v54  ;;  %v6508_v12 = vld [vmem:[#allocation3 + $0x18] sm:$0xff]  ;;  %v5679_v53 = vsel %vm5554_vm10, %v12724_v32, %v12794_v29  ;;  %v12829_v32 = vld [vmem:[#allocation2 + $0x84] sm:$0xff]  }
 0x342   : > { %2987 = vst.msk [vmem:[#allocation3 + $0x30] sm:$0xff] %vm2984_vm12, %v2872_v57  ;;  %v5124_v48 = vpop.permute.xlu0 %5123  ;;  %v6506_v2 = vld [vmem:[#allocation3 + $0x8] sm:$0xff]  ;;  %v3329_v10 = vsel %vm2787_vm7, %v3326_v5, %v3328_v25  ;;  %v6516_v5 = vld [vmem:[#allocation3 + $0x58] sm:$0xff] }
 0x343   : > { %2377 = vrot.lane.b32.xlu1 %v2144_v41, %s10075_s29  ;;  %5239 = vst.msk [vmem:[#allocation3 + $0x20] sm:$0xff] %vm2984_vm12, %v5124_v48  ;;  %6922 = vmatprep.mubr.bf16.mxu0 %v6506_v2  ;;  %v12796_v57 = vld [vmem:[#allocation2 + $0x7c] sm:$0xff]   ;;  %v12806_v48 = vrot.slane %v2157_v62, 1 }
 0x344   : > { %4631 = vrot.lane.b32.xlu0 %v4554_v1, %s10075_s29  ;;  %6923 = vmatmul.mubr.bf16.vlgmr.msra.gmra.mrb[172].mxu0 %v6505_v11  ;;  %v12808_v2 = vld [vmem:[#allocation2 + $0x78] sm:$0xff]   ;;  %v6418_v1 = vsel %vm512_vm1, %v12707_v30, %v12774_v63  ;;  %v4557_v14 = vrot.slane %v12796_v57, 2  ;;  %v5681_v30 = vshrl.u32 %v9919_v34, 16 }
 0x345   : > { %v3385_v59 = vpop.permute.xlu1 %3384  ;;  %v6142_v11 = vld [vmem:[#allocation2 + $0x138] sm:$0xf]  ;;  %6500 = vst.msk [vmem:[#allocation3 + $0x340] sm:$0xff] %vm1719_vm5, %v6418_v1 }
 0x346   : > { %3500 = vst.msk [vmem:[#allocation3 + $0x30] sm:$0xff] %vm3497_vm13, %v3385_v59  ;;  %v5917_v36 = vpop.permute.xlu0 %5916  ;;  %v12821_v59 = vld [vmem:[#allocation2 + $0x88] sm:$0xff]   ;;  %v5683_v6 = vrot.slane %v5681_v30, 2 }
 0x347   : > { %2891 = vrot.lane.b32.xlu1 %v2814_v55, %s10074_s28  ;;  %6032 = vst.msk [vmem:[#allocation3 + $0x20] sm:$0xff] %vm3497_vm13, %v5917_v36  ;;  %v5684_v55 = vshll.u32 %v9919_v34, 16  ;;  %v8739_v36 = vcombine.low %v6142_v11, %v6143_v22  ;;  %v5069_v45 = vrot.slane %v12821_v59, 2  ;;  %v12898_v34 = vld [vmem:[#allocation2 + $0x8c] sm:$0xff]  }
 0x348   : > { %5143 = vrot.lane.b32.xlu0 %v5066_v51, %s10074_s28  ;;  %9205 = vmatmul.mubr.msk.bf16.gmra.mrb[76].mxu1 %vm1719_vm5, %v6510_v28  ;;  %v2160_v51 = vsel %vm2036_vm8, %v2155_v19, %v12806_v48  ;;  %v2817_v28 = vrot.slane %v12808_v2, 1 }
 0x349   : > { %v2360_v58 = vpop.permute.xlu1 %2359  ;;  %9208 = vmatprep.mubr.msk.bf16.mxu1 %vm10072_vm2, %v13790_v54  ;;  %v5686_v23 = vrot.slane %v5684_v55, 3  ;;  %v12844_v42 = vrot.slane %v8739_v36, 3  ;;  %v5070_v16 = vsel %vm4529_vm9, %v5067_v4, %v5069_v45  ;;  %v6144_v4 = vld [vmem:[#allocation2 + $0x140] sm:$0xf]  ;;  %v9935_v36 = vld [vmem:[#allocation2 + $0x98] sm:$0xff]  }
 0x34a   : > { %2474 = vst.msk [vmem:[#allocation3 + $0x48] sm:$0xff] %vm2470_vm11, %v2360_v58  ;;  %v4614_v37 = vpop.permute.xlu0 %4613  ;;  %v2818_v61 = vsel %vm2787_vm7, %v2815_v31, %v2817_v28 }
 0x34b   : > { %3404 = vrot.lane.b32.xlu1 %v3327_v50, %s10076_s7  ;;  %4728 = vst.msk [vmem:[#allocation3 + $0x38] sm:$0xff] %vm2470_vm11, %v4614_v37  ;;  %v4558_v50 = vsel %vm4529_vm9, %v4555_v21, %v4557_v14  ;;  %v2165_v21 = vshll.u32 %v12831_v27, 16 }
 0x34c   : > { %5936 = vrot.lane.b32.xlu0 %v5670_v9, %s10076_s7  ;;  %v3330_v9 = vrot.slane %v12829_v32, 1 }
 0x34d   : > { %v2874_v38 = vpop.permute.xlu1 %2873  ;;  %v6511_v0 = vld [vmem:[#allocation3 + $0x30] sm:$0xff] }
 0x34e   : > { %2988 = vst.msk [vmem:[#allocation3 + $0x48] sm:$0xff] %vm2984_vm12, %v2874_v38  ;;  %v5126_v46 = vpop.permute.xlu0 %5125  ;;  %v6509_v40 = vld [vmem:[#allocation3 + $0x20] sm:$0xff]  ;;  %v12861_v38 = vor.u32 %v5686_v23, %v5683_v6  ;;  %v3331_v7 = vsel %vm2787_vm7, %v3328_v25, %v3330_v9 }
 0x34f   : > { %2379 = vrot.lane.b32.xlu1 %v2152_v52, %s10075_s29  ;;  %5240 = vst.msk [vmem:[#allocation3 + $0x38] sm:$0xff] %vm2984_vm12, %v5126_v46  ;;  %6930 = vmatprep.mubr.bf16.mxu0 %v6509_v40  ;;  %v6519_v52 = vld [vmem:[#allocation3 + $0x70] sm:$0xff]  ;;  %v2161_v46 = vshrl.u32 %v12763_v24, 16  ;;  %v12874_v40 = vrot.slane %v2165_v21, 1 }
 0x350   : > { %4633 = vrot.lane.b32.xlu0 %v4556_v47, %s10075_s29  ;;  %6931 = vmatmul.mubr.bf16.gmra.mrb[176].mxu0 %v6508_v12  ;;  %v12876_v47 = vld [vmem:[#allocation2 + $0x80] sm:$0xff]   ;;  %v6420_v12 = vsel %vm512_vm1, %v12774_v63, %v12844_v42  ;;  %v5688_v60 = vsel %vm5554_vm10, %v12794_v29, %v12861_v38  ;;  %v5690_v63 = vshrl.u32 %v9927_v13, 16  ;;  %v12900_v29 = vld [vmem:[#allocation2 + $0x88] sm:$0xff]  }
 0x351   : > { %v3387_v15 = vpop.permute.xlu1 %3386  ;;  %9209 = vmatmul.mubr.msk.bf16.gmra.mrb[80].mxu1 %vm1719_vm5, %v6513_v8  ;;  %v6145_v24 = vld [vmem:[#allocation2 + $0x144] sm:$0xf]  ;;  %v2163_v43 = vor.u32 %v2161_v46, %v12806_v48  ;;  %6501 = vst.msk [vmem:[#allocation3 + $0x358] sm:$0xff] %vm1719_vm5, %v6420_v12  ;;  %v4559_v8 = vrot.slane %v12863_v49, 2  ;;  %v2173_v30 = vshll.u32 %v12900_v29, 16 }
 0x352   : > { %3501 = vst.msk [vmem:[#allocation3 + $0x48] sm:$0xff] %vm3497_vm13, %v3387_v15  ;;  %v5919_v56 = vpop.permute.xlu0 %5918  ;;  %9212 = vmatprep.mubr.msk.bf16.mxu1 %vm10072_vm2, %v13790_v54  ;;  %v12891_v15 = vld [vmem:[#allocation2 + $0x90] sm:$0xff]   ;;  %v8740_v62 = vcombine.low %v6144_v4, %v6145_v24  ;;  %v5692_v11 = vrot.slane %v5690_v63, 2 }
 0x353   : > { %2893 = vrot.lane.b32.xlu1 %v2816_v39, %s10074_s28  ;;  %6033 = vst.msk [vmem:[#allocation3 + $0x38] sm:$0xff] %vm3497_vm13, %v5919_v56  ;;  %v5693_v39 = vshll.u32 %v9927_v13, 16  ;;  %v2168_v56 = vsel %vm2036_vm8, %v2163_v43, %v12874_v40  ;;  %v5071_v1 = vrot.slane %v12891_v15, 2  ;;  %v12966_v13 = vld [vmem:[#allocation2 + $0x94] sm:$0xff]  }
 0x354   : > { %5145 = vrot.lane.b32.xlu0 %v5068_v20, %s10074_s28  ;;  %v2819_v20 = vrot.slane %v12876_v47, 1  ;;  %v13000_v47 = vld [vmem:[#allocation2 + $0x94] sm:$0xff]  }
 0x355   : > { %v2362_v41 = vpop.permute.xlu1 %2361  ;;  %v5695_v22 = vrot.slane %v5693_v39, 3  ;;  %v5072_v2 = vsel %vm4529_vm9, %v5069_v45, %v5071_v1  ;;  %v6147_v45 = vld [vmem:[#allocation2 + $0x14c] sm:$0xf] }
 0x356   : > { %2475 = vst.msk [vmem:[#allocation3 + $0x60] sm:$0xff] %vm2470_vm11, %v2362_v41  ;;  %v4616_v35 = vpop.permute.xlu0 %4615  ;;  %v2820_v57 = vsel %vm2787_vm7, %v2817_v28, %v2819_v20  ;;  %v2169_v28 = vshrl.u32 %v12831_v27, 16 }
 0x357   : > { %3406 = vrot.lane.b32.xlu1 %v3329_v10, %s10076_s7  ;;  %4729 = vst.msk [vmem:[#allocation3 + $0x50] sm:$0xff] %vm2470_vm11, %v4616_v35  ;;  %v4560_v10 = vsel %vm4529_vm9, %v4557_v14, %v4559_v8  ;;  %v6522_v35 = vld [vmem:[#allocation3 + $0x88] sm:$0xff]  ;;  %v3332_v14 = vrot.slane %v12898_v34, 1 }
 0x358   : > { %5938 = vrot.lane.b32.xlu0 %v5679_v53, %s10076_s7  ;;  %v12911_v53 = vrot.slane %v8740_v62, 3  ;;  %v2171_v27 = vor.u32 %v2169_v28, %v12874_v40  ;;  %v9943_v62 = vld [vmem:[#allocation2 + $0xa0] sm:$0xff]  }
 0x359   : > { %v2876_v33 = vpop.permute.xlu1 %2875  ;;  %9213 = vmatmul.mubr.msk.bf16.gmra.mrb[84].mxu1 %vm1719_vm5, %v6516_v5  ;;  %v6514_v48 = vld [vmem:[#allocation3 + $0x48] sm:$0xff]  ;;  %v12931_v5 = vor.u32 %v5695_v22, %v5692_v11  ;;  %v3333_v59 = vsel %vm2787_vm7, %v3330_v9, %v3332_v14  ;;  %v6525_v9 = vld [vmem:[#allocation3 + $0xa0] sm:$0xff]  ;;  %v4563_v11 = vrot.slane %v13000_v47, 2 }
 0x35a   : > { %2989 = vst.msk [vmem:[#allocation3 + $0x60] sm:$0xff] %vm2984_vm12, %v2876_v33  ;;  %v5128_v58 = vpop.permute.xlu0 %5127  ;;  %v6512_v44 = vld [vmem:[#allocation3 + $0x38] sm:$0xff]  ;;  %9216 = vmatprep.mubr.msk.bf16.mxu1 %vm10072_vm2, %v13790_v54  ;;  %v13026_v22 = vld [vmem:[#allocation2 + $0xa0] sm:$0xff]  }
 0x35b   : > { %2381 = vrot.lane.b32.xlu1 %v2160_v51, %s10075_s29  ;;  %5241 = vst.msk [vmem:[#allocation3 + $0x50] sm:$0xff] %vm2984_vm12, %v5128_v58  ;;  %6938 = vmatprep.mubr.bf16.mxu0 %v6512_v44  ;;  %v12933_v33 = vld [vmem:[#allocation2 + $0x8c] sm:$0xff]   ;;  %v12943_v58 = vrot.slane %v2173_v30, 1  ;;  %v5697_v32 = vsel %vm5554_vm10, %v12861_v38, %v12931_v5  ;;  %v13032_v30 = vld [vmem:[#allocation2 + $0x9c] sm:$0xff]  }
 0x35c   : > { %4635 = vrot.lane.b32.xlu0 %v4558_v50, %s10075_s29  ;;  %6939 = vmatmul.mubr.bf16.gmra.mrb[180].mxu0 %v6511_v0  ;;  %v12945_v44 = vld [vmem:[#allocation2 + $0x88] sm:$0xff]   ;;  %v6422_v50 = vsel %vm512_vm1, %v12844_v42, %v12911_v53  ;;  %v4561_v23 = vrot.slane %v12933_v33, 2  ;;  %v5699_v42 = vshrl.u32 %v9935_v36, 16 }
 0x35d   : > { %v3389_v37 = vpop.permute.xlu1 %3388  ;;  %v6146_v0 = vld [vmem:[#allocation2 + $0x148] sm:$0xf]  ;;  %6502 = vst.msk [vmem:[#allocation3 + $0x370] sm:$0xff] %vm1719_vm5, %v6422_v50  ;;  %v2821_v38 = vrot.slane %v12945_v44, 1 }
 0x35e   : > { %3502 = vst.msk [vmem:[#allocation3 + $0x60] sm:$0xff] %vm3497_vm13, %v3389_v37  ;;  %v5921_v26 = vpop.permute.xlu0 %5920  ;;  %v12958_v37 = vld [vmem:[#allocation2 + $0x98] sm:$0xff]   ;;  %v5701_v4 = vrot.slane %v5699_v42, 2 }
 0x35f   : > { %2895 = vrot.lane.b32.xlu1 %v2818_v61, %s10074_s28  ;;  %6034 = vst.msk [vmem:[#allocation3 + $0x50] sm:$0xff] %vm3497_vm13, %v5921_v26  ;;  %v5702_v61 = vshll.u32 %v9935_v36, 16  ;;  %v8741_v26 = vcombine.low %v6146_v0, %v6147_v45  ;;  %v5073_v12 = vrot.slane %v12958_v37, 2  ;;  %v2822_v49 = vsel %vm2787_vm7, %v2819_v20, %v2821_v38  ;;  %v6531_v0 = vld [vmem:[#allocation3 + $0xd0] sm:$0xff]  ;;  %v13075_v37 = vld [vmem:[#allocation2 + $0x98] sm:$0xff]  }
 0x360   : > { %5147 = vrot.lane.b32.xlu0 %v5070_v16, %s10074_s28  ;;  %v2176_v16 = vsel %vm2036_vm8, %v2171_v27, %v12943_v58 }
 0x361   : > { %v2364_v31 = vpop.permute.xlu1 %2363  ;;  %9217 = vmatmul.mubr.msk.bf16.gmra.mrb[88].mxu1 %vm1719_vm5, %v6519_v52  ;;  %v12968_v52 = vld [vmem:[#allocation2 + $0x90] sm:$0xff]   ;;  %v5704_v24 = vrot.slane %v5702_v61, 3  ;;  %v12981_v43 = vrot.slane %v8741_v26, 3  ;;  %v5074_v39 = vsel %vm4529_vm9, %v5071_v1, %v5073_v12 }
 0x362   : > { %2476 = vst.msk [vmem:[#allocation3 + $0x78] sm:$0xff] %vm2470_vm11, %v2364_v31  ;;  %v4618_v3 = vpop.permute.xlu0 %4617  ;;  %9220 = vmatprep.mubr.msk.bf16.mxu1 %vm10072_vm2, %v13790_v54  ;;  %v2185_v26 = vshrl.u32 %v12968_v52, 16 }
 0x363   : > { %3408 = vrot.lane.b32.xlu1 %v3331_v7, %s10076_s7  ;;  %4730 = vst.msk [vmem:[#allocation3 + $0x68] sm:$0xff] %vm2470_vm11, %v4618_v3  ;;  %v4562_v7 = vsel %vm4529_vm9, %v4559_v8, %v4561_v23  ;;  %v2181_v8 = vshll.u32 %v12968_v52, 16 }
 0x364   : > { %5940 = vrot.lane.b32.xlu0 %v5688_v60, %s10076_s7  ;;  %v3334_v60 = vrot.slane %v12966_v13, 1 }
 0x365   : > { %v2878_v25 = vpop.permute.xlu1 %2877  ;;  %v6517_v40 = vld [vmem:[#allocation3 + $0x60] sm:$0xff] }
 0x366   : > { %2990 = vst.msk [vmem:[#allocation3 + $0x78] sm:$0xff] %vm2984_vm12, %v2878_v25  ;;  %v5130_v41 = vpop.permute.xlu0 %5129  ;;  %v6515_v17 = vld [vmem:[#allocation3 + $0x50] sm:$0xff]  ;;  %v12998_v25 = vor.u32 %v5704_v24, %v5701_v4  ;;  %v3335_v15 = vsel %vm2787_vm7, %v3332_v14, %v3334_v60  ;;  %v6534_v24 = vld [vmem:[#allocation3 + $0xe8] sm:$0xff] }
 0x367   : > { %2383 = vrot.lane.b32.xlu1 %v2168_v56, %s10075_s29  ;;  %5242 = vst.msk [vmem:[#allocation3 + $0x68] sm:$0xff] %vm2984_vm12, %v5130_v41  ;;  %6946 = vmatprep.mubr.bf16.mxu0 %v6515_v17  ;;  %v6528_v56 = vld [vmem:[#allocation3 + $0xb8] sm:$0xff]  ;;  %v2177_v41 = vshrl.u32 %v12900_v29, 16  ;;  %v2183_v17 = vrot.slane %v2181_v8, 1  ;;  %v13093_v8 = vld [vmem:[#allocation2 + $0xa4] sm:$0xff]  }
 0x368   : > { %4637 = vrot.lane.b32.xlu0 %v4560_v10, %s10075_s29  ;;  %6947 = vmatmul.mubr.bf16.gmra.mrb[184].mxu0 %v6514_v48  ;;  %v13011_v10 = vld [vmem:[#allocation2 + $0x90] sm:$0xff]   ;;  %v6424_v48 = vsel %vm512_vm1, %v12911_v53, %v12981_v43  ;;  %v5706_v34 = vsel %vm5554_vm10, %v12931_v5, %v12998_v25  ;;  %v3338_v47 = vrot.slane %v13093_v8, 1 }
 0x369   : > { %v3391_v19 = vpop.permute.xlu1 %3390  ;;  %9221 = vmatmul.mubr.msk.bf16.gmra.mrb[92].mxu1 %vm1719_vm5, %v6522_v35  ;;  %v2179_v29 = vor.u32 %v2177_v41, %v12943_v58  ;;  %6503 = vst.msk [vmem:[#allocation3 + $0x388] sm:$0xff] %vm1719_vm5, %v6424_v48  ;;  %v5708_v35 = vshrl.u32 %v9943_v62, 16  ;;  %v2823_v14 = vrot.slane %v13011_v10, 1  ;;  %v13125_v10 = vld [vmem:[#allocation2 + $0xa4] sm:$0xff]  }
 0x36a   : > { %3503 = vst.msk [vmem:[#allocation3 + $0x78] sm:$0xff] %vm3497_vm13, %v3391_v19  ;;  %v5923_v55 = vpop.permute.xlu0 %5922  ;;  %9224 = vmatprep.mubr.msk.bf16.mxu1 %vm10072_vm2, %v13790_v54  ;;  %v5711_v19 = vshll.u32 %v9943_v62, 16 }
 0x36b   : > { %2897 = vrot.lane.b32.xlu1 %v2820_v57, %s10074_s28  ;;  %6035 = vst.msk [vmem:[#allocation3 + $0x68] sm:$0xff] %vm3497_vm13, %v5923_v55  ;;  %v2184_v57 = vsel %vm2036_vm8, %v2179_v29, %v2183_v17  ;;  %v13034_v55 = vld [vmem:[#allocation2 + $0x98] sm:$0xff]   ;;  %v5710_v58 = vrot.slane %v5708_v35, 2  ;;  %v2824_v33 = vsel %vm2787_vm7, %v2821_v38, %v2823_v14 }
 0x36c   : > { %5149 = vrot.lane.b32.xlu0 %v5072_v2, %s10074_s28  ;;  %v9775_v2 = vld [vmem:[#allocation2 + $0x150] ss:$0 sps:$4 sm:$0x77]   ;;  %v5713_v50 = vrot.slane %v5711_v19, 3  ;;  %v2189_v27 = vshll.u32 %v13034_v55, 16  ;;  %v6537_v35 = vld [vmem:[#allocation3 + $0x100] sm:$0xff] }
 0x36d   : > { %v2366_v51 = vpop.permute.xlu1 %2365  ;;  %v6425_v42 = vrot.slane %v9775_v2, 3 }
 0x36e   : > { %2477 = vst.msk [vmem:[#allocation3 + $0x90] sm:$0xff] %vm2470_vm11, %v2366_v51  ;;  %v4620_v6 = vpop.permute.xlu0 %4619  ;;  %v4564_v51 = vsel %vm4529_vm9, %v4561_v23, %v4563_v11  ;;  %v13057_v23 = vld [vmem:[#allocation2 + $0x9c] sm:$0xff]   ;;  %v13065_v61 = vor.u32 %v5713_v50, %v5710_v58  ;;  %v2191_v38 = vrot.slane %v2189_v27, 1 }
 0x36f   : > { %3410 = vrot.lane.b32.xlu1 %v3333_v59, %s10076_s7  ;;  %4731 = vst.msk [vmem:[#allocation3 + $0x80] sm:$0xff] %vm2470_vm11, %v4620_v6  ;;  %v5075_v59 = vrot.slane %v13026_v22, 2  ;;  %v3336_v6 = vrot.slane %v13032_v30, 1  ;;  %v6426_v4 = vsel %vm512_vm1, %v12981_v43, %v6425_v42  ;;  %v4567_v30 = vrot.slane %v13125_v10, 2 }
 0x370   : > { %5942 = vrot.lane.b32.xlu0 %v5697_v32, %s10076_s7  ;;  %v5715_v52 = vsel %vm5554_vm10, %v12998_v25, %v13065_v61  ;;  %6504 = vst.msk [vmem:[#allocation3 + $0x3a0] sm:$0xff] %vm1719_vm5, %v6426_v4  ;;  %vm7989_vm1 = vcmask 517120  }
 0x371   : > { %v2880_v21 = vpop.permute.xlu1 %2879  ;;  %9225 = vmatmul.mubr.msk.bf16.gmra.mrb[96].mxu1 %vm1719_vm5, %v6525_v9  ;;  %v6520_v28 = vld [vmem:[#allocation3 + $0x78] sm:$0xff]  ;;  %v5076_v44 = vsel %vm4529_vm9, %v5073_v12, %v5075_v59  ;;  %v3339_v22 = vsel %vm2787_vm7, %v3336_v6, %v3338_v47 }
 0x372   : > { %2991 = vst.msk [vmem:[#allocation3 + $0x90] sm:$0xff] %vm2984_vm12, %v2880_v21  ;;  %v5132_v31 = vpop.permute.xlu0 %5131  ;;  %v6518_v46 = vld [vmem:[#allocation3 + $0x68] sm:$0xff]  ;;  %9228 = vmatprep.mubr.msk.bf16.mxu1 %vm10072_vm2, %v13790_v54  ;;  %v9951_v9 = vld [vmem:[#allocation2 + $0xa8] sm:$0xff]  }
 0x373   : > { %2385 = vrot.lane.b32.xlu1 %v2176_v16, %s10075_s29  ;;  %5243 = vst.msk [vmem:[#allocation3 + $0x80] sm:$0xff] %vm2984_vm12, %v5132_v31  ;;  %6954 = vmatprep.mubr.bf16.mxu0 %v6518_v46  ;;  %v3337_v16 = vsel %vm2787_vm7, %v3334_v60, %v3336_v6  ;;  %v2187_v46 = vor.u32 %v2185_v26, %v2183_v17  ;;  %v5717_v13 = vshrl.u32 %v9951_v9, 16  ;;  %v5720_v12 = vshll.u32 %v9951_v9, 16 }
 0x374   : > { %4639 = vrot.lane.b32.xlu0 %v4562_v7, %s10075_s29  ;;  %6955 = vmatmul.mubr.bf16.gmra.mrb[188].mxu0 %v6517_v40  ;;  %v4565_v7 = vrot.slane %v13057_v23, 2  ;;  %v13083_v40 = vld [vmem:[#allocation2 + $0xa8] sm:$0xff]   ;;  %v2825_v60 = vrot.slane %v13075_v37, 1  ;;  %v9964_v37 = vld [vmem:[#allocation2 + $0xb8] sm:$0xff]  }
 0x375   : > { %v3393_v3 = vpop.permute.xlu1 %3392  ;;  %v5722_v41 = vrot.slane %v5720_v12, 3 }
 0x376   : > { %3504 = vst.msk [vmem:[#allocation3 + $0x90] sm:$0xff] %vm3497_vm13, %v3393_v3  ;;  %v5925_v63 = vpop.permute.xlu0 %5924  ;;  %v4566_v25 = vsel %vm4529_vm9, %v4563_v11, %v4565_v7  ;;  %v2826_v17 = vsel %vm2787_vm7, %v2823_v14, %v2825_v60  ;;  %v9959_v11 = vld [vmem:[#allocation2 + $0xb0] sm:$0xff]   ;;  %v13136_v14 = vld [vmem:[#allocation2 + $0xa0] sm:$0xff]   ;;  %v4568_v6 = vsel %vm4529_vm9, %v4565_v7, %v4567_v30 }
 0x377   : > { %2899 = vrot.lane.b32.xlu1 %v2822_v49, %s10074_s28  ;;  %6036 = vst.msk [vmem:[#allocation3 + $0x80] sm:$0xff] %vm3497_vm13, %v5925_v63  ;;  %v2192_v49 = vsel %vm2036_vm8, %v2187_v46, %v2191_v38  ;;  %v13095_v63 = vld [vmem:[#allocation2 + $0xa0] sm:$0xff]   ;;  %v2827_v50 = vrot.slane %v13136_v14, 1 }
 0x378   : > { %5151 = vrot.lane.b32.xlu0 %v5074_v39, %s10074_s28  ;;  %v2197_v48 = vshll.u32 %v13095_v63, 16  ;;  %v2201_v7 = vshrl.u32 %v13095_v63, 16 }
 0x379   : > { %v2368_v20 = vpop.permute.xlu1 %2367  ;;  %9229 = vmatmul.mubr.msk.bf16.gmra.mrb[100].mxu1 %vm1719_vm5, %v6528_v56  ;;  %v5077_v56 = vrot.slane %v13083_v40, 2  ;;  %v2828_v23 = vsel %vm2787_vm7, %v2825_v60, %v2827_v50  ;;  %v6543_v60 = vld [vmem:[#allocation3 + $0x130] sm:$0xff] }
 0x37a   : > { %2478 = vst.msk [vmem:[#allocation3 + $0xa8] sm:$0xff] %vm2470_vm11, %v2368_v20  ;;  %v4622_v1 = vpop.permute.xlu0 %4621  ;;  %9232 = vmatprep.mubr.msk.bf16.mxu1 %vm10072_vm2, %v13790_v54  ;;  %v5719_v20 = vrot.slane %v5717_v13, 2 }
 0x37b   : > { %3412 = vrot.lane.b32.xlu1 %v3335_v15, %s10076_s7  ;;  %4732 = vst.msk [vmem:[#allocation3 + $0x98] sm:$0xff] %vm2470_vm11, %v4622_v1  ;;  %v5078_v29 = vsel %vm4529_vm9, %v5075_v59, %v5077_v56 }
 0x37c   : > { %5944 = vrot.lane.b32.xlu0 %v5706_v34, %s10076_s7  ;;  %v13123_v34 = vor.u32 %v5722_v41, %v5719_v20 }
 0x37d   : > { %v2882_v53 = vpop.permute.xlu1 %2881  ;;  %v6523_v62 = vld [vmem:[#allocation3 + $0x90] sm:$0xff] }
 0x37e   : > { %2992 = vst.msk [vmem:[#allocation3 + $0xa8] sm:$0xff] %vm2984_vm12, %v2882_v53  ;;  %v5134_v5 = vpop.permute.xlu0 %5133  ;;  %v6521_v36 = vld [vmem:[#allocation3 + $0x80] sm:$0xff]  ;;  %v2193_v53 = vshrl.u32 %v13034_v55, 16 }
 0x37f   : > { %2387 = vrot.lane.b32.xlu1 %v2184_v57, %s10075_s29  ;;  %5244 = vst.msk [vmem:[#allocation3 + $0x98] sm:$0xff] %vm2984_vm12, %v5134_v5  ;;  %6962 = vmatprep.mubr.bf16.mxu0 %v6521_v36  ;;  %v2199_v57 = vrot.slane %v2197_v48, 1  ;;  %v5724_v5 = vsel %vm5554_vm10, %v13065_v61, %v13123_v34  ;;  %v13146_v36 = vld [vmem:[#allocation2 + $0xb0] sm:$0xff]  }
 0x380   : > { %4641 = vrot.lane.b32.xlu0 %v4564_v51, %s10075_s29  ;;  %6963 = vmatmul.mubr.bf16.gmra.mrb[192].mxu0 %v6520_v28  ;;  %v2195_v55 = vor.u32 %v2193_v53, %v2191_v38  ;;  %v5726_v51 = vshrl.u32 %v9959_v11, 16  ;;  %v5729_v28 = vshll.u32 %v9959_v11, 16  ;;  %v6540_v61 = vld [vmem:[#allocation3 + $0x118] sm:$0xff]  ;;  %v13831_v11 = vld [vmem:[#allocation15_spill] sm:$0xff] }
 0x381   : > { %v3395_v45 = vpop.permute.xlu1 %3394  ;;  %9233 = vmatmul.mubr.msk.bf16.gmra.mrb[104].mxu1 %vm1719_vm5, %v6531_v0  ;;  %v13152_v0 = vld [vmem:[#allocation2 + $0xac] sm:$0xff]   ;;  %v2203_v40 = vor.u32 %v2201_v7, %v2199_v57 }
 0x382   : > { %3505 = vst.msk [vmem:[#allocation3 + $0xa8] sm:$0xff] %vm3497_vm13, %v3395_v45  ;;  %v5927_v32 = vpop.permute.xlu0 %5926  ;;  %9236 = vmatprep.mubr.msk.bf16.mxu1 %vm10072_vm2, %v13790_v54  ;;  %v2200_v58 = vsel %vm2036_vm8, %v2195_v55, %v2199_v57  ;;  %v5728_v42 = vrot.slane %v5726_v51, 2  ;;  %v13833_v55 = vld [vmem:[#allocation14_spill] sm:$0xff] }
 0x383   : > { %2901 = vrot.lane.b32.xlu1 %v2824_v33, %s10074_s28  ;;  %6037 = vst.msk [vmem:[#allocation3 + $0x98] sm:$0xff] %vm3497_vm13, %v5927_v32  ;;  %v5079_v32 = vrot.slane %v13146_v36, 2  ;;  %v2208_v63 = vsel %vm2036_vm8, %v2203_v40, %v10512_v18  ;;  %v6549_v51 = vld [vmem:[#allocation3 + $0x160] sm:$0xff] }
 0x384   : > { %5153 = vrot.lane.b32.xlu0 %v5076_v44, %s10074_s28  ;;  %v5731_v44 = vrot.slane %v5729_v28, 3 }
 0x385   : > { %v2370_v21 = vpop.permute.xlu1 %2369 }
 0x386   : > { %2479 = vst.msk [vmem:[#allocation3 + $0xc0] sm:$0xff] %vm2470_vm11, %v2370_v21  ;;  %v4624_v31 = vpop.permute.xlu0 %4623  ;;  %v3340_v21 = vrot.slane %v13152_v0, 1  ;;  %v5732_v38 = vor.u32 %v5731_v44, %v5728_v42 }
 0x387   : > { %3414 = vrot.lane.b32.xlu1 %v3337_v16, %s10076_s7  ;;  %4733 = vst.msk [vmem:[#allocation3 + $0xb0] sm:$0xff] %vm2470_vm11, %v4624_v31  ;;  %v5080_v16 = vsel %vm4529_vm9, %v5077_v56, %v5079_v32  ;;  %v13178_v31 = vld [vmem:[#allocation2 + $0xac] sm:$0xff]  }
 0x388   : > { %5946 = vrot.lane.b32.xlu0 %v5715_v52, %s10076_s7  ;;  %v3341_v52 = vsel %vm2787_vm7, %v3338_v47, %v3340_v21  ;;  %v5733_v12 = vsel %vm5554_vm10, %v13123_v34, %v5732_v38  ;;  %v4569_v4 = vrot.slane %v13178_v31, 2  ;;  %v6546_v34 = vld [vmem:[#allocation3 + $0x148] sm:$0xff] }
 0x389   : > { %v2884_v3 = vpop.permute.xlu1 %2883  ;;  %9237 = vmatmul.mubr.msk.bf16.gmra.mrb[108].mxu1 %vm1719_vm5, %v6534_v24  ;;  %v6526_v27 = vld [vmem:[#allocation3 + $0xa8] sm:$0xff] }
 0x38a   : > { %2993 = vst.msk [vmem:[#allocation3 + $0xc0] sm:$0xff] %vm2984_vm12, %v2884_v3  ;;  %v5136_v39 = vpop.permute.xlu0 %5135  ;;  %v6524_v43 = vld [vmem:[#allocation3 + $0x98] sm:$0xff]  ;;  %9240 = vmatprep.mubr.msk.bf16.mxu1 %vm10072_vm2, %v13790_v54  ;;  %v9961_v24 = vld [vmem:[#allocation2 + $0xb8] sm:$0xff]   ;;  %v5735_v3 = vshrl.u32 %v9964_v37, 16 }
 0x38b   : > { %2389 = vrot.lane.b32.xlu1 %v2192_v49, %s10075_s29  ;;  %5245 = vst.msk [vmem:[#allocation3 + $0xb0] sm:$0xff] %vm2984_vm12, %v5136_v39  ;;  %6970 = vmatprep.mubr.bf16.mxu0 %v6524_v43  ;;  %v5738_v49 = vshll.u32 %v9964_v37, 16  ;;  %v5081_v56 = vrot.slane %v9961_v24, 2  ;;  %v6561_v24 = vld [vmem:[#allocation3 + $0x1c0] sm:$0xff] }
 0x38c   : > { %4643 = vrot.lane.b32.xlu0 %v4566_v25, %s10075_s29  ;;  %6971 = vmatmul.mubr.bf16.gmra.mrb[196].mxu0 %v6523_v62  ;;  %v4570_v25 = vsel %vm4529_vm9, %v4567_v30, %v4569_v4  ;;  %v5737_v20 = vrot.slane %v5735_v3, 2 }
 0x38d   : > { %v3397_v15 = vpop.permute.xlu1 %3396  ;;  %v5740_v41 = vrot.slane %v5738_v49, 3 }
 0x38e   : > { %3506 = vst.msk [vmem:[#allocation3 + $0xc0] sm:$0xff] %vm3497_vm13, %v3397_v15  ;;  %v5929_v1 = vpop.permute.xlu0 %5928  ;;  %v13829_v15 = vld [vmem:[#allocation13_spill] sm:$0xff] }
 0x38f   : > { %2903 = vrot.lane.b32.xlu1 %v2826_v17, %s10074_s28  ;;  %6038 = vst.msk [vmem:[#allocation3 + $0xb0] sm:$0xff] %vm3497_vm13, %v5929_v1  ;;  %v13830_v17 = vrot.slane %v13829_v15, 1  ;;  %v5082_v1 = vsel %vm4529_vm9, %v5079_v32, %v5081_v56  ;;  %v6552_v32 = vld [vmem:[#allocation3 + $0x178] sm:$0xff]  ;;  %v6567_v15 = vld [vmem:[#allocation3 + $0x1f0] sm:$0xff] }
 0x390   : > { %5155 = vrot.lane.b32.xlu0 %v5078_v29, %s10074_s28  ;;  %v5741_v29 = vor.u32 %v5740_v41, %v5737_v20 }
 0x391   : > { %v2372_v19 = vpop.permute.xlu1 %2371  ;;  %9241 = vmatmul.mubr.msk.bf16.gmra.mrb[112].mxu1 %vm1719_vm5, %v6537_v35  ;;  %v2830_v47 = vsel %vm2787_vm7, %v2827_v50, %v13830_v17  ;;  %v13832_v35 = vrot.slane %v13831_v11, 1 }
 0x392   : > { %2480 = vst.msk [vmem:[#allocation3 + $0xd8] sm:$0xff] %vm2470_vm11, %v2372_v19  ;;  %v4626_v2 = vpop.permute.xlu0 %4625  ;;  %9244 = vmatprep.mubr.msk.bf16.mxu1 %vm10072_vm2, %v13790_v54 }
 0x393   : > { %3416 = vrot.lane.b32.xlu1 %v3339_v22, %s10076_s7  ;;  %4734 = vst.msk [vmem:[#allocation3 + $0xc8] sm:$0xff] %vm2470_vm11, %v4626_v2  ;;  %v3343_v19 = vsel %vm2787_vm7, %v3340_v21, %v13832_v35  ;;  %v5742_v22 = vsel %vm5554_vm10, %v5732_v38, %v5741_v29 }
 0x394   : > { %5948 = vrot.lane.b32.xlu0 %v5724_v5, %s10076_s7  ;;  %v13834_v5 = vrot.slane %v13833_v55, 2 }
 0x395   : > { %v2886_v59 = vpop.permute.xlu1 %2885  ;;  %v6529_v62 = vld [vmem:[#allocation3 + $0xc0] sm:$0xff] }
 0x396   : > { %2994 = vst.msk [vmem:[#allocation3 + $0xd8] sm:$0xff] %vm2984_vm12, %v2886_v59  ;;  %v5138_v45 = vpop.permute.xlu0 %5137  ;;  %v6527_v33 = vld [vmem:[#allocation3 + $0xb0] sm:$0xff]  ;;  %v4572_v30 = vsel %vm4529_vm9, %v4569_v4, %v13834_v5 }
 0x397   : > { %2391 = vrot.lane.b32.xlu1 %v2200_v58, %s10075_s29  ;;  %5246 = vst.msk [vmem:[#allocation3 + $0xc8] sm:$0xff] %vm2984_vm12, %v5138_v45  ;;  %6978 = vmatprep.mubr.bf16.mxu0 %v6527_v33  ;;  %v13835_v58 = vld [vmem:[#allocation16_spill] sm:$0xff] }
 0x398   : > { %4645 = vrot.lane.b32.xlu0 %v4568_v6, %s10075_s29  ;;  %6979 = vmatmul.mubr.bf16.gmra.mrb[200].mxu0 %v6526_v27  ;;  %v13836_v50 = vrot.slane %v13835_v58, 2  ;;  %v13837_v6 = vld [vmem:[#allocation17_spill] sm:$0xff] }
 0x399   : > { %v3399_v9 = vpop.permute.xlu1 %3398  ;;  %9245 = vmatmul.mubr.msk.bf16.gmra.mrb[116].mxu1 %vm1719_vm5, %v6540_v61  ;;  %v5751_v27 = vsel %vm5554_vm10, %v5741_v29, %v13837_v6  ;;  %v6570_v29 = vld [vmem:[#allocation3 + $0x208] sm:$0xff] }
 0x39a   : > { %3507 = vst.msk [vmem:[#allocation3 + $0xd8] sm:$0xff] %vm3497_vm13, %v3399_v9  ;;  %v5931_v26 = vpop.permute.xlu0 %5930  ;;  %9248 = vmatprep.mubr.msk.bf16.mxu1 %vm10072_vm2, %v13790_v54  ;;  %v5084_v0 = vsel %vm4529_vm9, %v5081_v56, %v13836_v50  ;;  %v6579_v50 = vld [vmem:[#allocation3 + $0x250] sm:$0xff] }
 0x39b   : > { %2905 = vrot.lane.b32.xlu1 %v2828_v23, %s10074_s28  ;;  %6039 = vst.msk [vmem:[#allocation3 + $0xc8] sm:$0xff] %vm3497_vm13, %v5931_v26  ;;  %v6555_v26 = vld [vmem:[#allocation3 + $0x190] sm:$0xff] }
 0x39c   : > { %5157 = vrot.lane.b32.xlu0 %v5080_v16, %s10074_s28 }
 0x39d   : > { %v2374_v46 = vpop.permute.xlu1 %2373 }
 0x39e   : > { %2481 = vst.msk [vmem:[#allocation3 + $0xf0] sm:$0xff] %vm2470_vm11, %v2374_v46  ;;  %v4628_v13 = vpop.permute.xlu0 %4627 }
 0x39f   : > { %3418 = vrot.lane.b32.xlu1 %v3341_v52, %s10076_s7  ;;  %4735 = vst.msk [vmem:[#allocation3 + $0xe0] sm:$0xff] %vm2470_vm11, %v4628_v13  ;;  %v6558_v52 = vld [vmem:[#allocation3 + $0x1a8] sm:$0xff] }
 0x3a0   : > { %5950 = vrot.lane.b32.xlu0 %v5733_v12, %s10076_s7 }
 0x3a1   : > { %v2888_v8 = vpop.permute.xlu1 %2887  ;;  %9249 = vmatmul.mubr.msk.bf16.gmra.mrb[120].mxu1 %vm1719_vm5, %v6543_v60  ;;  %v6532_v36 = vld [vmem:[#allocation3 + $0xd8] sm:$0xff] }
 0x3a2   : > { %2995 = vst.msk [vmem:[#allocation3 + $0xf0] sm:$0xff] %vm2984_vm12, %v2888_v8  ;;  %v5140_v39 = vpop.permute.xlu0 %5139  ;;  %v6530_v43 = vld [vmem:[#allocation3 + $0xc8] sm:$0xff]  ;;  %9252 = vmatprep.mubr.msk.bf16.mxu1 %vm10072_vm2, %v13790_v54 }
 0x3a3   : > { %2393 = vrot.lane.b32.xlu1 %v2208_v63, %s10075_s29  ;;  %5247 = vst.msk [vmem:[#allocation3 + $0xe0] sm:$0xff] %vm2984_vm12, %v5140_v39  ;;  %6986 = vmatprep.mubr.bf16.mxu0 %v6530_v43  ;;  %v6564_v43 = vld [vmem:[#allocation3 + $0x1d8] sm:$0xff] }
 0x3a4   : > { %4647 = vrot.lane.b32.xlu0 %v4570_v25, %s10075_s29  ;;  %6987 = vmatmul.mubr.bf16.gmra.mrb[204].mxu0 %v6529_v62 }
 0x3a5   : > { %v3401_v18 = vpop.permute.xlu1 %3400 }
 0x3a6   : > { %3508 = vst.msk [vmem:[#allocation3 + $0xf0] sm:$0xff] %vm3497_vm13, %v3401_v18  ;;  %v5933_v48 = vpop.permute.xlu0 %5932 }
 0x3a7   : > { %2907 = vrot.lane.b32.xlu1 %v2830_v47, %s10074_s28  ;;  %6040 = vst.msk [vmem:[#allocation3 + $0xe0] sm:$0xff] %vm3497_vm13, %v5933_v48 }
 0x3a8   : > { %5159 = vrot.lane.b32.xlu0 %v5082_v1, %s10074_s28 }
 0x3a9   : > { %v2376_v10 = vpop.permute.xlu1 %2375  ;;  %9253 = vmatmul.mubr.msk.bf16.gmra.mrb[124].mxu1 %vm1719_vm5, %v6546_v34 }
 0x3aa   : > { %2482 = vst.msk [vmem:[#allocation3 + $0x108] sm:$0xff] %vm2470_vm11, %v2376_v10  ;;  %v4630_v53 = vpop.permute.xlu0 %4629  ;;  %9256 = vmatprep.mubr.msk.bf16.mxu1 %vm10072_vm2, %v13790_v54 }
 0x3ab   : > { %3420 = vrot.lane.b32.xlu1 %v3343_v19, %s10076_s7  ;;  %4736 = vst.msk [vmem:[#allocation3 + $0xf8] sm:$0xff] %vm2470_vm11, %v4630_v53 }
 0x3ac   : > { %5952 = vrot.lane.b32.xlu0 %v5742_v22, %s10076_s7  ;;  %v6573_v22 = vld [vmem:[#allocation3 + $0x220] sm:$0xff] }
 0x3ad   : > { %v2890_v57 = vpop.permute.xlu1 %2889  ;;  %v6535_v9 = vld [vmem:[#allocation3 + $0xf0] sm:$0xff] }
 0x3ae   : > { %2996 = vst.msk [vmem:[#allocation3 + $0x108] sm:$0xff] %vm2984_vm12, %v2890_v57  ;;  %v5142_v14 = vpop.permute.xlu0 %5141  ;;  %v6533_v2 = vld [vmem:[#allocation3 + $0xe0] sm:$0xff] }
 0x3af   : > { %5248 = vst.msk [vmem:[#allocation3 + $0xf8] sm:$0xff] %vm2984_vm12, %v5142_v14  ;;  %6994 = vmatprep.mubr.bf16.mxu0 %v6533_v2 }
 0x3b0   : > { %4649 = vrot.lane.b32.xlu0 %v4572_v30, %s10075_s29  ;;  %6995 = vmatmul.mubr.bf16.gmra.mrb[208].mxu0 %v6532_v36  ;;  %v6576_v36 = vld [vmem:[#allocation3 + $0x238] sm:$0xff] }
 0x3b1   : > { %v3403_v28 = vpop.permute.xlu1 %3402  ;;  %9257 = vmatmul.mubr.msk.bf16.gmra.mrb[128].mxu1 %vm1719_vm5, %v6549_v51 }
 0x3b2   : > { %3509 = vst.msk [vmem:[#allocation3 + $0x108] sm:$0xff] %vm3497_vm13, %v3403_v28  ;;  %v5935_v59 = vpop.permute.xlu0 %5934  ;;  %9260 = vmatprep.mubr.msk.bf16.mxu1 %vm10072_vm2, %v13790_v54 }
 0x3b3   : > { %6041 = vst.msk [vmem:[#allocation3 + $0xf8] sm:$0xff] %vm3497_vm13, %v5935_v59 }
 0x3b4   : > { %5161 = vrot.lane.b32.xlu0 %v5084_v0, %s10074_s28 }
 0x3b5   : > { %v2378_v45 = vpop.permute.xlu1 %2377 }
 0x3b6   : > { %2483 = vst.msk [vmem:[#allocation3 + $0x120] sm:$0xff] %vm2470_vm11, %v2378_v45  ;;  %v4632_v33 = vpop.permute.xlu0 %4631 }
 0x3b7   : > { %4737 = vst.msk [vmem:[#allocation3 + $0x110] sm:$0xff] %vm2470_vm11, %v4632_v33 }
 0x3b8   : > { %5954 = vrot.lane.b32.xlu0 %v5751_v27, %s10076_s7 }
 0x3b9   : > { %v2892_v42 = vpop.permute.xlu1 %2891  ;;  %9261 = vmatmul.mubr.msk.bf16.gmra.mrb[132].mxu1 %vm1719_vm5, %v6552_v32  ;;  %v6538_v7 = vld [vmem:[#allocation3 + $0x108] sm:$0xff] }
 0x3ba   : > { %2997 = vst.msk [vmem:[#allocation3 + $0x120] sm:$0xff] %vm2984_vm12, %v2892_v42  ;;  %v5144_v44 = vpop.permute.xlu0 %5143  ;;  %v6536_v61 = vld [vmem:[#allocation3 + $0xf8] sm:$0xff]  ;;  %9264 = vmatprep.mubr.msk.bf16.mxu1 %vm10072_vm2, %v13790_v54  ;;  %v6582_v42 = vld [vmem:[#allocation3 + $0x268] sm:$0xff] }
 0x3bb   : > { %5249 = vst.msk [vmem:[#allocation3 + $0x110] sm:$0xff] %vm2984_vm12, %v5144_v44  ;;  %7002 = vmatprep.mubr.bf16.mxu0 %v6536_v61 }
 0x3bc   : > { %7003 = vmatmul.mubr.bf16.gmra.mrb[212].mxu0 %v6535_v9 }
 0x3bd   : > { %v3405_v23 = vpop.permute.xlu1 %3404 }
 0x3be   : > { %3510 = vst.msk [vmem:[#allocation3 + $0x120] sm:$0xff] %vm3497_vm13, %v3405_v23  ;;  %v5937_v21 = vpop.permute.xlu0 %5936 }
 0x3bf   : > { %6042 = vst.msk [vmem:[#allocation3 + $0x110] sm:$0xff] %vm3497_vm13, %v5937_v21 }
 0x3c1   : > { %v2380_v16 = vpop.permute.xlu1 %2379  ;;  %9265 = vmatmul.mubr.msk.bf16.gmra.mrb[136].mxu1 %vm1719_vm5, %v6555_v26 }
 0x3c2   : > { %2484 = vst.msk [vmem:[#allocation3 + $0x138] sm:$0xff] %vm2470_vm11, %v2380_v16  ;;  %v4634_v38 = vpop.permute.xlu0 %4633  ;;  %9268 = vmatprep.mubr.msk.bf16.mxu1 %vm10072_vm2, %v13790_v54  ;;  %v6585_v16 = vld [vmem:[#allocation3 + $0x280] sm:$0xff] }
 0x3c3   : > { %4738 = vst.msk [vmem:[#allocation3 + $0x128] sm:$0xff] %vm2470_vm11, %v4634_v38 }
 0x3c5   : > { %v2894_v31 = vpop.permute.xlu1 %2893  ;;  %v6541_v8 = vld [vmem:[#allocation3 + $0x120] sm:$0xff] }
 0x3c6   : > { %2998 = vst.msk [vmem:[#allocation3 + $0x138] sm:$0xff] %vm2984_vm12, %v2894_v31  ;;  %v5146_v37 = vpop.permute.xlu0 %5145  ;;  %v6539_v46 = vld [vmem:[#allocation3 + $0x110] sm:$0xff] }
 0x3c7   : > { %5250 = vst.msk [vmem:[#allocation3 + $0x128] sm:$0xff] %vm2984_vm12, %v5146_v37  ;;  %7010 = vmatprep.mubr.bf16.mxu0 %v6539_v46 }
 0x3c8   : > { %7011 = vmatmul.mubr.bf16.gmra.mrb[216].mxu0 %v6538_v7 }
 0x3c9   : > { %v3407_v13 = vpop.permute.xlu1 %3406  ;;  %9269 = vmatmul.mubr.msk.bf16.gmra.mrb[140].mxu1 %vm1719_vm5, %v6558_v52 }
 0x3ca   : > { %3511 = vst.msk [vmem:[#allocation3 + $0x138] sm:$0xff] %vm3497_vm13, %v3407_v13  ;;  %v5939_v40 = vpop.permute.xlu0 %5938  ;;  %9272 = vmatprep.mubr.msk.bf16.mxu1 %vm10072_vm2, %v13790_v54  ;;  %v13328_v13 = vld [vmem:[#allocation10] ss:$0 sm:$0xff] }
 0x3cb   : > { %6043 = vst.msk [vmem:[#allocation3 + $0x128] sm:$0xff] %vm3497_vm13, %v5939_v40 }
 0x3cd   : > { %v2382_v12 = vpop.permute.xlu1 %2381 }
 0x3ce   : > { %2485 = vst.msk [vmem:[#allocation3 + $0x150] sm:$0xff] %vm2470_vm11, %v2382_v12  ;;  %v4636_v4 = vpop.permute.xlu0 %4635 }
 0x3cf   : > { %4739 = vst.msk [vmem:[#allocation3 + $0x140] sm:$0xff] %vm2470_vm11, %v4636_v4 }
 0x3d1   : > { %v2896_v3 = vpop.permute.xlu1 %2895  ;;  %9273 = vmatmul.mubr.msk.bf16.gmra.mrb[144].mxu1 %vm1719_vm5, %v6561_v24  ;;  %v6544_v18 = vld [vmem:[#allocation3 + $0x138] sm:$0xff] }
 0x3d2   : > { %2999 = vst.msk [vmem:[#allocation3 + $0x150] sm:$0xff] %vm2984_vm12, %v2896_v3  ;;  %v5148_v49 = vpop.permute.xlu0 %5147  ;;  %v6542_v60 = vld [vmem:[#allocation3 + $0x128] sm:$0xff]  ;;  %9276 = vmatprep.mubr.msk.bf16.mxu1 %vm10072_vm2, %v13790_v54 }
 0x3d3   : > { %5251 = vst.msk [vmem:[#allocation3 + $0x140] sm:$0xff] %vm2984_vm12, %v5148_v49  ;;  %7018 = vmatprep.mubr.bf16.mxu0 %v6542_v60  ;;  %v6588_v49 = vld [vmem:[#allocation3 + $0x298] sm:$0xff] }
 0x3d4   : > { %7019 = vmatmul.mubr.bf16.gmra.mrb[220].mxu0 %v6541_v8 }
 0x3d5   : > { %v3409_v63 = vpop.permute.xlu1 %3408 }
 0x3d6   : > { %3512 = vst.msk [vmem:[#allocation3 + $0x150] sm:$0xff] %vm3497_vm13, %v3409_v63  ;;  %v5941_v39 = vpop.permute.xlu0 %5940 }
 0x3d7   : > { %6044 = vst.msk [vmem:[#allocation3 + $0x140] sm:$0xff] %vm3497_vm13, %v5941_v39 }
 0x3d9   : > { %v2384_v25 = vpop.permute.xlu1 %2383  ;;  %9277 = vmatmul.mubr.msk.bf16.gmra.mrb[148].mxu1 %vm1719_vm5, %v6564_v43 }
 0x3da   : > { %2486 = vst.msk [vmem:[#allocation3 + $0x168] sm:$0xff] %vm2470_vm11, %v2384_v25  ;;  %v4638_v62 = vpop.permute.xlu0 %4637  ;;  %9280 = vmatprep.mubr.msk.bf16.mxu1 %vm10072_vm2, %v13790_v54 }
 0x3db   : > { %4740 = vst.msk [vmem:[#allocation3 + $0x158] sm:$0xff] %vm2470_vm11, %v4638_v62 }
 0x3dd   : > { %v2898_v56 = vpop.permute.xlu1 %2897  ;;  %v6547_v35 = vld [vmem:[#allocation3 + $0x150] sm:$0xff] }
 0x3de   : > { %3000 = vst.msk [vmem:[#allocation3 + $0x168] sm:$0xff] %vm2984_vm12, %v2898_v56  ;;  %v5150_v20 = vpop.permute.xlu0 %5149  ;;  %v6545_v41 = vld [vmem:[#allocation3 + $0x140] sm:$0xff] }
 0x3df   : > { %5252 = vst.msk [vmem:[#allocation3 + $0x158] sm:$0xff] %vm2984_vm12, %v5150_v20  ;;  %7026 = vmatprep.mubr.bf16.mxu0 %v6545_v41 }
 0x3e0   : > { %7027 = vmatmul.mubr.bf16.gmra.mrb[224].mxu0 %v6544_v18 }
 0x3e1   : > { %v3411_v17 = vpop.permute.xlu1 %3410  ;;  %9281 = vmatmul.mubr.msk.bf16.gmra.mrb[152].mxu1 %vm1719_vm5, %v6567_v15 }
 0x3e2   : > { %3513 = vst.msk [vmem:[#allocation3 + $0x168] sm:$0xff] %vm3497_vm13, %v3411_v17  ;;  %v5943_v47 = vpop.permute.xlu0 %5942  ;;  %9284 = vmatprep.mubr.msk.bf16.mxu1 %vm10072_vm2, %v13790_v54 }
 0x3e3   : > { %6045 = vst.msk [vmem:[#allocation3 + $0x158] sm:$0xff] %vm3497_vm13, %v5943_v47 }
 0x3e5   : > { %v2386_v48 = vpop.permute.xlu1 %2385 }
 0x3e6   : > { %2487 = vst.msk [vmem:[#allocation3 + $0x180] sm:$0xff] %vm2470_vm11, %v2386_v48  ;;  %v4640_v1 = vpop.permute.xlu0 %4639 }
 0x3e7   : > { %4741 = vst.msk [vmem:[#allocation3 + $0x170] sm:$0xff] %vm2470_vm11, %v4640_v1 }
 0x3e9   : > { %v2900_v34 = vpop.permute.xlu1 %2899  ;;  %9285 = vmatmul.mubr.msk.bf16.gmra.mrb[0].mxu1 %vm1719_vm5, %v6570_v29  ;;  %v6550_v30 = vld [vmem:[#allocation3 + $0x168] sm:$0xff] }
 0x3ea   : > { %3001 = vst.msk [vmem:[#allocation3 + $0x180] sm:$0xff] %vm2984_vm12, %v2900_v34  ;;  %v5152_v10 = vpop.permute.xlu0 %5151  ;;  %v6548_v11 = vld [vmem:[#allocation3 + $0x158] sm:$0xff]  ;;  %9288 = vmatprep.mubr.msk.bf16.mxu1 %vm10072_vm2, %v13790_v54  ;;  %v6591_v34 = vld [vmem:[#allocation3 + $0x2b0] sm:$0xff] }
 0x3eb   : > { %5253 = vst.msk [vmem:[#allocation3 + $0x170] sm:$0xff] %vm2984_vm12, %v5152_v10  ;;  %7034 = vmatprep.mubr.bf16.mxu0 %v6548_v11 }
 0x3ec   : > { %7035 = vmatmul.mubr.bf16.gmra.mrb[228].mxu0 %v6547_v35 }
 0x3ed   : > { %v3413_v19 = vpop.permute.xlu1 %3412 }
 0x3ee   : > { %3514 = vst.msk [vmem:[#allocation3 + $0x180] sm:$0xff] %vm3497_vm13, %v3413_v19  ;;  %v5945_v53 = vpop.permute.xlu0 %5944 }
 0x3ef   : > { %6046 = vst.msk [vmem:[#allocation3 + $0x170] sm:$0xff] %vm3497_vm13, %v5945_v53 }
 0x3f1   : > { %v2388_v57 = vpop.permute.xlu1 %2387  ;;  %9289 = vmatmul.mubr.msk.bf16.gmra.mrb[4].mxu1 %vm1719_vm5, %v6573_v22 }
 0x3f2   : > { %2488 = vst.msk [vmem:[#allocation3 + $0x198] sm:$0xff] %vm2470_vm11, %v2388_v57  ;;  %v4642_v14 = vpop.permute.xlu0 %4641  ;;  %9292 = vmatprep.mubr.msk.bf16.mxu1 %vm10072_vm2, %v13790_v54 }
 0x3f3   : > { %4742 = vst.msk [vmem:[#allocation3 + $0x188] sm:$0xff] %vm2470_vm11, %v4642_v14 }
 0x3f5   : > { %v2902_v2 = vpop.permute.xlu1 %2901  ;;  %v6553_v6 = vld [vmem:[#allocation3 + $0x180] sm:$0xff] }
 0x3f6   : > { %3002 = vst.msk [vmem:[#allocation3 + $0x198] sm:$0xff] %vm2984_vm12, %v2902_v2  ;;  %v5154_v55 = vpop.permute.xlu0 %5153  ;;  %v6551_v5 = vld [vmem:[#allocation3 + $0x170] sm:$0xff] }
 0x3f7   : > { %5254 = vst.msk [vmem:[#allocation3 + $0x188] sm:$0xff] %vm2984_vm12, %v5154_v55  ;;  %7042 = vmatprep.mubr.bf16.mxu0 %v6551_v5 }
 0x3f8   : > { %7043 = vmatmul.mubr.bf16.gmra.mrb[232].mxu0 %v6550_v30 }
 0x3f9   : > { %v3415_v51 = vpop.permute.xlu1 %3414  ;;  %9293 = vmatmul.mubr.msk.bf16.gmra.mrb[8].mxu1 %vm1719_vm5, %v6576_v36 }
 0x3fa   : > { %3515 = vst.msk [vmem:[#allocation3 + $0x198] sm:$0xff] %vm3497_vm13, %v3415_v51  ;;  %v5947_v28 = vpop.permute.xlu0 %5946  ;;  %9296 = vmatprep.mubr.msk.bf16.mxu1 %vm10072_vm2, %v13790_v54 }
 0x3fb   : > { %6047 = vst.msk [vmem:[#allocation3 + $0x188] sm:$0xff] %vm3497_vm13, %v5947_v28 }
 0x3fd   : > { %v2390_v59 = vpop.permute.xlu1 %2389 }
 0x3fe   : > { %2489 = vst.msk [vmem:[#allocation3 + $0x1b0] sm:$0xff] %vm2470_vm11, %v2390_v59  ;;  %v4644_v58 = vpop.permute.xlu0 %4643 }
 0x3ff   : > { %4743 = vst.msk [vmem:[#allocation3 + $0x1a0] sm:$0xff] %vm2470_vm11, %v4644_v58 }
 0x401   : > { %v2904_v0 = vpop.permute.xlu1 %2903  ;;  %9297 = vmatmul.mubr.msk.bf16.gmra.mrb[12].mxu1 %vm1719_vm5, %v6579_v50  ;;  %v6556_v26 = vld [vmem:[#allocation3 + $0x198] sm:$0xff] }
 0x402   : > { %3003 = vst.msk [vmem:[#allocation3 + $0x1b0] sm:$0xff] %vm2984_vm12, %v2904_v0  ;;  %v5156_v45 = vpop.permute.xlu0 %5155  ;;  %v6554_v33 = vld [vmem:[#allocation3 + $0x188] sm:$0xff]  ;;  %9300 = vmatprep.mubr.msk.bf16.mxu1 %vm10072_vm2, %v13790_v54 }
 0x403   : > { %5255 = vst.msk [vmem:[#allocation3 + $0x1a0] sm:$0xff] %vm2984_vm12, %v5156_v45  ;;  %7050 = vmatprep.mubr.bf16.mxu0 %v6554_v33  ;;  %v6594_v33 = vld [vmem:[#allocation3 + $0x2c8] sm:$0xff] }
 0x404   : > { %7051 = vmatmul.mubr.bf16.gmra.mrb[236].mxu0 %v6553_v6 }
 0x405   : > { %v3417_v27 = vpop.permute.xlu1 %3416 }
 0x406   : > { %3516 = vst.msk [vmem:[#allocation3 + $0x1b0] sm:$0xff] %vm3497_vm13, %v3417_v27  ;;  %v5949_v32 = vpop.permute.xlu0 %5948 }
 0x407   : > { %6048 = vst.msk [vmem:[#allocation3 + $0x1a0] sm:$0xff] %vm3497_vm13, %v5949_v32 }
 0x409   : > { %v2392_v44 = vpop.permute.xlu1 %2391  ;;  %9301 = vmatmul.mubr.msk.bf16.gmra.mrb[16].mxu1 %vm1719_vm5, %v6582_v42 }
 0x40a   : > { %2490 = vst.msk [vmem:[#allocation3 + $0x1c8] sm:$0xff] %vm2470_vm11, %v2392_v44  ;;  %v4646_v61 = vpop.permute.xlu0 %4645  ;;  %9304 = vmatprep.mubr.msk.bf16.mxu1 %vm10072_vm2, %v13790_v54 }
 0x40b   : > { %4744 = vst.msk [vmem:[#allocation3 + $0x1b8] sm:$0xff] %vm2470_vm11, %v4646_v61 }
 0x40d   : > { %v2906_v9 = vpop.permute.xlu1 %2905  ;;  %v6559_v20 = vld [vmem:[#allocation3 + $0x1b0] sm:$0xff] }
 0x40e   : > { %3004 = vst.msk [vmem:[#allocation3 + $0x1c8] sm:$0xff] %vm2984_vm12, %v2906_v9  ;;  %v5158_v23 = vpop.permute.xlu0 %5157  ;;  %v6557_v21 = vld [vmem:[#allocation3 + $0x1a0] sm:$0xff] }
 0x40f   : > { %5256 = vst.msk [vmem:[#allocation3 + $0x1b8] sm:$0xff] %vm2984_vm12, %v5158_v23  ;;  %7058 = vmatprep.mubr.bf16.mxu0 %v6557_v21 }
 0x410   : > { %7059 = vmatmul.mubr.bf16.gmra.mrb[240].mxu0 %v6556_v26  ;;  %v6597_v26 = vld [vmem:[#allocation3 + $0x2e0] sm:$0xff] }
 0x411   : > { %v3419_v38 = vpop.permute.xlu1 %3418  ;;  %9305 = vmatmul.mubr.msk.bf16.gmra.mrb[20].mxu1 %vm1719_vm5, %v6585_v16 }
 0x412   : > { %3517 = vst.msk [vmem:[#allocation3 + $0x1c8] sm:$0xff] %vm3497_vm13, %v3419_v38  ;;  %v5951_v31 = vpop.permute.xlu0 %5950  ;;  %9308 = vmatprep.mubr.msk.bf16.mxu1 %vm10072_vm2, %v13790_v54 }
 0x413   : > { %6049 = vst.msk [vmem:[#allocation3 + $0x1b8] sm:$0xff] %vm3497_vm13, %v5951_v31  ;;  %v7269_v37 = vpop.f32.mrb[72].mxu1 }
 0x414   : > { %v9202_v46 = vpop.f32.mrb[73].mxu1 }
 0x415   : > { %v2394_v7 = vpop.permute.xlu1 %2393  ;;  %v7272_v52 = vpop.f32.mrb[74].mxu1 }
 0x416   : > { %2491 = vst.msk [vmem:[#allocation3 + $0x1e0] sm:$0xff] %vm2470_vm11, %v2394_v7  ;;  %v9203_v40 = vpop.f32.mrb[75].mxu1  ;;  %v4648_v12 = vpop.permute.xlu0 %4647 }
 0x417   : > { %4745 = vst.msk [vmem:[#allocation3 + $0x1d0] sm:$0xff] %vm2470_vm11, %v4648_v12  ;;  %v6924_v4 = vpop.f32.mrb[172].mxu0 }
 0x418   : > { %v6925_v24 = vadd.f32 %v13328_v13, %v6924_v4  ;;  %v6926_v3 = vpop.f32.mrb[173].mxu0 }
 0x419   : > { %v2908_v60 = vpop.permute.xlu1 %2907  ;;  %9309 = vmatmul.mubr.msk.bf16.gmra.mrb[24].mxu1 %vm1719_vm5, %v6588_v49  ;;  %v6927_v8 = vpop.f32.mrb[174].mxu0  ;;  %v6562_v36 = vld [vmem:[#allocation3 + $0x1c8] sm:$0xff] }
 0x41a   : > { %3005 = vst.msk [vmem:[#allocation3 + $0x1e0] sm:$0xff] %vm2984_vm12, %v2908_v60  ;;  %v7270_v63 = vadd.f32 %v7269_v37, %v6925_v24  ;;  %v6928_v39 = vadd.f32 %v13328_v13, %v6927_v8  ;;  %v5160_v43 = vpop.permute.xlu0 %5159  ;;  %v6929_v25 = vpop.f32.mrb[175].mxu0  ;;  %v6560_v62 = vld [vmem:[#allocation3 + $0x1b8] sm:$0xff]  ;;  %9312 = vmatprep.mubr.msk.bf16.mxu1 %vm10072_vm2, %v13790_v54 }
 0x41b   : > { %5257 = vst.msk [vmem:[#allocation3 + $0x1d0] sm:$0xff] %vm2984_vm12, %v5160_v43  ;;  %7066 = vmatprep.mubr.bf16.mxu0 %v6560_v62  ;;  %v7277_v56 = vpop.f32.mrb[76].mxu1 }
 0x41c   : > { %v7580_v41 = vmax.f32 %v7270_v63, 0.0  ;;  %v7273_v18 = vadd.f32 %v7272_v52, %v6928_v39  ;;  %7067 = vmatmul.mubr.bf16.gmra.mrb[244].mxu0 %v6559_v20  ;;  %v9206_v15 = vpop.f32.mrb[77].mxu1  ;;  %v6600_v39 = vld [vmem:[#allocation3 + $0x2f8] sm:$0xff] }
 0x41d   : > { %v3421_v17 = vpop.permute.xlu1 %3420  ;;  %v7280_v47 = vpop.f32.mrb[78].mxu1 }
 0x41e   : > { %3518 = vst.msk [vmem:[#allocation3 + $0x1e0] sm:$0xff] %vm3497_vm13, %v3421_v17  ;;  %v7581_v48 = vmax.f32 %v7273_v18, 0.0  ;;  %v9207_v1 = vpop.f32.mrb[79].mxu1  ;;  %v5953_v29 = vpop.permute.xlu0 %5952 }
 0x41f   : > { %7659 = vst.msk [vmem:[#allocation4] sm:$0xff] %vm7658_vm15, %v7580_v41 }
 0x420   : > { %6050 = vst.msk [vmem:[#allocation3 + $0x1d0] sm:$0xff] %vm3497_vm13, %v5953_v29 }
 0x421   : > { %7660 = vst.msk [vmem:[#allocation4 + $0x8] sm:$0xff] %vm7658_vm15, %v7581_v48  ;;  %9313 = vmatmul.mubr.msk.bf16.gmra.mrb[28].mxu1 %vm1719_vm5, %v6591_v34 }
 0x422   : > { %v4650_v10 = vpop.permute.xlu0 %4649  ;;  %9316 = vmatprep.mubr.msk.bf16.mxu1 %vm10072_vm2, %v13790_v54 }
 0x423   : > { %4746 = vst.msk [vmem:[#allocation3 + $0x1e8] sm:$0xff] %vm2470_vm11, %v4650_v10  ;;  %v6932_v11 = vpop.f32.mrb[176].mxu0 }
 0x424   : > { %v6933_v35 = vadd.f32 %v13328_v13, %v6932_v11  ;;  %v7285_v19 = vpop.f32.mrb[80].mxu1  ;;  %v6934_v53 = vpop.f32.mrb[177].mxu0 }
 0x425   : > { %v9210_v22 = vpop.f32.mrb[81].mxu1  ;;  %v6935_v57 = vpop.f32.mrb[178].mxu0  ;;  %v6565_v40 = vld [vmem:[#allocation3 + $0x1e0] sm:$0xff] }
 0x426   : > { %v7278_v14 = vadd.f32 %v7277_v56, %v6933_v35  ;;  %v6936_v2 = vadd.f32 %v13328_v13, %v6935_v57  ;;  %v7288_v55 = vpop.f32.mrb[82].mxu1  ;;  %v5162_v5 = vpop.permute.xlu0 %5161  ;;  %v6603_v35 = vld [vmem:[#allocation3 + $0x310] sm:$0xff] }
 0x427   : > { %v6563_v30 = vld [vmem:[#allocation3 + $0x1d0] sm:$0xff]  ;;  %v9211_v59 = vpop.f32.mrb[83].mxu1  ;;  %5258 = vst.msk [vmem:[#allocation3 + $0x1e8] sm:$0xff] %vm2984_vm12, %v5162_v5  ;;  %v6937_v58 = vpop.f32.mrb[179].mxu0 }
 0x428   : > { %v7737_v51 = vld [vmem:[#allocation4] ss:$2 sm:$0xff]  ;;  %v7815_v28 = vld [vmem:[#allocation4 + $0x1] ss:$2 sm:$0xff]  ;;  %7074 = vmatprep.mubr.bf16.mxu0 %v6563_v30  ;;  %v7582_v0 = vmax.f32 %v7278_v14, 0.0  ;;  %v7281_v45 = vadd.f32 %v7280_v47, %v6936_v2 }
 0x429   : > { %v7892_v50 = vmax.f32 %v7737_v51, %v7815_v28  ;;  %7075 = vmatmul.mubr.bf16.gmra.mrb[248].mxu0 %v6562_v36  ;;  %9317 = vmatmul.mubr.msk.bf16.gmra.mrb[32].mxu1 %vm1719_vm5, %v6594_v33  ;;  %v6606_v30 = vld [vmem:[#allocation3 + $0x328] sm:$0xff] }
 0x42a   : > { %7661 = vst.msk [vmem:[#allocation4 + $0x10] sm:$0xff] %vm7658_vm15, %v7582_v0  ;;  %v7583_v6 = vmax.f32 %v7281_v45, 0.0  ;;  %v5955_v27 = vpop.permute.xlu0 %5954  ;;  %9320 = vmatprep.mubr.msk.bf16.mxu1 %vm10072_vm2, %v13790_v54 }
 0x42b   : > { %7931 = vst.msk [vmem:[#allocation5] sm:$0xff] %vm7658_vm15, %v7892_v50 }
 0x42c   : > { %6051 = vst.msk [vmem:[#allocation3 + $0x1e8] sm:$0xff] %vm3497_vm13, %v5955_v27  ;;  %v7293_v32 = vpop.f32.mrb[84].mxu1 }
 0x42d   : > { %7662 = vst.msk [vmem:[#allocation4 + $0x18] sm:$0xff] %vm7658_vm15, %v7583_v6  ;;  %v9214_v42 = vpop.f32.mrb[85].mxu1 }
 0x42e   : > { %v7296_v44 = vpop.f32.mrb[86].mxu1 }
 0x42f   : > { %v9215_v61 = vpop.f32.mrb[87].mxu1  ;;  %v6940_v9 = vpop.f32.mrb[180].mxu0 }
 0x430   : > { %v6941_v23 = vadd.f32 %v13328_v13, %v6940_v9  ;;  %v6942_v21 = vpop.f32.mrb[181].mxu0 }
 0x431   : > { %9321 = vmatmul.mubr.msk.bf16.gmra.mrb[36].mxu1 %vm1719_vm5, %v6597_v26  ;;  %v6943_v16 = vpop.f32.mrb[182].mxu0  ;;  %v6609_v26 = vld [vmem:[#allocation3 + $0x340] sm:$0xff] }
 0x432   : > { %v7286_v38 = vadd.f32 %v7285_v19, %v6941_v23  ;;  %v6944_v31 = vadd.f32 %v13328_v13, %v6943_v16  ;;  %v6945_v37 = vpop.f32.mrb[183].mxu0  ;;  %9324 = vmatprep.mubr.msk.bf16.mxu1 %vm10072_vm2, %v13790_v54  ;;  %v7970_v36 = vld [vmem:[#allocation5] sm:$0xff] }
 0x433   : > { %v6566_v46 = vld [vmem:[#allocation3 + $0x1e8] sm:$0xff] }
 0x434   : > { %v7739_v7 = vld [vmem:[#allocation4 + $0x10] ss:$2 sm:$0xff]  ;;  %v7817_v52 = vld [vmem:[#allocation4 + $0x11] ss:$2 sm:$0xff]  ;;  %7082 = vmatprep.mubr.bf16.mxu0 %v6566_v46  ;;  %v7584_v4 = vmax.f32 %v7286_v38, 0.0  ;;  %v7289_v24 = vadd.f32 %v7288_v55, %v6944_v31  ;;  %v7301_v3 = vpop.f32.mrb[88].mxu1 }
 0x435   : > { %v7893_v12 = vmax.f32 %v7739_v7, %v7817_v52  ;;  %7083 = vmatmul.mubr.bf16.gmra.mrb[252].mxu0 %v6565_v40  ;;  %v9218_v49 = vpop.f32.mrb[89].mxu1 }
 0x436   : > { %7663 = vst.msk [vmem:[#allocation4 + $0x20] sm:$0xff] %vm7658_vm15, %v7584_v4  ;;  %v7585_v60 = vmax.f32 %v7289_v24, 0.0  ;;  %v7304_v8 = vpop.f32.mrb[90].mxu1 }
 0x437   : > { %7932 = vst.msk [vmem:[#allocation5 + $0x8] sm:$0xff] %vm7658_vm15, %v7893_v12  ;;  %v9219_v63 = vpop.f32.mrb[91].mxu1 }
 0x438   : > { %7664 = vst.msk [vmem:[#allocation4 + $0x28] sm:$0xff] %vm7658_vm15, %v7585_v60 }
 0x439   : > { %9325 = vmatmul.mubr.msk.bf16.gmra.mrb[40].mxu1 %vm1719_vm5, %v6600_v39 }
 0x43a   : > { %9328 = vmatprep.mubr.msk.bf16.mxu1 %vm10072_vm2, %v13790_v54 }
 0x43b   : > { %v6948_v43 = vpop.f32.mrb[184].mxu0 }
 0x43c   : > { %v6949_v25 = vadd.f32 %v13328_v13, %v6948_v43  ;;  %v13368_v62 = vpop.f32.mrb[92].mxu1  ;;  %v6950_v56 = vpop.f32.mrb[185].mxu0 }
 0x43d   : > { %v9222_v20 = vpop.f32.mrb[93].mxu1  ;;  %v6951_v41 = vpop.f32.mrb[186].mxu0 }
 0x43e   : > { %v7294_v18 = vadd.f32 %v7293_v32, %v6949_v25  ;;  %v6952_v15 = vadd.f32 %v13328_v13, %v6951_v41  ;;  %v13371_v17 = vpop.f32.mrb[94].mxu1  ;;  %v6953_v47 = vpop.f32.mrb[187].mxu0  ;;  %v7971_v46 = vld [vmem:[#allocation5 + $0x8] sm:$0xf]  ;;  %v6612_v20 = vld [vmem:[#allocation3 + $0x358] sm:$0xff] }
 0x43f   : > { %v7741_v48 = vld [vmem:[#allocation4 + $0x20] ss:$2 sm:$0xff]  ;;  %v7819_v1 = vld [vmem:[#allocation4 + $0x21] ss:$2 sm:$0xff]  ;;  %v9223_v29 = vpop.f32.mrb[95].mxu1 }
 0x440   : > { %v7894_v34 = vmax.f32 %v7741_v48, %v7819_v1  ;;  %v7586_v10 = vmax.f32 %v7294_v18, 0.0  ;;  %v7297_v11 = vadd.f32 %v7296_v44, %v6952_v15  ;;  %v6615_v29 = vld [vmem:[#allocation3 + $0x370] sm:$0xff] }
 0x441   : > { %9329 = vmatmul.mubr.msk.bf16.gmra.mrb[44].mxu1 %vm1719_vm5, %v6603_v35 }
 0x442   : > { %7933 = vst.msk [vmem:[#allocation5 + $0x10] sm:$0xff] %vm7658_vm15, %v7894_v34  ;;  %7665 = vst.msk [vmem:[#allocation4 + $0x30] sm:$0xff] %vm7658_vm15, %v7586_v10  ;;  %v7587_v19 = vmax.f32 %v7297_v11, 0.0  ;;  %9332 = vmatprep.mubr.msk.bf16.mxu1 %vm10072_vm2, %v13790_v54 }
 0x444   : > { %7666 = vst.msk [vmem:[#allocation4 + $0x38] sm:$0xff] %vm7658_vm15, %v7587_v19  ;;  %v13379_v53 = vpop.f32.mrb[96].mxu1 }
 0x445   : > { %v9226_v22 = vpop.f32.mrb[97].mxu1 }
 0x446   : > { %v13381_v57 = vpop.f32.mrb[98].mxu1 }
 0x447   : > { %v9227_v14 = vpop.f32.mrb[99].mxu1  ;;  %v6956_v2 = vpop.f32.mrb[188].mxu0 }
 0x448   : > { %v6957_v55 = vadd.f32 %v13328_v13, %v6956_v2  ;;  %v6958_v5 = vpop.f32.mrb[189].mxu0 }
 0x449   : > { %v7972_v51 = vld [vmem:[#allocation5 + $0xd] sm:$0xff]  ;;  %9333 = vmatmul.mubr.msk.bf16.gmra.mrb[48].mxu1 %vm1719_vm5, %v6606_v30  ;;  %v6959_v28 = vpop.f32.mrb[190].mxu0 }
 0x44a   : > { %v7974_v59 = vmax.f32 %v7970_v36, %v7972_v51  ;;  %v7302_v58 = vadd.f32 %v7301_v3, %v6957_v55  ;;  %v6960_v50 = vadd.f32 %v13328_v13, %v6959_v28  ;;  %v6961_v0 = vpop.f32.mrb[191].mxu0  ;;  %9336 = vmatprep.mubr.msk.bf16.mxu1 %vm10072_vm2, %v13790_v54  ;;  %v6618_v28 = vld [vmem:[#allocation3 + $0x388] sm:$0xff] }
 0x44b   : > { %v7743_v45 = vld [vmem:[#allocation4 + $0x30] ss:$2 sm:$0xff]  ;;  %v7821_v33 = vld [vmem:[#allocation4 + $0x31] ss:$2 sm:$0xff] }
 0x44c   : > { %v8912_v6 = vpack.c.bf16 %v7974_v59, %v7974_v59  ;;  %v7895_v27 = vmax.f32 %v7743_v45, %v7821_v33  ;;  %v7588_v32 = vmax.f32 %v7302_v58, 0.0  ;;  %v7305_v42 = vadd.f32 %v7304_v8, %v6960_v50  ;;  %v13394_v44 = vpop.f32.mrb[100].mxu1 }
 0x44d   : > { %v9230_v61 = vpop.f32.mrb[101].mxu1 }
 0x44e   : > { %7988 = vst.msk [vmem:[%s13392_s25] sm:$0xf] %vm7987_vm0, %v8912_v6  ;;  %v7589_v9 = vmax.f32 %v7305_v42, 0.0  ;;  %v13400_v23 = vpop.f32.mrb[102].mxu1 }
 0x44f   : > { %7934 = vst.msk [vmem:[#allocation5 + $0x18] sm:$0xff] %vm7658_vm15, %v7895_v27  ;;  %7667 = vst.msk [vmem:[#allocation4 + $0x40] sm:$0xff] %vm7658_vm15, %v7588_v32  ;;  %v9231_v21 = vpop.f32.mrb[103].mxu1 }
 0x450   : > { %7668 = vst.msk [vmem:[#allocation4 + $0x48] sm:$0xff] %vm7658_vm15, %v7589_v9 }
 0x451   : > { %9337 = vmatmul.mubr.msk.bf16.gmra.mrb[52].mxu1 %vm1719_vm5, %v6609_v26 }
 0x452   : > { %9340 = vmatprep.mubr.msk.bf16.mxu1 %vm10072_vm2, %v13790_v54 }
 0x453   : > { %v6964_v16 = vpop.f32.mrb[192].mxu0 }
 0x454   : > { %v6965_v38 = vadd.f32 %v13328_v13, %v6964_v16  ;;  %v13407_v31 = vpop.f32.mrb[104].mxu1  ;;  %v6966_v37 = vpop.f32.mrb[193].mxu0 }
 0x455   : > { %v9234_v52 = vpop.f32.mrb[105].mxu1  ;;  %v6967_v40 = vpop.f32.mrb[194].mxu0 }
 0x456   : > { %v7973_v7 = vld [vmem:[#allocation5 + $0x15] sm:$0xf]  ;;  %v7310_v4 = vadd.f32 %v13368_v62, %v6965_v38  ;;  %v6968_v24 = vadd.f32 %v13328_v13, %v6967_v40  ;;  %v13411_v3 = vpop.f32.mrb[106].mxu1  ;;  %v6969_v49 = vpop.f32.mrb[195].mxu0 }
 0x457   : > { %v7975_v12 = vmax.f32 %v7971_v46, %v7973_v7  ;;  %v7745_v60 = vld [vmem:[#allocation4 + $0x40] ss:$2 sm:$0xff]  ;;  %v7823_v8 = vld [vmem:[#allocation4 + $0x41] ss:$2 sm:$0xff]  ;;  %v9235_v63 = vpop.f32.mrb[107].mxu1  ;;  %v6621_v7 = vld [vmem:[#allocation3 + $0x3a0] sm:$0xff] }
 0x458   : > { %v7896_v43 = vmax.f32 %v7745_v60, %v7823_v8  ;;  %v7590_v25 = vmax.f32 %v7310_v4, 0.0  ;;  %v7313_v56 = vadd.f32 %v13371_v17, %v6968_v24 }
 0x459   : > { %v8913_v39 = vpack.c.bf16 %v7975_v12, %v7975_v12  ;;  %9341 = vmatmul.mubr.msk.bf16.gmra.mrb[56].mxu1 %vm1719_vm5, %v6612_v20 }
 0x45a   : > { %7935 = vst.msk [vmem:[#allocation5 + $0x20] sm:$0xff] %vm7658_vm15, %v7896_v43  ;;  %7669 = vst.msk [vmem:[#allocation4 + $0x50] sm:$0xff] %vm7658_vm15, %v7590_v25  ;;  %v7591_v62 = vmax.f32 %v7313_v56, 0.0  ;;  %9344 = vmatprep.mubr.msk.bf16.mxu1 %vm10072_vm2, %v13790_v54 }
 0x45b   : > { %7990 = vst.msk [vmem:[%s13392_s25 + $0x4] sm:$0x3] %vm7989_vm1, %v8913_v39 }
 0x45c   : > { %7670 = vst.msk [vmem:[#allocation4 + $0x58] sm:$0xff] %vm7658_vm15, %v7591_v62  ;;  %v13422_v41 = vpop.f32.mrb[108].mxu1 }
 0x45d   : > { %v9238_v18 = vpop.f32.mrb[109].mxu1 }
 0x45e   : > { %v13424_v15 = vpop.f32.mrb[110].mxu1 }
 0x45f   : > { %v9239_v17 = vpop.f32.mrb[111].mxu1  ;;  %v6972_v47 = vpop.f32.mrb[196].mxu0 }
 0x460   : > { %v6973_v48 = vadd.f32 %v13328_v13, %v6972_v47  ;;  %v6974_v1 = vpop.f32.mrb[197].mxu0 }
 0x461   : > { %9345 = vmatmul.mubr.msk.bf16.gmra.mrb[60].mxu1 %vm1719_vm5, %v6615_v29  ;;  %v6975_v34 = vpop.f32.mrb[198].mxu0  ;;  %v7991_v0 = vld [vmem:[#allocation5 + $0x1a] sm:$0xff]  ;;  %v7992_v8 = vld [vmem:[#allocation5 + $0x22] sm:$0xf] }
 0x462   : > { %v7318_v10 = vadd.f32 %v13379_v53, %v6973_v48  ;;  %v6976_v11 = vadd.f32 %v13328_v13, %v6975_v34  ;;  %v6977_v35 = vpop.f32.mrb[199].mxu0  ;;  %9348 = vmatprep.mubr.msk.bf16.mxu1 %vm10072_vm2, %v13790_v54 }
 0x463   : > { %v7747_v19 = vld [vmem:[#allocation4 + $0x50] ss:$2 sm:$0xff]  ;;  %v7825_v22 = vld [vmem:[#allocation4 + $0x51] ss:$2 sm:$0xff] }
 0x464   : > { %v7897_v14 = vmax.f32 %v7747_v19, %v7825_v22  ;;  %v7592_v2 = vmax.f32 %v7318_v10, 0.0  ;;  %v7321_v55 = vadd.f32 %v13381_v57, %v6976_v11  ;;  %v13433_v5 = vpop.f32.mrb[112].mxu1 }
 0x465   : > { %v9242_v30 = vpop.f32.mrb[113].mxu1 }
 0x466   : > { %7936 = vst.msk [vmem:[#allocation5 + $0x28] sm:$0xff] %vm7658_vm15, %v7897_v14  ;;  %7671 = vst.msk [vmem:[#allocation4 + $0x60] sm:$0xff] %vm7658_vm15, %v7592_v2  ;;  %v7593_v53 = vmax.f32 %v7321_v55, 0.0  ;;  %v13437_v36 = vpop.f32.mrb[114].mxu1 }
 0x467   : > { %v9243_v51 = vpop.f32.mrb[115].mxu1 }
 0x468   : > { %7672 = vst.msk [vmem:[#allocation4 + $0x68] sm:$0xff] %vm7658_vm15, %v7593_v53 }
 0x469   : > { %9349 = vmatmul.mubr.msk.bf16.gmra.mrb[64].mxu1 %vm1719_vm5, %v6618_v28 }
 0x46a   : > { %9352 = vmatprep.mubr.msk.bf16.mxu1 %vm10072_vm2, %v13790_v54  ;;  %vm8012_vm2 = vcmask 519170  }
 0x46b   : > { %v6980_v57 = vpop.f32.mrb[200].mxu0 }
 0x46c   : > { %v6981_v59 = vadd.f32 %v13328_v13, %v6980_v57  ;;  %v13444_v58 = vpop.f32.mrb[116].mxu1  ;;  %v6982_v50 = vpop.f32.mrb[201].mxu0 }
 0x46d   : > { %v7993_v45 = vld [vmem:[#allocation5 + $0x27] sm:$0xff]  ;;  %v9246_v33 = vpop.f32.mrb[117].mxu1  ;;  %v6983_v6 = vpop.f32.mrb[202].mxu0 }
 0x46e   : > { %v7995_v27 = vmax.f32 %v7991_v0, %v7993_v45  ;;  %v7326_v32 = vadd.f32 %v13394_v44, %v6981_v59  ;;  %v6984_v42 = vadd.f32 %v13328_v13, %v6983_v6  ;;  %v13448_v61 = vpop.f32.mrb[118].mxu1  ;;  %v6985_v9 = vpop.f32.mrb[203].mxu0 }
 0x46f   : > { %v7749_v54 = vld [vmem:[#allocation4 + $0x60] ss:$2 sm:$0xff]  ;;  %v7827_v21 = vld [vmem:[#allocation4 + $0x61] ss:$2 sm:$0xff]  ;;  %v9247_v26 = vpop.f32.mrb[119].mxu1 }
 0x470   : > { %v8915_v16 = vpack.c.bf16 %v7995_v27, %v7995_v27  ;;  %v7898_v38 = vmax.f32 %v7749_v54, %v7827_v21  ;;  %v7594_v37 = vmax.f32 %v7326_v32, 0.0  ;;  %v7329_v46 = vadd.f32 %v13400_v23, %v6984_v42 }
 0x471   : > { %9353 = vmatmul.mubr.msk.bf16.gmra.mrb[68].mxu1 %vm1719_vm5, %v6621_v7  ;;  %vm13467_vm5 = vmor %vm8003_vm3, %vm8004_vm4 }
 0x472   : > { %v8006_v52 = vrot.slane %v8915_v16, 6  ;;  %7937 = vst.msk [vmem:[#allocation5 + $0x30] sm:$0xff] %vm7658_vm15, %v7898_v38  ;;  %7673 = vst.msk [vmem:[#allocation4 + $0x70] sm:$0xff] %vm7658_vm15, %v7594_v37  ;;  %v7595_v44 = vmax.f32 %v7329_v46, 0.0 }
 0x474   : > { %8013 = vst.msk [vmem:[%s13392_s25 + $0x4] sm:$0xc] %vm8012_vm2, %v8006_v52  ;;  %v13457_v40 = vpop.f32.mrb[120].mxu1  ;;  %v8007_v11 = vrot.slane %v8006_v52, 4 }
 0x475   : > { %7674 = vst.msk [vmem:[#allocation4 + $0x78] sm:$0xff] %vm7658_vm15, %v7595_v44  ;;  %v9250_v12 = vpop.f32.mrb[121].mxu1 }
 0x476   : > { %v13459_v4 = vpop.f32.mrb[122].mxu1 }
 0x477   : > { %v9251_v23 = vpop.f32.mrb[123].mxu1  ;;  %v6988_v24 = vpop.f32.mrb[204].mxu0 }
 0x478   : > { %v6989_v49 = vadd.f32 %v13328_v13, %v6988_v24  ;;  %v6990_v60 = vpop.f32.mrb[205].mxu0 }
 0x479   : > { %v7994_v63 = vld [vmem:[#allocation5 + $0x2f] sm:$0xf]  ;;  %v6991_v39 = vpop.f32.mrb[206].mxu0 }
 0x47a   : > { %v7996_v43 = vmax.f32 %v7992_v8, %v7994_v63  ;;  %v7334_v25 = vadd.f32 %v13407_v31, %v6989_v49  ;;  %v6992_v56 = vadd.f32 %v13328_v13, %v6991_v39  ;;  %v6993_v20 = vpop.f32.mrb[207].mxu0 }
 0x47c   : > { %v7751_v62 = vld [vmem:[#allocation4 + $0x70] ss:$2 sm:$0xff]  ;;  %v7829_v18 = vld [vmem:[#allocation4 + $0x71] ss:$2 sm:$0xff]  ;;  %v8916_v17 = vpack.c.bf16 %v7996_v43, %v7996_v43  ;;  %v7596_v48 = vmax.f32 %v7334_v25, 0.0  ;;  %v7337_v1 = vadd.f32 %v13411_v3, %v6992_v56  ;;  %v13465_v29 = vpop.f32.mrb[124].mxu1 }
 0x47d   : > { %v7899_v47 = vmax.f32 %v7751_v62, %v7829_v18  ;;  %v9254_v10 = vpop.f32.mrb[125].mxu1 }
 0x47e   : > { %v8008_v31 = vrot.slane %v8916_v17, 6  ;;  %7675 = vst.msk [vmem:[#allocation4 + $0x80] sm:$0xff] %vm7658_vm15, %v7596_v48  ;;  %v7597_v35 = vmax.f32 %v7337_v1, 0.0  ;;  %v13473_v19 = vpop.f32.mrb[126].mxu1 }
 0x47f   : > { %7938 = vst.msk [vmem:[#allocation5 + $0x38] sm:$0xff] %vm7658_vm15, %v7899_v47  ;;  %v9255_v22 = vpop.f32.mrb[127].mxu1 }
 0x480   : > { %v8009_v3 = vsel %vm13467_vm5, %v8007_v11, %v8008_v31  ;;  %7676 = vst.msk [vmem:[#allocation4 + $0x88] sm:$0xff] %vm7658_vm15, %v7597_v35 }
 0x481   : > { %8014 = vst.msk [vmem:[%s13392_s25 + $0x8] sm:$0xf] %vm7987_vm0, %v8009_v3 }
 0x483   : > { %v6996_v14 = vpop.f32.mrb[208].mxu0 }
 0x484   : > { %v6997_v2 = vadd.f32 %v13328_v13, %v6996_v14  ;;  %v13481_v55 = vpop.f32.mrb[128].mxu1  ;;  %v6998_v30 = vpop.f32.mrb[209].mxu0 }
 0x485   : > { %v9258_v53 = vpop.f32.mrb[129].mxu1  ;;  %v6999_v51 = vpop.f32.mrb[210].mxu0 }
 0x486   : > { %v7342_v28 = vadd.f32 %v13422_v41, %v6997_v2  ;;  %v7000_v57 = vadd.f32 %v13328_v13, %v6999_v51  ;;  %v13485_v59 = vpop.f32.mrb[130].mxu1  ;;  %v7001_v50 = vpop.f32.mrb[211].mxu0  ;;  %v8016_v43 = vld [vmem:[#allocation5 + $0x3c] sm:$0xf]  ;;  %v8015_v20 = vld [vmem:[#allocation5 + $0x34] sm:$0xff] }
 0x487   : > { %v7753_v0 = vld [vmem:[#allocation4 + $0x80] ss:$2 sm:$0xff]  ;;  %v7831_v45 = vld [vmem:[#allocation4 + $0x81] ss:$2 sm:$0xff]  ;;  %v9259_v33 = vpop.f32.mrb[131].mxu1 }
 0x488   : > { %v7900_v6 = vmax.f32 %v7753_v0, %v7831_v45  ;;  %v7598_v27 = vmax.f32 %v7342_v28, 0.0  ;;  %v7345_v32 = vadd.f32 %v13424_v15, %v7000_v57 }
 0x48a   : > { %7939 = vst.msk [vmem:[#allocation5 + $0x40] sm:$0xff] %vm7658_vm15, %v7900_v6  ;;  %7677 = vst.msk [vmem:[#allocation4 + $0x90] sm:$0xff] %vm7658_vm15, %v7598_v27  ;;  %v7599_v42 = vmax.f32 %v7345_v32, 0.0 }
 0x48c   : > { %7678 = vst.msk [vmem:[#allocation4 + $0x98] sm:$0xff] %vm7658_vm15, %v7599_v42  ;;  %v13491_v41 = vpop.f32.mrb[132].mxu1 }
 0x48d   : > { %v9262_v9 = vpop.f32.mrb[133].mxu1 }
 0x48e   : > { %v13493_v54 = vpop.f32.mrb[134].mxu1 }
 0x48f   : > { %v9263_v21 = vpop.f32.mrb[135].mxu1  ;;  %v7004_v26 = vpop.f32.mrb[212].mxu0 }
 0x490   : > { %v7005_v16 = vadd.f32 %v13328_v13, %v7004_v26  ;;  %v7006_v38 = vpop.f32.mrb[213].mxu0 }
 0x491   : > { %v7007_v37 = vpop.f32.mrb[214].mxu0 }
 0x492   : > { %v7350_v15 = vadd.f32 %v13433_v5, %v7005_v16  ;;  %v7008_v46 = vadd.f32 %v13328_v13, %v7007_v37  ;;  %v7009_v7 = vpop.f32.mrb[215].mxu0 }
 0x493   : > { %v7755_v52 = vld [vmem:[#allocation4 + $0x90] ss:$2 sm:$0xff]  ;;  %v7833_v44 = vld [vmem:[#allocation4 + $0x91] ss:$2 sm:$0xff] }
 0x494   : > { %v7901_v12 = vmax.f32 %v7755_v52, %v7833_v44  ;;  %v7600_v23 = vmax.f32 %v7350_v15, 0.0  ;;  %v7353_v24 = vadd.f32 %v13437_v36, %v7008_v46  ;;  %v13499_v49 = vpop.f32.mrb[136].mxu1 }
 0x495   : > { %v9266_v60 = vpop.f32.mrb[137].mxu1 }
 0x496   : > { %7940 = vst.msk [vmem:[#allocation5 + $0x48] sm:$0xff] %vm7658_vm15, %v7901_v12  ;;  %7679 = vst.msk [vmem:[#allocation4 + $0xa0] sm:$0xff] %vm7658_vm15, %v7600_v23  ;;  %v7601_v8 = vmax.f32 %v7353_v24, 0.0  ;;  %v13503_v63 = vpop.f32.mrb[138].mxu1 }
 0x497   : > { %v9267_v5 = vpop.f32.mrb[139].mxu1 }
 0x498   : > { %7680 = vst.msk [vmem:[#allocation4 + $0xa8] sm:$0xff] %vm7658_vm15, %v7601_v8 }
 0x49b   : > { %v7012_v39 = vpop.f32.mrb[216].mxu0 }
 0x49c   : > { %v7013_v25 = vadd.f32 %v13328_v13, %v7012_v39  ;;  %v13507_v56 = vpop.f32.mrb[140].mxu1  ;;  %v7014_v36 = vpop.f32.mrb[217].mxu0 }
 0x49d   : > { %v8017_v62 = vld [vmem:[#allocation5 + $0x41] sm:$0xff]  ;;  %v8018_v18 = vld [vmem:[#allocation5 + $0x49] sm:$0xf]  ;;  %v9270_v17 = vpop.f32.mrb[141].mxu1  ;;  %v7015_v47 = vpop.f32.mrb[218].mxu0 }
 0x49e   : > { %v8019_v48 = vmax.f32 %v8015_v20, %v8017_v62  ;;  %v8020_v1 = vmax.f32 %v8016_v43, %v8018_v18  ;;  %v7358_v10 = vadd.f32 %v13444_v58, %v7013_v25  ;;  %v7016_v11 = vadd.f32 %v13328_v13, %v7015_v47  ;;  %v13511_v31 = vpop.f32.mrb[142].mxu1  ;;  %v7017_v35 = vpop.f32.mrb[219].mxu0 }
 0x49f   : > { %v7757_v22 = vld [vmem:[#allocation4 + $0xa0] ss:$2 sm:$0xff]  ;;  %v7835_v3 = vld [vmem:[#allocation4 + $0xa1] ss:$2 sm:$0xff]  ;;  %v9271_v14 = vpop.f32.mrb[143].mxu1 }
 0x4a0   : > { %v8917_v2 = vpack.c.bf16 %v8019_v48, %v8019_v48  ;;  %v8918_v30 = vpack.c.bf16 %v8020_v1, %v8020_v1  ;;  %v7902_v53 = vmax.f32 %v7757_v22, %v7835_v3  ;;  %v7602_v51 = vmax.f32 %v7358_v10, 0.0 }
 0x4a1   : > { %v7361_v28 = vadd.f32 %v13448_v61, %v7016_v11 }
 0x4a2   : > { %8029 = vst.msk [vmem:[%s13392_s25 + $0xc] sm:$0xf] %vm7987_vm0, %v8917_v2 }
 0x4a3   : > { %8030 = vst.msk [vmem:[%s13392_s25 + $0x10] sm:$0x3] %vm7989_vm1, %v8918_v30  ;;  %v7603_v58 = vmax.f32 %v7361_v28, 0.0 }
 0x4a4   : > { %7941 = vst.msk [vmem:[#allocation5 + $0x50] sm:$0xff] %vm7658_vm15, %v7902_v53  ;;  %7681 = vst.msk [vmem:[#allocation4 + $0xb0] sm:$0xff] %vm7658_vm15, %v7602_v51  ;;  %v13520_v57 = vpop.f32.mrb[144].mxu1 }
 0x4a5   : > { %7682 = vst.msk [vmem:[#allocation4 + $0xb8] sm:$0xff] %vm7658_vm15, %v7603_v58  ;;  %v9274_v50 = vpop.f32.mrb[145].mxu1 }
 0x4a6   : > { %v13523_v0 = vpop.f32.mrb[146].mxu1 }
 0x4a7   : > { %v9275_v45 = vpop.f32.mrb[147].mxu1  ;;  %v7020_v33 = vpop.f32.mrb[220].mxu0 }
 0x4a8   : > { %v7021_v61 = vadd.f32 %v13328_v13, %v7020_v33  ;;  %v7022_v6 = vpop.f32.mrb[221].mxu0 }
 0x4a9   : > { %v7023_v27 = vpop.f32.mrb[222].mxu0 }
 0x4aa   : > { %v7366_v32 = vadd.f32 %v13457_v40, %v7021_v61  ;;  %v7024_v42 = vadd.f32 %v13328_v13, %v7023_v27  ;;  %v7025_v9 = vpop.f32.mrb[223].mxu0 }
 0x4ab   : > { %v8031_v30 = vld [vmem:[#allocation5 + $0x4e] sm:$0xff] }
 0x4ac   : > { %v7759_v21 = vld [vmem:[#allocation4 + $0xb0] ss:$2 sm:$0xff]  ;;  %v7837_v26 = vld [vmem:[#allocation4 + $0xb1] ss:$2 sm:$0xff]  ;;  %v7604_v16 = vmax.f32 %v7366_v32, 0.0  ;;  %v7369_v38 = vadd.f32 %v13459_v4, %v7024_v42  ;;  %v13529_v37 = vpop.f32.mrb[148].mxu1 }
 0x4ad   : > { %v7903_v15 = vmax.f32 %v7759_v21, %v7837_v26  ;;  %v9278_v46 = vpop.f32.mrb[149].mxu1 }
 0x4ae   : > { %7683 = vst.msk [vmem:[#allocation4 + $0xc0] sm:$0xff] %vm7658_vm15, %v7604_v16  ;;  %v7605_v7 = vmax.f32 %v7369_v38, 0.0  ;;  %v13532_v52 = vpop.f32.mrb[150].mxu1 }
 0x4af   : > { %7942 = vst.msk [vmem:[#allocation5 + $0x58] sm:$0xff] %vm7658_vm15, %v7903_v15  ;;  %v9279_v40 = vpop.f32.mrb[151].mxu1 }
 0x4b0   : > { %7684 = vst.msk [vmem:[#allocation4 + $0xc8] sm:$0xff] %vm7658_vm15, %v7605_v7 }
 0x4b3   : > { %v7028_v44 = vpop.f32.mrb[224].mxu0 }
 0x4b4   : > { %v7029_v12 = vadd.f32 %v13328_v13, %v7028_v44  ;;  %v13537_v23 = vpop.f32.mrb[152].mxu1  ;;  %v7030_v4 = vpop.f32.mrb[225].mxu0 }
 0x4b5   : > { %v9282_v24 = vpop.f32.mrb[153].mxu1  ;;  %v7031_v60 = vpop.f32.mrb[226].mxu0 }
 0x4b6   : > { %v7374_v8 = vadd.f32 %v13465_v29, %v7029_v12  ;;  %v7032_v5 = vadd.f32 %v13328_v13, %v7031_v60  ;;  %v13541_v39 = vpop.f32.mrb[154].mxu1  ;;  %v7033_v43 = vpop.f32.mrb[227].mxu0  ;;  %v8032_v14 = vld [vmem:[#allocation5 + $0x56] sm:$0xf] }
 0x4b7   : > { %v7761_v25 = vld [vmem:[#allocation4 + $0xc0] ss:$2 sm:$0xff]  ;;  %v7839_v36 = vld [vmem:[#allocation4 + $0xc1] ss:$2 sm:$0xff]  ;;  %v9283_v20 = vpop.f32.mrb[155].mxu1 }
 0x4b8   : > { %v7904_v62 = vmax.f32 %v7761_v25, %v7839_v36  ;;  %v7606_v18 = vmax.f32 %v7374_v8, 0.0  ;;  %v7377_v17 = vadd.f32 %v13473_v19, %v7032_v5 }
 0x4ba   : > { %7943 = vst.msk [vmem:[#allocation5 + $0x60] sm:$0xff] %vm7658_vm15, %v7904_v62  ;;  %7685 = vst.msk [vmem:[#allocation4 + $0xd0] sm:$0xff] %vm7658_vm15, %v7606_v18  ;;  %v7607_v47 = vmax.f32 %v7377_v17, 0.0 }
 0x4bc   : > { %7686 = vst.msk [vmem:[#allocation4 + $0xd8] sm:$0xff] %vm7658_vm15, %v7607_v47  ;;  %v7437_v29 = vpop.f32.mrb[0].mxu1 }
 0x4bd   : > { %v9472_v48 = vadd.f32 %v13328_v13, %v7437_v29  ;;  %v9286_v1 = vpop.f32.mrb[1].mxu1 }
 0x4be   : > { %v7440_v10 = vpop.f32.mrb[2].mxu1 }
 0x4bf   : > { %v7622_v11 = vmax.f32 %v9472_v48, 0.0  ;;  %v9473_v35 = vadd.f32 %v13328_v13, %v7440_v10  ;;  %v9287_v22 = vpop.f32.mrb[3].mxu1  ;;  %v7036_v3 = vpop.f32.mrb[228].mxu0 }
 0x4c0   : > { %v7037_v19 = vadd.f32 %v13328_v13, %v7036_v3  ;;  %v7038_v2 = vpop.f32.mrb[229].mxu0 }
 0x4c1   : > { %v8033_v53 = vld [vmem:[#allocation5 + $0x5b] sm:$0xff]  ;;  %v8034_v51 = vld [vmem:[#allocation5 + $0x63] sm:$0xf]  ;;  %7701 = vst.msk [vmem:[#allocation4 + $0x150] sm:$0xff] %vm7658_vm15, %v7622_v11  ;;  %v7623_v28 = vmax.f32 %v9473_v35, 0.0  ;;  %v7039_v58 = vpop.f32.mrb[230].mxu0 }
 0x4c2   : > { %v8035_v50 = vmax.f32 %v8031_v30, %v8033_v53  ;;  %v8036_v45 = vmax.f32 %v8032_v14, %v8034_v51  ;;  %v7382_v33 = vadd.f32 %v13481_v55, %v7037_v19  ;;  %v7040_v61 = vadd.f32 %v13328_v13, %v7039_v58  ;;  %v7041_v6 = vpop.f32.mrb[231].mxu0 }
 0x4c3   : > { %v7763_v27 = vld [vmem:[#allocation4 + $0xd0] ss:$2 sm:$0xff]  ;;  %v7841_v32 = vld [vmem:[#allocation4 + $0xd1] ss:$2 sm:$0xff]  ;;  %7702 = vst.msk [vmem:[#allocation4 + $0x158] sm:$0xff] %vm7658_vm15, %v7623_v28 }
 0x4c4   : > { %v8919_v42 = vpack.c.bf16 %v8035_v50, %v8035_v50  ;;  %v8920_v9 = vpack.c.bf16 %v8036_v45, %v8036_v45  ;;  %v7905_v21 = vmax.f32 %v7763_v27, %v7841_v32  ;;  %v7608_v26 = vmax.f32 %v7382_v33, 0.0  ;;  %v7445_v16 = vpop.f32.mrb[4].mxu1 }
 0x4c5   : > { %v7385_v38 = vadd.f32 %v13485_v59, %v7040_v61  ;;  %v9474_v15 = vadd.f32 %v13328_v13, %v7445_v16  ;;  %v9290_v46 = vpop.f32.mrb[5].mxu1 }
 0x4c6   : > { %v8043_v7 = vrot.slane %v8919_v42, 6  ;;  %7944 = vst.msk [vmem:[#allocation5 + $0x68] sm:$0xff] %vm7658_vm15, %v7905_v21  ;;  %7687 = vst.msk [vmem:[#allocation4 + $0xe0] sm:$0xff] %vm7658_vm15, %v7608_v26  ;;  %v7448_v55 = vpop.f32.mrb[6].mxu1  ;;  %v8045_v60 = vrot.slane %v8920_v9, 6 }
 0x4c7   : > { %v7609_v40 = vmax.f32 %v7385_v38, 0.0  ;;  %v7624_v44 = vmax.f32 %v9474_v15, 0.0  ;;  %v9475_v12 = vadd.f32 %v13328_v13, %v7448_v55  ;;  %v9291_v4 = vpop.f32.mrb[7].mxu1 }
 0x4c8   : > { %v8044_v24 = vrot.slane %v8043_v7, 4  ;;  %8049 = vst.msk [vmem:[%s13392_s25 + $0x10] sm:$0xc] %vm8012_vm2, %v8043_v7 }
 0x4c9   : > { %7688 = vst.msk [vmem:[#allocation4 + $0xe8] sm:$0xff] %vm7658_vm15, %v7609_v40  ;;  %7703 = vst.msk [vmem:[#allocation4 + $0x160] sm:$0xff] %vm7658_vm15, %v7624_v44  ;;  %v7625_v59 = vmax.f32 %v9475_v12, 0.0 }
 0x4ca   : > { %v8046_v8 = vsel %vm13467_vm5, %v8044_v24, %v8045_v60  ;;  %v7779_v5 = vld [vmem:[#allocation4 + $0x150] ss:$2 sm:$0xff]  ;;  %v7857_v43 = vld [vmem:[#allocation4 + $0x151] ss:$2 sm:$0xff] }
 0x4cb   : > { %8050 = vst.msk [vmem:[%s13392_s25 + $0x14] sm:$0xf] %vm7987_vm0, %v8046_v8  ;;  %v7913_v25 = vmax.f32 %v7779_v5, %v7857_v43  ;;  %v7044_v36 = vpop.f32.mrb[232].mxu0  ;;  %v13590_v8 = vld [vmem:[#allocation10] ss:$0 sm:$0xff] }
 0x4cc   : > { %7704 = vst.msk [vmem:[#allocation4 + $0x168] sm:$0xff] %vm7658_vm15, %v7625_v59  ;;  %v7045_v20 = vadd.f32 %v13328_v13, %v7044_v36  ;;  %v7453_v62 = vpop.f32.mrb[8].mxu1  ;;  %v7046_v18 = vpop.f32.mrb[233].mxu0 }
 0x4cd   : > { %7952 = vst.msk [vmem:[#allocation5 + $0xa8] sm:$0xff] %vm7658_vm15, %v7913_v25  ;;  %v9476_v17 = vadd.f32 %v13328_v13, %v7453_v62  ;;  %v9294_v47 = vpop.f32.mrb[9].mxu1  ;;  %v7047_v29 = vpop.f32.mrb[234].mxu0 }
 0x4ce   : > { %v7390_v48 = vadd.f32 %v13491_v41, %v7045_v20  ;;  %v7048_v1 = vadd.f32 %v13328_v13, %v7047_v29  ;;  %v7456_v10 = vpop.f32.mrb[10].mxu1  ;;  %v7049_v11 = vpop.f32.mrb[235].mxu0 }
 0x4cf   : > { %v7626_v35 = vmax.f32 %v9476_v17, 0.0  ;;  %v9477_v22 = vadd.f32 %v13328_v13, %v7456_v10  ;;  %v9295_v3 = vpop.f32.mrb[11].mxu1  ;;  %v8051_v10 = vld [vmem:[#allocation5 + $0x68] sm:$0xff] }
 0x4d0   : > { %v7765_v14 = vld [vmem:[#allocation4 + $0xe0] ss:$2 sm:$0xff]  ;;  %v7843_v19 = vld [vmem:[#allocation4 + $0xe1] ss:$2 sm:$0xff]  ;;  %v7610_v2 = vmax.f32 %v7390_v48, 0.0  ;;  %v7393_v30 = vadd.f32 %v13493_v54, %v7048_v1 }
 0x4d1   : > { %v7906_v53 = vmax.f32 %v7765_v14, %v7843_v19  ;;  %7705 = vst.msk [vmem:[#allocation4 + $0x170] sm:$0xff] %vm7658_vm15, %v7626_v35  ;;  %v7627_v51 = vmax.f32 %v9477_v22, 0.0 }
 0x4d2   : > { %7689 = vst.msk [vmem:[#allocation4 + $0xf0] sm:$0xff] %vm7658_vm15, %v7610_v2  ;;  %v7611_v41 = vmax.f32 %v7393_v30, 0.0 }
 0x4d3   : > { %v7781_v28 = vld [vmem:[#allocation4 + $0x160] ss:$2 sm:$0xff]  ;;  %v7859_v58 = vld [vmem:[#allocation4 + $0x161] ss:$2 sm:$0xff]  ;;  %7945 = vst.msk [vmem:[#allocation5 + $0x70] sm:$0xff] %vm7658_vm15, %v7906_v53  ;;  %7706 = vst.msk [vmem:[#allocation4 + $0x178] sm:$0xff] %vm7658_vm15, %v7627_v51 }
 0x4d4   : > { %v7914_v50 = vmax.f32 %v7781_v28, %v7859_v58  ;;  %7690 = vst.msk [vmem:[#allocation4 + $0xf8] sm:$0xff] %vm7658_vm15, %v7611_v41  ;;  %v7461_v45 = vpop.f32.mrb[12].mxu1 }
 0x4d5   : > { %v9478_v54 = vadd.f32 %v13328_v13, %v7461_v45  ;;  %v9298_v33 = vpop.f32.mrb[13].mxu1 }
 0x4d6   : > { %7953 = vst.msk [vmem:[#allocation5 + $0xb0] sm:$0xff] %vm7658_vm15, %v7914_v50  ;;  %v7464_v61 = vpop.f32.mrb[14].mxu1 }
 0x4d7   : > { %v7628_v6 = vmax.f32 %v9478_v54, 0.0  ;;  %v9479_v27 = vadd.f32 %v13328_v13, %v7464_v61  ;;  %v9299_v32 = vpop.f32.mrb[15].mxu1  ;;  %v7052_v42 = vpop.f32.mrb[236].mxu0 }
 0x4d8   : > { %v7053_v9 = vadd.f32 %v13328_v13, %v7052_v42  ;;  %v7054_v21 = vpop.f32.mrb[237].mxu0 }
 0x4d9   : > { %7707 = vst.msk [vmem:[#allocation4 + $0x180] sm:$0xff] %vm7658_vm15, %v7628_v6  ;;  %v7629_v26 = vmax.f32 %v9479_v27, 0.0  ;;  %v7055_v16 = vpop.f32.mrb[238].mxu0 }
 0x4da   : > { %v7783_v38 = vld [vmem:[#allocation4 + $0x170] ss:$2 sm:$0xff]  ;;  %v7861_v15 = vld [vmem:[#allocation4 + $0x171] ss:$2 sm:$0xff]  ;;  %v7398_v46 = vadd.f32 %v13499_v49, %v7053_v9  ;;  %v7056_v7 = vadd.f32 %v13328_v13, %v7055_v16  ;;  %v7057_v12 = vpop.f32.mrb[239].mxu0 }
 0x4db   : > { %v7767_v55 = vld [vmem:[#allocation4 + $0xf0] ss:$2 sm:$0xff]  ;;  %v7845_v40 = vld [vmem:[#allocation4 + $0xf1] ss:$2 sm:$0xff]  ;;  %v7915_v44 = vmax.f32 %v7783_v38, %v7861_v15  ;;  %7708 = vst.msk [vmem:[#allocation4 + $0x188] sm:$0xff] %vm7658_vm15, %v7629_v26 }
 0x4dc   : > { %v7907_v4 = vmax.f32 %v7767_v55, %v7845_v40  ;;  %v7612_v24 = vmax.f32 %v7398_v46, 0.0  ;;  %v7401_v60 = vadd.f32 %v13503_v63, %v7056_v7  ;;  %v7469_v59 = vpop.f32.mrb[16].mxu1  ;;  %v8052_v40 = vld [vmem:[#allocation5 + $0x70] sm:$0xf] }
 0x4dd   : > { %7954 = vst.msk [vmem:[#allocation5 + $0xb8] sm:$0xff] %vm7658_vm15, %v7915_v44  ;;  %v9480_v5 = vadd.f32 %v13590_v8, %v7469_v59  ;;  %v9302_v49 = vpop.f32.mrb[17].mxu1 }
 0x4de   : > { %7946 = vst.msk [vmem:[#allocation5 + $0x78] sm:$0xff] %vm7658_vm15, %v7907_v4  ;;  %7691 = vst.msk [vmem:[#allocation4 + $0x100] sm:$0xff] %vm7658_vm15, %v7612_v24  ;;  %v7613_v13 = vmax.f32 %v7401_v60, 0.0  ;;  %v7472_v43 = vpop.f32.mrb[18].mxu1 }
 0x4df   : > { %v7630_v25 = vmax.f32 %v9480_v5, 0.0  ;;  %v9481_v36 = vadd.f32 %v13590_v8, %v7472_v43  ;;  %v9303_v20 = vpop.f32.mrb[19].mxu1 }
 0x4e0   : > { %7692 = vst.msk [vmem:[#allocation4 + $0x108] sm:$0xff] %vm7658_vm15, %v7613_v13 }
 0x4e1   : > { %7709 = vst.msk [vmem:[#allocation4 + $0x190] sm:$0xff] %vm7658_vm15, %v7630_v25  ;;  %v7631_v63 = vmax.f32 %v9481_v36, 0.0 }
 0x4e2   : > { %v7785_v62 = vld [vmem:[#allocation4 + $0x180] ss:$2 sm:$0xff]  ;;  %v7863_v18 = vld [vmem:[#allocation4 + $0x181] ss:$2 sm:$0xff] }
 0x4e3   : > { %v7916_v17 = vmax.f32 %v7785_v62, %v7863_v18  ;;  %7710 = vst.msk [vmem:[#allocation4 + $0x198] sm:$0xff] %vm7658_vm15, %v7631_v63  ;;  %v7060_v47 = vpop.f32.mrb[240].mxu0 }
 0x4e4   : > { %v7061_v29 = vadd.f32 %v13590_v8, %v7060_v47  ;;  %v7477_v48 = vpop.f32.mrb[20].mxu1  ;;  %v7062_v1 = vpop.f32.mrb[241].mxu0  ;;  %v8103_v63 = vld [vmem:[#allocation5 + $0xb6] sm:$0xff] }
 0x4e5   : > { %v8053_v11 = vld [vmem:[#allocation5 + $0x75] sm:$0xff]  ;;  %7955 = vst.msk [vmem:[#allocation5 + $0xc0] sm:$0xff] %vm7658_vm15, %v7916_v17  ;;  %v9482_v35 = vadd.f32 %v13590_v8, %v7477_v48  ;;  %v9306_v22 = vpop.f32.mrb[21].mxu1  ;;  %v7063_v3 = vpop.f32.mrb[242].mxu0 }
 0x4e6   : > { %v8055_v14 = vmax.f32 %v8051_v10, %v8053_v11  ;;  %v7406_v19 = vadd.f32 %v13507_v56, %v7061_v29  ;;  %v7064_v2 = vadd.f32 %v13590_v8, %v7063_v3  ;;  %v7480_v30 = vpop.f32.mrb[22].mxu1  ;;  %v7065_v53 = vpop.f32.mrb[243].mxu0 }
 0x4e7   : > { %v7769_v51 = vld [vmem:[#allocation4 + $0x100] ss:$2 sm:$0xff]  ;;  %v7847_v28 = vld [vmem:[#allocation4 + $0x101] ss:$2 sm:$0xff]  ;;  %v7632_v58 = vmax.f32 %v9482_v35, 0.0  ;;  %v9483_v41 = vadd.f32 %v13590_v8, %v7480_v30  ;;  %v9307_v50 = vpop.f32.mrb[23].mxu1 }
 0x4e8   : > { %v8921_v45 = vpack.c.bf16 %v8055_v14, %v8055_v14  ;;  %v7908_v54 = vmax.f32 %v7769_v51, %v7847_v28  ;;  %v7614_v33 = vmax.f32 %v7406_v19, 0.0  ;;  %v7409_v61 = vadd.f32 %v13511_v31, %v7064_v2 }
 0x4e9   : > { %7711 = vst.msk [vmem:[#allocation4 + $0x1a0] sm:$0xff] %vm7658_vm15, %v7632_v58  ;;  %v7633_v6 = vmax.f32 %v9483_v41, 0.0 }
 0x4ea   : > { %8065 = vst.msk [vmem:[%s13392_s25 + $0x18] sm:$0xf] %vm7987_vm0, %v8921_v45  ;;  %v7787_v56 = vld [vmem:[#allocation4 + $0x190] ss:$2 sm:$0xff]  ;;  %v7865_v27 = vld [vmem:[#allocation4 + $0x191] ss:$2 sm:$0xff] }
 0x4eb   : > { %7947 = vst.msk [vmem:[#allocation5 + $0x80] sm:$0xff] %vm7658_vm15, %v7908_v54  ;;  %7693 = vst.msk [vmem:[#allocation4 + $0x110] sm:$0xff] %vm7658_vm15, %v7614_v33  ;;  %v7615_v32 = vmax.f32 %v7409_v61, 0.0  ;;  %v7917_v42 = vmax.f32 %v7787_v56, %v7865_v27 }
 0x4ec   : > { %7712 = vst.msk [vmem:[#allocation4 + $0x1a8] sm:$0xff] %vm7658_vm15, %v7633_v6  ;;  %v7485_v9 = vpop.f32.mrb[24].mxu1  ;;  %v8104_v43 = vld [vmem:[#allocation5 + $0xbe] sm:$0xf] }
 0x4ed   : > { %7694 = vst.msk [vmem:[#allocation4 + $0x118] sm:$0xff] %vm7658_vm15, %v7615_v32  ;;  %7956 = vst.msk [vmem:[#allocation5 + $0xc8] sm:$0xff] %vm7658_vm15, %v7917_v42  ;;  %v9484_v31 = vadd.f32 %v13590_v8, %v7485_v9  ;;  %v9310_v21 = vpop.f32.mrb[25].mxu1 }
 0x4ee   : > { %v7488_v26 = vpop.f32.mrb[26].mxu1 }
 0x4ef   : > { %v7634_v16 = vmax.f32 %v9484_v31, 0.0  ;;  %v9485_v38 = vadd.f32 %v13590_v8, %v7488_v26  ;;  %v9311_v15 = vpop.f32.mrb[27].mxu1  ;;  %v7068_v46 = vpop.f32.mrb[244].mxu0 }
 0x4f0   : > { %v7069_v7 = vadd.f32 %v13590_v8, %v7068_v46  ;;  %v7070_v55 = vpop.f32.mrb[245].mxu0 }
 0x4f1   : > { %7713 = vst.msk [vmem:[#allocation4 + $0x1b0] sm:$0xff] %vm7658_vm15, %v7634_v16  ;;  %v7635_v12 = vmax.f32 %v9485_v38, 0.0  ;;  %v7071_v4 = vpop.f32.mrb[246].mxu0 }
 0x4f2   : > { %v8054_v44 = vld [vmem:[#allocation5 + $0x7d] sm:$0xf]  ;;  %v7414_v5 = vadd.f32 %v13520_v57, %v7069_v7  ;;  %v7072_v49 = vadd.f32 %v13590_v8, %v7071_v4  ;;  %v7073_v13 = vpop.f32.mrb[247].mxu0 }
 0x4f3   : > { %v8056_v24 = vmax.f32 %v8052_v40, %v8054_v44  ;;  %v7789_v60 = vld [vmem:[#allocation4 + $0x1a0] ss:$2 sm:$0xff]  ;;  %v7867_v59 = vld [vmem:[#allocation4 + $0x1a1] ss:$2 sm:$0xff]  ;;  %7714 = vst.msk [vmem:[#allocation4 + $0x1b8] sm:$0xff] %vm7658_vm15, %v7635_v12 }
 0x4f4   : > { %v7771_v25 = vld [vmem:[#allocation4 + $0x110] ss:$2 sm:$0xff]  ;;  %v7849_v36 = vld [vmem:[#allocation4 + $0x111] ss:$2 sm:$0xff]  ;;  %v7918_v20 = vmax.f32 %v7789_v60, %v7867_v59  ;;  %v7616_v29 = vmax.f32 %v7414_v5, 0.0  ;;  %v7417_v48 = vadd.f32 %v13523_v0, %v7072_v49  ;;  %v7493_v1 = vpop.f32.mrb[28].mxu1 }
 0x4f5   : > { %v8922_v62 = vpack.c.bf16 %v8056_v24, %v8056_v24  ;;  %v8105_v18 = vld [vmem:[#allocation5 + $0xc3] sm:$0xff]  ;;  %v8106_v17 = vld [vmem:[#allocation5 + $0xcb] sm:$0xf]  ;;  %v7909_v47 = vmax.f32 %v7771_v25, %v7849_v36  ;;  %v9486_v11 = vadd.f32 %v13590_v8, %v7493_v1  ;;  %v9314_v35 = vpop.f32.mrb[29].mxu1 }
 0x4f6   : > { %v8107_v57 = vmax.f32 %v8103_v63, %v8105_v18  ;;  %v8108_v10 = vmax.f32 %v8104_v43, %v8106_v17  ;;  %7957 = vst.msk [vmem:[#allocation5 + $0xd0] sm:$0xff] %vm7658_vm15, %v7918_v20  ;;  %7695 = vst.msk [vmem:[#allocation4 + $0x120] sm:$0xff] %vm7658_vm15, %v7616_v29  ;;  %v7617_v22 = vmax.f32 %v7417_v48, 0.0  ;;  %v7496_v3 = vpop.f32.mrb[30].mxu1 }
 0x4f7   : > { %8066 = vst.msk [vmem:[%s13392_s25 + $0x1c] sm:$0x3] %vm7989_vm1, %v8922_v62  ;;  %v7636_v0 = vmax.f32 %v9486_v11, 0.0  ;;  %v9487_v2 = vadd.f32 %v13590_v8, %v7496_v3  ;;  %v9315_v30 = vpop.f32.mrb[31].mxu1 }
 0x4f8   : > { %7948 = vst.msk [vmem:[#allocation5 + $0x88] sm:$0xff] %vm7658_vm15, %v7909_v47  ;;  %v8927_v14 = vpack.c.bf16 %v8107_v57, %v8107_v57  ;;  %v8928_v19 = vpack.c.bf16 %v8108_v10, %v8108_v10  ;;  %7696 = vst.msk [vmem:[#allocation4 + $0x128] sm:$0xff] %vm7658_vm15, %v7617_v22 }
 0x4f9   : > { %7715 = vst.msk [vmem:[#allocation4 + $0x1c0] sm:$0xff] %vm7658_vm15, %v7636_v0  ;;  %v7637_v51 = vmax.f32 %v9487_v2, 0.0 }
 0x4fa   : > { %v8115_v53 = vrot.slane %v8927_v14, 6  ;;  %v7791_v28 = vld [vmem:[#allocation4 + $0x1b0] ss:$2 sm:$0xff]  ;;  %v7869_v58 = vld [vmem:[#allocation4 + $0x1b1] ss:$2 sm:$0xff]  ;;  %v8117_v50 = vrot.slane %v8928_v19, 6 }
 0x4fb   : > { %v7919_v45 = vmax.f32 %v7791_v28, %v7869_v58  ;;  %7716 = vst.msk [vmem:[#allocation4 + $0x1c8] sm:$0xff] %vm7658_vm15, %v7637_v51 }
 0x4fc   : > { %v8116_v41 = vrot.slane %v8115_v53, 4  ;;  %8121 = vst.msk [vmem:[%s13392_s25 + $0x28] sm:$0xc] %vm8012_vm2, %v8115_v53  ;;  %v7076_v54 = vpop.f32.mrb[248].mxu0  ;;  %v7501_v61 = vpop.f32.mrb[32].mxu1 }
 0x4fd   : > { %v7077_v33 = vadd.f32 %v13590_v8, %v7076_v54  ;;  %v7078_v6 = vpop.f32.mrb[249].mxu0  ;;  %7958 = vst.msk [vmem:[#allocation5 + $0xd8] sm:$0xff] %vm7658_vm15, %v7919_v45  ;;  %v9488_v27 = vadd.f32 %v13590_v8, %v7501_v61  ;;  %v9318_v32 = vpop.f32.mrb[33].mxu1  ;;  %v8123_v14 = vld [vmem:[#allocation5 + $0xd0] sm:$0xff] }
 0x4fe   : > { %v8118_v56 = vsel %vm13467_vm5, %v8116_v41, %v8117_v50  ;;  %v7079_v42 = vpop.f32.mrb[250].mxu0  ;;  %v7504_v21 = vpop.f32.mrb[34].mxu1 }
 0x4ff   : > { %8122 = vst.msk [vmem:[%s13392_s25 + $0x2c] sm:$0xf] %vm7987_vm0, %v8118_v56  ;;  %v7422_v9 = vadd.f32 %v13529_v37, %v7077_v33  ;;  %v7080_v31 = vadd.f32 %v13590_v8, %v7079_v42  ;;  %v7081_v26 = vpop.f32.mrb[251].mxu0  ;;  %v7773_v16 = vld [vmem:[#allocation4 + $0x120] ss:$2 sm:$0xff]  ;;  %v7638_v15 = vmax.f32 %v9488_v27, 0.0  ;;  %v9489_v46 = vadd.f32 %v13590_v8, %v7504_v21 }
 0x500   : > { %v7851_v38 = vld [vmem:[#allocation4 + $0x121] ss:$2 sm:$0xff]  ;;  %v9319_v7 = vpop.f32.mrb[35].mxu1  ;;  %v8067_v62 = vld [vmem:[#allocation5 + $0x82] sm:$0xff]  ;;  %v8068_v21 = vld [vmem:[#allocation5 + $0x8a] sm:$0xf] }
 0x501   : > { %v7910_v55 = vmax.f32 %v7773_v16, %v7851_v38  ;;  %v7618_v40 = vmax.f32 %v7422_v9, 0.0  ;;  %v7425_v44 = vadd.f32 %v13532_v52, %v7080_v31  ;;  %7717 = vst.msk [vmem:[#allocation4 + $0x1d0] sm:$0xff] %vm7658_vm15, %v7638_v15  ;;  %v7639_v12 = vmax.f32 %v9489_v46, 0.0 }
 0x502   : > { %v7793_v37 = vld [vmem:[#allocation4 + $0x1c0] ss:$2 sm:$0xff]  ;;  %v7871_v4 = vld [vmem:[#allocation4 + $0x1c1] ss:$2 sm:$0xff] }
 0x503   : > { %7949 = vst.msk [vmem:[#allocation5 + $0x90] sm:$0xff] %vm7658_vm15, %v7910_v55  ;;  %7697 = vst.msk [vmem:[#allocation4 + $0x130] sm:$0xff] %vm7658_vm15, %v7618_v40  ;;  %v7619_v24 = vmax.f32 %v7425_v44, 0.0  ;;  %v7920_v60 = vmax.f32 %v7793_v37, %v7871_v4 }
 0x504   : > { %7718 = vst.msk [vmem:[#allocation4 + $0x1d8] sm:$0xff] %vm7658_vm15, %v7639_v12  ;;  %v7509_v59 = vpop.f32.mrb[36].mxu1  ;;  %v8124_v42 = vld [vmem:[#allocation5 + $0xd8] sm:$0xf] }
 0x505   : > { %7698 = vst.msk [vmem:[#allocation4 + $0x138] sm:$0xff] %vm7658_vm15, %v7619_v24  ;;  %7959 = vst.msk [vmem:[#allocation5 + $0xe0] sm:$0xff] %vm7658_vm15, %v7920_v60  ;;  %v9490_v52 = vadd.f32 %v13590_v8, %v7509_v59  ;;  %v9322_v5 = vpop.f32.mrb[37].mxu1 }
 0x506   : > { %v7512_v49 = vpop.f32.mrb[38].mxu1 }
 0x507   : > { %v7640_v13 = vmax.f32 %v9490_v52, 0.0  ;;  %v9491_v43 = vadd.f32 %v13590_v8, %v7512_v49  ;;  %v9323_v25 = vpop.f32.mrb[39].mxu1 }
 0x508   : > { %v7084_v36 = vpop.f32.mrb[252].mxu0 }
 0x509   : > { %v7085_v20 = vadd.f32 %v13590_v8, %v7084_v36  ;;  %v7086_v63 = vpop.f32.mrb[253].mxu0  ;;  %7719 = vst.msk [vmem:[#allocation4 + $0x1e0] sm:$0xff] %vm7658_vm15, %v7640_v13  ;;  %v7641_v17 = vmax.f32 %v9491_v43, 0.0 }
 0x50a   : > { %v8069_v18 = vld [vmem:[#allocation5 + $0x8f] sm:$0xff]  ;;  %v7087_v47 = vpop.f32.mrb[254].mxu0 }
 0x50b   : > { %v8071_v29 = vmax.f32 %v8067_v62, %v8069_v18  ;;  %v7795_v48 = vld [vmem:[#allocation4 + $0x1d0] ss:$2 sm:$0xff]  ;;  %v7873_v1 = vld [vmem:[#allocation4 + $0x1d1] ss:$2 sm:$0xff]  ;;  %v7430_v57 = vadd.f32 %v13537_v23, %v7085_v20  ;;  %v7088_v10 = vadd.f32 %v13590_v8, %v7087_v47  ;;  %v7089_v11 = vpop.f32.mrb[255].mxu0  ;;  %7720 = vst.msk [vmem:[#allocation4 + $0x1e8] sm:$0xff] %vm7658_vm15, %v7641_v17 }
 0x50c   : > { %v7775_v35 = vld [vmem:[#allocation4 + $0x130] ss:$2 sm:$0xff]  ;;  %v7853_v22 = vld [vmem:[#allocation4 + $0x131] ss:$2 sm:$0xff]  ;;  %v7921_v3 = vmax.f32 %v7795_v48, %v7873_v1  ;;  %v7517_v51 = vpop.f32.mrb[40].mxu1 }
 0x50d   : > { %v8923_v19 = vpack.c.bf16 %v8071_v29, %v8071_v29  ;;  %v8125_v0 = vld [vmem:[#allocation5 + $0xdd] sm:$0xff]  ;;  %v7911_v2 = vmax.f32 %v7775_v35, %v7853_v22  ;;  %v7620_v30 = vmax.f32 %v7430_v57, 0.0  ;;  %v7433_v53 = vadd.f32 %v13541_v39, %v7088_v10  ;;  %v9326_v58 = vpop.f32.mrb[41].mxu1  ;;  %v8089_v29 = vld [vmem:[#allocation5 + $0xa9] sm:$0xff]  ;;  %v8090_v48 = vld [vmem:[#allocation5 + $0xb1] sm:$0xf] }
 0x50e   : > { %v8127_v28 = vmax.f32 %v8123_v14, %v8125_v0  ;;  %7960 = vst.msk [vmem:[#allocation5 + $0xe8] sm:$0xff] %vm7658_vm15, %v7921_v3  ;;  %v9492_v23 = vadd.f32 %v13590_v8, %v7517_v51  ;;  %v7520_v45 = vpop.f32.mrb[42].mxu1 }
 0x50f   : > { %v8079_v41 = vrot.slane %v8923_v19, 6  ;;  %7950 = vst.msk [vmem:[#allocation5 + $0x98] sm:$0xff] %vm7658_vm15, %v7911_v2  ;;  %7699 = vst.msk [vmem:[#allocation4 + $0x140] sm:$0xff] %vm7658_vm15, %v7620_v30  ;;  %v7621_v50 = vmax.f32 %v7433_v53, 0.0  ;;  %v9493_v61 = vadd.f32 %v13590_v8, %v7520_v45  ;;  %v9327_v39 = vpop.f32.mrb[43].mxu1 }
 0x510   : > { %v8929_v54 = vpack.c.bf16 %v8127_v28, %v8127_v28  ;;  %v7642_v33 = vmax.f32 %v9492_v23, 0.0 }
 0x511   : > { %8085 = vst.msk [vmem:[%s13392_s25 + $0x1c] sm:$0xc] %vm8012_vm2, %v8079_v41  ;;  %v7643_v6 = vmax.f32 %v9493_v61, 0.0  ;;  %v8080_v52 = vrot.slane %v8079_v41, 4 }
 0x512   : > { %7700 = vst.msk [vmem:[#allocation4 + $0x148] sm:$0xff] %vm7658_vm15, %v7621_v50  ;;  %7721 = vst.msk [vmem:[#allocation4 + $0x1f0] sm:$0xff] %vm7658_vm15, %v7642_v33  ;;  %v7797_v56 = vld [vmem:[#allocation4 + $0x1e0] ss:$2 sm:$0xff]  ;;  %v7875_v27 = vld [vmem:[#allocation4 + $0x1e1] ss:$2 sm:$0xff] }
 0x513   : > { %8137 = vst.msk [vmem:[%s13392_s25 + $0x30] sm:$0xf] %vm7987_vm0, %v8929_v54  ;;  %v7922_v32 = vmax.f32 %v7797_v56, %v7875_v27 }
 0x514   : > { %7722 = vst.msk [vmem:[#allocation4 + $0x1f8] sm:$0xff] %vm7658_vm15, %v7643_v6  ;;  %v7525_v31 = vpop.f32.mrb[44].mxu1 }
 0x515   : > { %v8126_v9 = vld [vmem:[#allocation5 + $0xe5] sm:$0xf]  ;;  %7961 = vst.msk [vmem:[#allocation5 + $0xf0] sm:$0xff] %vm7658_vm15, %v7922_v32  ;;  %v9494_v38 = vadd.f32 %v13590_v8, %v7525_v31  ;;  %v9330_v15 = vpop.f32.mrb[45].mxu1 }
 0x516   : > { %v8070_v26 = vld [vmem:[#allocation5 + $0x97] sm:$0xf]  ;;  %v8128_v16 = vmax.f32 %v8124_v42, %v8126_v9  ;;  %v7528_v7 = vpop.f32.mrb[46].mxu1 }
 0x517   : > { %v8072_v46 = vmax.f32 %v8068_v21, %v8070_v26  ;;  %v7644_v12 = vmax.f32 %v9494_v38, 0.0  ;;  %v9495_v37 = vadd.f32 %v13590_v8, %v7528_v7  ;;  %v9331_v4 = vpop.f32.mrb[47].mxu1 }
 0x518   : > { %v8930_v55 = vpack.c.bf16 %v8128_v16, %v8128_v16 }
 0x519   : > { %v7777_v40 = vld [vmem:[#allocation4 + $0x140] ss:$2 sm:$0xff]  ;;  %v7855_v44 = vld [vmem:[#allocation4 + $0x141] ss:$2 sm:$0xff]  ;;  %v8924_v24 = vpack.c.bf16 %v8072_v46, %v8072_v46  ;;  %7723 = vst.msk [vmem:[#allocation4 + $0x200] sm:$0xff] %vm7658_vm15, %v7644_v12  ;;  %v7645_v59 = vmax.f32 %v9495_v37, 0.0 }
 0x51a   : > { %v7912_v60 = vmax.f32 %v7777_v40, %v7855_v44  ;;  %8138 = vst.msk [vmem:[%s13392_s25 + $0x34] sm:$0x3] %vm7989_vm1, %v8930_v55 }
 0x51b   : > { %v8081_v5 = vrot.slane %v8924_v24, 6  ;;  %v7799_v49 = vld [vmem:[#allocation4 + $0x1f0] ss:$2 sm:$0xff]  ;;  %v7877_v13 = vld [vmem:[#allocation4 + $0x1f1] ss:$2 sm:$0xff]  ;;  %7724 = vst.msk [vmem:[#allocation4 + $0x208] sm:$0xff] %vm7658_vm15, %v7645_v59 }
 0x51c   : > { %7951 = vst.msk [vmem:[#allocation5 + $0xa0] sm:$0xff] %vm7658_vm15, %v7912_v60  ;;  %v7923_v43 = vmax.f32 %v7799_v49, %v7877_v13  ;;  %v7533_v36 = vpop.f32.mrb[48].mxu1  ;;  %v8139_v19 = vld [vmem:[#allocation5 + $0xea] sm:$0xff]  ;;  %v8140_v27 = vld [vmem:[#allocation5 + $0xf2] sm:$0xf] }
 0x51d   : > { %v8082_v25 = vsel %vm13467_vm5, %v8080_v52, %v8081_v5  ;;  %v9496_v20 = vadd.f32 %v13590_v8, %v7533_v36  ;;  %v9334_v63 = vpop.f32.mrb[49].mxu1 }
 0x51e   : > { %8086 = vst.msk [vmem:[%s13392_s25 + $0x20] sm:$0xf] %vm7987_vm0, %v8082_v25  ;;  %v7536_v62 = vpop.f32.mrb[50].mxu1 }
 0x51f   : > { %7962 = vst.msk [vmem:[#allocation5 + $0xf8] sm:$0xff] %vm7658_vm15, %v7923_v43  ;;  %v7646_v18 = vmax.f32 %v9496_v20, 0.0  ;;  %v9497_v17 = vadd.f32 %v13590_v8, %v7536_v62  ;;  %v9335_v47 = vpop.f32.mrb[51].mxu1 }
 0x521   : > { %7725 = vst.msk [vmem:[#allocation4 + $0x210] sm:$0xff] %vm7658_vm15, %v7646_v18  ;;  %v7647_v10 = vmax.f32 %v9497_v17, 0.0 }
 0x522   : > { %v7801_v22 = vld [vmem:[#allocation4 + $0x200] ss:$2 sm:$0xff]  ;;  %v7879_v3 = vld [vmem:[#allocation4 + $0x201] ss:$2 sm:$0xff] }
 0x523   : > { %v8087_v1 = vld [vmem:[#allocation5 + $0x9c] sm:$0xff]  ;;  %v8088_v57 = vld [vmem:[#allocation5 + $0xa4] sm:$0xf]  ;;  %v7924_v14 = vmax.f32 %v7801_v22, %v7879_v3  ;;  %7726 = vst.msk [vmem:[#allocation4 + $0x218] sm:$0xff] %vm7658_vm15, %v7647_v10 }
 0x524   : > { %v8091_v11 = vmax.f32 %v8087_v1, %v8089_v29  ;;  %v8092_v35 = vmax.f32 %v8088_v57, %v8090_v48  ;;  %v7541_v53 = vpop.f32.mrb[52].mxu1 }
 0x525   : > { %7963 = vst.msk [vmem:[#allocation5 + $0x100] sm:$0xff] %vm7658_vm15, %v7924_v14  ;;  %v9498_v28 = vadd.f32 %v13590_v8, %v7541_v53  ;;  %v9338_v23 = vpop.f32.mrb[53].mxu1 }
 0x526   : > { %v8925_v0 = vpack.c.bf16 %v8091_v11, %v8091_v11  ;;  %v8926_v2 = vpack.c.bf16 %v8092_v35, %v8092_v35  ;;  %v8141_v30 = vld [vmem:[#allocation5 + $0xf7] sm:$0xff]  ;;  %v7544_v58 = vpop.f32.mrb[54].mxu1 }
 0x527   : > { %v8143_v51 = vmax.f32 %v8139_v19, %v8141_v30  ;;  %v7648_v50 = vmax.f32 %v9498_v28, 0.0  ;;  %v9499_v45 = vadd.f32 %v13590_v8, %v7544_v58  ;;  %v9339_v54 = vpop.f32.mrb[55].mxu1 }
 0x528   : > { %8101 = vst.msk [vmem:[%s13392_s25 + $0x24] sm:$0xf] %vm7987_vm0, %v8925_v0 }
 0x529   : > { %8102 = vst.msk [vmem:[%s13392_s25 + $0x28] sm:$0x3] %vm7989_vm1, %v8926_v2  ;;  %v8931_v41 = vpack.c.bf16 %v8143_v51, %v8143_v51  ;;  %v7649_v61 = vmax.f32 %v9499_v45, 0.0 }
 0x52a   : > { %7727 = vst.msk [vmem:[#allocation4 + $0x220] sm:$0xff] %vm7658_vm15, %v7648_v50  ;;  %v7803_v39 = vld [vmem:[#allocation4 + $0x210] ss:$2 sm:$0xff]  ;;  %v7881_v6 = vld [vmem:[#allocation4 + $0x211] ss:$2 sm:$0xff] }
 0x52b   : > { %v8151_v33 = vrot.slane %v8931_v41, 6  ;;  %v7925_v56 = vmax.f32 %v7803_v39, %v7881_v6  ;;  %7728 = vst.msk [vmem:[#allocation4 + $0x228] sm:$0xff] %vm7658_vm15, %v7649_v61 }
 0x52c   : > { %v8142_v32 = vld [vmem:[#allocation5 + $0xff] sm:$0xf]  ;;  %v7549_v42 = vpop.f32.mrb[56].mxu1 }
 0x52d   : > { %8157 = vst.msk [vmem:[%s13392_s25 + $0x34] sm:$0xc] %vm8012_vm2, %v8151_v33  ;;  %v8144_v9 = vmax.f32 %v8140_v27, %v8142_v32  ;;  %v9500_v31 = vadd.f32 %v13590_v8, %v7549_v42  ;;  %v9342_v21 = vpop.f32.mrb[57].mxu1  ;;  %v8152_v7 = vrot.slane %v8151_v33, 4 }
 0x52e   : > { %7964 = vst.msk [vmem:[#allocation5 + $0x108] sm:$0xff] %vm7658_vm15, %v7925_v56  ;;  %v7552_v26 = vpop.f32.mrb[58].mxu1 }
 0x52f   : > { %v8932_v16 = vpack.c.bf16 %v8144_v9, %v8144_v9  ;;  %v7650_v38 = vmax.f32 %v9500_v31, 0.0  ;;  %v9501_v15 = vadd.f32 %v13590_v8, %v7552_v26  ;;  %v9343_v46 = vpop.f32.mrb[59].mxu1 }
 0x531   : > { %v8153_v55 = vrot.slane %v8932_v16, 6  ;;  %7729 = vst.msk [vmem:[#allocation4 + $0x230] sm:$0xff] %vm7658_vm15, %v7650_v38  ;;  %v7651_v40 = vmax.f32 %v9501_v15, 0.0 }
 0x532   : > { %v7805_v44 = vld [vmem:[#allocation4 + $0x220] ss:$2 sm:$0xff]  ;;  %v7883_v12 = vld [vmem:[#allocation4 + $0x221] ss:$2 sm:$0xff] }
 0x533   : > { %v8154_v37 = vsel %vm13467_vm5, %v8152_v7, %v8153_v55  ;;  %v7926_v4 = vmax.f32 %v7805_v44, %v7883_v12  ;;  %7730 = vst.msk [vmem:[#allocation4 + $0x238] sm:$0xff] %vm7658_vm15, %v7651_v40 }
 0x534   : > { %8158 = vst.msk [vmem:[%s13392_s25 + $0x38] sm:$0xf] %vm7987_vm0, %v8154_v37  ;;  %v7557_v24 = vpop.f32.mrb[60].mxu1 }
 0x535   : > { %7965 = vst.msk [vmem:[#allocation5 + $0x110] sm:$0xff] %vm7658_vm15, %v7926_v4  ;;  %v9502_v60 = vadd.f32 %v13590_v8, %v7557_v24  ;;  %v9346_v59 = vpop.f32.mrb[61].mxu1  ;;  %v8159_v11 = vld [vmem:[#allocation5 + $0x104] sm:$0xff]  ;;  %v8160_v22 = vld [vmem:[#allocation5 + $0x10c] sm:$0xf] }
 0x536   : > { %v7560_v52 = vpop.f32.mrb[62].mxu1 }
 0x537   : > { %v7652_v5 = vmax.f32 %v9502_v60, 0.0  ;;  %v9503_v49 = vadd.f32 %v13590_v8, %v7560_v52  ;;  %v9347_v13 = vpop.f32.mrb[63].mxu1 }
 0x539   : > { %7731 = vst.msk [vmem:[#allocation4 + $0x240] sm:$0xff] %vm7658_vm15, %v7652_v5  ;;  %v7653_v43 = vmax.f32 %v9503_v49, 0.0 }
 0x53a   : > { %v7807_v25 = vld [vmem:[#allocation4 + $0x230] ss:$2 sm:$0xff]  ;;  %v7885_v36 = vld [vmem:[#allocation4 + $0x231] ss:$2 sm:$0xff] }
 0x53b   : > { %v7927_v20 = vmax.f32 %v7807_v25, %v7885_v36  ;;  %7732 = vst.msk [vmem:[#allocation4 + $0x248] sm:$0xff] %vm7658_vm15, %v7653_v43 }
 0x53c   : > { %v7565_v63 = vpop.f32.mrb[64].mxu1 }
 0x53d   : > { %7966 = vst.msk [vmem:[#allocation5 + $0x118] sm:$0xff] %vm7658_vm15, %v7927_v20  ;;  %v9504_v62 = vadd.f32 %v13590_v8, %v7565_v63  ;;  %v9350_v18 = vpop.f32.mrb[65].mxu1 }
 0x53e   : > { %v7568_v17 = vpop.f32.mrb[66].mxu1 }
 0x53f   : > { %v7654_v47 = vmax.f32 %v9504_v62, 0.0  ;;  %v9505_v29 = vadd.f32 %v13590_v8, %v7568_v17  ;;  %v9351_v48 = vpop.f32.mrb[67].mxu1 }
 0x541   : > { %7733 = vst.msk [vmem:[#allocation4 + $0x250] sm:$0xff] %vm7658_vm15, %v7654_v47  ;;  %v7655_v1 = vmax.f32 %v9505_v29, 0.0 }
 0x542   : > { %v7809_v57 = vld [vmem:[#allocation4 + $0x240] ss:$2 sm:$0xff]  ;;  %v7887_v10 = vld [vmem:[#allocation4 + $0x241] ss:$2 sm:$0xff] }
 0x543   : > { %v7928_v35 = vmax.f32 %v7809_v57, %v7887_v10  ;;  %7734 = vst.msk [vmem:[#allocation4 + $0x258] sm:$0xff] %vm7658_vm15, %v7655_v1 }
 0x544   : > { %v8161_v3 = vld [vmem:[#allocation5 + $0x111] sm:$0xff]  ;;  %v8162_v14 = vld [vmem:[#allocation5 + $0x119] sm:$0xf]  ;;  %v7573_v19 = vpop.f32.mrb[68].mxu1 }
 0x545   : > { %v8163_v0 = vmax.f32 %v8159_v11, %v8161_v3  ;;  %v8164_v2 = vmax.f32 %v8160_v22, %v8162_v14  ;;  %7967 = vst.msk [vmem:[#allocation5 + $0x120] sm:$0xff] %vm7658_vm15, %v7928_v35  ;;  %v9506_v30 = vadd.f32 %v13590_v8, %v7573_v19  ;;  %v9354_v53 = vpop.f32.mrb[69].mxu1 }
 0x546   : > { %v7576_v51 = vpop.f32.mrb[70].mxu1 }
 0x547   : > { %v8933_v28 = vpack.c.bf16 %v8163_v0, %v8163_v0  ;;  %v8934_v23 = vpack.c.bf16 %v8164_v2, %v8164_v2  ;;  %v7656_v58 = vmax.f32 %v9506_v30, 0.0  ;;  %v9507_v41 = vadd.f32 %v13590_v8, %v7576_v51  ;;  %v9355_v50 = vpop.f32.mrb[71].mxu1 }
 0x549   : > { %8173 = vst.msk [vmem:[%s13392_s25 + $0x3c] sm:$0xf] %vm7987_vm0, %v8933_v28  ;;  %v7657_v45 = vmax.f32 %v9507_v41, 0.0 }
 0x54a   : > { %8174 = vst.msk [vmem:[%s13392_s25 + $0x40] sm:$0x3] %vm7989_vm1, %v8934_v23  ;;  %v7811_v54 = vld [vmem:[#allocation4 + $0x250] ss:$2 sm:$0xff]  ;;  %v7889_v33 = vld [vmem:[#allocation4 + $0x251] ss:$2 sm:$0xff] }
 0x54b   : > { %7735 = vst.msk [vmem:[#allocation4 + $0x260] sm:$0xff] %vm7658_vm15, %v7656_v58  ;;  %v7929_v61 = vmax.f32 %v7811_v54, %v7889_v33  ;;  %7736 = vst.msk [vmem:[#allocation4 + $0x268] sm:$0xff] %vm7658_vm15, %v7657_v45 }
 0x54c   : > { %v8175_v56 = vld [vmem:[#allocation5 + $0x11e] sm:$0xff] }
 0x54d   : > { %7968 = vst.msk [vmem:[#allocation5 + $0x128] sm:$0xff] %vm7658_vm15, %v7929_v61 }
 0x552   : > { %v7813_v39 = vld [vmem:[#allocation4 + $0x260] ss:$2 sm:$0xff]  ;;  %v7891_v6 = vld [vmem:[#allocation4 + $0x261] ss:$2 sm:$0xff] }
 0x553   : > { %v7930_v8 = vmax.f32 %v7813_v39, %v7891_v6 }
 0x554   : > { %v8176_v27 = vld [vmem:[#allocation5 + $0x126] sm:$0xf] }
 0x555   : > { %7969 = vst.msk [vmem:[#allocation5 + $0x130] sm:$0xff] %vm7658_vm15, %v7930_v8 }
 0x55c   : > { %v8177_v32 = vld [vmem:[#allocation5 + $0x12b] sm:$0xff]  ;;  %v8178_v42 = vld [vmem:[#allocation5 + $0x133] sm:$0xf] }
 0x55d   : > { %v8179_v9 = vmax.f32 %v8175_v56, %v8177_v32  ;;  %v8180_v31 = vmax.f32 %v8176_v27, %v8178_v42 }
 0x55f   : > { %v8935_v21 = vpack.c.bf16 %v8179_v9, %v8179_v9  ;;  %v8936_v26 = vpack.c.bf16 %v8180_v31, %v8180_v31 }
 0x560   :  { %64 = sbr.rel (!%p62_p10) target bundleno = 56 (0x38), region = 138 }
 0x561   : > { %v8187_v16 = vrot.slane %v8935_v21, 6  ;;  %v8189_v15 = vrot.slane %v8936_v26, 6 }
 0x563   : > { %v8188_v38 = vrot.slane %v8187_v16, 4  ;;  %8193 = vst.msk [vmem:[%s13392_s25 + $0x40] sm:$0xc] %vm8012_vm2, %v8187_v16 }
 0x565   : > { %v8190_v46 = vsel %vm13467_vm5, %v8188_v38, %v8189_v15 }
 0x566   : > { %8194 = vst.msk [vmem:[%s13392_s25 + $0x44] sm:$0xf] %vm7987_vm0, %v8190_v46 }
 0x567   :  { %8199 = vsyncpa [#allocation7], 1 }
 0x568   :  { %8200 = vsyncpa [#allocation9], 1 }

</bundles_post_ra>
